<compile_context>
chip_gen: v6e
topology: v6e:2x2x1
jax: 0.10.0
libtpu: 0.0.40
codegen_flags: <defaults>
</compile_context>

<pallas_src>
import functools

import jax
import jax.numpy as jnp
import numpy as np
from jax.experimental import pallas as pl
from jax.experimental.pallas import tpu as pltpu

NEG_SLOPE = 0.01   # nn.LeakyReLU default negative_slope
K_CONV = 10        # conv / deconv kernel size (module spec)
C_CONV = 50        # filter_1 == LSTM input size (module spec)
H1 = 50            # hidden size of lstm_1
HP = 128           # per-gate lane padding (one full vreg lane width)


def _vmem():
    # whole-array resident in VMEM (all operands here are KB scale)
    return pl.BlockSpec(memory_space=pltpu.MemorySpace.VMEM)


# ---------------------------------------------------------------------------
# Fused kernel: conv+LeakyReLU+maxpool -> biLSTM(50) -> biLSTM(1) -> decoder
# ---------------------------------------------------------------------------
def tae_fused_kernel(x_col_ref, conv_w_ref, conv_b_ref,
                     wih1_ref, b1_ref, whh1f_ref, whh1b_ref,
                     wih2_ref, b2_ref, whh2f_ref, whh2b_ref,
                     weff_ref, decb_ref,
                     feats_ref, dec_ref,
                     out1_s,
                     *, B, T, pool):
    C = C_CONV

    # ---- Conv1d (im2col -> one MXU matmul) + bias + LeakyReLU + MaxPool ----
    # x_col rows are ordered (t, b, p)  -> row = t*(B*pool) + b*pool + p
    y = jnp.dot(x_col_ref[...], conv_w_ref[...],
                preferred_element_type=jnp.float32)            # (T*B*pool, C)
    y = y + conv_b_ref[...]
    y = jnp.where(y > 0, y, NEG_SLOPE * y)                     # LeakyReLU
    xl = jnp.max(y.reshape(T * B, pool, C), axis=1)            # (T*B, C) time-major

    # ---- biLSTM-1 input projection: fwd+bwd fused, gates padded to HP lanes --
    gx1 = jnp.dot(xl, wih1_ref[...],
                  preferred_element_type=jnp.float32) + b1_ref[...]   # (T*B, 8*HP)
    whh_f = whh1f_ref[...]
    whh_b = whh1b_ref[...]

    def step1(g, h, c, whh):
        # g already contains x-projection + biases; gate slices are 128-aligned
        g = g + jnp.dot(h, whh, preferred_element_type=jnp.float32)
        i = jax.nn.sigmoid(g[:, 0 * HP:1 * HP])          # torch gate order i,f,g,o
        f = jax.nn.sigmoid(g[:, 1 * HP:2 * HP])
        gg = jnp.tanh(g[:, 2 * HP:3 * HP])
        o = jax.nn.sigmoid(g[:, 3 * HP:4 * HP])
        c = f * c + i * gg
        return o * jnp.tanh(c), c

    # forward direction: write h_f incrementally into VMEM scratch
    h = jnp.zeros((B, HP), jnp.float32)
    c = jnp.zeros((B, HP), jnp.float32)
    for t in range(T):
        h, c = step1(gx1[t * B:(t + 1) * B, :4 * HP], h, c, whh_f)
        out1_s[t * B:(t + 1) * B, :] = h
    # backward direction: accumulate (sum over the two directions)
    h = jnp.zeros((B, HP), jnp.float32)
    c = jnp.zeros((B, HP), jnp.float32)
    for t in range(T - 1, -1, -1):
        h, c = step1(gx1[t * B:(t + 1) * B, 4 * HP:], h, c, whh_b)
        out1_s[t * B:(t + 1) * B, :] = out1_s[t * B:(t + 1) * B, :] + h

    # ---- biLSTM-2 (H=1): MXU input projection, VPU recurrence ----------------
    o1 = out1_s[...]                                           # (T*B, HP)
    gx2 = jnp.dot(o1, wih2_ref[...],
                  preferred_element_type=jnp.float32) + b2_ref[...]   # (T*B, 8)
    whh2_f = whh2f_ref[...]                                    # (1, 4)
    whh2_b = whh2b_ref[...]                                    # (1, 4)

    def step2(g, h, c, whh_row):
        g = g + h * whh_row                                    # (B,1)*(1,4) -> (B,4)
        i = jax.nn.sigmoid(g[:, 0:1])
        f = jax.nn.sigmoid(g[:, 1:2])
        gg = jnp.tanh(g[:, 2:3])
        o = jax.nn.sigmoid(g[:, 3:4])
        c = f * c + i * gg
        return o * jnp.tanh(c), c

    hf = jnp.zeros((B, 1), jnp.float32)
    cf = jnp.zeros((B, 1), jnp.float32)
    feats_cols = [None] * T
    for t in range(T):
        hf, cf = step2(gx2[t * B:(t + 1) * B, 0:4], hf, cf, whh2_f)
        feats_cols[t] = hf
    hb = jnp.zeros((B, 1), jnp.float32)
    cb = jnp.zeros((B, 1), jnp.float32)
    for t in range(T - 1, -1, -1):
        hb, cb = step2(gx2[t * B:(t + 1) * B, 4:8], hb, cb, whh2_b)
        feats_cols[t] = feats_cols[t] + hb
    feats = jnp.concatenate(feats_cols, axis=1)                # (B, T)

    # ---- decoder: upsample(replicate) + ConvTranspose1d collapsed to 1 matmul
    feats_ref[...] = feats
    dec_ref[...] = (jnp.dot(feats, weff_ref[...],
                            preferred_element_type=jnp.float32)
                    + decb_ref[...])                           # (B, T*pool) lane-dense


# ---------------------------------------------------------------------------
# Parameter init (deterministic, PyTorch-shaped raw parameters)
# ---------------------------------------------------------------------------
def init_params(key, serie_size, pooling, filter_1=50, filter_lstm=(50, 1)):
    n_hidden = serie_size // pooling   # == features.shape[1] (torch get_hidden)
    keys = iter(jax.random.split(key, 40))

    def rnd(shape, scale=0.1):
        return scale * jax.random.normal(next(keys), shape, jnp.float32)

    def lstm_p(I, H):
        return {"wih_f": rnd((4 * H, I)), "whh_f": rnd((4 * H, H)),
                "bih_f": rnd((4 * H,)), "bhh_f": rnd((4 * H,)),
                "wih_b": rnd((4 * H, I)), "whh_b": rnd((4 * H, H)),
                "bih_b": rnd((4 * H,)), "bhh_b": rnd((4 * H,))}

    return {"conv_w": rnd((filter_1, 1, K_CONV)), "conv_b": rnd((filter_1,)),
            "lstm1": lstm_p(50, filter_lstm[0]),
            "lstm2": lstm_p(50, filter_lstm[1]),
            "deconv_w": rnd((n_hidden, n_hidden, K_CONV)),
            "deconv_b": rnd((n_hidden,)),
            "n_hidden": n_hidden}


# ---------------------------------------------------------------------------
# One-time parameter prepack (transposes / bias sums / gate padding / W_eff)
# ---------------------------------------------------------------------------
def prepack_params(params, *, serie_size, pooling):
    K, C = K_CONV, C_CONV
    T = serie_size // pooling

    conv_w_t = np.asarray(params["conv_w"])[:, 0, :].T              # (K, C)
    conv_b = np.asarray(params["conv_b"]).reshape(1, C)

    # ---- biLSTM-1 packing: gates padded to their own 128-lane block ----
    wih1 = np.zeros((C, 8 * HP), np.float32)
    b1 = np.zeros((1, 8 * HP), np.float32)
    whh1 = {}
    p1 = params["lstm1"]
    for d, tag in enumerate(("f", "b")):
        wih = np.asarray(p1[f"wih_{tag}"])                          # (4H, C)
        bsum = np.asarray(p1[f"bih_{tag}"]) + np.asarray(p1[f"bhh_{tag}"])
        whh = np.asarray(p1[f"whh_{tag}"])                          # (4H, H)
        whh_pad = np.zeros((HP, 4 * HP), np.float32)
        for g in range(4):
            col0 = d * 4 * HP + g * HP
            wih1[:, col0:col0 + H1] = wih[g * H1:(g + 1) * H1, :].T
            b1[0, col0:col0 + H1] = bsum[g * H1:(g + 1) * H1]
            whh_pad[:H1, g * HP:g * HP + H1] = whh[g * H1:(g + 1) * H1, :].T
        whh1[tag] = whh_pad

    # ---- biLSTM-2 packing (H=1): fwd gates in cols 0..3, bwd in 4..7 ----
    p2 = params["lstm2"]
    wih2 = np.zeros((HP, 8), np.float32)
    wih2[:C, 0:4] = np.asarray(p2["wih_f"]).T
    wih2[:C, 4:8] = np.asarray(p2["wih_b"]).T
    b2 = np.concatenate([np.asarray(p2["bih_f"]) + np.asarray(p2["bhh_f"]),
                         np.asarray(p2["bih_b"]) + np.asarray(p2["bhh_b"])]
                        ).reshape(1, 8).astype(np.float32)
    whh2_f = np.asarray(p2["whh_f"]).T.reshape(1, 4)
    whh2_b = np.asarray(p2["whh_b"]).T.reshape(1, 4)

    # ---- decoder: effective (tap-summed) weights, flattened lane-dense ----
    w = np.asarray(params["deconv_w"])                              # (T, T, K)
    pad = (K - 1) // 2
    cols = []
    for t in range(pooling):
        k_lo = max(0, t + pad - (pooling - 1))
        k_hi = min(K - 1, t + pad)
        cols.append(w[:, :, k_lo:k_hi + 1].sum(axis=2))             # (Cin, Cout)
    w_eff = np.stack(cols, axis=2).reshape(T, T * pooling)          # [ci, co*pool+t]
    dec_b = np.repeat(np.asarray(params["deconv_b"]), pooling).reshape(1, T * pooling)

    to_j = lambda a: jnp.asarray(a, jnp.float32)
    return {"conv_w_t": to_j(conv_w_t), "conv_b": to_j(conv_b),
            "wih1": to_j(wih1), "b1": to_j(b1),
            "whh1_f": to_j(whh1["f"]), "whh1_b": to_j(whh1["b"]),
            "wih2": to_j(wih2), "b2": to_j(b2),
            "whh2_f": to_j(whh2_f), "whh2_b": to_j(whh2_b),
            "w_eff": to_j(w_eff), "dec_b": to_j(dec_b)}


# ---------------------------------------------------------------------------
# Forward wrapper: im2col glue + single pallas_call
# ---------------------------------------------------------------------------
def _build_im2col(x, *, pooling):
    # x: (B, 1, L) -> (T*B*pool, K) sliding windows, rows ordered (t, b, p)
    B, _, L = x.shape
    K = K_CONV
    T = L // pooling
    left = (K - 1) // 2
    right = (K - 1) - left
    xpad = jnp.pad(x[:, 0, :], ((0, 0), (left, right)))             # (B, L+K-1)
    win = jnp.stack([xpad[:, k:k + L] for k in range(K)], axis=-1)  # (B, L, K)
    win = win[:, :T * pooling, :].reshape(B, T, pooling, K)
    win = jnp.transpose(win, (1, 0, 2, 3))                          # (T, B, pool, K)
    return win.reshape(T * B * pooling, K)


@functools.partial(jax.jit, static_argnames=("pooling",))
def tae_forward(packed, x, *, pooling):
    B, _, L = x.shape
    T = L // pooling
    x_col = _build_im2col(x, pooling=pooling)

    kern = functools.partial(tae_fused_kernel, B=B, T=T, pool=pooling)
    feats, out_deconv = pl.pallas_call(
        kern,
        out_shape=(jax.ShapeDtypeStruct((B, T), jnp.float32),
                   jax.ShapeDtypeStruct((B, T * pooling), jnp.float32)),
        in_specs=[_vmem()] * 13,
        out_specs=(_vmem(), _vmem()),
        scratch_shapes=[pltpu.VMEM((T * B, HP), jnp.float32)],
    )(x_col,
      packed["conv_w_t"], packed["conv_b"],
      packed["wih1"], packed["b1"], packed["whh1_f"], packed["whh1_b"],
      packed["wih2"], packed["b2"], packed["whh2_f"], packed["whh2_b"],
      packed["w_eff"], packed["dec_b"])
    return feats, out_deconv


# ---------------------------------------------------------------------------
# Pure-JAX reference (uses raw PyTorch-shaped parameters)
# ---------------------------------------------------------------------------
def _lstm_dir_ref(xseq, wih, whh, bih, bhh, H):
    B = xseq.shape[0]

    def step(carry, xt):
        h, c = carry
        g = xt @ wih.T + bih + h @ whh.T + bhh
        i = jax.nn.sigmoid(g[:, :H]); f = jax.nn.sigmoid(g[:, H:2 * H])
        gg = jnp.tanh(g[:, 2 * H:3 * H]); o = jax.nn.sigmoid(g[:, 3 * H:])
        c = f * c + i * gg
        h = o * jnp.tanh(c)
        return (h, c), h

    init = (jnp.zeros((B, H)), jnp.zeros((B, H)))
    _, hs = jax.lax.scan(step, init, jnp.swapaxes(xseq, 0, 1))
    return jnp.swapaxes(hs, 0, 1)


def _bilstm_sum_ref(xseq, p, H):
    fwd = _lstm_dir_ref(xseq, p["wih_f"], p["whh_f"], p["bih_f"], p["bhh_f"], H)
    bwd = _lstm_dir_ref(xseq[:, ::-1], p["wih_b"], p["whh_b"],
                        p["bih_b"], p["bhh_b"], H)[:, ::-1]
    return fwd + bwd


def ref_forward(params, x, pooling):
    B, _, L = x.shape
    K = K_CONV
    left = (K - 1) // 2
    y = jax.lax.conv_general_dilated(
        x, params["conv_w"], window_strides=(1,),
        padding=[(left, K - 1 - left)],
        dimension_numbers=("NCH", "OIH", "NCH"))                    # (B, 50, L)
    y = y + params["conv_b"][None, :, None]
    y = jnp.where(y > 0, y, NEG_SLOPE * y)
    T = L // pooling
    y = y[:, :, :T * pooling].reshape(B, 50, T, pooling).max(axis=3)
    h = jnp.transpose(y, (0, 2, 1))                                 # (B, T, 50)
    h = _bilstm_sum_ref(h, params["lstm1"], 50)
    feats3 = _bilstm_sum_ref(h, params["lstm2"], 1)                 # (B, T, 1)
    feats = feats3[:, :, 0]
    # decoder reference: upsample (replicate) + conv-transpose via flipped conv
    Cd = T
    up = jnp.broadcast_to(feats3, (B, Cd, pooling))
    pad = (K - 1) // 2
    up_pad = jnp.pad(up, ((0, 0), (0, 0), (K - 1 - pad, K - 1 - pad)))
    wf = params["deconv_w"][:, :, ::-1]
    cols = [jnp.einsum("bck,cok->bo", up_pad[:, :, t:t + K], wf)
            for t in range(pooling)]
    dec = jnp.stack(cols, axis=2) + params["deconv_b"][None, :, None]
    return feats, dec.reshape(B, -1)


if __name__ == "__main__":
    B, SERIE, POOL = 2, 64, 8              # small shapes: T = n_hidden = 8
    key = jax.random.PRNGKey(0)
    k_par, k_x = jax.random.split(key)
    params = init_params(k_par, serie_size=SERIE, pooling=POOL)
    packed = prepack_params(params, serie_size=SERIE, pooling=POOL)
    x = jax.random.normal(k_x, (B, 1, SERIE), jnp.float32)

    feats, out_deconv = tae_forward(packed, x, pooling=POOL)
    jax.block_until_ready((feats, out_deconv))

    assert feats.shape == (B, SERIE // POOL)
    assert out_deconv.shape == (B, (SERIE // POOL) * POOL)

    ref_f, ref_d = ref_forward(params, x, POOL)
    if not (np.allclose(np.asarray(feats), np.asarray(ref_f), atol=1e-3, rtol=1e-3)
            and np.allclose(np.asarray(out_deconv), np.asarray(ref_d),
                            atol=1e-3, rtol=1e-3)):
        raise AssertionError("Pallas kernel output mismatch vs JAX reference")

    print("KERNEL_OK")
</pallas_src>

<mosaic_0001>
module attributes {stable_mosaic.version = 11 : i64} {
  func.func @tae_fused_kernel(%arg0: memref<128x10xf32, #tpu.memory_space<vmem>>, %arg1: memref<10x50xf32, #tpu.memory_space<vmem>>, %arg2: memref<1x50xf32, #tpu.memory_space<vmem>>, %arg3: memref<50x1024xf32, #tpu.memory_space<vmem>>, %arg4: memref<1x1024xf32, #tpu.memory_space<vmem>>, %arg5: memref<128x512xf32, #tpu.memory_space<vmem>>, %arg6: memref<128x512xf32, #tpu.memory_space<vmem>>, %arg7: memref<128x8xf32, #tpu.memory_space<vmem>>, %arg8: memref<1x8xf32, #tpu.memory_space<vmem>>, %arg9: memref<1x4xf32, #tpu.memory_space<vmem>>, %arg10: memref<1x4xf32, #tpu.memory_space<vmem>>, %arg11: memref<8x64xf32, #tpu.memory_space<vmem>>, %arg12: memref<1x64xf32, #tpu.memory_space<vmem>>, %arg13: memref<2x8xf32, #tpu.memory_space<vmem>>, %arg14: memref<2x64xf32, #tpu.memory_space<vmem>>, %arg15: memref<16x128xf32, #tpu.memory_space<vmem>>) attributes {dimension_semantics = [], scalar_prefetch = 0 : i64, scratch_operands = 1 : i64, tpu.core_type = #tpu.core_type<tc>} {
    %c0 = arith.constant 0 : index
    %c0_0 = arith.constant 0 : index
    %0 = vector.load %arg0[%c0, %c0_0] : memref<128x10xf32, #tpu.memory_space<vmem>>, vector<128x10xf32>
    %c0_1 = arith.constant 0 : index
    %c0_2 = arith.constant 0 : index
    %1 = vector.load %arg1[%c0_1, %c0_2] : memref<10x50xf32, #tpu.memory_space<vmem>>, vector<10x50xf32>
    %cst = arith.constant dense<0.000000e+00> : vector<128x50xf32>
    %2 = tpu.matmul %0, %1, %cst {dimension_numbers = #tpu.dot_dimension_numbers<[1], [0], [0], [1], [0, 0, 1, 1], [], []>} : vector<128x10xf32>, vector<10x50xf32>, vector<128x50xf32> -> vector<128x50xf32>
    %c0_3 = arith.constant 0 : index
    %c0_4 = arith.constant 0 : index
    %3 = vector.load %arg2[%c0_3, %c0_4] : memref<1x50xf32, #tpu.memory_space<vmem>>, vector<1x50xf32>
    %4 = vector.broadcast %3 : vector<1x50xf32> to vector<128x50xf32>
    %5 = arith.addf %2, %4 : vector<128x50xf32>
    %cst_5 = arith.constant 0.000000e+00 : f32
    %6 = vector.broadcast %cst_5 : f32 to vector<128x50xf32>
    %7 = arith.cmpf ogt, %5, %6 : vector<128x50xf32>
    %cst_6 = arith.constant 0.00999999977 : f32
    %8 = vector.broadcast %cst_6 : f32 to vector<128x50xf32>
    %9 = arith.mulf %8, %5 : vector<128x50xf32>
    %10 = arith.select %7, %5, %9 : vector<128x50xi1>, vector<128x50xf32>
    %11 = vector.shape_cast %10 : vector<128x50xf32> to vector<16x8x50xf32>
    %cst_7 = arith.constant dense<0xFF800000> : vector<16x50xf32>
    %12 = vector.multi_reduction <maximumf>, %11, %cst_7 [1] : vector<16x8x50xf32> to vector<16x50xf32>
    %c0_8 = arith.constant 0 : index
    %c0_9 = arith.constant 0 : index
    %13 = vector.load %arg3[%c0_8, %c0_9] : memref<50x1024xf32, #tpu.memory_space<vmem>>, vector<50x1024xf32>
    %cst_10 = arith.constant dense<0.000000e+00> : vector<16x1024xf32>
    %14 = tpu.matmul %12, %13, %cst_10 {dimension_numbers = #tpu.dot_dimension_numbers<[1], [0], [0], [1], [0, 0, 1, 1], [], []>} : vector<16x50xf32>, vector<50x1024xf32>, vector<16x1024xf32> -> vector<16x1024xf32>
    %c0_11 = arith.constant 0 : index
    %c0_12 = arith.constant 0 : index
    %15 = vector.load %arg4[%c0_11, %c0_12] : memref<1x1024xf32, #tpu.memory_space<vmem>>, vector<1x1024xf32>
    %16 = vector.broadcast %15 : vector<1x1024xf32> to vector<16x1024xf32>
    %17 = arith.addf %14, %16 : vector<16x1024xf32>
    %c0_13 = arith.constant 0 : index
    %c0_14 = arith.constant 0 : index
    %18 = vector.load %arg5[%c0_13, %c0_14] : memref<128x512xf32, #tpu.memory_space<vmem>>, vector<128x512xf32>
    %c0_15 = arith.constant 0 : index
    %c0_16 = arith.constant 0 : index
    %19 = vector.load %arg6[%c0_15, %c0_16] : memref<128x512xf32, #tpu.memory_space<vmem>>, vector<128x512xf32>
    %cst_17 = arith.constant 0.000000e+00 : f32
    %20 = vector.broadcast %cst_17 : f32 to vector<2x128xf32>
    %cst_18 = arith.constant 0.000000e+00 : f32
    %21 = vector.broadcast %cst_18 : f32 to vector<2x128xf32>
    %22 = vector.extract_strided_slice %17 {offsets = [0, 0], sizes = [2, 512], strides = [1, 1]} : vector<16x1024xf32> to vector<2x512xf32>
    %cst_19 = arith.constant dense<0.000000e+00> : vector<2x512xf32>
    %23 = tpu.matmul %20, %18, %cst_19 {dimension_numbers = #tpu.dot_dimension_numbers<[1], [0], [0], [1], [0, 0, 1, 1], [], []>} : vector<2x128xf32>, vector<128x512xf32>, vector<2x512xf32> -> vector<2x512xf32>
    %24 = arith.addf %22, %23 : vector<2x512xf32>
    %25 = vector.extract_strided_slice %24 {offsets = [0, 0], sizes = [2, 128], strides = [1, 1]} : vector<2x512xf32> to vector<2x128xf32>
    %26 = arith.negf %25 : vector<2x128xf32>
    %27 = math.exp %26 : vector<2x128xf32>
    %cst_20 = arith.constant 1.000000e+00 : f32
    %28 = vector.broadcast %cst_20 : f32 to vector<2x128xf32>
    %29 = arith.addf %28, %27 : vector<2x128xf32>
    %30 = arith.divf %28, %29 : vector<2x128xf32>
    %31 = vector.extract_strided_slice %24 {offsets = [0, 128], sizes = [2, 128], strides = [1, 1]} : vector<2x512xf32> to vector<2x128xf32>
    %32 = arith.negf %31 : vector<2x128xf32>
    %33 = math.exp %32 : vector<2x128xf32>
    %cst_21 = arith.constant 1.000000e+00 : f32
    %34 = vector.broadcast %cst_21 : f32 to vector<2x128xf32>
    %35 = arith.addf %34, %33 : vector<2x128xf32>
    %36 = arith.divf %34, %35 : vector<2x128xf32>
    %37 = vector.extract_strided_slice %24 {offsets = [0, 256], sizes = [2, 128], strides = [1, 1]} : vector<2x512xf32> to vector<2x128xf32>
    %38 = math.tanh %37 : vector<2x128xf32>
    %39 = vector.extract_strided_slice %24 {offsets = [0, 384], sizes = [2, 128], strides = [1, 1]} : vector<2x512xf32> to vector<2x128xf32>
    %40 = arith.negf %39 : vector<2x128xf32>
    %41 = math.exp %40 : vector<2x128xf32>
    %cst_22 = arith.constant 1.000000e+00 : f32
    %42 = vector.broadcast %cst_22 : f32 to vector<2x128xf32>
    %43 = arith.addf %42, %41 : vector<2x128xf32>
    %44 = arith.divf %42, %43 : vector<2x128xf32>
    %45 = arith.mulf %36, %21 : vector<2x128xf32>
    %46 = arith.mulf %30, %38 : vector<2x128xf32>
    %47 = arith.addf %45, %46 : vector<2x128xf32>
    %48 = math.tanh %47 : vector<2x128xf32>
    %49 = arith.mulf %44, %48 : vector<2x128xf32>
    %c0_23 = arith.constant 0 : index
    %c0_24 = arith.constant 0 : index
    %50 = vector.load %arg15[%c0_23, %c0_24] : memref<16x128xf32, #tpu.memory_space<vmem>>, vector<2x128xf32>
    tpu.vector_store %arg15[%c0_23, %c0_24], %49 {strides = array<i32>} : memref<16x128xf32, #tpu.memory_space<vmem>>, vector<2x128xf32>,
    %51 = vector.extract_strided_slice %17 {offsets = [2, 0], sizes = [2, 512], strides = [1, 1]} : vector<16x1024xf32> to vector<2x512xf32>
    %cst_25 = arith.constant dense<0.000000e+00> : vector<2x512xf32>
    %52 = tpu.matmul %49, %18, %cst_25 {dimension_numbers = #tpu.dot_dimension_numbers<[1], [0], [0], [1], [0, 0, 1, 1], [], []>} : vector<2x128xf32>, vector<128x512xf32>, vector<2x512xf32> -> vector<2x512xf32>
    %53 = arith.addf %51, %52 : vector<2x512xf32>
    %54 = vector.extract_strided_slice %53 {offsets = [0, 0], sizes = [2, 128], strides = [1, 1]} : vector<2x512xf32> to vector<2x128xf32>
    %55 = arith.negf %54 : vector<2x128xf32>
    %56 = math.exp %55 : vector<2x128xf32>
    %cst_26 = arith.constant 1.000000e+00 : f32
    %57 = vector.broadcast %cst_26 : f32 to vector<2x128xf32>
    %58 = arith.addf %57, %56 : vector<2x128xf32>
    %59 = arith.divf %57, %58 : vector<2x128xf32>
    %60 = vector.extract_strided_slice %53 {offsets = [0, 128], sizes = [2, 128], strides = [1, 1]} : vector<2x512xf32> to vector<2x128xf32>
    %61 = arith.negf %60 : vector<2x128xf32>
    %62 = math.exp %61 : vector<2x128xf32>
    %cst_27 = arith.constant 1.000000e+00 : f32
    %63 = vector.broadcast %cst_27 : f32 to vector<2x128xf32>
    %64 = arith.addf %63, %62 : vector<2x128xf32>
    %65 = arith.divf %63, %64 : vector<2x128xf32>
    %66 = vector.extract_strided_slice %53 {offsets = [0, 256], sizes = [2, 128], strides = [1, 1]} : vector<2x512xf32> to vector<2x128xf32>
    %67 = math.tanh %66 : vector<2x128xf32>
    %68 = vector.extract_strided_slice %53 {offsets = [0, 384], sizes = [2, 128], strides = [1, 1]} : vector<2x512xf32> to vector<2x128xf32>
    %69 = arith.negf %68 : vector<2x128xf32>
    %70 = math.exp %69 : vector<2x128xf32>
    %cst_28 = arith.constant 1.000000e+00 : f32
    %71 = vector.broadcast %cst_28 : f32 to vector<2x128xf32>
    %72 = arith.addf %71, %70 : vector<2x128xf32>
    %73 = arith.divf %71, %72 : vector<2x128xf32>
    %74 = arith.mulf %65, %47 : vector<2x128xf32>
    %75 = arith.mulf %59, %67 : vector<2x128xf32>
    %76 = arith.addf %74, %75 : vector<2x128xf32>
    %77 = math.tanh %76 : vector<2x128xf32>
    %78 = arith.mulf %73, %77 : vector<2x128xf32>
    %c2 = arith.constant 2 : index
    %c0_29 = arith.constant 0 : index
    %79 = vector.load %arg15[%c2, %c0_29] : memref<16x128xf32, #tpu.memory_space<vmem>>, vector<2x128xf32>
    tpu.vector_store %arg15[%c2, %c0_29], %78 {strides = array<i32>} : memref<16x128xf32, #tpu.memory_space<vmem>>, vector<2x128xf32>,
    %80 = vector.extract_strided_slice %17 {offsets = [4, 0], sizes = [2, 512], strides = [1, 1]} : vector<16x1024xf32> to vector<2x512xf32>
    %cst_30 = arith.constant dense<0.000000e+00> : vector<2x512xf32>
    %81 = tpu.matmul %78, %18, %cst_30 {dimension_numbers = #tpu.dot_dimension_numbers<[1], [0], [0], [1], [0, 0, 1, 1], [], []>} : vector<2x128xf32>, vector<128x512xf32>, vector<2x512xf32> -> vector<2x512xf32>
    %82 = arith.addf %80, %81 : vector<2x512xf32>
    %83 = vector.extract_strided_slice %82 {offsets = [0, 0], sizes = [2, 128], strides = [1, 1]} : vector<2x512xf32> to vector<2x128xf32>
    %84 = arith.negf %83 : vector<2x128xf32>
    %85 = math.exp %84 : vector<2x128xf32>
    %cst_31 = arith.constant 1.000000e+00 : f32
    %86 = vector.broadcast %cst_31 : f32 to vector<2x128xf32>
    %87 = arith.addf %86, %85 : vector<2x128xf32>
    %88 = arith.divf %86, %87 : vector<2x128xf32>
    %89 = vector.extract_strided_slice %82 {offsets = [0, 128], sizes = [2, 128], strides = [1, 1]} : vector<2x512xf32> to vector<2x128xf32>
    %90 = arith.negf %89 : vector<2x128xf32>
    %91 = math.exp %90 : vector<2x128xf32>
    %cst_32 = arith.constant 1.000000e+00 : f32
    %92 = vector.broadcast %cst_32 : f32 to vector<2x128xf32>
    %93 = arith.addf %92, %91 : vector<2x128xf32>
    %94 = arith.divf %92, %93 : vector<2x128xf32>
    %95 = vector.extract_strided_slice %82 {offsets = [0, 256], sizes = [2, 128], strides = [1, 1]} : vector<2x512xf32> to vector<2x128xf32>
    %96 = math.tanh %95 : vector<2x128xf32>
    %97 = vector.extract_strided_slice %82 {offsets = [0, 384], sizes = [2, 128], strides = [1, 1]} : vector<2x512xf32> to vector<2x128xf32>
    %98 = arith.negf %97 : vector<2x128xf32>
    %99 = math.exp %98 : vector<2x128xf32>
    %cst_33 = arith.constant 1.000000e+00 : f32
    %100 = vector.broadcast %cst_33 : f32 to vector<2x128xf32>
    %101 = arith.addf %100, %99 : vector<2x128xf32>
    %102 = arith.divf %100, %101 : vector<2x128xf32>
    %103 = arith.mulf %94, %76 : vector<2x128xf32>
    %104 = arith.mulf %88, %96 : vector<2x128xf32>
    %105 = arith.addf %103, %104 : vector<2x128xf32>
    %106 = math.tanh %105 : vector<2x128xf32>
    %107 = arith.mulf %102, %106 : vector<2x128xf32>
    %c4 = arith.constant 4 : index
    %c0_34 = arith.constant 0 : index
    %108 = vector.load %arg15[%c4, %c0_34] : memref<16x128xf32, #tpu.memory_space<vmem>>, vector<2x128xf32>
    tpu.vector_store %arg15[%c4, %c0_34], %107 {strides = array<i32>} : memref<16x128xf32, #tpu.memory_space<vmem>>, vector<2x128xf32>,
    %109 = vector.extract_strided_slice %17 {offsets = [6, 0], sizes = [2, 512], strides = [1, 1]} : vector<16x1024xf32> to vector<2x512xf32>
    %cst_35 = arith.constant dense<0.000000e+00> : vector<2x512xf32>
    %110 = tpu.matmul %107, %18, %cst_35 {dimension_numbers = #tpu.dot_dimension_numbers<[1], [0], [0], [1], [0, 0, 1, 1], [], []>} : vector<2x128xf32>, vector<128x512xf32>, vector<2x512xf32> -> vector<2x512xf32>
    %111 = arith.addf %109, %110 : vector<2x512xf32>
    %112 = vector.extract_strided_slice %111 {offsets = [0, 0], sizes = [2, 128], strides = [1, 1]} : vector<2x512xf32> to vector<2x128xf32>
    %113 = arith.negf %112 : vector<2x128xf32>
    %114 = math.exp %113 : vector<2x128xf32>
    %cst_36 = arith.constant 1.000000e+00 : f32
    %115 = vector.broadcast %cst_36 : f32 to vector<2x128xf32>
    %116 = arith.addf %115, %114 : vector<2x128xf32>
    %117 = arith.divf %115, %116 : vector<2x128xf32>
    %118 = vector.extract_strided_slice %111 {offsets = [0, 128], sizes = [2, 128], strides = [1, 1]} : vector<2x512xf32> to vector<2x128xf32>
    %119 = arith.negf %118 : vector<2x128xf32>
    %120 = math.exp %119 : vector<2x128xf32>
    %cst_37 = arith.constant 1.000000e+00 : f32
    %121 = vector.broadcast %cst_37 : f32 to vector<2x128xf32>
    %122 = arith.addf %121, %120 : vector<2x128xf32>
    %123 = arith.divf %121, %122 : vector<2x128xf32>
    %124 = vector.extract_strided_slice %111 {offsets = [0, 256], sizes = [2, 128], strides = [1, 1]} : vector<2x512xf32> to vector<2x128xf32>
    %125 = math.tanh %124 : vector<2x128xf32>
    %126 = vector.extract_strided_slice %111 {offsets = [0, 384], sizes = [2, 128], strides = [1, 1]} : vector<2x512xf32> to vector<2x128xf32>
    %127 = arith.negf %126 : vector<2x128xf32>
    %128 = math.exp %127 : vector<2x128xf32>
    %cst_38 = arith.constant 1.000000e+00 : f32
    %129 = vector.broadcast %cst_38 : f32 to vector<2x128xf32>
    %130 = arith.addf %129, %128 : vector<2x128xf32>
    %131 = arith.divf %129, %130 : vector<2x128xf32>
    %132 = arith.mulf %123, %105 : vector<2x128xf32>
    %133 = arith.mulf %117, %125 : vector<2x128xf32>
    %134 = arith.addf %132, %133 : vector<2x128xf32>
    %135 = math.tanh %134 : vector<2x128xf32>
    %136 = arith.mulf %131, %135 : vector<2x128xf32>
    %c6 = arith.constant 6 : index
    %c0_39 = arith.constant 0 : index
    %137 = vector.load %arg15[%c6, %c0_39] : memref<16x128xf32, #tpu.memory_space<vmem>>, vector<2x128xf32>
    tpu.vector_store %arg15[%c6, %c0_39], %136 {strides = array<i32>} : memref<16x128xf32, #tpu.memory_space<vmem>>, vector<2x128xf32>,
    %138 = vector.extract_strided_slice %17 {offsets = [8, 0], sizes = [2, 512], strides = [1, 1]} : vector<16x1024xf32> to vector<2x512xf32>
    %cst_40 = arith.constant dense<0.000000e+00> : vector<2x512xf32>
    %139 = tpu.matmul %136, %18, %cst_40 {dimension_numbers = #tpu.dot_dimension_numbers<[1], [0], [0], [1], [0, 0, 1, 1], [], []>} : vector<2x128xf32>, vector<128x512xf32>, vector<2x512xf32> -> vector<2x512xf32>
    %140 = arith.addf %138, %139 : vector<2x512xf32>
    %141 = vector.extract_strided_slice %140 {offsets = [0, 0], sizes = [2, 128], strides = [1, 1]} : vector<2x512xf32> to vector<2x128xf32>
    %142 = arith.negf %141 : vector<2x128xf32>
    %143 = math.exp %142 : vector<2x128xf32>
    %cst_41 = arith.constant 1.000000e+00 : f32
    %144 = vector.broadcast %cst_41 : f32 to vector<2x128xf32>
    %145 = arith.addf %144, %143 : vector<2x128xf32>
    %146 = arith.divf %144, %145 : vector<2x128xf32>
    %147 = vector.extract_strided_slice %140 {offsets = [0, 128], sizes = [2, 128], strides = [1, 1]} : vector<2x512xf32> to vector<2x128xf32>
    %148 = arith.negf %147 : vector<2x128xf32>
    %149 = math.exp %148 : vector<2x128xf32>
    %cst_42 = arith.constant 1.000000e+00 : f32
    %150 = vector.broadcast %cst_42 : f32 to vector<2x128xf32>
    %151 = arith.addf %150, %149 : vector<2x128xf32>
    %152 = arith.divf %150, %151 : vector<2x128xf32>
    %153 = vector.extract_strided_slice %140 {offsets = [0, 256], sizes = [2, 128], strides = [1, 1]} : vector<2x512xf32> to vector<2x128xf32>
    %154 = math.tanh %153 : vector<2x128xf32>
    %155 = vector.extract_strided_slice %140 {offsets = [0, 384], sizes = [2, 128], strides = [1, 1]} : vector<2x512xf32> to vector<2x128xf32>
    %156 = arith.negf %155 : vector<2x128xf32>
    %157 = math.exp %156 : vector<2x128xf32>
    %cst_43 = arith.constant 1.000000e+00 : f32
    %158 = vector.broadcast %cst_43 : f32 to vector<2x128xf32>
    %159 = arith.addf %158, %157 : vector<2x128xf32>
    %160 = arith.divf %158, %159 : vector<2x128xf32>
    %161 = arith.mulf %152, %134 : vector<2x128xf32>
    %162 = arith.mulf %146, %154 : vector<2x128xf32>
    %163 = arith.addf %161, %162 : vector<2x128xf32>
    %164 = math.tanh %163 : vector<2x128xf32>
    %165 = arith.mulf %160, %164 : vector<2x128xf32>
    %c8 = arith.constant 8 : index
    %c0_44 = arith.constant 0 : index
    %166 = vector.load %arg15[%c8, %c0_44] : memref<16x128xf32, #tpu.memory_space<vmem>>, vector<2x128xf32>
    tpu.vector_store %arg15[%c8, %c0_44], %165 {strides = array<i32>} : memref<16x128xf32, #tpu.memory_space<vmem>>, vector<2x128xf32>,
    %167 = vector.extract_strided_slice %17 {offsets = [10, 0], sizes = [2, 512], strides = [1, 1]} : vector<16x1024xf32> to vector<2x512xf32>
    %cst_45 = arith.constant dense<0.000000e+00> : vector<2x512xf32>
    %168 = tpu.matmul %165, %18, %cst_45 {dimension_numbers = #tpu.dot_dimension_numbers<[1], [0], [0], [1], [0, 0, 1, 1], [], []>} : vector<2x128xf32>, vector<128x512xf32>, vector<2x512xf32> -> vector<2x512xf32>
    %169 = arith.addf %167, %168 : vector<2x512xf32>
    %170 = vector.extract_strided_slice %169 {offsets = [0, 0], sizes = [2, 128], strides = [1, 1]} : vector<2x512xf32> to vector<2x128xf32>
    %171 = arith.negf %170 : vector<2x128xf32>
    %172 = math.exp %171 : vector<2x128xf32>
    %cst_46 = arith.constant 1.000000e+00 : f32
    %173 = vector.broadcast %cst_46 : f32 to vector<2x128xf32>
    %174 = arith.addf %173, %172 : vector<2x128xf32>
    %175 = arith.divf %173, %174 : vector<2x128xf32>
    %176 = vector.extract_strided_slice %169 {offsets = [0, 128], sizes = [2, 128], strides = [1, 1]} : vector<2x512xf32> to vector<2x128xf32>
    %177 = arith.negf %176 : vector<2x128xf32>
    %178 = math.exp %177 : vector<2x128xf32>
    %cst_47 = arith.constant 1.000000e+00 : f32
    %179 = vector.broadcast %cst_47 : f32 to vector<2x128xf32>
    %180 = arith.addf %179, %178 : vector<2x128xf32>
    %181 = arith.divf %179, %180 : vector<2x128xf32>
    %182 = vector.extract_strided_slice %169 {offsets = [0, 256], sizes = [2, 128], strides = [1, 1]} : vector<2x512xf32> to vector<2x128xf32>
    %183 = math.tanh %182 : vector<2x128xf32>
    %184 = vector.extract_strided_slice %169 {offsets = [0, 384], sizes = [2, 128], strides = [1, 1]} : vector<2x512xf32> to vector<2x128xf32>
    %185 = arith.negf %184 : vector<2x128xf32>
    %186 = math.exp %185 : vector<2x128xf32>
    %cst_48 = arith.constant 1.000000e+00 : f32
    %187 = vector.broadcast %cst_48 : f32 to vector<2x128xf32>
    %188 = arith.addf %187, %186 : vector<2x128xf32>
    %189 = arith.divf %187, %188 : vector<2x128xf32>
    %190 = arith.mulf %181, %163 : vector<2x128xf32>
    %191 = arith.mulf %175, %183 : vector<2x128xf32>
    %192 = arith.addf %190, %191 : vector<2x128xf32>
    %193 = math.tanh %192 : vector<2x128xf32>
    %194 = arith.mulf %189, %193 : vector<2x128xf32>
    %c10 = arith.constant 10 : index
    %c0_49 = arith.constant 0 : index
    %195 = vector.load %arg15[%c10, %c0_49] : memref<16x128xf32, #tpu.memory_space<vmem>>, vector<2x128xf32>
    tpu.vector_store %arg15[%c10, %c0_49], %194 {strides = array<i32>} : memref<16x128xf32, #tpu.memory_space<vmem>>, vector<2x128xf32>,
    %196 = vector.extract_strided_slice %17 {offsets = [12, 0], sizes = [2, 512], strides = [1, 1]} : vector<16x1024xf32> to vector<2x512xf32>
    %cst_50 = arith.constant dense<0.000000e+00> : vector<2x512xf32>
    %197 = tpu.matmul %194, %18, %cst_50 {dimension_numbers = #tpu.dot_dimension_numbers<[1], [0], [0], [1], [0, 0, 1, 1], [], []>} : vector<2x128xf32>, vector<128x512xf32>, vector<2x512xf32> -> vector<2x512xf32>
    %198 = arith.addf %196, %197 : vector<2x512xf32>
    %199 = vector.extract_strided_slice %198 {offsets = [0, 0], sizes = [2, 128], strides = [1, 1]} : vector<2x512xf32> to vector<2x128xf32>
    %200 = arith.negf %199 : vector<2x128xf32>
    %201 = math.exp %200 : vector<2x128xf32>
    %cst_51 = arith.constant 1.000000e+00 : f32
    %202 = vector.broadcast %cst_51 : f32 to vector<2x128xf32>
    %203 = arith.addf %202, %201 : vector<2x128xf32>
    %204 = arith.divf %202, %203 : vector<2x128xf32>
    %205 = vector.extract_strided_slice %198 {offsets = [0, 128], sizes = [2, 128], strides = [1, 1]} : vector<2x512xf32> to vector<2x128xf32>
    %206 = arith.negf %205 : vector<2x128xf32>
    %207 = math.exp %206 : vector<2x128xf32>
    %cst_52 = arith.constant 1.000000e+00 : f32
    %208 = vector.broadcast %cst_52 : f32 to vector<2x128xf32>
    %209 = arith.addf %208, %207 : vector<2x128xf32>
    %210 = arith.divf %208, %209 : vector<2x128xf32>
    %211 = vector.extract_strided_slice %198 {offsets = [0, 256], sizes = [2, 128], strides = [1, 1]} : vector<2x512xf32> to vector<2x128xf32>
    %212 = math.tanh %211 : vector<2x128xf32>
    %213 = vector.extract_strided_slice %198 {offsets = [0, 384], sizes = [2, 128], strides = [1, 1]} : vector<2x512xf32> to vector<2x128xf32>
    %214 = arith.negf %213 : vector<2x128xf32>
    %215 = math.exp %214 : vector<2x128xf32>
    %cst_53 = arith.constant 1.000000e+00 : f32
    %216 = vector.broadcast %cst_53 : f32 to vector<2x128xf32>
    %217 = arith.addf %216, %215 : vector<2x128xf32>
    %218 = arith.divf %216, %217 : vector<2x128xf32>
    %219 = arith.mulf %210, %192 : vector<2x128xf32>
    %220 = arith.mulf %204, %212 : vector<2x128xf32>
    %221 = arith.addf %219, %220 : vector<2x128xf32>
    %222 = math.tanh %221 : vector<2x128xf32>
    %223 = arith.mulf %218, %222 : vector<2x128xf32>
    %c12 = arith.constant 12 : index
    %c0_54 = arith.constant 0 : index
    %224 = vector.load %arg15[%c12, %c0_54] : memref<16x128xf32, #tpu.memory_space<vmem>>, vector<2x128xf32>
    tpu.vector_store %arg15[%c12, %c0_54], %223 {strides = array<i32>} : memref<16x128xf32, #tpu.memory_space<vmem>>, vector<2x128xf32>,
    %225 = vector.extract_strided_slice %17 {offsets = [14, 0], sizes = [2, 512], strides = [1, 1]} : vector<16x1024xf32> to vector<2x512xf32>
    %cst_55 = arith.constant dense<0.000000e+00> : vector<2x512xf32>
    %226 = tpu.matmul %223, %18, %cst_55 {dimension_numbers = #tpu.dot_dimension_numbers<[1], [0], [0], [1], [0, 0, 1, 1], [], []>} : vector<2x128xf32>, vector<128x512xf32>, vector<2x512xf32> -> vector<2x512xf32>
    %227 = arith.addf %225, %226 : vector<2x512xf32>
    %228 = vector.extract_strided_slice %227 {offsets = [0, 0], sizes = [2, 128], strides = [1, 1]} : vector<2x512xf32> to vector<2x128xf32>
    %229 = arith.negf %228 : vector<2x128xf32>
    %230 = math.exp %229 : vector<2x128xf32>
    %cst_56 = arith.constant 1.000000e+00 : f32
    %231 = vector.broadcast %cst_56 : f32 to vector<2x128xf32>
    %232 = arith.addf %231, %230 : vector<2x128xf32>
    %233 = arith.divf %231, %232 : vector<2x128xf32>
    %234 = vector.extract_strided_slice %227 {offsets = [0, 128], sizes = [2, 128], strides = [1, 1]} : vector<2x512xf32> to vector<2x128xf32>
    %235 = arith.negf %234 : vector<2x128xf32>
    %236 = math.exp %235 : vector<2x128xf32>
    %cst_57 = arith.constant 1.000000e+00 : f32
    %237 = vector.broadcast %cst_57 : f32 to vector<2x128xf32>
    %238 = arith.addf %237, %236 : vector<2x128xf32>
    %239 = arith.divf %237, %238 : vector<2x128xf32>
    %240 = vector.extract_strided_slice %227 {offsets = [0, 256], sizes = [2, 128], strides = [1, 1]} : vector<2x512xf32> to vector<2x128xf32>
    %241 = math.tanh %240 : vector<2x128xf32>
    %242 = vector.extract_strided_slice %227 {offsets = [0, 384], sizes = [2, 128], strides = [1, 1]} : vector<2x512xf32> to vector<2x128xf32>
    %243 = arith.negf %242 : vector<2x128xf32>
    %244 = math.exp %243 : vector<2x128xf32>
    %cst_58 = arith.constant 1.000000e+00 : f32
    %245 = vector.broadcast %cst_58 : f32 to vector<2x128xf32>
    %246 = arith.addf %245, %244 : vector<2x128xf32>
    %247 = arith.divf %245, %246 : vector<2x128xf32>
    %248 = arith.mulf %239, %221 : vector<2x128xf32>
    %249 = arith.mulf %233, %241 : vector<2x128xf32>
    %250 = arith.addf %248, %249 : vector<2x128xf32>
    %251 = math.tanh %250 : vector<2x128xf32>
    %252 = arith.mulf %247, %251 : vector<2x128xf32>
    %c14 = arith.constant 14 : index
    %c0_59 = arith.constant 0 : index
    %253 = vector.load %arg15[%c14, %c0_59] : memref<16x128xf32, #tpu.memory_space<vmem>>, vector<2x128xf32>
    tpu.vector_store %arg15[%c14, %c0_59], %252 {strides = array<i32>} : memref<16x128xf32, #tpu.memory_space<vmem>>, vector<2x128xf32>,
    %cst_60 = arith.constant 0.000000e+00 : f32
    %254 = vector.broadcast %cst_60 : f32 to vector<2x128xf32>
    %cst_61 = arith.constant 0.000000e+00 : f32
    %255 = vector.broadcast %cst_61 : f32 to vector<2x128xf32>
    %256 = vector.extract_strided_slice %17 {offsets = [14, 512], sizes = [2, 512], strides = [1, 1]} : vector<16x1024xf32> to vector<2x512xf32>
    %cst_62 = arith.constant dense<0.000000e+00> : vector<2x512xf32>
    %257 = tpu.matmul %254, %19, %cst_62 {dimension_numbers = #tpu.dot_dimension_numbers<[1], [0], [0], [1], [0, 0, 1, 1], [], []>} : vector<2x128xf32>, vector<128x512xf32>, vector<2x512xf32> -> vector<2x512xf32>
    %258 = arith.addf %256, %257 : vector<2x512xf32>
    %259 = vector.extract_strided_slice %258 {offsets = [0, 0], sizes = [2, 128], strides = [1, 1]} : vector<2x512xf32> to vector<2x128xf32>
    %260 = arith.negf %259 : vector<2x128xf32>
    %261 = math.exp %260 : vector<2x128xf32>
    %cst_63 = arith.constant 1.000000e+00 : f32
    %262 = vector.broadcast %cst_63 : f32 to vector<2x128xf32>
    %263 = arith.addf %262, %261 : vector<2x128xf32>
    %264 = arith.divf %262, %263 : vector<2x128xf32>
    %265 = vector.extract_strided_slice %258 {offsets = [0, 128], sizes = [2, 128], strides = [1, 1]} : vector<2x512xf32> to vector<2x128xf32>
    %266 = arith.negf %265 : vector<2x128xf32>
    %267 = math.exp %266 : vector<2x128xf32>
    %cst_64 = arith.constant 1.000000e+00 : f32
    %268 = vector.broadcast %cst_64 : f32 to vector<2x128xf32>
    %269 = arith.addf %268, %267 : vector<2x128xf32>
    %270 = arith.divf %268, %269 : vector<2x128xf32>
    %271 = vector.extract_strided_slice %258 {offsets = [0, 256], sizes = [2, 128], strides = [1, 1]} : vector<2x512xf32> to vector<2x128xf32>
    %272 = math.tanh %271 : vector<2x128xf32>
    %273 = vector.extract_strided_slice %258 {offsets = [0, 384], sizes = [2, 128], strides = [1, 1]} : vector<2x512xf32> to vector<2x128xf32>
    %274 = arith.negf %273 : vector<2x128xf32>
    %275 = math.exp %274 : vector<2x128xf32>
    %cst_65 = arith.constant 1.000000e+00 : f32
    %276 = vector.broadcast %cst_65 : f32 to vector<2x128xf32>
    %277 = arith.addf %276, %275 : vector<2x128xf32>
    %278 = arith.divf %276, %277 : vector<2x128xf32>
    %279 = arith.mulf %270, %255 : vector<2x128xf32>
    %280 = arith.mulf %264, %272 : vector<2x128xf32>
    %281 = arith.addf %279, %280 : vector<2x128xf32>
    %282 = math.tanh %281 : vector<2x128xf32>
    %283 = arith.mulf %278, %282 : vector<2x128xf32>
    %c14_66 = arith.constant 14 : index
    %c0_67 = arith.constant 0 : index
    %284 = vector.load %arg15[%c14_66, %c0_67] : memref<16x128xf32, #tpu.memory_space<vmem>>, vector<2x128xf32>
    %285 = arith.addf %284, %283 : vector<2x128xf32>
    %c14_68 = arith.constant 14 : index
    %c0_69 = arith.constant 0 : index
    %286 = vector.load %arg15[%c14_68, %c0_69] : memref<16x128xf32, #tpu.memory_space<vmem>>, vector<2x128xf32>
    tpu.vector_store %arg15[%c14_68, %c0_69], %285 {strides = array<i32>} : memref<16x128xf32, #tpu.memory_space<vmem>>, vector<2x128xf32>,
    %287 = vector.extract_strided_slice %17 {offsets = [12, 512], sizes = [2, 512], strides = [1, 1]} : vector<16x1024xf32> to vector<2x512xf32>
    %cst_70 = arith.constant dense<0.000000e+00> : vector<2x512xf32>
    %288 = tpu.matmul %283, %19, %cst_70 {dimension_numbers = #tpu.dot_dimension_numbers<[1], [0], [0], [1], [0, 0, 1, 1], [], []>} : vector<2x128xf32>, vector<128x512xf32>, vector<2x512xf32> -> vector<2x512xf32>
    %289 = arith.addf %287, %288 : vector<2x512xf32>
    %290 = vector.extract_strided_slice %289 {offsets = [0, 0], sizes = [2, 128], strides = [1, 1]} : vector<2x512xf32> to vector<2x128xf32>
    %291 = arith.negf %290 : vector<2x128xf32>
    %292 = math.exp %291 : vector<2x128xf32>
    %cst_71 = arith.constant 1.000000e+00 : f32
    %293 = vector.broadcast %cst_71 : f32 to vector<2x128xf32>
    %294 = arith.addf %293, %292 : vector<2x128xf32>
    %295 = arith.divf %293, %294 : vector<2x128xf32>
    %296 = vector.extract_strided_slice %289 {offsets = [0, 128], sizes = [2, 128], strides = [1, 1]} : vector<2x512xf32> to vector<2x128xf32>
    %297 = arith.negf %296 : vector<2x128xf32>
    %298 = math.exp %297 : vector<2x128xf32>
    %cst_72 = arith.constant 1.000000e+00 : f32
    %299 = vector.broadcast %cst_72 : f32 to vector<2x128xf32>
    %300 = arith.addf %299, %298 : vector<2x128xf32>
    %301 = arith.divf %299, %300 : vector<2x128xf32>
    %302 = vector.extract_strided_slice %289 {offsets = [0, 256], sizes = [2, 128], strides = [1, 1]} : vector<2x512xf32> to vector<2x128xf32>
    %303 = math.tanh %302 : vector<2x128xf32>
    %304 = vector.extract_strided_slice %289 {offsets = [0, 384], sizes = [2, 128], strides = [1, 1]} : vector<2x512xf32> to vector<2x128xf32>
    %305 = arith.negf %304 : vector<2x128xf32>
    %306 = math.exp %305 : vector<2x128xf32>
    %cst_73 = arith.constant 1.000000e+00 : f32
    %307 = vector.broadcast %cst_73 : f32 to vector<2x128xf32>
    %308 = arith.addf %307, %306 : vector<2x128xf32>
    %309 = arith.divf %307, %308 : vector<2x128xf32>
    %310 = arith.mulf %301, %281 : vector<2x128xf32>
    %311 = arith.mulf %295, %303 : vector<2x128xf32>
    %312 = arith.addf %310, %311 : vector<2x128xf32>
    %313 = math.tanh %312 : vector<2x128xf32>
    %314 = arith.mulf %309, %313 : vector<2x128xf32>
    %c12_74 = arith.constant 12 : index
    %c0_75 = arith.constant 0 : index
    %315 = vector.load %arg15[%c12_74, %c0_75] : memref<16x128xf32, #tpu.memory_space<vmem>>, vector<2x128xf32>
    %316 = arith.addf %315, %314 : vector<2x128xf32>
    %c12_76 = arith.constant 12 : index
    %c0_77 = arith.constant 0 : index
    %317 = vector.load %arg15[%c12_76, %c0_77] : memref<16x128xf32, #tpu.memory_space<vmem>>, vector<2x128xf32>
    tpu.vector_store %arg15[%c12_76, %c0_77], %316 {strides = array<i32>} : memref<16x128xf32, #tpu.memory_space<vmem>>, vector<2x128xf32>,
    %318 = vector.extract_strided_slice %17 {offsets = [10, 512], sizes = [2, 512], strides = [1, 1]} : vector<16x1024xf32> to vector<2x512xf32>
    %cst_78 = arith.constant dense<0.000000e+00> : vector<2x512xf32>
    %319 = tpu.matmul %314, %19, %cst_78 {dimension_numbers = #tpu.dot_dimension_numbers<[1], [0], [0], [1], [0, 0, 1, 1], [], []>} : vector<2x128xf32>, vector<128x512xf32>, vector<2x512xf32> -> vector<2x512xf32>
    %320 = arith.addf %318, %319 : vector<2x512xf32>
    %321 = vector.extract_strided_slice %320 {offsets = [0, 0], sizes = [2, 128], strides = [1, 1]} : vector<2x512xf32> to vector<2x128xf32>
    %322 = arith.negf %321 : vector<2x128xf32>
    %323 = math.exp %322 : vector<2x128xf32>
    %cst_79 = arith.constant 1.000000e+00 : f32
    %324 = vector.broadcast %cst_79 : f32 to vector<2x128xf32>
    %325 = arith.addf %324, %323 : vector<2x128xf32>
    %326 = arith.divf %324, %325 : vector<2x128xf32>
    %327 = vector.extract_strided_slice %320 {offsets = [0, 128], sizes = [2, 128], strides = [1, 1]} : vector<2x512xf32> to vector<2x128xf32>
    %328 = arith.negf %327 : vector<2x128xf32>
    %329 = math.exp %328 : vector<2x128xf32>
    %cst_80 = arith.constant 1.000000e+00 : f32
    %330 = vector.broadcast %cst_80 : f32 to vector<2x128xf32>
    %331 = arith.addf %330, %329 : vector<2x128xf32>
    %332 = arith.divf %330, %331 : vector<2x128xf32>
    %333 = vector.extract_strided_slice %320 {offsets = [0, 256], sizes = [2, 128], strides = [1, 1]} : vector<2x512xf32> to vector<2x128xf32>
    %334 = math.tanh %333 : vector<2x128xf32>
    %335 = vector.extract_strided_slice %320 {offsets = [0, 384], sizes = [2, 128], strides = [1, 1]} : vector<2x512xf32> to vector<2x128xf32>
    %336 = arith.negf %335 : vector<2x128xf32>
    %337 = math.exp %336 : vector<2x128xf32>
    %cst_81 = arith.constant 1.000000e+00 : f32
    %338 = vector.broadcast %cst_81 : f32 to vector<2x128xf32>
    %339 = arith.addf %338, %337 : vector<2x128xf32>
    %340 = arith.divf %338, %339 : vector<2x128xf32>
    %341 = arith.mulf %332, %312 : vector<2x128xf32>
    %342 = arith.mulf %326, %334 : vector<2x128xf32>
    %343 = arith.addf %341, %342 : vector<2x128xf32>
    %344 = math.tanh %343 : vector<2x128xf32>
    %345 = arith.mulf %340, %344 : vector<2x128xf32>
    %c10_82 = arith.constant 10 : index
    %c0_83 = arith.constant 0 : index
    %346 = vector.load %arg15[%c10_82, %c0_83] : memref<16x128xf32, #tpu.memory_space<vmem>>, vector<2x128xf32>
    %347 = arith.addf %346, %345 : vector<2x128xf32>
    %c10_84 = arith.constant 10 : index
    %c0_85 = arith.constant 0 : index
    %348 = vector.load %arg15[%c10_84, %c0_85] : memref<16x128xf32, #tpu.memory_space<vmem>>, vector<2x128xf32>
    tpu.vector_store %arg15[%c10_84, %c0_85], %347 {strides = array<i32>} : memref<16x128xf32, #tpu.memory_space<vmem>>, vector<2x128xf32>,
    %349 = vector.extract_strided_slice %17 {offsets = [8, 512], sizes = [2, 512], strides = [1, 1]} : vector<16x1024xf32> to vector<2x512xf32>
    %cst_86 = arith.constant dense<0.000000e+00> : vector<2x512xf32>
    %350 = tpu.matmul %345, %19, %cst_86 {dimension_numbers = #tpu.dot_dimension_numbers<[1], [0], [0], [1], [0, 0, 1, 1], [], []>} : vector<2x128xf32>, vector<128x512xf32>, vector<2x512xf32> -> vector<2x512xf32>
    %351 = arith.addf %349, %350 : vector<2x512xf32>
    %352 = vector.extract_strided_slice %351 {offsets = [0, 0], sizes = [2, 128], strides = [1, 1]} : vector<2x512xf32> to vector<2x128xf32>
    %353 = arith.negf %352 : vector<2x128xf32>
    %354 = math.exp %353 : vector<2x128xf32>
    %cst_87 = arith.constant 1.000000e+00 : f32
    %355 = vector.broadcast %cst_87 : f32 to vector<2x128xf32>
    %356 = arith.addf %355, %354 : vector<2x128xf32>
    %357 = arith.divf %355, %356 : vector<2x128xf32>
    %358 = vector.extract_strided_slice %351 {offsets = [0, 128], sizes = [2, 128], strides = [1, 1]} : vector<2x512xf32> to vector<2x128xf32>
    %359 = arith.negf %358 : vector<2x128xf32>
    %360 = math.exp %359 : vector<2x128xf32>
    %cst_88 = arith.constant 1.000000e+00 : f32
    %361 = vector.broadcast %cst_88 : f32 to vector<2x128xf32>
    %362 = arith.addf %361, %360 : vector<2x128xf32>
    %363 = arith.divf %361, %362 : vector<2x128xf32>
    %364 = vector.extract_strided_slice %351 {offsets = [0, 256], sizes = [2, 128], strides = [1, 1]} : vector<2x512xf32> to vector<2x128xf32>
    %365 = math.tanh %364 : vector<2x128xf32>
    %366 = vector.extract_strided_slice %351 {offsets = [0, 384], sizes = [2, 128], strides = [1, 1]} : vector<2x512xf32> to vector<2x128xf32>
    %367 = arith.negf %366 : vector<2x128xf32>
    %368 = math.exp %367 : vector<2x128xf32>
    %cst_89 = arith.constant 1.000000e+00 : f32
    %369 = vector.broadcast %cst_89 : f32 to vector<2x128xf32>
    %370 = arith.addf %369, %368 : vector<2x128xf32>
    %371 = arith.divf %369, %370 : vector<2x128xf32>
    %372 = arith.mulf %363, %343 : vector<2x128xf32>
    %373 = arith.mulf %357, %365 : vector<2x128xf32>
    %374 = arith.addf %372, %373 : vector<2x128xf32>
    %375 = math.tanh %374 : vector<2x128xf32>
    %376 = arith.mulf %371, %375 : vector<2x128xf32>
    %c8_90 = arith.constant 8 : index
    %c0_91 = arith.constant 0 : index
    %377 = vector.load %arg15[%c8_90, %c0_91] : memref<16x128xf32, #tpu.memory_space<vmem>>, vector<2x128xf32>
    %378 = arith.addf %377, %376 : vector<2x128xf32>
    %c8_92 = arith.constant 8 : index
    %c0_93 = arith.constant 0 : index
    %379 = vector.load %arg15[%c8_92, %c0_93] : memref<16x128xf32, #tpu.memory_space<vmem>>, vector<2x128xf32>
    tpu.vector_store %arg15[%c8_92, %c0_93], %378 {strides = array<i32>} : memref<16x128xf32, #tpu.memory_space<vmem>>, vector<2x128xf32>,
    %380 = vector.extract_strided_slice %17 {offsets = [6, 512], sizes = [2, 512], strides = [1, 1]} : vector<16x1024xf32> to vector<2x512xf32>
    %cst_94 = arith.constant dense<0.000000e+00> : vector<2x512xf32>
    %381 = tpu.matmul %376, %19, %cst_94 {dimension_numbers = #tpu.dot_dimension_numbers<[1], [0], [0], [1], [0, 0, 1, 1], [], []>} : vector<2x128xf32>, vector<128x512xf32>, vector<2x512xf32> -> vector<2x512xf32>
    %382 = arith.addf %380, %381 : vector<2x512xf32>
    %383 = vector.extract_strided_slice %382 {offsets = [0, 0], sizes = [2, 128], strides = [1, 1]} : vector<2x512xf32> to vector<2x128xf32>
    %384 = arith.negf %383 : vector<2x128xf32>
    %385 = math.exp %384 : vector<2x128xf32>
    %cst_95 = arith.constant 1.000000e+00 : f32
    %386 = vector.broadcast %cst_95 : f32 to vector<2x128xf32>
    %387 = arith.addf %386, %385 : vector<2x128xf32>
    %388 = arith.divf %386, %387 : vector<2x128xf32>
    %389 = vector.extract_strided_slice %382 {offsets = [0, 128], sizes = [2, 128], strides = [1, 1]} : vector<2x512xf32> to vector<2x128xf32>
    %390 = arith.negf %389 : vector<2x128xf32>
    %391 = math.exp %390 : vector<2x128xf32>
    %cst_96 = arith.constant 1.000000e+00 : f32
    %392 = vector.broadcast %cst_96 : f32 to vector<2x128xf32>
    %393 = arith.addf %392, %391 : vector<2x128xf32>
    %394 = arith.divf %392, %393 : vector<2x128xf32>
    %395 = vector.extract_strided_slice %382 {offsets = [0, 256], sizes = [2, 128], strides = [1, 1]} : vector<2x512xf32> to vector<2x128xf32>
    %396 = math.tanh %395 : vector<2x128xf32>
    %397 = vector.extract_strided_slice %382 {offsets = [0, 384], sizes = [2, 128], strides = [1, 1]} : vector<2x512xf32> to vector<2x128xf32>
    %398 = arith.negf %397 : vector<2x128xf32>
    %399 = math.exp %398 : vector<2x128xf32>
    %cst_97 = arith.constant 1.000000e+00 : f32
    %400 = vector.broadcast %cst_97 : f32 to vector<2x128xf32>
    %401 = arith.addf %400, %399 : vector<2x128xf32>
    %402 = arith.divf %400, %401 : vector<2x128xf32>
    %403 = arith.mulf %394, %374 : vector<2x128xf32>
    %404 = arith.mulf %388, %396 : vector<2x128xf32>
    %405 = arith.addf %403, %404 : vector<2x128xf32>
    %406 = math.tanh %405 : vector<2x128xf32>
    %407 = arith.mulf %402, %406 : vector<2x128xf32>
    %c6_98 = arith.constant 6 : index
    %c0_99 = arith.constant 0 : index
    %408 = vector.load %arg15[%c6_98, %c0_99] : memref<16x128xf32, #tpu.memory_space<vmem>>, vector<2x128xf32>
    %409 = arith.addf %408, %407 : vector<2x128xf32>
    %c6_100 = arith.constant 6 : index
    %c0_101 = arith.constant 0 : index
    %410 = vector.load %arg15[%c6_100, %c0_101] : memref<16x128xf32, #tpu.memory_space<vmem>>, vector<2x128xf32>
    tpu.vector_store %arg15[%c6_100, %c0_101], %409 {strides = array<i32>} : memref<16x128xf32, #tpu.memory_space<vmem>>, vector<2x128xf32>,
    %411 = vector.extract_strided_slice %17 {offsets = [4, 512], sizes = [2, 512], strides = [1, 1]} : vector<16x1024xf32> to vector<2x512xf32>
    %cst_102 = arith.constant dense<0.000000e+00> : vector<2x512xf32>
    %412 = tpu.matmul %407, %19, %cst_102 {dimension_numbers = #tpu.dot_dimension_numbers<[1], [0], [0], [1], [0, 0, 1, 1], [], []>} : vector<2x128xf32>, vector<128x512xf32>, vector<2x512xf32> -> vector<2x512xf32>
    %413 = arith.addf %411, %412 : vector<2x512xf32>
    %414 = vector.extract_strided_slice %413 {offsets = [0, 0], sizes = [2, 128], strides = [1, 1]} : vector<2x512xf32> to vector<2x128xf32>
    %415 = arith.negf %414 : vector<2x128xf32>
    %416 = math.exp %415 : vector<2x128xf32>
    %cst_103 = arith.constant 1.000000e+00 : f32
    %417 = vector.broadcast %cst_103 : f32 to vector<2x128xf32>
    %418 = arith.addf %417, %416 : vector<2x128xf32>
    %419 = arith.divf %417, %418 : vector<2x128xf32>
    %420 = vector.extract_strided_slice %413 {offsets = [0, 128], sizes = [2, 128], strides = [1, 1]} : vector<2x512xf32> to vector<2x128xf32>
    %421 = arith.negf %420 : vector<2x128xf32>
    %422 = math.exp %421 : vector<2x128xf32>
    %cst_104 = arith.constant 1.000000e+00 : f32
    %423 = vector.broadcast %cst_104 : f32 to vector<2x128xf32>
    %424 = arith.addf %423, %422 : vector<2x128xf32>
    %425 = arith.divf %423, %424 : vector<2x128xf32>
    %426 = vector.extract_strided_slice %413 {offsets = [0, 256], sizes = [2, 128], strides = [1, 1]} : vector<2x512xf32> to vector<2x128xf32>
    %427 = math.tanh %426 : vector<2x128xf32>
    %428 = vector.extract_strided_slice %413 {offsets = [0, 384], sizes = [2, 128], strides = [1, 1]} : vector<2x512xf32> to vector<2x128xf32>
    %429 = arith.negf %428 : vector<2x128xf32>
    %430 = math.exp %429 : vector<2x128xf32>
    %cst_105 = arith.constant 1.000000e+00 : f32
    %431 = vector.broadcast %cst_105 : f32 to vector<2x128xf32>
    %432 = arith.addf %431, %430 : vector<2x128xf32>
    %433 = arith.divf %431, %432 : vector<2x128xf32>
    %434 = arith.mulf %425, %405 : vector<2x128xf32>
    %435 = arith.mulf %419, %427 : vector<2x128xf32>
    %436 = arith.addf %434, %435 : vector<2x128xf32>
    %437 = math.tanh %436 : vector<2x128xf32>
    %438 = arith.mulf %433, %437 : vector<2x128xf32>
    %c4_106 = arith.constant 4 : index
    %c0_107 = arith.constant 0 : index
    %439 = vector.load %arg15[%c4_106, %c0_107] : memref<16x128xf32, #tpu.memory_space<vmem>>, vector<2x128xf32>
    %440 = arith.addf %439, %438 : vector<2x128xf32>
    %c4_108 = arith.constant 4 : index
    %c0_109 = arith.constant 0 : index
    %441 = vector.load %arg15[%c4_108, %c0_109] : memref<16x128xf32, #tpu.memory_space<vmem>>, vector<2x128xf32>
    tpu.vector_store %arg15[%c4_108, %c0_109], %440 {strides = array<i32>} : memref<16x128xf32, #tpu.memory_space<vmem>>, vector<2x128xf32>,
    %442 = vector.extract_strided_slice %17 {offsets = [2, 512], sizes = [2, 512], strides = [1, 1]} : vector<16x1024xf32> to vector<2x512xf32>
    %cst_110 = arith.constant dense<0.000000e+00> : vector<2x512xf32>
    %443 = tpu.matmul %438, %19, %cst_110 {dimension_numbers = #tpu.dot_dimension_numbers<[1], [0], [0], [1], [0, 0, 1, 1], [], []>} : vector<2x128xf32>, vector<128x512xf32>, vector<2x512xf32> -> vector<2x512xf32>
    %444 = arith.addf %442, %443 : vector<2x512xf32>
    %445 = vector.extract_strided_slice %444 {offsets = [0, 0], sizes = [2, 128], strides = [1, 1]} : vector<2x512xf32> to vector<2x128xf32>
    %446 = arith.negf %445 : vector<2x128xf32>
    %447 = math.exp %446 : vector<2x128xf32>
    %cst_111 = arith.constant 1.000000e+00 : f32
    %448 = vector.broadcast %cst_111 : f32 to vector<2x128xf32>
    %449 = arith.addf %448, %447 : vector<2x128xf32>
    %450 = arith.divf %448, %449 : vector<2x128xf32>
    %451 = vector.extract_strided_slice %444 {offsets = [0, 128], sizes = [2, 128], strides = [1, 1]} : vector<2x512xf32> to vector<2x128xf32>
    %452 = arith.negf %451 : vector<2x128xf32>
    %453 = math.exp %452 : vector<2x128xf32>
    %cst_112 = arith.constant 1.000000e+00 : f32
    %454 = vector.broadcast %cst_112 : f32 to vector<2x128xf32>
    %455 = arith.addf %454, %453 : vector<2x128xf32>
    %456 = arith.divf %454, %455 : vector<2x128xf32>
    %457 = vector.extract_strided_slice %444 {offsets = [0, 256], sizes = [2, 128], strides = [1, 1]} : vector<2x512xf32> to vector<2x128xf32>
    %458 = math.tanh %457 : vector<2x128xf32>
    %459 = vector.extract_strided_slice %444 {offsets = [0, 384], sizes = [2, 128], strides = [1, 1]} : vector<2x512xf32> to vector<2x128xf32>
    %460 = arith.negf %459 : vector<2x128xf32>
    %461 = math.exp %460 : vector<2x128xf32>
    %cst_113 = arith.constant 1.000000e+00 : f32
    %462 = vector.broadcast %cst_113 : f32 to vector<2x128xf32>
    %463 = arith.addf %462, %461 : vector<2x128xf32>
    %464 = arith.divf %462, %463 : vector<2x128xf32>
    %465 = arith.mulf %456, %436 : vector<2x128xf32>
    %466 = arith.mulf %450, %458 : vector<2x128xf32>
    %467 = arith.addf %465, %466 : vector<2x128xf32>
    %468 = math.tanh %467 : vector<2x128xf32>
    %469 = arith.mulf %464, %468 : vector<2x128xf32>
    %c2_114 = arith.constant 2 : index
    %c0_115 = arith.constant 0 : index
    %470 = vector.load %arg15[%c2_114, %c0_115] : memref<16x128xf32, #tpu.memory_space<vmem>>, vector<2x128xf32>
    %471 = arith.addf %470, %469 : vector<2x128xf32>
    %c2_116 = arith.constant 2 : index
    %c0_117 = arith.constant 0 : index
    %472 = vector.load %arg15[%c2_116, %c0_117] : memref<16x128xf32, #tpu.memory_space<vmem>>, vector<2x128xf32>
    tpu.vector_store %arg15[%c2_116, %c0_117], %471 {strides = array<i32>} : memref<16x128xf32, #tpu.memory_space<vmem>>, vector<2x128xf32>,
    %473 = vector.extract_strided_slice %17 {offsets = [0, 512], sizes = [2, 512], strides = [1, 1]} : vector<16x1024xf32> to vector<2x512xf32>
    %cst_118 = arith.constant dense<0.000000e+00> : vector<2x512xf32>
    %474 = tpu.matmul %469, %19, %cst_118 {dimension_numbers = #tpu.dot_dimension_numbers<[1], [0], [0], [1], [0, 0, 1, 1], [], []>} : vector<2x128xf32>, vector<128x512xf32>, vector<2x512xf32> -> vector<2x512xf32>
    %475 = arith.addf %473, %474 : vector<2x512xf32>
    %476 = vector.extract_strided_slice %475 {offsets = [0, 0], sizes = [2, 128], strides = [1, 1]} : vector<2x512xf32> to vector<2x128xf32>
    %477 = arith.negf %476 : vector<2x128xf32>
    %478 = math.exp %477 : vector<2x128xf32>
    %cst_119 = arith.constant 1.000000e+00 : f32
    %479 = vector.broadcast %cst_119 : f32 to vector<2x128xf32>
    %480 = arith.addf %479, %478 : vector<2x128xf32>
    %481 = arith.divf %479, %480 : vector<2x128xf32>
    %482 = vector.extract_strided_slice %475 {offsets = [0, 128], sizes = [2, 128], strides = [1, 1]} : vector<2x512xf32> to vector<2x128xf32>
    %483 = arith.negf %482 : vector<2x128xf32>
    %484 = math.exp %483 : vector<2x128xf32>
    %cst_120 = arith.constant 1.000000e+00 : f32
    %485 = vector.broadcast %cst_120 : f32 to vector<2x128xf32>
    %486 = arith.addf %485, %484 : vector<2x128xf32>
    %487 = arith.divf %485, %486 : vector<2x128xf32>
    %488 = vector.extract_strided_slice %475 {offsets = [0, 256], sizes = [2, 128], strides = [1, 1]} : vector<2x512xf32> to vector<2x128xf32>
    %489 = math.tanh %488 : vector<2x128xf32>
    %490 = vector.extract_strided_slice %475 {offsets = [0, 384], sizes = [2, 128], strides = [1, 1]} : vector<2x512xf32> to vector<2x128xf32>
    %491 = arith.negf %490 : vector<2x128xf32>
    %492 = math.exp %491 : vector<2x128xf32>
    %cst_121 = arith.constant 1.000000e+00 : f32
    %493 = vector.broadcast %cst_121 : f32 to vector<2x128xf32>
    %494 = arith.addf %493, %492 : vector<2x128xf32>
    %495 = arith.divf %493, %494 : vector<2x128xf32>
    %496 = arith.mulf %487, %467 : vector<2x128xf32>
    %497 = arith.mulf %481, %489 : vector<2x128xf32>
    %498 = arith.addf %496, %497 : vector<2x128xf32>
    %499 = math.tanh %498 : vector<2x128xf32>
    %500 = arith.mulf %495, %499 : vector<2x128xf32>
    %c0_122 = arith.constant 0 : index
    %c0_123 = arith.constant 0 : index
    %501 = vector.load %arg15[%c0_122, %c0_123] : memref<16x128xf32, #tpu.memory_space<vmem>>, vector<2x128xf32>
    %502 = arith.addf %501, %500 : vector<2x128xf32>
    %c0_124 = arith.constant 0 : index
    %c0_125 = arith.constant 0 : index
    %503 = vector.load %arg15[%c0_124, %c0_125] : memref<16x128xf32, #tpu.memory_space<vmem>>, vector<2x128xf32>
    tpu.vector_store %arg15[%c0_124, %c0_125], %502 {strides = array<i32>} : memref<16x128xf32, #tpu.memory_space<vmem>>, vector<2x128xf32>,
    %c0_126 = arith.constant 0 : index
    %c0_127 = arith.constant 0 : index
    %504 = vector.load %arg15[%c0_126, %c0_127] : memref<16x128xf32, #tpu.memory_space<vmem>>, vector<16x128xf32>
    %c0_128 = arith.constant 0 : index
    %c0_129 = arith.constant 0 : index
    %505 = vector.load %arg7[%c0_128, %c0_129] : memref<128x8xf32, #tpu.memory_space<vmem>>, vector<128x8xf32>
    %cst_130 = arith.constant dense<0.000000e+00> : vector<16x8xf32>
    %506 = tpu.matmul %504, %505, %cst_130 {dimension_numbers = #tpu.dot_dimension_numbers<[1], [0], [0], [1], [0, 0, 1, 1], [], []>} : vector<16x128xf32>, vector<128x8xf32>, vector<16x8xf32> -> vector<16x8xf32>
    %c0_131 = arith.constant 0 : index
    %c0_132 = arith.constant 0 : index
    %507 = vector.load %arg8[%c0_131, %c0_132] : memref<1x8xf32, #tpu.memory_space<vmem>>, vector<1x8xf32>
    %508 = vector.broadcast %507 : vector<1x8xf32> to vector<16x8xf32>
    %509 = arith.addf %506, %508 : vector<16x8xf32>
    %c0_133 = arith.constant 0 : index
    %c0_134 = arith.constant 0 : index
    %510 = vector.load %arg9[%c0_133, %c0_134] : memref<1x4xf32, #tpu.memory_space<vmem>>, vector<1x4xf32>
    %c0_135 = arith.constant 0 : index
    %c0_136 = arith.constant 0 : index
    %511 = vector.load %arg10[%c0_135, %c0_136] : memref<1x4xf32, #tpu.memory_space<vmem>>, vector<1x4xf32>
    %cst_137 = arith.constant 0.000000e+00 : f32
    %512 = vector.broadcast %cst_137 : f32 to vector<2x1xf32>
    %cst_138 = arith.constant 0.000000e+00 : f32
    %513 = vector.broadcast %cst_138 : f32 to vector<2x1xf32>
    %514 = vector.extract_strided_slice %509 {offsets = [0, 0], sizes = [2, 4], strides = [1, 1]} : vector<16x8xf32> to vector<2x4xf32>
    %515 = vector.broadcast %512 : vector<2x1xf32> to vector<2x4xf32>
    %516 = vector.broadcast %510 : vector<1x4xf32> to vector<2x4xf32>
    %517 = arith.mulf %515, %516 : vector<2x4xf32>
    %518 = arith.addf %514, %517 : vector<2x4xf32>
    %519 = vector.extract_strided_slice %518 {offsets = [0, 0], sizes = [2, 1], strides = [1, 1]} : vector<2x4xf32> to vector<2x1xf32>
    %520 = arith.negf %519 : vector<2x1xf32>
    %521 = math.exp %520 : vector<2x1xf32>
    %cst_139 = arith.constant 1.000000e+00 : f32
    %522 = vector.broadcast %cst_139 : f32 to vector<2x1xf32>
    %523 = arith.addf %522, %521 : vector<2x1xf32>
    %524 = arith.divf %522, %523 : vector<2x1xf32>
    %525 = vector.extract_strided_slice %518 {offsets = [0, 1], sizes = [2, 1], strides = [1, 1]} : vector<2x4xf32> to vector<2x1xf32>
    %526 = arith.negf %525 : vector<2x1xf32>
    %527 = math.exp %526 : vector<2x1xf32>
    %cst_140 = arith.constant 1.000000e+00 : f32
    %528 = vector.broadcast %cst_140 : f32 to vector<2x1xf32>
    %529 = arith.addf %528, %527 : vector<2x1xf32>
    %530 = arith.divf %528, %529 : vector<2x1xf32>
    %531 = vector.extract_strided_slice %518 {offsets = [0, 2], sizes = [2, 1], strides = [1, 1]} : vector<2x4xf32> to vector<2x1xf32>
    %532 = math.tanh %531 : vector<2x1xf32>
    %533 = vector.extract_strided_slice %518 {offsets = [0, 3], sizes = [2, 1], strides = [1, 1]} : vector<2x4xf32> to vector<2x1xf32>
    %534 = arith.negf %533 : vector<2x1xf32>
    %535 = math.exp %534 : vector<2x1xf32>
    %cst_141 = arith.constant 1.000000e+00 : f32
    %536 = vector.broadcast %cst_141 : f32 to vector<2x1xf32>
    %537 = arith.addf %536, %535 : vector<2x1xf32>
    %538 = arith.divf %536, %537 : vector<2x1xf32>
    %539 = arith.mulf %530, %513 : vector<2x1xf32>
    %540 = arith.mulf %524, %532 : vector<2x1xf32>
    %541 = arith.addf %539, %540 : vector<2x1xf32>
    %542 = math.tanh %541 : vector<2x1xf32>
    %543 = arith.mulf %538, %542 : vector<2x1xf32>
    %544 = vector.extract_strided_slice %509 {offsets = [2, 0], sizes = [2, 4], strides = [1, 1]} : vector<16x8xf32> to vector<2x4xf32>
    %545 = vector.broadcast %543 : vector<2x1xf32> to vector<2x4xf32>
    %546 = vector.broadcast %510 : vector<1x4xf32> to vector<2x4xf32>
    %547 = arith.mulf %545, %546 : vector<2x4xf32>
    %548 = arith.addf %544, %547 : vector<2x4xf32>
    %549 = vector.extract_strided_slice %548 {offsets = [0, 0], sizes = [2, 1], strides = [1, 1]} : vector<2x4xf32> to vector<2x1xf32>
    %550 = arith.negf %549 : vector<2x1xf32>
    %551 = math.exp %550 : vector<2x1xf32>
    %cst_142 = arith.constant 1.000000e+00 : f32
    %552 = vector.broadcast %cst_142 : f32 to vector<2x1xf32>
    %553 = arith.addf %552, %551 : vector<2x1xf32>
    %554 = arith.divf %552, %553 : vector<2x1xf32>
    %555 = vector.extract_strided_slice %548 {offsets = [0, 1], sizes = [2, 1], strides = [1, 1]} : vector<2x4xf32> to vector<2x1xf32>
    %556 = arith.negf %555 : vector<2x1xf32>
    %557 = math.exp %556 : vector<2x1xf32>
    %cst_143 = arith.constant 1.000000e+00 : f32
    %558 = vector.broadcast %cst_143 : f32 to vector<2x1xf32>
    %559 = arith.addf %558, %557 : vector<2x1xf32>
    %560 = arith.divf %558, %559 : vector<2x1xf32>
    %561 = vector.extract_strided_slice %548 {offsets = [0, 2], sizes = [2, 1], strides = [1, 1]} : vector<2x4xf32> to vector<2x1xf32>
    %562 = math.tanh %561 : vector<2x1xf32>
    %563 = vector.extract_strided_slice %548 {offsets = [0, 3], sizes = [2, 1], strides = [1, 1]} : vector<2x4xf32> to vector<2x1xf32>
    %564 = arith.negf %563 : vector<2x1xf32>
    %565 = math.exp %564 : vector<2x1xf32>
    %cst_144 = arith.constant 1.000000e+00 : f32
    %566 = vector.broadcast %cst_144 : f32 to vector<2x1xf32>
    %567 = arith.addf %566, %565 : vector<2x1xf32>
    %568 = arith.divf %566, %567 : vector<2x1xf32>
    %569 = arith.mulf %560, %541 : vector<2x1xf32>
    %570 = arith.mulf %554, %562 : vector<2x1xf32>
    %571 = arith.addf %569, %570 : vector<2x1xf32>
    %572 = math.tanh %571 : vector<2x1xf32>
    %573 = arith.mulf %568, %572 : vector<2x1xf32>
    %574 = vector.extract_strided_slice %509 {offsets = [4, 0], sizes = [2, 4], strides = [1, 1]} : vector<16x8xf32> to vector<2x4xf32>
    %575 = vector.broadcast %573 : vector<2x1xf32> to vector<2x4xf32>
    %576 = vector.broadcast %510 : vector<1x4xf32> to vector<2x4xf32>
    %577 = arith.mulf %575, %576 : vector<2x4xf32>
    %578 = arith.addf %574, %577 : vector<2x4xf32>
    %579 = vector.extract_strided_slice %578 {offsets = [0, 0], sizes = [2, 1], strides = [1, 1]} : vector<2x4xf32> to vector<2x1xf32>
    %580 = arith.negf %579 : vector<2x1xf32>
    %581 = math.exp %580 : vector<2x1xf32>
    %cst_145 = arith.constant 1.000000e+00 : f32
    %582 = vector.broadcast %cst_145 : f32 to vector<2x1xf32>
    %583 = arith.addf %582, %581 : vector<2x1xf32>
    %584 = arith.divf %582, %583 : vector<2x1xf32>
    %585 = vector.extract_strided_slice %578 {offsets = [0, 1], sizes = [2, 1], strides = [1, 1]} : vector<2x4xf32> to vector<2x1xf32>
    %586 = arith.negf %585 : vector<2x1xf32>
    %587 = math.exp %586 : vector<2x1xf32>
    %cst_146 = arith.constant 1.000000e+00 : f32
    %588 = vector.broadcast %cst_146 : f32 to vector<2x1xf32>
    %589 = arith.addf %588, %587 : vector<2x1xf32>
    %590 = arith.divf %588, %589 : vector<2x1xf32>
    %591 = vector.extract_strided_slice %578 {offsets = [0, 2], sizes = [2, 1], strides = [1, 1]} : vector<2x4xf32> to vector<2x1xf32>
    %592 = math.tanh %591 : vector<2x1xf32>
    %593 = vector.extract_strided_slice %578 {offsets = [0, 3], sizes = [2, 1], strides = [1, 1]} : vector<2x4xf32> to vector<2x1xf32>
    %594 = arith.negf %593 : vector<2x1xf32>
    %595 = math.exp %594 : vector<2x1xf32>
    %cst_147 = arith.constant 1.000000e+00 : f32
    %596 = vector.broadcast %cst_147 : f32 to vector<2x1xf32>
    %597 = arith.addf %596, %595 : vector<2x1xf32>
    %598 = arith.divf %596, %597 : vector<2x1xf32>
    %599 = arith.mulf %590, %571 : vector<2x1xf32>
    %600 = arith.mulf %584, %592 : vector<2x1xf32>
    %601 = arith.addf %599, %600 : vector<2x1xf32>
    %602 = math.tanh %601 : vector<2x1xf32>
    %603 = arith.mulf %598, %602 : vector<2x1xf32>
    %604 = vector.extract_strided_slice %509 {offsets = [6, 0], sizes = [2, 4], strides = [1, 1]} : vector<16x8xf32> to vector<2x4xf32>
    %605 = vector.broadcast %603 : vector<2x1xf32> to vector<2x4xf32>
    %606 = vector.broadcast %510 : vector<1x4xf32> to vector<2x4xf32>
    %607 = arith.mulf %605, %606 : vector<2x4xf32>
    %608 = arith.addf %604, %607 : vector<2x4xf32>
    %609 = vector.extract_strided_slice %608 {offsets = [0, 0], sizes = [2, 1], strides = [1, 1]} : vector<2x4xf32> to vector<2x1xf32>
    %610 = arith.negf %609 : vector<2x1xf32>
    %611 = math.exp %610 : vector<2x1xf32>
    %cst_148 = arith.constant 1.000000e+00 : f32
    %612 = vector.broadcast %cst_148 : f32 to vector<2x1xf32>
    %613 = arith.addf %612, %611 : vector<2x1xf32>
    %614 = arith.divf %612, %613 : vector<2x1xf32>
    %615 = vector.extract_strided_slice %608 {offsets = [0, 1], sizes = [2, 1], strides = [1, 1]} : vector<2x4xf32> to vector<2x1xf32>
    %616 = arith.negf %615 : vector<2x1xf32>
    %617 = math.exp %616 : vector<2x1xf32>
    %cst_149 = arith.constant 1.000000e+00 : f32
    %618 = vector.broadcast %cst_149 : f32 to vector<2x1xf32>
    %619 = arith.addf %618, %617 : vector<2x1xf32>
    %620 = arith.divf %618, %619 : vector<2x1xf32>
    %621 = vector.extract_strided_slice %608 {offsets = [0, 2], sizes = [2, 1], strides = [1, 1]} : vector<2x4xf32> to vector<2x1xf32>
    %622 = math.tanh %621 : vector<2x1xf32>
    %623 = vector.extract_strided_slice %608 {offsets = [0, 3], sizes = [2, 1], strides = [1, 1]} : vector<2x4xf32> to vector<2x1xf32>
    %624 = arith.negf %623 : vector<2x1xf32>
    %625 = math.exp %624 : vector<2x1xf32>
    %cst_150 = arith.constant 1.000000e+00 : f32
    %626 = vector.broadcast %cst_150 : f32 to vector<2x1xf32>
    %627 = arith.addf %626, %625 : vector<2x1xf32>
    %628 = arith.divf %626, %627 : vector<2x1xf32>
    %629 = arith.mulf %620, %601 : vector<2x1xf32>
    %630 = arith.mulf %614, %622 : vector<2x1xf32>
    %631 = arith.addf %629, %630 : vector<2x1xf32>
    %632 = math.tanh %631 : vector<2x1xf32>
    %633 = arith.mulf %628, %632 : vector<2x1xf32>
    %634 = vector.extract_strided_slice %509 {offsets = [8, 0], sizes = [2, 4], strides = [1, 1]} : vector<16x8xf32> to vector<2x4xf32>
    %635 = vector.broadcast %633 : vector<2x1xf32> to vector<2x4xf32>
    %636 = vector.broadcast %510 : vector<1x4xf32> to vector<2x4xf32>
    %637 = arith.mulf %635, %636 : vector<2x4xf32>
    %638 = arith.addf %634, %637 : vector<2x4xf32>
    %639 = vector.extract_strided_slice %638 {offsets = [0, 0], sizes = [2, 1], strides = [1, 1]} : vector<2x4xf32> to vector<2x1xf32>
    %640 = arith.negf %639 : vector<2x1xf32>
    %641 = math.exp %640 : vector<2x1xf32>
    %cst_151 = arith.constant 1.000000e+00 : f32
    %642 = vector.broadcast %cst_151 : f32 to vector<2x1xf32>
    %643 = arith.addf %642, %641 : vector<2x1xf32>
    %644 = arith.divf %642, %643 : vector<2x1xf32>
    %645 = vector.extract_strided_slice %638 {offsets = [0, 1], sizes = [2, 1], strides = [1, 1]} : vector<2x4xf32> to vector<2x1xf32>
    %646 = arith.negf %645 : vector<2x1xf32>
    %647 = math.exp %646 : vector<2x1xf32>
    %cst_152 = arith.constant 1.000000e+00 : f32
    %648 = vector.broadcast %cst_152 : f32 to vector<2x1xf32>
    %649 = arith.addf %648, %647 : vector<2x1xf32>
    %650 = arith.divf %648, %649 : vector<2x1xf32>
    %651 = vector.extract_strided_slice %638 {offsets = [0, 2], sizes = [2, 1], strides = [1, 1]} : vector<2x4xf32> to vector<2x1xf32>
    %652 = math.tanh %651 : vector<2x1xf32>
    %653 = vector.extract_strided_slice %638 {offsets = [0, 3], sizes = [2, 1], strides = [1, 1]} : vector<2x4xf32> to vector<2x1xf32>
    %654 = arith.negf %653 : vector<2x1xf32>
    %655 = math.exp %654 : vector<2x1xf32>
    %cst_153 = arith.constant 1.000000e+00 : f32
    %656 = vector.broadcast %cst_153 : f32 to vector<2x1xf32>
    %657 = arith.addf %656, %655 : vector<2x1xf32>
    %658 = arith.divf %656, %657 : vector<2x1xf32>
    %659 = arith.mulf %650, %631 : vector<2x1xf32>
    %660 = arith.mulf %644, %652 : vector<2x1xf32>
    %661 = arith.addf %659, %660 : vector<2x1xf32>
    %662 = math.tanh %661 : vector<2x1xf32>
    %663 = arith.mulf %658, %662 : vector<2x1xf32>
    %664 = vector.extract_strided_slice %509 {offsets = [10, 0], sizes = [2, 4], strides = [1, 1]} : vector<16x8xf32> to vector<2x4xf32>
    %665 = vector.broadcast %663 : vector<2x1xf32> to vector<2x4xf32>
    %666 = vector.broadcast %510 : vector<1x4xf32> to vector<2x4xf32>
    %667 = arith.mulf %665, %666 : vector<2x4xf32>
    %668 = arith.addf %664, %667 : vector<2x4xf32>
    %669 = vector.extract_strided_slice %668 {offsets = [0, 0], sizes = [2, 1], strides = [1, 1]} : vector<2x4xf32> to vector<2x1xf32>
    %670 = arith.negf %669 : vector<2x1xf32>
    %671 = math.exp %670 : vector<2x1xf32>
    %cst_154 = arith.constant 1.000000e+00 : f32
    %672 = vector.broadcast %cst_154 : f32 to vector<2x1xf32>
    %673 = arith.addf %672, %671 : vector<2x1xf32>
    %674 = arith.divf %672, %673 : vector<2x1xf32>
    %675 = vector.extract_strided_slice %668 {offsets = [0, 1], sizes = [2, 1], strides = [1, 1]} : vector<2x4xf32> to vector<2x1xf32>
    %676 = arith.negf %675 : vector<2x1xf32>
    %677 = math.exp %676 : vector<2x1xf32>
    %cst_155 = arith.constant 1.000000e+00 : f32
    %678 = vector.broadcast %cst_155 : f32 to vector<2x1xf32>
    %679 = arith.addf %678, %677 : vector<2x1xf32>
    %680 = arith.divf %678, %679 : vector<2x1xf32>
    %681 = vector.extract_strided_slice %668 {offsets = [0, 2], sizes = [2, 1], strides = [1, 1]} : vector<2x4xf32> to vector<2x1xf32>
    %682 = math.tanh %681 : vector<2x1xf32>
    %683 = vector.extract_strided_slice %668 {offsets = [0, 3], sizes = [2, 1], strides = [1, 1]} : vector<2x4xf32> to vector<2x1xf32>
    %684 = arith.negf %683 : vector<2x1xf32>
    %685 = math.exp %684 : vector<2x1xf32>
    %cst_156 = arith.constant 1.000000e+00 : f32
    %686 = vector.broadcast %cst_156 : f32 to vector<2x1xf32>
    %687 = arith.addf %686, %685 : vector<2x1xf32>
    %688 = arith.divf %686, %687 : vector<2x1xf32>
    %689 = arith.mulf %680, %661 : vector<2x1xf32>
    %690 = arith.mulf %674, %682 : vector<2x1xf32>
    %691 = arith.addf %689, %690 : vector<2x1xf32>
    %692 = math.tanh %691 : vector<2x1xf32>
    %693 = arith.mulf %688, %692 : vector<2x1xf32>
    %694 = vector.extract_strided_slice %509 {offsets = [12, 0], sizes = [2, 4], strides = [1, 1]} : vector<16x8xf32> to vector<2x4xf32>
    %695 = vector.broadcast %693 : vector<2x1xf32> to vector<2x4xf32>
    %696 = vector.broadcast %510 : vector<1x4xf32> to vector<2x4xf32>
    %697 = arith.mulf %695, %696 : vector<2x4xf32>
    %698 = arith.addf %694, %697 : vector<2x4xf32>
    %699 = vector.extract_strided_slice %698 {offsets = [0, 0], sizes = [2, 1], strides = [1, 1]} : vector<2x4xf32> to vector<2x1xf32>
    %700 = arith.negf %699 : vector<2x1xf32>
    %701 = math.exp %700 : vector<2x1xf32>
    %cst_157 = arith.constant 1.000000e+00 : f32
    %702 = vector.broadcast %cst_157 : f32 to vector<2x1xf32>
    %703 = arith.addf %702, %701 : vector<2x1xf32>
    %704 = arith.divf %702, %703 : vector<2x1xf32>
    %705 = vector.extract_strided_slice %698 {offsets = [0, 1], sizes = [2, 1], strides = [1, 1]} : vector<2x4xf32> to vector<2x1xf32>
    %706 = arith.negf %705 : vector<2x1xf32>
    %707 = math.exp %706 : vector<2x1xf32>
    %cst_158 = arith.constant 1.000000e+00 : f32
    %708 = vector.broadcast %cst_158 : f32 to vector<2x1xf32>
    %709 = arith.addf %708, %707 : vector<2x1xf32>
    %710 = arith.divf %708, %709 : vector<2x1xf32>
    %711 = vector.extract_strided_slice %698 {offsets = [0, 2], sizes = [2, 1], strides = [1, 1]} : vector<2x4xf32> to vector<2x1xf32>
    %712 = math.tanh %711 : vector<2x1xf32>
    %713 = vector.extract_strided_slice %698 {offsets = [0, 3], sizes = [2, 1], strides = [1, 1]} : vector<2x4xf32> to vector<2x1xf32>
    %714 = arith.negf %713 : vector<2x1xf32>
    %715 = math.exp %714 : vector<2x1xf32>
    %cst_159 = arith.constant 1.000000e+00 : f32
    %716 = vector.broadcast %cst_159 : f32 to vector<2x1xf32>
    %717 = arith.addf %716, %715 : vector<2x1xf32>
    %718 = arith.divf %716, %717 : vector<2x1xf32>
    %719 = arith.mulf %710, %691 : vector<2x1xf32>
    %720 = arith.mulf %704, %712 : vector<2x1xf32>
    %721 = arith.addf %719, %720 : vector<2x1xf32>
    %722 = math.tanh %721 : vector<2x1xf32>
    %723 = arith.mulf %718, %722 : vector<2x1xf32>
    %724 = vector.extract_strided_slice %509 {offsets = [14, 0], sizes = [2, 4], strides = [1, 1]} : vector<16x8xf32> to vector<2x4xf32>
    %725 = vector.broadcast %723 : vector<2x1xf32> to vector<2x4xf32>
    %726 = vector.broadcast %510 : vector<1x4xf32> to vector<2x4xf32>
    %727 = arith.mulf %725, %726 : vector<2x4xf32>
    %728 = arith.addf %724, %727 : vector<2x4xf32>
    %729 = vector.extract_strided_slice %728 {offsets = [0, 0], sizes = [2, 1], strides = [1, 1]} : vector<2x4xf32> to vector<2x1xf32>
    %730 = arith.negf %729 : vector<2x1xf32>
    %731 = math.exp %730 : vector<2x1xf32>
    %cst_160 = arith.constant 1.000000e+00 : f32
    %732 = vector.broadcast %cst_160 : f32 to vector<2x1xf32>
    %733 = arith.addf %732, %731 : vector<2x1xf32>
    %734 = arith.divf %732, %733 : vector<2x1xf32>
    %735 = vector.extract_strided_slice %728 {offsets = [0, 1], sizes = [2, 1], strides = [1, 1]} : vector<2x4xf32> to vector<2x1xf32>
    %736 = arith.negf %735 : vector<2x1xf32>
    %737 = math.exp %736 : vector<2x1xf32>
    %cst_161 = arith.constant 1.000000e+00 : f32
    %738 = vector.broadcast %cst_161 : f32 to vector<2x1xf32>
    %739 = arith.addf %738, %737 : vector<2x1xf32>
    %740 = arith.divf %738, %739 : vector<2x1xf32>
    %741 = vector.extract_strided_slice %728 {offsets = [0, 2], sizes = [2, 1], strides = [1, 1]} : vector<2x4xf32> to vector<2x1xf32>
    %742 = math.tanh %741 : vector<2x1xf32>
    %743 = vector.extract_strided_slice %728 {offsets = [0, 3], sizes = [2, 1], strides = [1, 1]} : vector<2x4xf32> to vector<2x1xf32>
    %744 = arith.negf %743 : vector<2x1xf32>
    %745 = math.exp %744 : vector<2x1xf32>
    %cst_162 = arith.constant 1.000000e+00 : f32
    %746 = vector.broadcast %cst_162 : f32 to vector<2x1xf32>
    %747 = arith.addf %746, %745 : vector<2x1xf32>
    %748 = arith.divf %746, %747 : vector<2x1xf32>
    %749 = arith.mulf %740, %721 : vector<2x1xf32>
    %750 = arith.mulf %734, %742 : vector<2x1xf32>
    %751 = arith.addf %749, %750 : vector<2x1xf32>
    %752 = math.tanh %751 : vector<2x1xf32>
    %753 = arith.mulf %748, %752 : vector<2x1xf32>
    %cst_163 = arith.constant 0.000000e+00 : f32
    %754 = vector.broadcast %cst_163 : f32 to vector<2x1xf32>
    %cst_164 = arith.constant 0.000000e+00 : f32
    %755 = vector.broadcast %cst_164 : f32 to vector<2x1xf32>
    %756 = vector.extract_strided_slice %509 {offsets = [14, 4], sizes = [2, 4], strides = [1, 1]} : vector<16x8xf32> to vector<2x4xf32>
    %757 = vector.broadcast %754 : vector<2x1xf32> to vector<2x4xf32>
    %758 = vector.broadcast %511 : vector<1x4xf32> to vector<2x4xf32>
    %759 = arith.mulf %757, %758 : vector<2x4xf32>
    %760 = arith.addf %756, %759 : vector<2x4xf32>
    %761 = vector.extract_strided_slice %760 {offsets = [0, 0], sizes = [2, 1], strides = [1, 1]} : vector<2x4xf32> to vector<2x1xf32>
    %762 = arith.negf %761 : vector<2x1xf32>
    %763 = math.exp %762 : vector<2x1xf32>
    %cst_165 = arith.constant 1.000000e+00 : f32
    %764 = vector.broadcast %cst_165 : f32 to vector<2x1xf32>
    %765 = arith.addf %764, %763 : vector<2x1xf32>
    %766 = arith.divf %764, %765 : vector<2x1xf32>
    %767 = vector.extract_strided_slice %760 {offsets = [0, 1], sizes = [2, 1], strides = [1, 1]} : vector<2x4xf32> to vector<2x1xf32>
    %768 = arith.negf %767 : vector<2x1xf32>
    %769 = math.exp %768 : vector<2x1xf32>
    %cst_166 = arith.constant 1.000000e+00 : f32
    %770 = vector.broadcast %cst_166 : f32 to vector<2x1xf32>
    %771 = arith.addf %770, %769 : vector<2x1xf32>
    %772 = arith.divf %770, %771 : vector<2x1xf32>
    %773 = vector.extract_strided_slice %760 {offsets = [0, 2], sizes = [2, 1], strides = [1, 1]} : vector<2x4xf32> to vector<2x1xf32>
    %774 = math.tanh %773 : vector<2x1xf32>
    %775 = vector.extract_strided_slice %760 {offsets = [0, 3], sizes = [2, 1], strides = [1, 1]} : vector<2x4xf32> to vector<2x1xf32>
    %776 = arith.negf %775 : vector<2x1xf32>
    %777 = math.exp %776 : vector<2x1xf32>
    %cst_167 = arith.constant 1.000000e+00 : f32
    %778 = vector.broadcast %cst_167 : f32 to vector<2x1xf32>
    %779 = arith.addf %778, %777 : vector<2x1xf32>
    %780 = arith.divf %778, %779 : vector<2x1xf32>
    %781 = arith.mulf %772, %755 : vector<2x1xf32>
    %782 = arith.mulf %766, %774 : vector<2x1xf32>
    %783 = arith.addf %781, %782 : vector<2x1xf32>
    %784 = math.tanh %783 : vector<2x1xf32>
    %785 = arith.mulf %780, %784 : vector<2x1xf32>
    %786 = arith.addf %753, %785 : vector<2x1xf32>
    %787 = vector.extract_strided_slice %509 {offsets = [12, 4], sizes = [2, 4], strides = [1, 1]} : vector<16x8xf32> to vector<2x4xf32>
    %788 = vector.broadcast %785 : vector<2x1xf32> to vector<2x4xf32>
    %789 = vector.broadcast %511 : vector<1x4xf32> to vector<2x4xf32>
    %790 = arith.mulf %788, %789 : vector<2x4xf32>
    %791 = arith.addf %787, %790 : vector<2x4xf32>
    %792 = vector.extract_strided_slice %791 {offsets = [0, 0], sizes = [2, 1], strides = [1, 1]} : vector<2x4xf32> to vector<2x1xf32>
    %793 = arith.negf %792 : vector<2x1xf32>
    %794 = math.exp %793 : vector<2x1xf32>
    %cst_168 = arith.constant 1.000000e+00 : f32
    %795 = vector.broadcast %cst_168 : f32 to vector<2x1xf32>
    %796 = arith.addf %795, %794 : vector<2x1xf32>
    %797 = arith.divf %795, %796 : vector<2x1xf32>
    %798 = vector.extract_strided_slice %791 {offsets = [0, 1], sizes = [2, 1], strides = [1, 1]} : vector<2x4xf32> to vector<2x1xf32>
    %799 = arith.negf %798 : vector<2x1xf32>
    %800 = math.exp %799 : vector<2x1xf32>
    %cst_169 = arith.constant 1.000000e+00 : f32
    %801 = vector.broadcast %cst_169 : f32 to vector<2x1xf32>
    %802 = arith.addf %801, %800 : vector<2x1xf32>
    %803 = arith.divf %801, %802 : vector<2x1xf32>
    %804 = vector.extract_strided_slice %791 {offsets = [0, 2], sizes = [2, 1], strides = [1, 1]} : vector<2x4xf32> to vector<2x1xf32>
    %805 = math.tanh %804 : vector<2x1xf32>
    %806 = vector.extract_strided_slice %791 {offsets = [0, 3], sizes = [2, 1], strides = [1, 1]} : vector<2x4xf32> to vector<2x1xf32>
    %807 = arith.negf %806 : vector<2x1xf32>
    %808 = math.exp %807 : vector<2x1xf32>
    %cst_170 = arith.constant 1.000000e+00 : f32
    %809 = vector.broadcast %cst_170 : f32 to vector<2x1xf32>
    %810 = arith.addf %809, %808 : vector<2x1xf32>
    %811 = arith.divf %809, %810 : vector<2x1xf32>
    %812 = arith.mulf %803, %783 : vector<2x1xf32>
    %813 = arith.mulf %797, %805 : vector<2x1xf32>
    %814 = arith.addf %812, %813 : vector<2x1xf32>
    %815 = math.tanh %814 : vector<2x1xf32>
    %816 = arith.mulf %811, %815 : vector<2x1xf32>
    %817 = arith.addf %723, %816 : vector<2x1xf32>
    %818 = vector.extract_strided_slice %509 {offsets = [10, 4], sizes = [2, 4], strides = [1, 1]} : vector<16x8xf32> to vector<2x4xf32>
    %819 = vector.broadcast %816 : vector<2x1xf32> to vector<2x4xf32>
    %820 = vector.broadcast %511 : vector<1x4xf32> to vector<2x4xf32>
    %821 = arith.mulf %819, %820 : vector<2x4xf32>
    %822 = arith.addf %818, %821 : vector<2x4xf32>
    %823 = vector.extract_strided_slice %822 {offsets = [0, 0], sizes = [2, 1], strides = [1, 1]} : vector<2x4xf32> to vector<2x1xf32>
    %824 = arith.negf %823 : vector<2x1xf32>
    %825 = math.exp %824 : vector<2x1xf32>
    %cst_171 = arith.constant 1.000000e+00 : f32
    %826 = vector.broadcast %cst_171 : f32 to vector<2x1xf32>
    %827 = arith.addf %826, %825 : vector<2x1xf32>
    %828 = arith.divf %826, %827 : vector<2x1xf32>
    %829 = vector.extract_strided_slice %822 {offsets = [0, 1], sizes = [2, 1], strides = [1, 1]} : vector<2x4xf32> to vector<2x1xf32>
    %830 = arith.negf %829 : vector<2x1xf32>
    %831 = math.exp %830 : vector<2x1xf32>
    %cst_172 = arith.constant 1.000000e+00 : f32
    %832 = vector.broadcast %cst_172 : f32 to vector<2x1xf32>
    %833 = arith.addf %832, %831 : vector<2x1xf32>
    %834 = arith.divf %832, %833 : vector<2x1xf32>
    %835 = vector.extract_strided_slice %822 {offsets = [0, 2], sizes = [2, 1], strides = [1, 1]} : vector<2x4xf32> to vector<2x1xf32>
    %836 = math.tanh %835 : vector<2x1xf32>
    %837 = vector.extract_strided_slice %822 {offsets = [0, 3], sizes = [2, 1], strides = [1, 1]} : vector<2x4xf32> to vector<2x1xf32>
    %838 = arith.negf %837 : vector<2x1xf32>
    %839 = math.exp %838 : vector<2x1xf32>
    %cst_173 = arith.constant 1.000000e+00 : f32
    %840 = vector.broadcast %cst_173 : f32 to vector<2x1xf32>
    %841 = arith.addf %840, %839 : vector<2x1xf32>
    %842 = arith.divf %840, %841 : vector<2x1xf32>
    %843 = arith.mulf %834, %814 : vector<2x1xf32>
    %844 = arith.mulf %828, %836 : vector<2x1xf32>
    %845 = arith.addf %843, %844 : vector<2x1xf32>
    %846 = math.tanh %845 : vector<2x1xf32>
    %847 = arith.mulf %842, %846 : vector<2x1xf32>
    %848 = arith.addf %693, %847 : vector<2x1xf32>
    %849 = vector.extract_strided_slice %509 {offsets = [8, 4], sizes = [2, 4], strides = [1, 1]} : vector<16x8xf32> to vector<2x4xf32>
    %850 = vector.broadcast %847 : vector<2x1xf32> to vector<2x4xf32>
    %851 = vector.broadcast %511 : vector<1x4xf32> to vector<2x4xf32>
    %852 = arith.mulf %850, %851 : vector<2x4xf32>
    %853 = arith.addf %849, %852 : vector<2x4xf32>
    %854 = vector.extract_strided_slice %853 {offsets = [0, 0], sizes = [2, 1], strides = [1, 1]} : vector<2x4xf32> to vector<2x1xf32>
    %855 = arith.negf %854 : vector<2x1xf32>
    %856 = math.exp %855 : vector<2x1xf32>
    %cst_174 = arith.constant 1.000000e+00 : f32
    %857 = vector.broadcast %cst_174 : f32 to vector<2x1xf32>
    %858 = arith.addf %857, %856 : vector<2x1xf32>
    %859 = arith.divf %857, %858 : vector<2x1xf32>
    %860 = vector.extract_strided_slice %853 {offsets = [0, 1], sizes = [2, 1], strides = [1, 1]} : vector<2x4xf32> to vector<2x1xf32>
    %861 = arith.negf %860 : vector<2x1xf32>
    %862 = math.exp %861 : vector<2x1xf32>
    %cst_175 = arith.constant 1.000000e+00 : f32
    %863 = vector.broadcast %cst_175 : f32 to vector<2x1xf32>
    %864 = arith.addf %863, %862 : vector<2x1xf32>
    %865 = arith.divf %863, %864 : vector<2x1xf32>
    %866 = vector.extract_strided_slice %853 {offsets = [0, 2], sizes = [2, 1], strides = [1, 1]} : vector<2x4xf32> to vector<2x1xf32>
    %867 = math.tanh %866 : vector<2x1xf32>
    %868 = vector.extract_strided_slice %853 {offsets = [0, 3], sizes = [2, 1], strides = [1, 1]} : vector<2x4xf32> to vector<2x1xf32>
    %869 = arith.negf %868 : vector<2x1xf32>
    %870 = math.exp %869 : vector<2x1xf32>
    %cst_176 = arith.constant 1.000000e+00 : f32
    %871 = vector.broadcast %cst_176 : f32 to vector<2x1xf32>
    %872 = arith.addf %871, %870 : vector<2x1xf32>
    %873 = arith.divf %871, %872 : vector<2x1xf32>
    %874 = arith.mulf %865, %845 : vector<2x1xf32>
    %875 = arith.mulf %859, %867 : vector<2x1xf32>
    %876 = arith.addf %874, %875 : vector<2x1xf32>
    %877 = math.tanh %876 : vector<2x1xf32>
    %878 = arith.mulf %873, %877 : vector<2x1xf32>
    %879 = arith.addf %663, %878 : vector<2x1xf32>
    %880 = vector.extract_strided_slice %509 {offsets = [6, 4], sizes = [2, 4], strides = [1, 1]} : vector<16x8xf32> to vector<2x4xf32>
    %881 = vector.broadcast %878 : vector<2x1xf32> to vector<2x4xf32>
    %882 = vector.broadcast %511 : vector<1x4xf32> to vector<2x4xf32>
    %883 = arith.mulf %881, %882 : vector<2x4xf32>
    %884 = arith.addf %880, %883 : vector<2x4xf32>
    %885 = vector.extract_strided_slice %884 {offsets = [0, 0], sizes = [2, 1], strides = [1, 1]} : vector<2x4xf32> to vector<2x1xf32>
    %886 = arith.negf %885 : vector<2x1xf32>
    %887 = math.exp %886 : vector<2x1xf32>
    %cst_177 = arith.constant 1.000000e+00 : f32
    %888 = vector.broadcast %cst_177 : f32 to vector<2x1xf32>
    %889 = arith.addf %888, %887 : vector<2x1xf32>
    %890 = arith.divf %888, %889 : vector<2x1xf32>
    %891 = vector.extract_strided_slice %884 {offsets = [0, 1], sizes = [2, 1], strides = [1, 1]} : vector<2x4xf32> to vector<2x1xf32>
    %892 = arith.negf %891 : vector<2x1xf32>
    %893 = math.exp %892 : vector<2x1xf32>
    %cst_178 = arith.constant 1.000000e+00 : f32
    %894 = vector.broadcast %cst_178 : f32 to vector<2x1xf32>
    %895 = arith.addf %894, %893 : vector<2x1xf32>
    %896 = arith.divf %894, %895 : vector<2x1xf32>
    %897 = vector.extract_strided_slice %884 {offsets = [0, 2], sizes = [2, 1], strides = [1, 1]} : vector<2x4xf32> to vector<2x1xf32>
    %898 = math.tanh %897 : vector<2x1xf32>
    %899 = vector.extract_strided_slice %884 {offsets = [0, 3], sizes = [2, 1], strides = [1, 1]} : vector<2x4xf32> to vector<2x1xf32>
    %900 = arith.negf %899 : vector<2x1xf32>
    %901 = math.exp %900 : vector<2x1xf32>
    %cst_179 = arith.constant 1.000000e+00 : f32
    %902 = vector.broadcast %cst_179 : f32 to vector<2x1xf32>
    %903 = arith.addf %902, %901 : vector<2x1xf32>
    %904 = arith.divf %902, %903 : vector<2x1xf32>
    %905 = arith.mulf %896, %876 : vector<2x1xf32>
    %906 = arith.mulf %890, %898 : vector<2x1xf32>
    %907 = arith.addf %905, %906 : vector<2x1xf32>
    %908 = math.tanh %907 : vector<2x1xf32>
    %909 = arith.mulf %904, %908 : vector<2x1xf32>
    %910 = arith.addf %633, %909 : vector<2x1xf32>
    %911 = vector.extract_strided_slice %509 {offsets = [4, 4], sizes = [2, 4], strides = [1, 1]} : vector<16x8xf32> to vector<2x4xf32>
    %912 = vector.broadcast %909 : vector<2x1xf32> to vector<2x4xf32>
    %913 = vector.broadcast %511 : vector<1x4xf32> to vector<2x4xf32>
    %914 = arith.mulf %912, %913 : vector<2x4xf32>
    %915 = arith.addf %911, %914 : vector<2x4xf32>
    %916 = vector.extract_strided_slice %915 {offsets = [0, 0], sizes = [2, 1], strides = [1, 1]} : vector<2x4xf32> to vector<2x1xf32>
    %917 = arith.negf %916 : vector<2x1xf32>
    %918 = math.exp %917 : vector<2x1xf32>
    %cst_180 = arith.constant 1.000000e+00 : f32
    %919 = vector.broadcast %cst_180 : f32 to vector<2x1xf32>
    %920 = arith.addf %919, %918 : vector<2x1xf32>
    %921 = arith.divf %919, %920 : vector<2x1xf32>
    %922 = vector.extract_strided_slice %915 {offsets = [0, 1], sizes = [2, 1], strides = [1, 1]} : vector<2x4xf32> to vector<2x1xf32>
    %923 = arith.negf %922 : vector<2x1xf32>
    %924 = math.exp %923 : vector<2x1xf32>
    %cst_181 = arith.constant 1.000000e+00 : f32
    %925 = vector.broadcast %cst_181 : f32 to vector<2x1xf32>
    %926 = arith.addf %925, %924 : vector<2x1xf32>
    %927 = arith.divf %925, %926 : vector<2x1xf32>
    %928 = vector.extract_strided_slice %915 {offsets = [0, 2], sizes = [2, 1], strides = [1, 1]} : vector<2x4xf32> to vector<2x1xf32>
    %929 = math.tanh %928 : vector<2x1xf32>
    %930 = vector.extract_strided_slice %915 {offsets = [0, 3], sizes = [2, 1], strides = [1, 1]} : vector<2x4xf32> to vector<2x1xf32>
    %931 = arith.negf %930 : vector<2x1xf32>
    %932 = math.exp %931 : vector<2x1xf32>
    %cst_182 = arith.constant 1.000000e+00 : f32
    %933 = vector.broadcast %cst_182 : f32 to vector<2x1xf32>
    %934 = arith.addf %933, %932 : vector<2x1xf32>
    %935 = arith.divf %933, %934 : vector<2x1xf32>
    %936 = arith.mulf %927, %907 : vector<2x1xf32>
    %937 = arith.mulf %921, %929 : vector<2x1xf32>
    %938 = arith.addf %936, %937 : vector<2x1xf32>
    %939 = math.tanh %938 : vector<2x1xf32>
    %940 = arith.mulf %935, %939 : vector<2x1xf32>
    %941 = arith.addf %603, %940 : vector<2x1xf32>
    %942 = vector.extract_strided_slice %509 {offsets = [2, 4], sizes = [2, 4], strides = [1, 1]} : vector<16x8xf32> to vector<2x4xf32>
    %943 = vector.broadcast %940 : vector<2x1xf32> to vector<2x4xf32>
    %944 = vector.broadcast %511 : vector<1x4xf32> to vector<2x4xf32>
    %945 = arith.mulf %943, %944 : vector<2x4xf32>
    %946 = arith.addf %942, %945 : vector<2x4xf32>
    %947 = vector.extract_strided_slice %946 {offsets = [0, 0], sizes = [2, 1], strides = [1, 1]} : vector<2x4xf32> to vector<2x1xf32>
    %948 = arith.negf %947 : vector<2x1xf32>
    %949 = math.exp %948 : vector<2x1xf32>
    %cst_183 = arith.constant 1.000000e+00 : f32
    %950 = vector.broadcast %cst_183 : f32 to vector<2x1xf32>
    %951 = arith.addf %950, %949 : vector<2x1xf32>
    %952 = arith.divf %950, %951 : vector<2x1xf32>
    %953 = vector.extract_strided_slice %946 {offsets = [0, 1], sizes = [2, 1], strides = [1, 1]} : vector<2x4xf32> to vector<2x1xf32>
    %954 = arith.negf %953 : vector<2x1xf32>
    %955 = math.exp %954 : vector<2x1xf32>
    %cst_184 = arith.constant 1.000000e+00 : f32
    %956 = vector.broadcast %cst_184 : f32 to vector<2x1xf32>
    %957 = arith.addf %956, %955 : vector<2x1xf32>
    %958 = arith.divf %956, %957 : vector<2x1xf32>
    %959 = vector.extract_strided_slice %946 {offsets = [0, 2], sizes = [2, 1], strides = [1, 1]} : vector<2x4xf32> to vector<2x1xf32>
    %960 = math.tanh %959 : vector<2x1xf32>
    %961 = vector.extract_strided_slice %946 {offsets = [0, 3], sizes = [2, 1], strides = [1, 1]} : vector<2x4xf32> to vector<2x1xf32>
    %962 = arith.negf %961 : vector<2x1xf32>
    %963 = math.exp %962 : vector<2x1xf32>
    %cst_185 = arith.constant 1.000000e+00 : f32
    %964 = vector.broadcast %cst_185 : f32 to vector<2x1xf32>
    %965 = arith.addf %964, %963 : vector<2x1xf32>
    %966 = arith.divf %964, %965 : vector<2x1xf32>
    %967 = arith.mulf %958, %938 : vector<2x1xf32>
    %968 = arith.mulf %952, %960 : vector<2x1xf32>
    %969 = arith.addf %967, %968 : vector<2x1xf32>
    %970 = math.tanh %969 : vector<2x1xf32>
    %971 = arith.mulf %966, %970 : vector<2x1xf32>
    %972 = arith.addf %573, %971 : vector<2x1xf32>
    %973 = vector.extract_strided_slice %509 {offsets = [0, 4], sizes = [2, 4], strides = [1, 1]} : vector<16x8xf32> to vector<2x4xf32>
    %974 = vector.broadcast %971 : vector<2x1xf32> to vector<2x4xf32>
    %975 = vector.broadcast %511 : vector<1x4xf32> to vector<2x4xf32>
    %976 = arith.mulf %974, %975 : vector<2x4xf32>
    %977 = arith.addf %973, %976 : vector<2x4xf32>
    %978 = vector.extract_strided_slice %977 {offsets = [0, 0], sizes = [2, 1], strides = [1, 1]} : vector<2x4xf32> to vector<2x1xf32>
    %979 = arith.negf %978 : vector<2x1xf32>
    %980 = math.exp %979 : vector<2x1xf32>
    %cst_186 = arith.constant 1.000000e+00 : f32
    %981 = vector.broadcast %cst_186 : f32 to vector<2x1xf32>
    %982 = arith.addf %981, %980 : vector<2x1xf32>
    %983 = arith.divf %981, %982 : vector<2x1xf32>
    %984 = vector.extract_strided_slice %977 {offsets = [0, 1], sizes = [2, 1], strides = [1, 1]} : vector<2x4xf32> to vector<2x1xf32>
    %985 = arith.negf %984 : vector<2x1xf32>
    %986 = math.exp %985 : vector<2x1xf32>
    %cst_187 = arith.constant 1.000000e+00 : f32
    %987 = vector.broadcast %cst_187 : f32 to vector<2x1xf32>
    %988 = arith.addf %987, %986 : vector<2x1xf32>
    %989 = arith.divf %987, %988 : vector<2x1xf32>
    %990 = vector.extract_strided_slice %977 {offsets = [0, 2], sizes = [2, 1], strides = [1, 1]} : vector<2x4xf32> to vector<2x1xf32>
    %991 = math.tanh %990 : vector<2x1xf32>
    %992 = vector.extract_strided_slice %977 {offsets = [0, 3], sizes = [2, 1], strides = [1, 1]} : vector<2x4xf32> to vector<2x1xf32>
    %993 = arith.negf %992 : vector<2x1xf32>
    %994 = math.exp %993 : vector<2x1xf32>
    %cst_188 = arith.constant 1.000000e+00 : f32
    %995 = vector.broadcast %cst_188 : f32 to vector<2x1xf32>
    %996 = arith.addf %995, %994 : vector<2x1xf32>
    %997 = arith.divf %995, %996 : vector<2x1xf32>
    %998 = arith.mulf %989, %969 : vector<2x1xf32>
    %999 = arith.mulf %983, %991 : vector<2x1xf32>
    %1000 = arith.addf %998, %999 : vector<2x1xf32>
    %1001 = math.tanh %1000 : vector<2x1xf32>
    %1002 = arith.mulf %997, %1001 : vector<2x1xf32>
    %1003 = arith.addf %543, %1002 : vector<2x1xf32>
    %1004 = tpu.concatenate %1003, %972, %941, %910, %879, %848, %817, %786 in 1 : vector<2x1xf32>, vector<2x1xf32>, vector<2x1xf32>, vector<2x1xf32>, vector<2x1xf32>, vector<2x1xf32>, vector<2x1xf32>, vector<2x1xf32> -> vector<2x8xf32>
    %c0_189 = arith.constant 0 : index
    %c0_190 = arith.constant 0 : index
    %1005 = vector.load %arg13[%c0_189, %c0_190] : memref<2x8xf32, #tpu.memory_space<vmem>>, vector<2x8xf32>
    tpu.vector_store %arg13[%c0_189, %c0_190], %1004 {strides = array<i32>} : memref<2x8xf32, #tpu.memory_space<vmem>>, vector<2x8xf32>,
    %c0_191 = arith.constant 0 : index
    %c0_192 = arith.constant 0 : index
    %1006 = vector.load %arg11[%c0_191, %c0_192] : memref<8x64xf32, #tpu.memory_space<vmem>>, vector<8x64xf32>
    %cst_193 = arith.constant dense<0.000000e+00> : vector<2x64xf32>
    %1007 = tpu.matmul %1004, %1006, %cst_193 {dimension_numbers = #tpu.dot_dimension_numbers<[1], [0], [0], [1], [0, 0, 1, 1], [], []>} : vector<2x8xf32>, vector<8x64xf32>, vector<2x64xf32> -> vector<2x64xf32>
    %c0_194 = arith.constant 0 : index
    %c0_195 = arith.constant 0 : index
    %1008 = vector.load %arg12[%c0_194, %c0_195] : memref<1x64xf32, #tpu.memory_space<vmem>>, vector<1x64xf32>
    %1009 = vector.broadcast %1008 : vector<1x64xf32> to vector<2x64xf32>
    %1010 = arith.addf %1007, %1009 : vector<2x64xf32>
    %c0_196 = arith.constant 0 : index
    %c0_197 = arith.constant 0 : index
    %1011 = vector.load %arg14[%c0_196, %c0_197] : memref<2x64xf32, #tpu.memory_space<vmem>>, vector<2x64xf32>
    tpu.vector_store %arg14[%c0_196, %c0_197], %1010 {strides = array<i32>} : memref<2x64xf32, #tpu.memory_space<vmem>>, vector<2x64xf32>,
    return
  }
}

</mosaic_0001>

<bundles_post_ra>
// kernel: tae_forward.1
= control target key start
LH: loop header
LB: loop body
LE: loop exit
PB: predicated region body
PF: predicated region fallthrough
CT: control target
= control target key end

     0   :  { %20 = vsyncpa [#allocation4], 0  ;;  %s8704_s0 = inlined_call_operand.vmem [shape: f32[128,10], index: 0, kind: input, shape index: {}]   ;;  %s8705_s1 = inlined_call_operand.vmem [shape: f32[10,50], index: 1, kind: input, shape index: {}]   ;;  %s8706_s2 = inlined_call_operand.vmem [shape: f32[1,50], index: 2, kind: input, shape index: {}]   ;;  %s8707_s3 = inlined_call_operand.vmem [shape: f32[50,1024], index: 3, kind: input, shape index: {}]   ;;  %s8708_s4 = inlined_call_operand.hbm [shape: f32[1,1024], index: 4, kind: input, shape index: {}]   ;;  %s8709_s5 = inlined_call_operand.vmem [shape: f32[128,512], index: 5, kind: input, shape index: {}]   ;;  %s8710_s6 = inlined_call_operand.hbm [shape: f32[128,512], index: 6, kind: input, shape index: {}]   ;;  %s8711_s7 = inlined_call_operand.vmem [shape: f32[128,8], index: 7, kind: input, shape index: {}]   ;;  %s8712_s8 = inlined_call_operand.vmem [shape: f32[1,8], index: 8, kind: input, shape index: {}]   ;;  %s8713_s9 = inlined_call_operand.hbm [shape: f32[1,4], index: 9, kind: input, shape index: {}]   ;;  %s8714_s10 = inlined_call_operand.hbm [shape: f32[1,4], index: 10, kind: input, shape index: {}]   ;;  %s8715_s11 = inlined_call_operand.hbm [shape: f32[8,64], index: 11, kind: input, shape index: {}]   ;;  %s8716_s12 = inlined_call_operand.vmem [shape: f32[1,64], index: 12, kind: input, shape index: {}]   ;;  %s8717_s13 = inlined_call_operand.hbm [shape: f32[2,8], index: 13, kind: output, shape index: {0}]   ;;  %s8718_s14 = inlined_call_operand.hbm [shape: f32[2,64], index: 14, kind: output, shape index: {1}]  }
   0x1   :  { %21 = vsyncpa [#allocation7], 0 }
   0x2   :  { %22 = vsyncpa [#allocation10], 0 }
   0x3   :  { %23 = vsyncpa [#allocation5], 0 }
   0x4   :  { %24 = vsyncpa [#allocation14], 0  ;;  %s5874_s29 = smov [#allocation6]  }
   0x5   :  { %s50_s30 = sshll.u32 %s5874_s29, 4  ;;  %s51_s30 = int_to_ptr.vmem [resolvable:$true] %s50_s30 }
   0x6   :  { %s5732_s15 = scalar_lea.vmem %s51_s30, 8192  ;;  %p5737_p1 = scmp.lt.s32.totalorder %s51_s30, %s51_s30 }
   0x7   :  { %p5733_p0 = scmp.ne.s32.totalorder %s51_s30, %s5732_s15  ;;  %p5738_p2 = scmp.lt.s32.totalorder %s5732_s15, %s5732_s15 }
   0x9   :  { %p5739_p3 = por %p5738_p2, %p5737_p1 }
   0xb   :  { %p5740_p4 = pnand %p5739_p3, %p5733_p0 }
   0xd   :  { %5743 = shalt.err (!%p5740_p4)
}
   0xe   :  { %s5875_s16 = smov 512   ;;  %s5876_s17 = smov 32  }
   0xf   :  { %56 = dma.hbm_to_vmem [thread:$0]  %s8710_s6, 8192, %s51_s30, [#allocation7], %s5875_s16, %s5875_s16, %s5876_s17  }
  0x10   :  { %s5877_s20 = smov [#allocation9]   ;;  %s5878_s22 = smov [#allocation3]  }
  0x11   :  { %s77_s21 = sshll.u32 %s5877_s20, 4  ;;  %s39_s23 = sshll.u32 %s5878_s22, 4  ;;  %s78_s21 = int_to_ptr.vmem [resolvable:$true] %s77_s21  ;;  %s40_s23 = int_to_ptr.vmem [resolvable:$true] %s39_s23 }
  0x12   :  { %s5752_s24 = scalar_lea.vmem %s78_s21, 16  ;;  %s5756_s25 = scalar_lea.vmem %s78_s21, 32 }
  0x13   :  { %p5753_p5 = scmp.ne.s32.totalorder %s78_s21, %s5752_s24  ;;  %p5757_p6 = scmp.lt.s32.totalorder %s78_s21, %s78_s21 }
  0x14   :  { %p5758_p7 = scmp.lt.s32.totalorder %s5756_s25, %s5752_s24 }
  0x16   :  { %p5759_p8 = por %p5758_p7, %p5757_p6 }
  0x18   :  { %p5760_p9 = pnand %p5759_p8, %p5753_p5 }
  0x1a   :  { %5763 = shalt.err (!%p5760_p9)
}
  0x1b   :  { %80 = dma.hbm_to_vmem [thread:$0]  %s8714_s10, 16, %s78_s21, [#allocation10]  }
  0x1c   :  { %s5772_s28 = scalar_lea.vmem %s40_s23, 128  ;;  %p5777_p11 = scmp.lt.s32.totalorder %s40_s23, %s40_s23 }
  0x1d   :  { %p5773_p10 = scmp.ne.s32.totalorder %s40_s23, %s5772_s28  ;;  %p5778_p12 = scmp.lt.s32.totalorder %s5772_s28, %s5772_s28 }
  0x1f   :  { %p5779_p13 = por %p5778_p12, %p5777_p11 }
  0x21   :  { %p5780_p0 = pnand %p5779_p13, %p5773_p10 }
  0x23   :  { %5783 = shalt.err (!%p5780_p0)
}
  0x24   :  { %42 = dma.hbm_to_vmem [thread:$0]  %s8708_s4, 128, %s40_s23, [#allocation4]  }
  0x25   :  { %s5879_s30 = smov [#allocation8]   ;;  %s5880_s16 = smov [#allocation11]  }
  0x26   :  { %s67_s15 = sshll.u32 %s5879_s30, 4  ;;  %s87_s17 = sshll.u32 %s5880_s16, 4  ;;  %s68_s15 = int_to_ptr.vmem [resolvable:$true] %s67_s15  ;;  %s88_s17 = int_to_ptr.vmem [resolvable:$true] %s87_s17 }
  0x27   :  { %s5792_s18 = scalar_lea.vmem %s68_s15, 16  ;;  %s5796_s10 = scalar_lea.vmem %s68_s15, 32 }
  0x28   :  { %p5793_p1 = scmp.ne.s32.totalorder %s68_s15, %s5792_s18  ;;  %p5797_p2 = scmp.lt.s32.totalorder %s68_s15, %s68_s15 }
  0x29   :  { %p5798_p3 = scmp.lt.s32.totalorder %s5796_s10, %s5792_s18 }
  0x2b   :  { %p5799_p4 = por %p5798_p3, %p5797_p2 }
  0x2d   :  { %p5800_p5 = pnand %p5799_p4, %p5793_p1 }
  0x2f   :  { %5803 = shalt.err (!%p5800_p5)
}
  0x30   :  { %70 = dma.hbm_to_vmem [thread:$0]  %s8713_s9, 16, %s68_s15, [#allocation7]  }
  0x31   :  { %s5812_s21 = scalar_lea.vmem %s88_s17, 128  ;;  %p5817_p7 = scmp.lt.s32.totalorder %s88_s17, %s88_s17 }
  0x32   :  { %p5813_p6 = scmp.ne.s32.totalorder %s88_s17, %s5812_s21  ;;  %p5818_p8 = scmp.lt.s32.totalorder %s5812_s21, %s5812_s21 }
  0x34   :  { %p5819_p9 = por %p5818_p8, %p5817_p7 }
  0x36   :  { %p5820_p10 = pnand %p5819_p9, %p5813_p6 }
  0x38   :  { %5823 = shalt.err (!%p5820_p10)
}
  0x39   :  { %90 = dma.hbm_to_vmem [thread:$0]  %s8715_s11, 128, %s88_s17, [#allocation10]  }
  0x3a   :  { %5864 = dma.done.wait [#allocation4], 128  }
  0x3b   :  { %5865 = vsyncadd [#allocation4], 4294967168 }
  0x3c   :  { %5866 = dma.done.wait [#allocation7], 8208  }
  0x3d   :  { %5867 = vsyncadd [#allocation7], 4294959088 }
  0x3e   :  { %5868 = dma.done.wait [#allocation10], 144  }
  0x3f   :  { %5869 = vsyncadd [#allocation10], 4294967152  ;;  %vm182_vm0 = vcmask 1041408   ;;  %v125_v0 = vld [vmem:[%s8705_s1 + $0x8] sm:$0x3]  ;;  %v124_v1 = vld [vmem:[%s8705_s1] sm:$0xff] }
  0x40   :  { %5105 = vmatprep.subr.msk.mxu0 %vm182_vm0, %v125_v0  ;;  %5173 = vmatprep.subr.msk.mxu1 %vm182_vm0, %v125_v0  ;;  %v108_v2 = vld [vmem:[%s8704_s0] sm:$0xff]  ;;  %vm133_vm1 = vcmask 80896   ;;  %v109_v4 = vld [vmem:[%s8704_s0 + $0x8] sm:$0xff]  ;;  %v110_v6 = vld [vmem:[%s8704_s0 + $0x10] sm:$0xff]  ;;  %v8719_v48 = vmov 0.0   ;;  %vm379_vm2 = vcmask 408576  }
  0x41   :  { %5106 = vmatpush3.msk.msra.mxu0 %vm182_vm0, %v125_v0  ;;  %5175 = vmatpush3.msk.msra.mxu1 %vm182_vm0, %v125_v0  ;;  %v116_v3 = vld [vmem:[%s8704_s0 + $0x40] sm:$0xff]  ;;  %v117_v5 = vld [vmem:[%s8704_s0 + $0x48] sm:$0xff]  ;;  %v118_v7 = vld [vmem:[%s8704_s0 + $0x50] sm:$0xff]  ;;  %s5882_s22 = smov 4   ;;  %s5883_s23 = smov 126  }
  0x42   :  { %5107 = vmatprep.subr.mxu0 %v124_v1  ;;  %5174 = vmatprep.subr.mxu1 %v124_v1  ;;  %v111_v8 = vld [vmem:[%s8704_s0 + $0x18] sm:$0xff]  ;;  %v112_v10 = vld [vmem:[%s8704_s0 + $0x20] sm:$0xff]  ;;  %v113_v12 = vld [vmem:[%s8704_s0 + $0x28] sm:$0xff]  ;;  %s5886_s24 = smov 2   ;;  %s5888_s25 = smov 124  }
  0x43   :  { %5108 = vmatpush3.msra.mxu0 %v124_v1  ;;  %5176 = vmatpush3.msra.mxu1 %v124_v1  ;;  %v119_v9 = vld [vmem:[%s8704_s0 + $0x58] sm:$0xff]  ;;  %v120_v11 = vld [vmem:[%s8704_s0 + $0x60] sm:$0xff]  ;;  %v121_v13 = vld [vmem:[%s8704_s0 + $0x68] sm:$0xff]  ;;  %s5889_s11 = smov 127   ;;  %s5891_s26 = smov 125  }
  0x44   :  { %5109 = vmatprep.mubr.msk.f32.mxu0 %vm133_vm1, %v108_v2  ;;  %5121 = vmatprep.mubr.msk.f32.mxu1 %vm133_vm1, %v116_v3  ;;  %v114_v14 = vld [vmem:[%s8704_s0 + $0x30] sm:$0xff]  ;;  %v115_v16 = vld [vmem:[%s8704_s0 + $0x38] sm:$0xff]  ;;  %v541_v18 = vld [vmem:[%s8707_s3 + $0x188] sm:$0x3]  ;;  %s5892_s27 = smov 3  }
  0x45   :  { %5110 = vmatmul.mubr.msk.f32.vlgmr.msra.gmra.mxu0 %vm133_vm1, %v109_v4  ;;  %5122 = vmatmul.mubr.msk.f32.vlgmr.msra.gmra.mxu1 %vm133_vm1, %v117_v5  ;;  %v122_v15 = vld [vmem:[%s8704_s0 + $0x70] sm:$0xff]  ;;  %v123_v17 = vld [vmem:[%s8704_s0 + $0x78] sm:$0xff]  ;;  %v545_v19 = vld [vmem:[%s8707_s3 + $0x1a8] sm:$0x3] }
  0x46   :  { %5112 = vmatprep.mubr.msk.f32.mxu0 %vm133_vm1, %v110_v6  ;;  %5124 = vmatprep.mubr.msk.f32.mxu1 %vm133_vm1, %v118_v7  ;;  %v540_v20 = vld [vmem:[%s8707_s3 + $0x180] sm:$0x3]  ;;  %v533_v22 = vld [vmem:[%s8707_s3 + $0x148] sm:$0xff]  ;;  %v543_v46 = vld [vmem:[%s8707_s3 + $0x198] sm:$0x3] }
  0x47   :  { %4982 = vmatprep.subr.msk.mxu1 %vm182_vm0, %v541_v18  ;;  %4990 = vmatprep.subr.msk.mxu0 %vm182_vm0, %v545_v19  ;;  %v544_v21 = vld [vmem:[%s8707_s3 + $0x1a0] sm:$0x3]  ;;  %v537_v23 = vld [vmem:[%s8707_s3 + $0x168] sm:$0xff] }
  0x48   :  { %4983 = vmatpush1.msk.msra.mxu1 %vm182_vm0, %v540_v20  ;;  %4991 = vmatpush1.msk.msra.mxu0 %vm182_vm0, %v544_v21  ;;  %v532_v24 = vld [vmem:[%s8707_s3 + $0x140] sm:$0xff]  ;;  %v525_v26 = vld [vmem:[%s8707_s3 + $0x108] sm:$0xff] }
  0x49   :  { %5113 = vmatmul.mubr.msk.f32.gmra.mxu0 %vm133_vm1, %v111_v8  ;;  %5125 = vmatmul.mubr.msk.f32.gmra.mxu1 %vm133_vm1, %v119_v9  ;;  %v536_v25 = vld [vmem:[%s8707_s3 + $0x160] sm:$0xff]  ;;  %v529_v27 = vld [vmem:[%s8707_s3 + $0x128] sm:$0xff] }
  0x4a   :  { %5115 = vmatprep.mubr.msk.f32.mxu0 %vm133_vm1, %v112_v10  ;;  %5127 = vmatprep.mubr.msk.f32.mxu1 %vm133_vm1, %v120_v11  ;;  %v524_v28 = vld [vmem:[%s8707_s3 + $0x100] sm:$0xff]  ;;  %v517_v30 = vld [vmem:[%s8707_s3 + $0xc8] sm:$0xff] }
  0x4b   :  { %675 = vmatprep.subr.mxu1 %v533_v22  ;;  %829 = vmatprep.subr.mxu0 %v537_v23  ;;  %v528_v29 = vld [vmem:[%s8707_s3 + $0x120] sm:$0xff]  ;;  %v521_v31 = vld [vmem:[%s8707_s3 + $0xe8] sm:$0xff] }
  0x4c   :  { %676 = vmatpush1.msra.mxu1 %v532_v24  ;;  %830 = vmatpush1.msra.mxu0 %v536_v25  ;;  %v516_v32 = vld [vmem:[%s8707_s3 + $0xc0] sm:$0xff]  ;;  %v509_v34 = vld [vmem:[%s8707_s3 + $0x88] sm:$0xff] }
  0x4d   :  { %5116 = vmatmul.mubr.msk.f32.gmra.mxu0 %vm133_vm1, %v113_v12  ;;  %5128 = vmatmul.mubr.msk.f32.gmra.mxu1 %vm133_vm1, %v121_v13  ;;  %v520_v33 = vld [vmem:[%s8707_s3 + $0xe0] sm:$0xff]  ;;  %v513_v35 = vld [vmem:[%s8707_s3 + $0xa8] sm:$0xff] }
  0x4e   :  { %5118 = vmatprep.mubr.msk.f32.mxu0 %vm133_vm1, %v114_v14  ;;  %5130 = vmatprep.mubr.msk.f32.mxu1 %vm133_vm1, %v122_v15  ;;  %v508_v36 = vld [vmem:[%s8707_s3 + $0x80] sm:$0xff]  ;;  %v501_v38 = vld [vmem:[%s8707_s3 + $0x48] sm:$0xff] }
  0x4f   :  { %677 = vmatprep.subr.mxu1 %v525_v26  ;;  %831 = vmatprep.subr.mxu0 %v529_v27  ;;  %v512_v37 = vld [vmem:[%s8707_s3 + $0xa0] sm:$0xff]  ;;  %v505_v39 = vld [vmem:[%s8707_s3 + $0x68] sm:$0xff] }
  0x50   :  { %678 = vmatpush1.msra.mxu1 %v524_v28  ;;  %832 = vmatpush1.msra.mxu0 %v528_v29  ;;  %v500_v40 = vld [vmem:[%s8707_s3 + $0x40] sm:$0xff]  ;;  %v493_v42 = vld [vmem:[%s8707_s3 + $0x8] sm:$0xff] }
  0x51   :  { %5119 = vmatmul.mubr.msk.f32.gmra.mxu0 %vm133_vm1, %v115_v16  ;;  %5131 = vmatmul.mubr.msk.f32.gmra.mxu1 %vm133_vm1, %v123_v17  ;;  %v504_v41 = vld [vmem:[%s8707_s3 + $0x60] sm:$0xff]  ;;  %v497_v43 = vld [vmem:[%s8707_s3 + $0x28] sm:$0xff]  ;;  %vm606_vm1 = vcmask 1041409  }
  0x52   :  { %679 = vmatprep.subr.mxu1 %v517_v30  ;;  %833 = vmatprep.subr.mxu0 %v521_v31  ;;  %v492_v44 = vld [vmem:[%s8707_s3] sm:$0xff]  ;;  %v6153_v47 = vld [vmem:[%s8709_s5 + $0x1e8] sm:$0xff] }
  0x53   :  { %680 = vmatpush1.msra.mxu1 %v516_v32  ;;  %834 = vmatpush1.msra.mxu0 %v520_v33  ;;  %v496_v45 = vld [vmem:[%s8707_s3 + $0x20] sm:$0xff] }
  0x54   :  { %681 = vmatprep.subr.mxu1 %v509_v34  ;;  %835 = vmatprep.subr.mxu0 %v513_v35  ;;  %v6162_v49 = vld [vmem:[%s8706_s2] ss:$0 sm:$0xff]  ;;  %s5893_s2 = smov [#allocation12]  }
  0x55   :  { %682 = vmatpush1.msra.mxu1 %v508_v36  ;;  %836 = vmatpush1.msra.mxu0 %v512_v37  ;;  %s4939_s28 = sshll.u32 %s5893_s2, 4  ;;  %s4940_s28 = int_to_ptr.vmem [resolvable:$true] %s4939_s28 }
  0x56   :  { %683 = vmatprep.subr.mxu1 %v501_v38  ;;  %837 = vmatprep.subr.mxu0 %v505_v39  ;;  %s5824_s1 = scalar_lea.vmem %s4940_s28, 32  ;;  %p5829_p12 = scmp.lt.s32.totalorder %s4940_s28, %s4940_s28 }
  0x57   :  { %684 = vmatpush1.msra.mxu1 %v500_v40  ;;  %838 = vmatpush1.msra.mxu0 %v504_v41  ;;  %p5825_p11 = scmp.ne.s32.totalorder %s4940_s28, %s5824_s1  ;;  %p5830_p13 = scmp.lt.s32.totalorder %s5824_s1, %s5824_s1 }
  0x58   :  { %685 = vmatprep.subr.mxu1 %v493_v42  ;;  %839 = vmatprep.subr.mxu0 %v497_v43 }
  0x59   :  { %686 = vmatpush1.msra.mxu1 %v492_v44  ;;  %840 = vmatpush1.msra.mxu0 %v496_v45  ;;  %p5831_p0 = por %p5830_p13, %p5829_p12 }
  0x5a   :  { %719 = vmatprep.mubr.f32.mxu1 %v8719_v48  ;;  %4986 = vmatprep.subr.msk.mxu1 %vm182_vm0, %v543_v46 }
  0x5b   :  { %873 = vmatprep.mubr.f32.mxu0 %v8719_v48  ;;  %1091 = vmatprep.subr.mxu0 %v6153_v47  ;;  %p5832_p1 = pnand %p5831_p0, %p5825_p11 }
 0x105   :  { %v5111_v50 = vpop.f32.mrf.mxu0  ;;  %v5123_v51 = vpop.f32.mrf.mxu1 }
 0x106   :  { %v258_v52 = vadd.f32 %v5111_v50, %v6162_v49  ;;  %v298_v53 = vadd.f32 %v5123_v51, %v6162_v49 }
 0x107   :  { %v252_v54 = vpop.f32.mrf.mxu0  ;;  %v292_v55 = vpop.f32.mrf.mxu1 }
 0x108   :  { %vm332_vm3 = vcmp.gt.f32.partialorder %v258_v52, 0.0  ;;  %v348_v56 = vmul.f32 0.01, %v258_v52  ;;  %vm340_vm4 = vcmp.gt.f32.partialorder %v298_v53, 0.0  ;;  %v356_v57 = vmul.f32 0.01, %v298_v53 }
 0x109   :  { %v253_v58 = vadd.f32 %v6162_v49, %v252_v54  ;;  %v293_v59 = vadd.f32 %v6162_v49, %v292_v55  ;;  %v5114_v60 = vpop.f32.mrf.mxu0  ;;  %v5126_v6 = vpop.f32.mrf.mxu1 }
 0x10a   :  { %v364_v61 = vsel %vm332_vm3, %v258_v52, %v348_v56  ;;  %v372_v62 = vsel %vm340_vm4, %v298_v53, %v356_v57  ;;  %v268_v63 = vadd.f32 %v5114_v60, %v6162_v49  ;;  %v308_v9 = vadd.f32 %v5126_v6, %v6162_v49 }
 0x10b   :  { %v387_v0 = vsel %vm379_vm2, %v364_v61, -inf  ;;  %v443_v1 = vsel %vm379_vm2, %v372_v62, -inf  ;;  %vm331_vm5 = vcmp.gt.f32.partialorder %v253_v58, 0.0  ;;  %v347_v2 = vmul.f32 0.01, %v253_v58  ;;  %v262_v13 = vpop.f32.mrf.mxu0  ;;  %v302_v21 = vpop.f32.mrf.mxu1 }
 0x10c   :  { %v388_v3 = vrot.slane %v387_v0, 4  ;;  %v444_v4 = vrot.slane %v443_v1, 4  ;;  %vm339_vm6 = vcmp.gt.f32.partialorder %v293_v59, 0.0  ;;  %v355_v5 = vmul.f32 0.01, %v293_v59 }
 0x10d   :  { %v363_v7 = vsel %vm331_vm5, %v253_v58, %v347_v2  ;;  %vm334_vm7 = vcmp.gt.f32.partialorder %v268_v63, 0.0  ;;  %v350_v8 = vmul.f32 0.01, %v268_v63  ;;  %v358_v18 = vmul.f32 0.01, %v308_v9  ;;  %v5117_v31 = vpop.f32.mrf.mxu0  ;;  %v5129_v36 = vpop.f32.mrf.mxu1 }
 0x10e   :  { %v389_v10 = vmax.f32 %v387_v0, %v388_v3  ;;  %v380_v11 = vsel %vm379_vm2, %v363_v7, -inf  ;;  %v371_v12 = vsel %vm339_vm6, %v293_v59, %v355_v5  ;;  %v445_v14 = vmax.f32 %v443_v1, %v444_v4 }
 0x10f   :  { %v436_v15 = vsel %vm379_vm2, %v371_v12, -inf  ;;  %v366_v16 = vsel %vm334_vm7, %v268_v63, %v350_v8  ;;  %v381_v17 = vrot.slane %v380_v11, 4  ;;  %v263_v19 = vadd.f32 %v6162_v49, %v262_v13  ;;  %v272_v44 = vpop.f32.mrf.mxu0  ;;  %v312_v52 = vpop.f32.mrf.mxu1 }
 0x110   :  { %v390_v20 = vrot.slane %v389_v10, 2  ;;  %vm342_vm8 = vcmp.gt.f32.partialorder %v308_v9, 0.0  ;;  %v446_v22 = vrot.slane %v445_v14, 2  ;;  %v437_v23 = vrot.slane %v436_v15, 4 }
 0x111   :  { %v401_v24 = vsel %vm379_vm2, %v366_v16, -inf  ;;  %vm333_vm9 = vcmp.gt.f32.partialorder %v263_v19, 0.0  ;;  %v349_v25 = vmul.f32 0.01, %v263_v19  ;;  %v382_v26 = vmax.f32 %v380_v11, %v381_v17  ;;  %v5120_v62 = vpop.f32.mrf.mxu0  ;;  %v5132_v13 = vpop.f32.mrf.mxu1 }
 0x112   :  { %v374_v27 = vsel %vm342_vm8, %v308_v9, %v358_v18  ;;  %v303_v28 = vadd.f32 %v6162_v49, %v302_v21  ;;  %v402_v29 = vrot.slane %v401_v24, 4  ;;  %v391_v32 = vmax.f32 %v389_v10, %v390_v20 }
 0x113   :  { %v365_v30 = vsel %vm333_vm9, %v263_v19, %v349_v25  ;;  %v447_v33 = vmax.f32 %v445_v14, %v446_v22  ;;  %v438_v34 = vmax.f32 %v436_v15, %v437_v23  ;;  %v457_v37 = vsel %vm379_vm2, %v374_v27, -inf  ;;  %v282_v25 = vpop.f32.mrf.mxu0 }
 0x114   :  { %v394_v35 = vsel %vm379_vm2, %v365_v30, -inf  ;;  %vm341_vm10 = vcmp.gt.f32.partialorder %v303_v28, 0.0  ;;  %v357_v39 = vmul.f32 0.01, %v303_v28  ;;  %v383_v40 = vrot.slane %v382_v26, 2  ;;  %v322_v30 = vpop.f32.mrf.mxu1 }
 0x115   :  { %v395_v38 = vrot.slane %v394_v35, 4  ;;  %v278_v41 = vadd.f32 %v5117_v31, %v6162_v49  ;;  %v318_v43 = vadd.f32 %v5129_v36, %v6162_v49  ;;  %v392_v45 = vrot.slane %v391_v32, 1 }
 0x116   :  { %v373_v42 = vsel %vm341_vm10, %v303_v28, %v357_v39  ;;  %v403_v46 = vmax.f32 %v401_v24, %v402_v29  ;;  %v458_v50 = vrot.slane %v457_v37, 4  ;;  %v448_v53 = vrot.slane %v447_v33, 1 }
 0x117   :  { %v450_v51 = vsel %vm379_vm2, %v373_v42, -inf  ;;  %v439_v54 = vrot.slane %v438_v34, 2  ;;  %v396_v55 = vmax.f32 %v394_v35, %v395_v38  ;;  %vm336_vm11 = vcmp.gt.f32.partialorder %v278_v41, 0.0 }
 0x118   :  { %v384_v56 = vmax.f32 %v382_v26, %v383_v40  ;;  %v352_v57 = vmul.f32 0.01, %v278_v41  ;;  %vm344_vm12 = vcmp.gt.f32.partialorder %v318_v43, 0.0  ;;  %v360_v58 = vmul.f32 0.01, %v318_v43 }
 0x119   :  { %v451_v59 = vrot.slane %v450_v51, 4  ;;  %v273_v60 = vadd.f32 %v6162_v49, %v272_v44  ;;  %v313_v61 = vadd.f32 %v6162_v49, %v312_v52  ;;  %v6184_v63 = vmax.f32 %v391_v32, %v392_v45 }
 0x11a   :  { %v404_v0 = vrot.slane %v403_v46, 2  ;;  %v459_v1 = vmax.f32 %v457_v37, %v458_v50  ;;  %v368_v2 = vsel %vm336_vm11, %v278_v41, %v352_v57  ;;  %v6186_v3 = vmax.f32 %v447_v33, %v448_v53 }
 0x11b   :  { %v6188_v4 = vmax.f32 %v438_v34, %v439_v54  ;;  %v397_v5 = vrot.slane %v396_v55, 2  ;;  %v376_v6 = vsel %vm344_vm12, %v318_v43, %v360_v58  ;;  %v385_v7 = vrot.slane %v384_v56, 1 }
 0x11c   :  { %vm335_vm13 = vcmp.gt.f32.partialorder %v273_v60, 0.0  ;;  %v351_v8 = vmul.f32 0.01, %v273_v60  ;;  %v288_v9 = vadd.f32 %v5120_v62, %v6162_v49  ;;  %v452_v10 = vmax.f32 %v450_v51, %v451_v59 }
 0x11d   :  { %v415_v11 = vsel %vm379_vm2, %v368_v2, -inf  ;;  %vm343_vm14 = vcmp.gt.f32.partialorder %v313_v61, 0.0  ;;  %v359_v12 = vmul.f32 0.01, %v313_v61  ;;  %v6192_v14 = vmax.f32 %v403_v46, %v404_v0 }
 0x11e   :  { %v471_v15 = vsel %vm379_vm2, %v376_v6, -inf  ;;  %v367_v16 = vsel %vm335_vm13, %v273_v60, %v351_v8  ;;  %v328_v17 = vadd.f32 %v5132_v13, %v6162_v49  ;;  %v460_v18 = vrot.slane %v459_v1, 2 }
 0x11f   :  { %v398_v19 = vmax.f32 %v396_v55, %v397_v5  ;;  %v408_v20 = vsel %vm379_vm2, %v367_v16, -inf  ;;  %v375_v21 = vsel %vm343_vm14, %v313_v61, %v359_v12  ;;  %v416_v22 = vrot.slane %v415_v11, 4 }
 0x120   :  { %v409_v23 = vrot.slane %v408_v20, 4  ;;  %v464_v24 = vsel %vm379_vm2, %v375_v21, -inf  ;;  %vm338_vm15 = vcmp.gt.f32.partialorder %v288_v9, 0.0  ;;  %v453_v26 = vrot.slane %v452_v10, 2 }
 0x121   :  { %v472_v27 = vrot.slane %v471_v15, 4  ;;  %v465_v28 = vrot.slane %v464_v24, 4  ;;  %v354_v29 = vmul.f32 0.01, %v288_v9  ;;  %v441_v31 = vrot.slane %v6188_v4, 1 }
 0x122   :  { %v410_v32 = vmax.f32 %v408_v20, %v409_v23  ;;  %vm346_vm3 = vcmp.gt.f32.partialorder %v328_v17, 0.0  ;;  %v362_v33 = vmul.f32 0.01, %v328_v17  ;;  %v399_v34 = vrot.slane %v398_v19, 1 }
 0x123   :  { %vm608_vm4 = vcmask 1042434   ;;  %v466_v35 = vmax.f32 %v464_v24, %v465_v28  ;;  %v370_v36 = vsel %vm338_vm15, %v288_v9, %v354_v29  ;;  %v283_v37 = vadd.f32 %v6162_v49, %v282_v25 }
 0x124   :  { %v417_v38 = vmax.f32 %v415_v11, %v416_v22  ;;  %v411_v39 = vrot.slane %v410_v32, 2  ;;  %v429_v40 = vsel %vm379_vm2, %v370_v36, -inf  ;;  %v323_v41 = vadd.f32 %v6162_v49, %v322_v30 }
 0x125   :  { %v454_v42 = vmax.f32 %v452_v10, %v453_v26  ;;  %v473_v43 = vmax.f32 %v471_v15, %v472_v27  ;;  %v430_v44 = vrot.slane %v429_v40, 4  ;;  %v378_v45 = vsel %vm346_vm3, %v328_v17, %v362_v33 }
 0x126   :  { %v386_v46 = vmax.f32 %v384_v56, %v385_v7  ;;  %v467_v50 = vrot.slane %v466_v35, 2  ;;  %v485_v51 = vsel %vm379_vm2, %v378_v45, -inf  ;;  %vm337_vm5 = vcmp.gt.f32.partialorder %v283_v37, 0.0 }
 0x127   :  { %v412_v52 = vmax.f32 %v410_v32, %v411_v39  ;;  %v431_v53 = vmax.f32 %v429_v40, %v430_v44  ;;  %v486_v54 = vrot.slane %v485_v51, 4  ;;  %v353_v55 = vmul.f32 0.01, %v283_v37 }
 0x128   :  { %vm610_vm6 = vcmask 1043459   ;;  %v461_v57 = vmax.f32 %v459_v1, %v460_v18  ;;  %v418_v58 = vrot.slane %v417_v38, 2  ;;  %vm345_vm7 = vcmp.gt.f32.partialorder %v323_v41, 0.0 }
 0x129   :  { %v361_v59 = vmul.f32 0.01, %v323_v41  ;;  %vm612_vm8 = vcmask 1044484   ;;  %v400_v49 = vmax.f32 %v398_v19, %v399_v34  ;;  %v455_v60 = vrot.slane %v454_v42, 1 }
 0x12a   :  { %v474_v61 = vrot.slane %v473_v43, 2  ;;  %v369_v62 = vsel %vm337_vm5, %v283_v37, %v353_v55  ;;  %v432_v0 = vrot.slane %v431_v53, 2  ;;  %v487_v56 = vmax.f32 %v485_v51, %v486_v54  ;;  %v535_v54 = vld [vmem:[%s8707_s3 + $0x158] sm:$0xff]  ;;  %v6237_v55 = vld [vmem:[%s8709_s5 + $0x1c8] sm:$0xff] }
 0x12b   :  { %v422_v2 = vsel %vm379_vm2, %v369_v62, -inf  ;;  %v377_v5 = vsel %vm345_vm7, %v323_v41, %v361_v59  ;;  %v406_v6 = vrot.slane %v6192_v14, 1  ;;  %v413_v7 = vrot.slane %v412_v52, 1  ;;  %v527_v59 = vld [vmem:[%s8707_s3 + $0x118] sm:$0xff] }
 0x12c   :  { %v468_v8 = vmax.f32 %v466_v35, %v467_v50  ;;  %v423_v9 = vrot.slane %v422_v2, 4  ;;  %v607_v1 = vsel %vm606_vm1, %v6184_v63, %v386_v46  ;;  %v442_v10 = vmax.f32 %v6188_v4, %v441_v31  ;;  %v542_v46 = vld [vmem:[%s8707_s3 + $0x190] sm:$0x3]  ;;  %v6225_v50 = vld [vmem:[%s8709_s5 + $0x1e0] sm:$0xff] }
 0x12d   :  { %v419_v11 = vmax.f32 %v417_v38, %v418_v58  ;;  %v478_v12 = vsel %vm379_vm2, %v377_v5, -inf  ;;  %v462_v13 = vrot.slane %v461_v57, 1  ;;  %v475_v15 = vmax.f32 %v473_v43, %v474_v61  ;;  %v6249_v58 = vld [vmem:[%s8709_s5 + $0x1c0] sm:$0xff]  ;;  %v6261_v61 = vld [vmem:[%s8709_s5 + $0x1a8] sm:$0xff]  ;;  %v519_v5 = vld [vmem:[%s8707_s3 + $0xd8] sm:$0xff] }
 0x12e   :  { %v424_v16 = vmax.f32 %v422_v2, %v423_v9  ;;  %v479_v17 = vrot.slane %v478_v12, 4  ;;  %v609_v18 = vsel %vm608_vm4, %v400_v49, %v607_v1  ;;  %v456_v19 = vmax.f32 %v454_v42, %v455_v60  ;;  %v511_v9 = vld [vmem:[%s8707_s3 + $0x98] sm:$0xff]  ;;  %v6306_v1 = vld [vmem:[%s8709_s5 + $0x168] sm:$0xff] }
 0x12f   :  { %v433_v20 = vmax.f32 %v431_v53, %v432_v0  ;;  %v488_v21 = vrot.slane %v487_v56, 2  ;;  %v414_v22 = vmax.f32 %v412_v52, %v413_v7  ;;  %v469_v23 = vrot.slane %v468_v8, 1  ;;  %v526_v0 = vld [vmem:[%s8707_s3 + $0x110] sm:$0xff] }
 0x130   :  { %v425_v24 = vrot.slane %v424_v16, 2  ;;  %v480_v25 = vmax.f32 %v478_v12, %v479_v17  ;;  %v620_v63 = vsel %vm606_vm1, %v6186_v3, %v442_v10  ;;  %v407_v4 = vmax.f32 %v6192_v14, %v406_v6  ;;  %v6285_v6 = vld [vmem:[%s8709_s5 + $0x188] sm:$0xff]  ;;  %v518_v7 = vld [vmem:[%s8707_s3 + $0xd0] sm:$0xff]  ;;  %v503_v12 = vld [vmem:[%s8707_s3 + $0x58] sm:$0xff] }
 0x131   :  { %v420_v26 = vrot.slane %v419_v11, 1  ;;  %vm614_vm9 = vcmask 1045509   ;;  %v463_v27 = vmax.f32 %v461_v57, %v462_v13  ;;  %v476_v28 = vrot.slane %v475_v15, 1  ;;  %v534_v57 = vld [vmem:[%s8707_s3 + $0x150] sm:$0xff]  ;;  %v6324_v13 = vld [vmem:[%s8709_s5 + $0x148] sm:$0xff]  ;;  %v495_v17 = vld [vmem:[%s8707_s3 + $0x18] sm:$0xff] }
 0x132   :  { %v426_v29 = vmax.f32 %v424_v16, %v425_v24  ;;  %v481_v30 = vrot.slane %v480_v25, 2  ;;  %v434_v31 = vrot.slane %v433_v20, 1  ;;  %v489_v32 = vmax.f32 %v487_v56, %v488_v21  ;;  %v6272_v56 = vld [vmem:[%s8709_s5 + $0x1a0] sm:$0xff]  ;;  %v510_v10 = vld [vmem:[%s8707_s3 + $0x90] sm:$0xff]  ;;  %v547_v21 = vld [vmem:[%s8707_s3 + $0x1b8] sm:$0x3] }
 0x133   :  { %v611_v33 = vsel %vm610_vm6, %v407_v4, %v609_v18  ;;  %v621_v34 = vsel %vm608_vm4, %v456_v19, %v620_v63  ;;  %v470_v35 = vmax.f32 %v468_v8, %v469_v23  ;;  %v421_v3 = vmax.f32 %v419_v11, %v420_v26  ;;  %v6297_v8 = vld [vmem:[%s8709_s5 + $0x180] sm:$0xff]  ;;  %v6342_v18 = vld [vmem:[%s8709_s5 + $0x128] sm:$0xff]  ;;  %v494_v19 = vld [vmem:[%s8707_s3 + $0x10] sm:$0xff] }
 0x134   :  { %v427_v36 = vrot.slane %v426_v29, 1  ;;  %v482_v37 = vmax.f32 %v480_v25, %v481_v30  ;;  %v613_v38 = vsel %vm612_vm8, %v414_v22, %v611_v33  ;;  %vm616_vm10 = vcmask 1046534   ;;  %v6315_v11 = vld [vmem:[%s8709_s5 + $0x160] sm:$0xff]  ;;  %v6361_v22 = vld [vmem:[%s8709_s5 + $0x108] sm:$0xff]  ;;  %v546_v23 = vld [vmem:[%s8707_s3 + $0x1b0] sm:$0x3] }
 0x135   :  { %v477_v14 = vmax.f32 %v475_v15, %v476_v28  ;;  %vm618_vm11 = vcmask 1047559   ;;  %v435_v41 = vmax.f32 %v433_v20, %v434_v31  ;;  %v615_v42 = vsel %vm614_vm9, %v421_v3, %v613_v38  ;;  %v502_v15 = vld [vmem:[%s8707_s3 + $0x50] sm:$0xff]  ;;  %v6333_v16 = vld [vmem:[%s8709_s5 + $0x140] sm:$0xff]  ;;  %v539_v25 = vld [vmem:[%s8707_s3 + $0x178] sm:$0xff] }
 0x136   :  { %v428_v39 = vmax.f32 %v426_v29, %v427_v36  ;;  %v483_v40 = vrot.slane %v482_v37, 1  ;;  %v490_v43 = vrot.slane %v489_v32, 1  ;;  %v622_v44 = vsel %vm610_vm6, %v463_v27, %v621_v34  ;;  %v6352_v20 = vld [vmem:[%s8709_s5 + $0x120] sm:$0xff]  ;;  %v6381_v63 = vld [vmem:[%s8709_s5 + $0xe8] sm:$0xff]  ;;  %v538_v4 = vld [vmem:[%s8707_s3 + $0x170] sm:$0xff] }
 0x137   :  { %v623_v52 = vsel %vm612_vm8, %v470_v35, %v622_v44  ;;  %v6370_v24 = vld [vmem:[%s8709_s5 + $0x100] sm:$0xff]  ;;  %v531_v27 = vld [vmem:[%s8707_s3 + $0x138] sm:$0xff]  ;;  %v6402_v28 = vld [vmem:[%s8709_s5 + $0xc8] sm:$0xff]  ;;  %vm4835_vm12 = vcmask 15360   ;;  %vm4837_vm13 = vcmask 23552   ;;  %vm4839_vm14 = vcmask 31744  }
 0x138   :  { %v617_v45 = vsel %vm616_vm10, %v428_v39, %v615_v42  ;;  %v484_v51 = vmax.f32 %v482_v37, %v483_v40  ;;  %v491_v49 = vmax.f32 %v489_v32, %v490_v43  ;;  %v624_v60 = vsel %vm614_vm9, %v477_v14, %v623_v52  ;;  %v6393_v26 = vld [vmem:[%s8709_s5 + $0xe0] sm:$0xff]  ;;  %v530_v29 = vld [vmem:[%s8707_s3 + $0x130] sm:$0xff]  ;;  %v523_v31 = vld [vmem:[%s8707_s3 + $0xf8] sm:$0xff] }
 0x139   :  { %v6229_v53 = vsel %vm618_vm11, %v435_v41, %v617_v45  ;;  %v6411_v30 = vld [vmem:[%s8709_s5 + $0xc0] sm:$0xff]  ;;  %v6422_v32 = vld [vmem:[%s8709_s5 + $0xa8] sm:$0xff]  ;;  %v522_v33 = vld [vmem:[%s8707_s3 + $0xf0] sm:$0xff]  ;;  %vm4841_vm15 = vcmask 39936   ;;  %vm4843_vm1 = vcmask 48128   ;;  %vm4845_vm3 = vcmask 56320  }
 0x13a   :  { %4984 = vmatmul.mubr.msk.f32.vlgmr.msra.gmra.mxu1 %vm379_vm2, %v6229_v53  ;;  %4992 = vmatmul.mubr.msk.f32.vlgmr.msra.gmra.mxu0 %vm379_vm2, %v6229_v53  ;;  %v625_v62 = vsel %vm616_vm10, %v484_v51, %v624_v60  ;;  %v6431_v34 = vld [vmem:[%s8709_s5 + $0xa0] sm:$0xff]  ;;  %v515_v35 = vld [vmem:[%s8707_s3 + $0xb8] sm:$0xff]  ;;  %v6440_v36 = vld [vmem:[%s8709_s5 + $0x88] sm:$0xff]  ;;  %vm4857_vm4 = vcmask 64512   ;;  %vm4847_vm5 = vcmask 58368  }
 0x13b   :  { %4987 = vmatpush1.msk.msra.mxu1 %vm182_vm0, %v542_v46  ;;  %1092 = vmatpush1.msra.mxu0 %v6225_v50  ;;  %v6277_v2 = vsel %vm618_vm11, %v491_v49, %v625_v62  ;;  %8924 = vst [vmem:[#allocation20_spill] sm:$0xff] %v6431_v34  ;;  %8925 = vst [vmem:[#allocation21_spill] sm:$0xff] %v6440_v36  ;;  %v514_v37 = vld [vmem:[%s8707_s3 + $0xb0] sm:$0xff]  ;;  %v6449_v38 = vld [vmem:[%s8709_s5 + $0x80] sm:$0xff] }
 0x13c   :  { %752 = vmatprep.subr.mxu1 %v535_v54  ;;  %1093 = vmatprep.subr.mxu0 %v6237_v55  ;;  %8926 = vst [vmem:[#allocation22_spill] sm:$0xff] %v6449_v38  ;;  %v507_v3 = vld [vmem:[%s8707_s3 + $0x78] sm:$0xff]  ;;  %v6458_v14 = vld [vmem:[%s8709_s5 + $0x68] sm:$0xff]  ;;  %v506_v39 = vld [vmem:[%s8707_s3 + $0x70] sm:$0xff] }
 0x13d   :  { %753 = vmatpush1.msra.mxu1 %v534_v57  ;;  %1094 = vmatpush1.msra.mxu0 %v6249_v58  ;;  %8927 = vst [vmem:[#allocation23_spill] sm:$0xff] %v6458_v14  ;;  %v6467_v40 = vld [vmem:[%s8709_s5 + $0x60] sm:$0xff]  ;;  %v499_v41 = vld [vmem:[%s8707_s3 + $0x38] sm:$0xff]  ;;  %v6476_v42 = vld [vmem:[%s8709_s5 + $0x48] sm:$0xff] }
 0x13e   :  { %725 = vmatprep.mubr.f32.mxu1 %v8719_v48  ;;  %754 = vmatprep.subr.mxu1 %v527_v59  ;;  %8928 = vst [vmem:[#allocation24_spill] sm:$0xff] %v6467_v40  ;;  %8929 = vst [vmem:[#allocation25_spill] sm:$0xff] %v6476_v42  ;;  %v498_v43 = vld [vmem:[%s8707_s3 + $0x30] sm:$0xff]  ;;  %v6486_v44 = vld [vmem:[%s8709_s5 + $0x40] sm:$0xff] }
 0x13f   :  { %879 = vmatprep.mubr.f32.mxu0 %v8719_v48  ;;  %1095 = vmatprep.subr.mxu0 %v6261_v61  ;;  %8930 = vst [vmem:[#allocation26_spill] sm:$0xff] %v6486_v44  ;;  %v6492_v45 = vld [vmem:[%s8709_s5 + $0x28] sm:$0xff]  ;;  %v6497_v46 = vld [vmem:[%s8709_s5 + $0x1f8] sm:$0xff]  ;;  %v6503_v51 = vld [vmem:[%s8709_s5 + $0x20] sm:$0xff] }
 0x140   :  { %4985 = vmatmul.mubr.msk.f32.gmra.mxu1 %vm379_vm2, %v6277_v2  ;;  %4993 = vmatmul.mubr.msk.f32.gmra.mxu0 %vm379_vm2, %v6277_v2  ;;  %8931 = vst [vmem:[#allocation27_spill] sm:$0xff] %v6492_v45  ;;  %8932 = vst [vmem:[#allocation28_spill] sm:$0xff] %v6497_v46  ;;  %v6508_v52 = vld [vmem:[%s8709_s5 + $0x1f0] sm:$0xff]  ;;  %v6516_v54 = vld [vmem:[%s8709_s5 + $0x8] sm:$0xff] }
 0x141   :  { %755 = vmatpush1.msra.mxu1 %v526_v0  ;;  %1096 = vmatpush1.msra.mxu0 %v6272_v56  ;;  %8933 = vst [vmem:[#allocation29_spill] sm:$0xff] %v6503_v51  ;;  %8934 = vst [vmem:[#allocation30_spill] sm:$0xff] %v6516_v54  ;;  %v6521_v57 = vld [vmem:[%s8709_s5 + $0x1d8] sm:$0xff]  ;;  %v6528_v59 = vld [vmem:[%s8709_s5] sm:$0xff] }
 0x142   :  { %756 = vmatprep.subr.mxu1 %v519_v5  ;;  %1097 = vmatprep.subr.mxu0 %v6285_v6  ;;  %8935 = vst [vmem:[#allocation31_spill] sm:$0xff] %v6528_v59  ;;  %v6544_v49 = vld [vmem:[%s8709_s5 + $0x1b8] sm:$0xff]  ;;  %v6551_v60 = vld [vmem:[%s8709_s5 + $0x1b0] sm:$0xff] }
 0x143   :  { %757 = vmatpush1.msra.mxu1 %v518_v7  ;;  %1098 = vmatpush1.msra.mxu0 %v6297_v8  ;;  %v6559_v62 = vld [vmem:[%s8709_s5 + $0x198] sm:$0xff]  ;;  %v6565_v0 = vld [vmem:[%s8709_s5 + $0x190] sm:$0xff] }
 0x144   :  { %758 = vmatprep.subr.mxu1 %v511_v9  ;;  %1099 = vmatprep.subr.mxu0 %v6306_v1  ;;  %v6579_v5 = vld [vmem:[%s8709_s5 + $0x170] sm:$0xff]  ;;  %v6586_v7 = vld [vmem:[%s8709_s5 + $0x158] sm:$0xff] }
 0x145   :  { %759 = vmatpush1.msra.mxu1 %v510_v10  ;;  %1100 = vmatpush1.msra.mxu0 %v6315_v11  ;;  %v6593_v9 = vld [vmem:[%s8709_s5 + $0x150] sm:$0xff]  ;;  %v6600_v10 = vld [vmem:[%s8709_s5 + $0x138] sm:$0xff] }
 0x146   :  { %760 = vmatprep.subr.mxu1 %v503_v12  ;;  %1101 = vmatprep.subr.mxu0 %v6324_v13  ;;  %v6607_v12 = vld [vmem:[%s8709_s5 + $0x130] sm:$0xff] }
 0x147   :  { %761 = vmatpush1.msra.mxu1 %v502_v15  ;;  %1102 = vmatpush1.msra.mxu0 %v6333_v16  ;;  %v6614_v15 = vld [vmem:[%s8709_s5 + $0x118] sm:$0xff] }
 0x148   :  { %762 = vmatprep.subr.mxu1 %v495_v17  ;;  %1103 = vmatprep.subr.mxu0 %v6342_v18  ;;  %v6621_v17 = vld [vmem:[%s8709_s5 + $0x110] sm:$0xff] }
 0x149   :  { %763 = vmatpush1.msra.mxu1 %v494_v19  ;;  %796 = vmatprep.mubr.f32.mxu1 %v8719_v48  ;;  %v6628_v19 = vld [vmem:[%s8709_s5 + $0xf8] sm:$0xff] }
 0x14a   :  { %1104 = vmatpush1.msra.mxu0 %v6352_v20  ;;  %4988 = vmatmul.mubr.msk.f32.vlgmr.msra.gmra.mxu1 %vm379_vm2, %v6229_v53 }
 0x14b   :  { %4994 = vmatprep.subr.msk.mxu1 %vm182_vm0, %v547_v21  ;;  %1105 = vmatprep.subr.mxu0 %v6361_v22  ;;  %v6635_v21 = vld [vmem:[%s8709_s5 + $0xf0] sm:$0xff] }
 0x14c   :  { %4995 = vmatpush1.msk.msra.mxu1 %vm182_vm0, %v546_v23  ;;  %1106 = vmatpush1.msra.mxu0 %v6370_v24  ;;  %v6642_v23 = vld [vmem:[%s8709_s5 + $0xd8] sm:$0xff]  ;;  %vm5890_vm0 = vmmov 0  }
 0x14d   :  { %906 = vmatprep.subr.mxu1 %v539_v25  ;;  %1107 = vmatprep.subr.mxu0 %v6381_v63  ;;  %v6649_v25 = vld [vmem:[%s8709_s5 + $0xd0] sm:$0xff] }
 0x14e   :  { %802 = vmatprep.mubr.f32.mxu1 %v8719_v48  ;;  %907 = vmatpush1.msra.mxu1 %v538_v4  ;;  %v6656_v4 = vld [vmem:[%s8709_s5 + $0xb8] sm:$0xff] }
 0x14f   :  { %1108 = vmatpush1.msra.mxu0 %v6393_v26  ;;  %4989 = vmatmul.mubr.msk.f32.gmra.mxu1 %vm379_vm2, %v6277_v2 }
 0x150   :  { %908 = vmatprep.subr.mxu1 %v531_v27  ;;  %1109 = vmatprep.subr.mxu0 %v6402_v28  ;;  %v6663_v27 = vld [vmem:[%s8709_s5 + $0xb0] sm:$0xff] }
 0x151   :  { %909 = vmatpush1.msra.mxu1 %v530_v29  ;;  %1110 = vmatpush1.msra.mxu0 %v6411_v30  ;;  %8936 = vst [vmem:[#allocation32_spill] sm:$0xff] %v6663_v27  ;;  %v6670_v29 = vld [vmem:[%s8709_s5 + $0x98] sm:$0xff] }
 0x152   :  { %910 = vmatprep.subr.mxu1 %v523_v31  ;;  %1111 = vmatprep.subr.mxu0 %v6422_v32  ;;  %8937 = vst [vmem:[#allocation33_spill] sm:$0xff] %v6670_v29  ;;  %v6677_v31 = vld [vmem:[%s8709_s5 + $0x90] sm:$0xff] }
 0x153   :  { %911 = vmatpush1.msra.mxu1 %v522_v33  ;;  %1112 = vmatpush1.msra.mxu0 %v6431_v34  ;;  %8938 = vst [vmem:[#allocation34_spill] sm:$0xff] %v6677_v31  ;;  %v6684_v33 = vld [vmem:[%s8709_s5 + $0x78] sm:$0xff] }
 0x154   :  { %912 = vmatprep.subr.mxu1 %v515_v35  ;;  %1113 = vmatprep.subr.mxu0 %v6440_v36  ;;  %8939 = vst [vmem:[#allocation35_spill] sm:$0xff] %v6684_v33  ;;  %v6691_v35 = vld [vmem:[%s8709_s5 + $0x70] sm:$0xff] }
 0x155   :  { %913 = vmatpush1.msra.mxu1 %v514_v37  ;;  %1114 = vmatpush1.msra.mxu0 %v6449_v38  ;;  %8940 = vst [vmem:[#allocation36_spill] sm:$0xff] %v6691_v35  ;;  %v6698_v37 = vld [vmem:[%s8709_s5 + $0x58] sm:$0xff] }
 0x156   :  { %914 = vmatprep.subr.mxu1 %v507_v3  ;;  %1115 = vmatprep.subr.mxu0 %v6458_v14  ;;  %8941 = vst [vmem:[#allocation37_spill] sm:$0xff] %v6698_v37  ;;  %v6705_v3 = vld [vmem:[%s8709_s5 + $0x50] sm:$0xff] }
 0x157   :  { %915 = vmatpush1.msra.mxu1 %v506_v39  ;;  %1116 = vmatpush1.msra.mxu0 %v6467_v40  ;;  %8942 = vst [vmem:[#allocation38_spill] sm:$0xff] %v6705_v3  ;;  %v6712_v39 = vld [vmem:[%s8709_s5 + $0x38] sm:$0xff] }
 0x158   :  { %916 = vmatprep.subr.mxu1 %v499_v41  ;;  %1117 = vmatprep.subr.mxu0 %v6476_v42  ;;  %8943 = vst [vmem:[#allocation39_spill] sm:$0xff] %v6712_v39  ;;  %v6719_v41 = vld [vmem:[%s8709_s5 + $0x30] sm:$0xff] }
 0x159   :  { %917 = vmatpush1.msra.mxu1 %v498_v43  ;;  %950 = vmatprep.mubr.f32.mxu1 %v8719_v48  ;;  %8944 = vst [vmem:[#allocation40_spill] sm:$0xff] %v6719_v41  ;;  %v6726_v43 = vld [vmem:[%s8709_s5 + $0x18] sm:$0xff] }
 0x15a   :  { %1118 = vmatpush1.msra.mxu0 %v6486_v44  ;;  %4996 = vmatmul.mubr.msk.f32.vlgmr.msra.gmra.mxu1 %vm379_vm2, %v6229_v53  ;;  %v6535_v53 = vld [vmem:[%s8709_s5 + $0x1d0] sm:$0xff]  ;;  %8945 = vst [vmem:[#allocation41_spill] sm:$0xff] %v6726_v43 }
 0x15b   :  { %1119 = vmatprep.subr.mxu0 %v6492_v45  ;;  %1162 = vmatprep.subr.mxu1 %v6497_v46 }
 0x15c   :  { %1120 = vmatpush1.msra.mxu0 %v6503_v51  ;;  %1163 = vmatpush1.msra.mxu1 %v6508_v52 }
 0x15d   :  { %1121 = vmatprep.subr.mxu0 %v6516_v54  ;;  %1164 = vmatprep.subr.mxu1 %v6521_v57 }
 0x15e   :  { %956 = vmatprep.mubr.f32.mxu1 %v8719_v48  ;;  %1122 = vmatpush1.msra.mxu0 %v6528_v59 }
 0x15f   :  { %1155 = vmatprep.mubr.f32.mxu0 %v8719_v48  ;;  %1165 = vmatpush1.msra.mxu1 %v6535_v53 }
 0x160   :  { %4997 = vmatmul.mubr.msk.f32.gmra.mxu1 %vm379_vm2, %v6277_v2  ;;  %1156 = vmatmul.mubr.f32.vlgmr.msra.gmra.mxu0 %v8719_v48  ;;  %v6572_v2 = vld [vmem:[%s8709_s5 + $0x178] sm:$0xff]  ;;  %vm4833_vm2 = vcmask 7168  }
 0x161   :  { %1166 = vmatprep.subr.mxu1 %v6544_v49  ;;  %1226 = vmatprep.mubr.f32.mxu1 %v8719_v48  ;;  %v6733_v48 = vld [vmem:[%s8709_s5 + $0x10] sm:$0xff] }
 0x162   :  { %1167 = vmatpush1.msra.mxu1 %v6551_v60  ;;  %1262 = vmatprep.subr.mxu0 %v6153_v47  ;;  %8946 = vst [vmem:[#allocation42_spill] sm:$0xff] %v6733_v48 }
 0x163   :  { %1168 = vmatprep.subr.mxu1 %v6559_v62  ;;  %1263 = vmatpush1.msra.mxu0 %v6225_v50 }
 0x164   :  { %1169 = vmatpush1.msra.mxu1 %v6565_v0  ;;  %1264 = vmatprep.subr.mxu0 %v6237_v55 }
 0x165   :  { %1170 = vmatprep.subr.mxu1 %v6572_v2  ;;  %1265 = vmatpush1.msra.mxu0 %v6249_v58 }
 0x166   :  { %1171 = vmatpush1.msra.mxu1 %v6579_v5  ;;  %1266 = vmatprep.subr.mxu0 %v6261_v61 }
 0x167   :  { %1172 = vmatprep.subr.mxu1 %v6586_v7  ;;  %1267 = vmatpush1.msra.mxu0 %v6272_v56 }
 0x168   :  { %1173 = vmatpush1.msra.mxu1 %v6593_v9  ;;  %1268 = vmatprep.subr.mxu0 %v6285_v6 }
 0x169   :  { %1174 = vmatprep.subr.mxu1 %v6600_v10  ;;  %1269 = vmatpush1.msra.mxu0 %v6297_v8 }
 0x16a   :  { %1175 = vmatpush1.msra.mxu1 %v6607_v12  ;;  %1270 = vmatprep.subr.mxu0 %v6306_v1 }
 0x16b   :  { %1176 = vmatprep.subr.mxu1 %v6614_v15  ;;  %1271 = vmatpush1.msra.mxu0 %v6315_v11 }
 0x16c   :  { %1177 = vmatpush1.msra.mxu1 %v6621_v17  ;;  %1272 = vmatprep.subr.mxu0 %v6324_v13 }
 0x16d   :  { %1178 = vmatprep.subr.mxu1 %v6628_v19  ;;  %1273 = vmatpush1.msra.mxu0 %v6333_v16 }
 0x16e   :  { %1179 = vmatpush1.msra.mxu1 %v6635_v21  ;;  %1274 = vmatprep.subr.mxu0 %v6342_v18 }
 0x16f   :  { %1180 = vmatprep.subr.mxu1 %v6642_v23  ;;  %1275 = vmatpush1.msra.mxu0 %v6352_v20 }
 0x170   :  { %1181 = vmatpush1.msra.mxu1 %v6649_v25  ;;  %1276 = vmatprep.subr.mxu0 %v6361_v22 }
 0x171   :  { %1182 = vmatprep.subr.mxu1 %v6656_v4  ;;  %1277 = vmatpush1.msra.mxu0 %v6370_v24 }
 0x172   :  { %1183 = vmatpush1.msra.mxu1 %v6663_v27  ;;  %1278 = vmatprep.subr.mxu0 %v6381_v63 }
 0x173   :  { %1184 = vmatprep.subr.mxu1 %v6670_v29  ;;  %1279 = vmatpush1.msra.mxu0 %v6393_v26 }
 0x174   :  { %1185 = vmatpush1.msra.mxu1 %v6677_v31  ;;  %1280 = vmatprep.subr.mxu0 %v6402_v28 }
 0x175   :  { %1186 = vmatprep.subr.mxu1 %v6684_v33  ;;  %1281 = vmatpush1.msra.mxu0 %v6411_v30 }
 0x176   :  { %1187 = vmatpush1.msra.mxu1 %v6691_v35  ;;  %1282 = vmatprep.subr.mxu0 %v6422_v32 }
 0x177   :  { %1188 = vmatprep.subr.mxu1 %v6698_v37  ;;  %1283 = vmatpush1.msra.mxu0 %v6431_v34 }
 0x178   :  { %1189 = vmatpush1.msra.mxu1 %v6705_v3  ;;  %1284 = vmatprep.subr.mxu0 %v6440_v36  ;;  %v8947_v36 = vmov 0.0  }
 0x179   :  { %1190 = vmatprep.subr.mxu1 %v6712_v39  ;;  %1285 = vmatpush1.msra.mxu0 %v6449_v38 }
 0x17a   :  { %1191 = vmatpush1.msra.mxu1 %v6719_v41  ;;  %1286 = vmatprep.subr.mxu0 %v6458_v14 }
 0x17b   :  { %1192 = vmatprep.subr.mxu1 %v6726_v43  ;;  %1287 = vmatpush1.msra.mxu0 %v6467_v40 }
 0x17c   :  { %1193 = vmatpush1.msra.mxu1 %v6733_v48  ;;  %1288 = vmatprep.subr.mxu0 %v6476_v42 }
 0x17d   :  { %1227 = vmatmul.mubr.f32.vlgmr.msra.gmra.mxu1 %v8947_v36  ;;  %1333 = vmatprep.subr.mxu1 %v6497_v46 }
 0x17e   :  { %1334 = vmatpush1.msra.mxu1 %v6508_v52  ;;  %1289 = vmatpush1.msra.mxu0 %v6486_v44 }
 0x17f   :  { %1335 = vmatprep.subr.mxu1 %v6521_v57  ;;  %1290 = vmatprep.subr.mxu0 %v6492_v45 }
 0x180   :  { %1336 = vmatpush1.msra.mxu1 %v6535_v53  ;;  %1291 = vmatpush1.msra.mxu0 %v6503_v51 }
 0x181   :  { %1337 = vmatprep.subr.mxu1 %v6544_v49  ;;  %1292 = vmatprep.subr.mxu0 %v6516_v54  ;;  %v548_v54 = vld [vmem:[#allocation3] sm:$0xff] }
 0x182   :  { %1338 = vmatpush1.msra.mxu1 %v6551_v60  ;;  %1293 = vmatpush1.msra.mxu0 %v6528_v59 }
 0x183   :  { %1339 = vmatprep.subr.mxu1 %v6559_v62  ;;  %1326 = vmatprep.mubr.f32.mxu0 %v8947_v36 }
 0x184   :  { %1340 = vmatpush1.msra.mxu1 %v6565_v0  ;;  %1397 = vmatprep.mubr.f32.mxu1 %v8947_v36 }
 0x185   :  { %1341 = vmatprep.subr.mxu1 %v6572_v2  ;;  %1451 = vmatprep.subr.mxu0 %v6153_v47  ;;  %v550_v47 = vlaneseq }
 0x186   :  { %1342 = vmatpush1.msra.mxu1 %v6579_v5 }
 0x187   :  { %1343 = vmatprep.subr.mxu1 %v6586_v7  ;;  %v551_v36 = vshrl.u32 %v550_v47, 7 }
 0x188   :  { %1344 = vmatpush1.msra.mxu1 %v6593_v9 }
 0x189   :  { %1345 = vmatprep.subr.mxu1 %v6600_v10  ;;  %v568_v59 = vsub.s32 4, %v551_v36  ;;  %v572_v51 = vsub.s32 5, %v551_v36  ;;  %v560_v14 = vsub.s32 2, %v551_v36  ;;  %v564_v38 = vsub.s32 3, %v551_v36 }
 0x18a   :  { %1346 = vmatpush1.msra.mxu1 %v6607_v12 }
 0x18b   :  { %1347 = vmatprep.subr.mxu1 %v6614_v15  ;;  %v6784_v45 = vrot.slane %v548_v54, %v568_v59  ;;  %v6786_v44 = vrot.slane %v548_v54, %v572_v51 }
 0x18c   :  { %1348 = vmatpush1.msra.mxu1 %v6621_v17 }
 0x18d   :  { %1349 = vmatprep.subr.mxu1 %v6628_v19  ;;  %8948 = vst [vmem:[#allocation43_spill] sm:$0xff] %v6784_v45  ;;  %8949 = vst [vmem:[#allocation44_spill] sm:$0xff] %v6786_v44 }
 0x18e   :  { %1350 = vmatpush1.msra.mxu1 %v6635_v21 }
 0x18f   :  { %1351 = vmatprep.subr.mxu1 %v6642_v23 }
 0x190   :  { %1352 = vmatpush1.msra.mxu1 %v6649_v25 }
 0x191   :  { %1353 = vmatprep.subr.mxu1 %v6656_v4 }
 0x192   :  { %1354 = vmatpush1.msra.mxu1 %v6663_v27 }
 0x193   :  { %1355 = vmatprep.subr.mxu1 %v6670_v29 }
 0x194   :  { %1356 = vmatpush1.msra.mxu1 %v6677_v31 }
 0x195   :  { %1357 = vmatprep.subr.mxu1 %v6684_v33 }
 0x196   :  { %1358 = vmatpush1.msra.mxu1 %v6691_v35 }
 0x197   :  { %1359 = vmatprep.subr.mxu1 %v6698_v37 }
 0x198   :  { %1360 = vmatpush1.msra.mxu1 %v6705_v3 }
 0x199   :  { %1361 = vmatprep.subr.mxu1 %v6712_v39  ;;  %v552_v39 = vsub.s32 0, %v551_v36 }
 0x19a   :  { %1362 = vmatpush1.msra.mxu1 %v6719_v41 }
 0x19b   :  { %1363 = vmatprep.subr.mxu1 %v6726_v43  ;;  %v553_v47 = vrot.slane %v548_v54, %v552_v39  ;;  %v576_v39 = vsub.s32 6, %v551_v36 }
 0x19c   :  { %1364 = vmatpush1.msra.mxu1 %v6733_v48  ;;  %v556_v48 = vsub.s32 1, %v551_v36 }
 0x19d   :  { %1522 = vmatprep.subr.mxu1 %v6497_v46 }
 0x19e   :  { %v557_v40 = vrot.slane %v548_v54, %v556_v48  ;;  %v6802_v48 = vrot.slane %v548_v54, %v576_v39 }
 0x1a0   :  { %8956 = vst [vmem:[#allocation51_spill] sm:$0xff] %v6802_v48 }
 0x1fa   :  { %v721_v3 = vpop.f32.mrf.mxu1  ;;  %v875_v37 = vpop.f32.mrf.mxu0 }
 0x1fb   :  { %v6789_v41 = vadd.f32 %v875_v37, %v6784_v45  ;;  %v561_v37 = vrot.slane %v548_v54, %v560_v14  ;;  %v565_v45 = vrot.slane %v548_v54, %v564_v38 }
 0x1fc   :  { %v723_v43 = vpop.f32.mrf.mxu1  ;;  %v877_v42 = vpop.f32.mrf.mxu0 }
 0x1fd   :  { %8950 = vst [vmem:[#allocation45_spill] sm:$0xff] %v6789_v41  ;;  %v6792_v46 = vadd.f32 %v877_v42, %v6786_v44 }
 0x1ff   :  { %8951 = vst [vmem:[#allocation46_spill] sm:$0xff] %v6792_v46  ;;  %v580_v46 = vsub.s32 7, %v551_v36  ;;  %v6818_v36 = vadd.f32 %v723_v43, %v557_v40 }
 0x200   :  { %v727_v35 = vpop.f32.mrf.mxu1 }
 0x201   :  { %v6794_v33 = vadd.f32 %v727_v35, %v553_v47  ;;  %v6804_v35 = vrot.slane %v548_v54, %v580_v46 }
 0x202   :  { %v729_v59 = vpop.f32.mrf.mxu1 }
 0x203   :  { %8952 = vst [vmem:[#allocation47_spill] sm:$0xff] %v6794_v33  ;;  %v6796_v51 = vadd.f32 %v729_v59, %v557_v40  ;;  %8957 = vst [vmem:[#allocation52_spill] sm:$0xff] %v6804_v35  ;;  %v6806_v59 = vpop.f32.mrf.mxu0  ;;  %v8982_v33 = vld [vmem:[#allocation30_spill] sm:$0xff] }
 0x204   :  { %8958 = vst [vmem:[#allocation53_spill] sm:$0xff] %v6806_v59 }
 0x205   :  { %8953 = vst [vmem:[#allocation48_spill] sm:$0xff] %v6796_v51 }
 0x20a   :  { %v798_v31 = vpop.f32.mrf.mxu1 }
 0x20c   :  { %v800_v29 = vpop.f32.mrf.mxu1 }
 0x20d   :  { %v6828_v43 = vadd.f32 %v800_v29, %v565_v45 }
 0x20f   :  { %v804_v41 = vpop.f32.mrf.mxu1 }
 0x210   :  { %v6798_v27 = vadd.f32 %v804_v41, %v561_v37  ;;  %v6814_v41 = vpop.f32.mrf.mxu0 }
 0x211   :  { %v806_v34 = vpop.f32.mrf.mxu1  ;;  %8961 = vst [vmem:[#allocation56_spill] sm:$0xff] %v6814_v41  ;;  %v8981_v41 = vld [vmem:[#allocation40_spill] sm:$0xff] }
 0x212   :  { %8954 = vst [vmem:[#allocation49_spill] sm:$0xff] %v6798_v27  ;;  %v6800_v42 = vadd.f32 %v806_v34, %v565_v45  ;;  %v6816_v27 = vadd.f32 %v721_v3, %v553_v47  ;;  %v6826_v3 = vadd.f32 %v798_v31, %v561_v37 }
 0x214   :  { %8955 = vst [vmem:[#allocation50_spill] sm:$0xff] %v6800_v42 }
 0x21a   :  { %v952_v44 = vpop.f32.mrf.mxu1 }
 0x21b   :  { %v6809_v51 = vadd.f32 %v952_v44, %v6802_v48 }
 0x21c   :  { %v954_v14 = vpop.f32.mrf.mxu1 }
 0x21d   :  { %8959 = vst [vmem:[#allocation54_spill] sm:$0xff] %v6809_v51  ;;  %v6812_v38 = vadd.f32 %v954_v14, %v6804_v35 }
 0x21f   :  { %8960 = vst [vmem:[#allocation55_spill] sm:$0xff] %v6812_v38 }
 0x220   :  { %v1157_v34 = vpop.f32.mrf.mxu0  ;;  %v6822_v51 = vpop.f32.mrf.mxu1 }
 0x221   :  { %v1233_v46 = vadd.f32 %v1157_v34, %v6816_v27  ;;  %8962 = vst [vmem:[#allocation57_spill] sm:$0xff] %v6822_v51  ;;  %v8979_v51 = vld [vmem:[#allocation39_spill] sm:$0xff] }
 0x222   :  { %v1159_v39 = vpop.f32.mrf.mxu0  ;;  %v6824_v35 = vpop.f32.mrf.mxu1 }
 0x223   :  { %v1234_v54 = vadd.f32 %v1159_v39, %v6818_v36  ;;  %v4998_v42 = vmul.f32 -1.442695, %v1233_v46  ;;  %8963 = vst [vmem:[#allocation58_spill] sm:$0xff] %v6824_v35  ;;  %v8980_v35 = vld [vmem:[#allocation29_spill] sm:$0xff] }
 0x225   :  { %v4999_v59 = vmul.f32 -1.442695, %v1234_v54 }
 0x227   :  { %5212 = vpow2.f32 %v4999_v59 }
 0x228   :  { %5214 = vpow2.f32 %v4998_v42 }
 0x234   :  { %v5213_v44 = vpop.eup %5212 }
 0x235   :  { %v5215_v14 = vpop.eup %5214  ;;  %v1246_v38 = vadd.f32 1.0, %v5213_v44 }
 0x236   :  { %v1240_v48 = vadd.f32 1.0, %v5215_v14 }
 0x237   :  { %5216 = vrcp.f32 %v1246_v38 }
 0x238   :  { %5218 = vrcp.f32 %v1240_v48 }
 0x23d   :  { %v1228_v40 = vpop.f32.mrf.mxu1 }
 0x23e   :  { %v1235_v47 = vadd.f32 %v1228_v40, %v6826_v3  ;;  %v8964_v40 = vld [vmem:[#allocation20_spill] sm:$0xff] }
 0x23f   :  { %v1230_v34 = vpop.f32.mrf.mxu1 }
 0x240   :  { %5220 = vtanh.f32 %v1235_v47  ;;  %v1236_v42 = vadd.f32 %v1230_v34, %v6828_v43  ;;  %v8965_v47 = vld [vmem:[#allocation32_spill] sm:$0xff]  ;;  %v8966_v34 = vld [vmem:[#allocation21_spill] sm:$0xff] }
 0x242   :  { %v5000_v59 = vmul.f32 -1.442695, %v1236_v42  ;;  %v8967_v42 = vld [vmem:[#allocation33_spill] sm:$0xff] }
 0x244   :  { %5222 = vpow2.f32 %v5000_v59  ;;  %v5217_v39 = vpop.eup %5216  ;;  %v8968_v59 = vld [vmem:[#allocation22_spill] sm:$0xff] }
 0x245   :  { %v5219_v46 = vpop.eup %5218  ;;  %v1256_v44 = vmul.f32 0.0, %v5217_v39  ;;  %v8969_v39 = vld [vmem:[#allocation34_spill] sm:$0xff] }
 0x24d   :  { %v5221_v54 = vpop.eup %5220 }
 0x24e   :  { %v1257_v14 = vmul.f32 %v5221_v54, %v5219_v46  ;;  %v8970_v46 = vld [vmem:[#allocation23_spill] sm:$0xff] }
 0x24f   :  { %v8971_v54 = vld [vmem:[#allocation35_spill] sm:$0xff] }
 0x250   :  { %v6832_v31 = vadd.f32 %v1257_v14, %v1256_v44  ;;  %v8972_v44 = vld [vmem:[#allocation24_spill] sm:$0xff] }
 0x251   :  { %v5223_v37 = vpop.eup %5222  ;;  %v8973_v14 = vld [vmem:[#allocation36_spill] sm:$0xff] }
 0x252   :  { %v1253_v45 = vadd.f32 1.0, %v5223_v37  ;;  %5224 = vtanh.f32 %v6832_v31  ;;  %v8974_v37 = vld [vmem:[#allocation25_spill] sm:$0xff] }
 0x254   :  { %5226 = vrcp.f32 %v1253_v45  ;;  %v8975_v45 = vld [vmem:[#allocation37_spill] sm:$0xff] }
 0x25f   :  { %v5225_v29 = vpop.eup %5224 }
 0x261   :  { %v5227_v48 = vpop.eup %5226 }
 0x262   :  { %v1260_v38 = vmul.f32 %v5227_v48, %v5225_v29  ;;  %v8976_v29 = vld [vmem:[#allocation26_spill] sm:$0xff] }
 0x263   :  { %v8977_v48 = vld [vmem:[#allocation38_spill] sm:$0xff] }
 0x264   :  { %1261 = vst [vmem:[#allocation2] sm:$0x3] %v1260_v38  ;;  %1327 = vmatmul.mubr.f32.vlgmr.msra.gmra.mxu0 %v1260_v38  ;;  %1398 = vmatmul.mubr.f32.vlgmr.msra.gmra.mxu1 %v1260_v38  ;;  %v8978_v38 = vld [vmem:[#allocation27_spill] sm:$0xff] }
 0x265   :  { %1452 = vmatpush1.msra.mxu0 %v6225_v50  ;;  %1523 = vmatpush1.msra.mxu1 %v6508_v52 }
 0x266   :  { %1453 = vmatprep.subr.mxu0 %v6237_v55  ;;  %1524 = vmatprep.subr.mxu1 %v6521_v57 }
 0x267   :  { %1454 = vmatpush1.msra.mxu0 %v6249_v58  ;;  %1525 = vmatpush1.msra.mxu1 %v6535_v53 }
 0x268   :  { %1455 = vmatprep.subr.mxu0 %v6261_v61  ;;  %1526 = vmatprep.subr.mxu1 %v6544_v49 }
 0x269   :  { %1456 = vmatpush1.msra.mxu0 %v6272_v56  ;;  %1527 = vmatpush1.msra.mxu1 %v6551_v60 }
 0x26a   :  { %1457 = vmatprep.subr.mxu0 %v6285_v6  ;;  %1528 = vmatprep.subr.mxu1 %v6559_v62 }
 0x26b   :  { %1458 = vmatpush1.msra.mxu0 %v6297_v8  ;;  %1529 = vmatpush1.msra.mxu1 %v6565_v0 }
 0x26c   :  { %1459 = vmatprep.subr.mxu0 %v6306_v1  ;;  %1530 = vmatprep.subr.mxu1 %v6572_v2 }
 0x26d   :  { %1460 = vmatpush1.msra.mxu0 %v6315_v11  ;;  %1531 = vmatpush1.msra.mxu1 %v6579_v5 }
 0x26e   :  { %1461 = vmatprep.subr.mxu0 %v6324_v13  ;;  %1532 = vmatprep.subr.mxu1 %v6586_v7 }
 0x26f   :  { %1462 = vmatpush1.msra.mxu0 %v6333_v16  ;;  %1533 = vmatpush1.msra.mxu1 %v6593_v9 }
 0x270   :  { %1463 = vmatprep.subr.mxu0 %v6342_v18  ;;  %1534 = vmatprep.subr.mxu1 %v6600_v10 }
 0x271   :  { %1464 = vmatpush1.msra.mxu0 %v6352_v20  ;;  %1535 = vmatpush1.msra.mxu1 %v6607_v12 }
 0x272   :  { %1465 = vmatprep.subr.mxu0 %v6361_v22  ;;  %1536 = vmatprep.subr.mxu1 %v6614_v15 }
 0x273   :  { %1466 = vmatpush1.msra.mxu0 %v6370_v24  ;;  %1537 = vmatpush1.msra.mxu1 %v6621_v17 }
 0x274   :  { %1467 = vmatprep.subr.mxu0 %v6381_v63  ;;  %1538 = vmatprep.subr.mxu1 %v6628_v19 }
 0x275   :  { %1468 = vmatpush1.msra.mxu0 %v6393_v26  ;;  %1539 = vmatpush1.msra.mxu1 %v6635_v21 }
 0x276   :  { %1469 = vmatprep.subr.mxu0 %v6402_v28  ;;  %1540 = vmatprep.subr.mxu1 %v6642_v23 }
 0x277   :  { %1470 = vmatpush1.msra.mxu0 %v6411_v30  ;;  %1541 = vmatpush1.msra.mxu1 %v6649_v25 }
 0x278   :  { %1471 = vmatprep.subr.mxu0 %v6422_v32  ;;  %1542 = vmatprep.subr.mxu1 %v6656_v4 }
 0x279   :  { %1472 = vmatpush1.msra.mxu0 %v8964_v40  ;;  %1543 = vmatpush1.msra.mxu1 %v8965_v47 }
 0x27a   :  { %1473 = vmatprep.subr.mxu0 %v8966_v34  ;;  %1544 = vmatprep.subr.mxu1 %v8967_v42 }
 0x27b   :  { %1474 = vmatpush1.msra.mxu0 %v8968_v59  ;;  %1545 = vmatpush1.msra.mxu1 %v8969_v39 }
 0x27c   :  { %1475 = vmatprep.subr.mxu0 %v8970_v46  ;;  %1546 = vmatprep.subr.mxu1 %v8971_v54 }
 0x27d   :  { %1476 = vmatpush1.msra.mxu0 %v8972_v44  ;;  %1547 = vmatpush1.msra.mxu1 %v8973_v14  ;;  %v8983_v44 = vld [vmem:[#allocation41_spill] sm:$0xff]  ;;  %v8984_v14 = vld [vmem:[#allocation31_spill] sm:$0xff] }
 0x27e   :  { %1477 = vmatprep.subr.mxu0 %v8974_v37  ;;  %1548 = vmatprep.subr.mxu1 %v8975_v45  ;;  %v8985_v37 = vmov 0.0   ;;  %v8986_v45 = vld [vmem:[#allocation42_spill] sm:$0xff] }
 0x27f   :  { %1478 = vmatpush1.msra.mxu0 %v8976_v29  ;;  %1549 = vmatpush1.msra.mxu1 %v8977_v48 }
 0x280   :  { %1479 = vmatprep.subr.mxu0 %v8978_v38  ;;  %1550 = vmatprep.subr.mxu1 %v8979_v51  ;;  %v6902_v51 = vld [vmem:[%s8709_s5 + $0x1e8] sm:$0xff] }
 0x281   :  { %1480 = vmatpush1.msra.mxu0 %v8980_v35  ;;  %1551 = vmatpush1.msra.mxu1 %v8981_v41  ;;  %8987 = vst [vmem:[#allocation20_spill] sm:$0xff] %v6902_v51  ;;  %v8988_v41 = vld [vmem:[#allocation28_spill] sm:$0xff] }
 0x282   :  { %1481 = vmatprep.subr.mxu0 %v8982_v33  ;;  %1552 = vmatprep.subr.mxu1 %v8983_v44 }
 0x283   :  { %1482 = vmatpush1.msra.mxu0 %v8984_v14  ;;  %1515 = vmatprep.mubr.f32.mxu0 %v8985_v37 }
 0x284   :  { %1553 = vmatpush1.msra.mxu1 %v8986_v45  ;;  %1586 = vmatprep.mubr.f32.mxu1 %v8985_v37 }
 0x285   :  { %1640 = vmatprep.subr.mxu0 %v6902_v51  ;;  %1711 = vmatprep.subr.mxu1 %v8988_v41 }
 0x324   :  { %v1328_v33 = vpop.f32.mrf.mxu0  ;;  %v1399_v38 = vpop.f32.mrf.mxu1 }
 0x325   :  { %v1408_v35 = vrot.slane %v1328_v33, 6  ;;  %v1410_v51 = vrot.slane %v1399_v38, 6 }
 0x326   :  { %v1330_v44 = vpop.f32.mrf.mxu0  ;;  %v1401_v54 = vpop.f32.mrf.mxu1 }
 0x327   :  { %v1416_v14 = vadd.f32 %v1408_v35, %v6816_v27  ;;  %v1409_v48 = vrot.slane %v1330_v44, 6  ;;  %v1411_v46 = vrot.slane %v1401_v54, 6  ;;  %v1418_v33 = vadd.f32 %v1410_v51, %v6826_v3 }
 0x329   :  { %v5001_v29 = vmul.f32 -1.442695, %v1416_v14  ;;  %v1417_v45 = vadd.f32 %v1409_v48, %v6818_v36  ;;  %v1419_v39 = vadd.f32 %v1411_v46, %v6828_v43 }
 0x32b   :  { %5228 = vpow2.f32 %v5001_v29  ;;  %v5002_v37 = vmul.f32 -1.442695, %v1417_v45  ;;  %v5003_v59 = vmul.f32 -1.442695, %v1419_v39 }
 0x32d   :  { %5230 = vpow2.f32 %v5002_v37  ;;  %v1440_v37 = vrot.slane %v6832_v31, 6  ;;  %v9009_v31 = vld [vmem:[#allocation42_spill] sm:$0xff] }
 0x32e   :  { %5232 = vpow2.f32 %v5003_v59  ;;  %v9011_v59 = vld [vmem:[#allocation28_spill] sm:$0xff] }
 0x338   :  { %v5229_v41 = vpop.eup %5228 }
 0x339   :  { %v1423_v42 = vadd.f32 1.0, %v5229_v41 }
 0x33a   :  { %v5231_v34 = vpop.eup %5230 }
 0x33b   :  { %5234 = vrcp.f32 %v1423_v42  ;;  %v1429_v35 = vadd.f32 1.0, %v5231_v34  ;;  %v5233_v44 = vpop.eup %5232 }
 0x33c   :  { %5236 = vtanh.f32 %v1418_v33  ;;  %v1436_v29 = vadd.f32 1.0, %v5233_v44 }
 0x33d   :  { %5238 = vrcp.f32 %v1429_v35 }
 0x33e   :  { %5240 = vrcp.f32 %v1436_v29 }
 0x348   :  { %v5235_v14 = vpop.eup %5234 }
 0x349   :  { %v5237_v45 = vpop.eup %5236 }
 0x34a   :  { %v5239_v54 = vpop.eup %5238  ;;  %v1443_v46 = vmul.f32 %v5237_v45, %v5235_v14 }
 0x34b   :  { %v1442_v48 = vmul.f32 %v5239_v54, %v1440_v37  ;;  %v5241_v51 = vpop.eup %5240 }
 0x34d   :  { %v6911_v39 = vadd.f32 %v1443_v46, %v1442_v48 }
 0x34f   :  { %5242 = vtanh.f32 %v6911_v39 }
 0x35c   :  { %v5243_v41 = vpop.eup %5242 }
 0x35d   :  { %v1446_v42 = vmul.f32 %v5243_v41, %v5241_v51 }
 0x35f   :  { %1447 = vst [vmem:[#allocation2] sm:$0xc] %v1446_v42  ;;  %v1449_v34 = vrot.slane %v1446_v42, 2 }
 0x361   :  { %1516 = vmatmul.mubr.f32.vlgmr.msra.gmra.mxu0 %v1449_v34  ;;  %1587 = vmatmul.mubr.f32.vlgmr.msra.gmra.mxu1 %v1449_v34 }
 0x362   :  { %1641 = vmatpush1.msra.mxu0 %v6225_v50  ;;  %1712 = vmatpush1.msra.mxu1 %v6508_v52  ;;  %v8989_v50 = vld [vmem:[#allocation21_spill] sm:$0xff] }
 0x363   :  { %1642 = vmatprep.subr.mxu0 %v6237_v55  ;;  %1713 = vmatprep.subr.mxu1 %v6521_v57  ;;  %v8990_v55 = vld [vmem:[#allocation33_spill] sm:$0xff] }
 0x364   :  { %1643 = vmatpush1.msra.mxu0 %v6249_v58  ;;  %1714 = vmatpush1.msra.mxu1 %v6535_v53  ;;  %v8991_v58 = vld [vmem:[#allocation22_spill] sm:$0xff] }
 0x365   :  { %1644 = vmatprep.subr.mxu0 %v6261_v61  ;;  %1715 = vmatprep.subr.mxu1 %v6544_v49  ;;  %v8992_v61 = vld [vmem:[#allocation34_spill] sm:$0xff] }
 0x366   :  { %1645 = vmatpush1.msra.mxu0 %v6272_v56  ;;  %1716 = vmatpush1.msra.mxu1 %v6551_v60  ;;  %v8993_v56 = vld [vmem:[#allocation23_spill] sm:$0xff] }
 0x367   :  { %1646 = vmatprep.subr.mxu0 %v6285_v6  ;;  %1717 = vmatprep.subr.mxu1 %v6559_v62  ;;  %v8994_v6 = vld [vmem:[#allocation35_spill] sm:$0xff] }
 0x368   :  { %1647 = vmatpush1.msra.mxu0 %v6297_v8  ;;  %1718 = vmatpush1.msra.mxu1 %v6565_v0  ;;  %v8995_v8 = vld [vmem:[#allocation24_spill] sm:$0xff] }
 0x369   :  { %1648 = vmatprep.subr.mxu0 %v6306_v1  ;;  %1719 = vmatprep.subr.mxu1 %v6572_v2  ;;  %v8996_v1 = vld [vmem:[#allocation36_spill] sm:$0xff] }
 0x36a   :  { %1649 = vmatpush1.msra.mxu0 %v6315_v11  ;;  %1720 = vmatpush1.msra.mxu1 %v6579_v5  ;;  %v8997_v11 = vld [vmem:[#allocation25_spill] sm:$0xff] }
 0x36b   :  { %1650 = vmatprep.subr.mxu0 %v6324_v13  ;;  %1721 = vmatprep.subr.mxu1 %v6586_v7  ;;  %v8998_v13 = vld [vmem:[#allocation37_spill] sm:$0xff] }
 0x36c   :  { %1651 = vmatpush1.msra.mxu0 %v6333_v16  ;;  %1722 = vmatpush1.msra.mxu1 %v6593_v9  ;;  %v8999_v16 = vld [vmem:[#allocation26_spill] sm:$0xff] }
 0x36d   :  { %1652 = vmatprep.subr.mxu0 %v6342_v18  ;;  %1723 = vmatprep.subr.mxu1 %v6600_v10  ;;  %v9000_v18 = vld [vmem:[#allocation38_spill] sm:$0xff] }
 0x36e   :  { %1653 = vmatpush1.msra.mxu0 %v6352_v20  ;;  %1724 = vmatpush1.msra.mxu1 %v6607_v12  ;;  %v9001_v20 = vld [vmem:[#allocation27_spill] sm:$0xff] }
 0x36f   :  { %1654 = vmatprep.subr.mxu0 %v6361_v22  ;;  %1725 = vmatprep.subr.mxu1 %v6614_v15  ;;  %v9002_v22 = vld [vmem:[#allocation39_spill] sm:$0xff] }
 0x370   :  { %1655 = vmatpush1.msra.mxu0 %v6370_v24  ;;  %1726 = vmatpush1.msra.mxu1 %v6621_v17  ;;  %v9003_v24 = vld [vmem:[#allocation29_spill] sm:$0xff] }
 0x371   :  { %1656 = vmatprep.subr.mxu0 %v6381_v63  ;;  %1727 = vmatprep.subr.mxu1 %v6628_v19  ;;  %v9004_v63 = vld [vmem:[#allocation40_spill] sm:$0xff] }
 0x372   :  { %1657 = vmatpush1.msra.mxu0 %v6393_v26  ;;  %1728 = vmatpush1.msra.mxu1 %v6635_v21  ;;  %v9005_v26 = vld [vmem:[#allocation30_spill] sm:$0xff] }
 0x373   :  { %1658 = vmatprep.subr.mxu0 %v6402_v28  ;;  %1729 = vmatprep.subr.mxu1 %v6642_v23  ;;  %v9006_v28 = vld [vmem:[#allocation41_spill] sm:$0xff] }
 0x374   :  { %1659 = vmatpush1.msra.mxu0 %v6411_v30  ;;  %1730 = vmatpush1.msra.mxu1 %v6649_v25  ;;  %v9007_v30 = vld [vmem:[#allocation31_spill] sm:$0xff] }
 0x375   :  { %1660 = vmatprep.subr.mxu0 %v6422_v32  ;;  %1731 = vmatprep.subr.mxu1 %v6656_v4  ;;  %v9008_v32 = vmov 0.0  }
 0x376   :  { %1661 = vmatpush1.msra.mxu0 %v8964_v40  ;;  %1732 = vmatpush1.msra.mxu1 %v8965_v47  ;;  %v9010_v40 = vld [vmem:[#allocation20_spill] sm:$0xff] }
 0x377   :  { %1662 = vmatprep.subr.mxu0 %v8989_v50  ;;  %1733 = vmatprep.subr.mxu1 %v8990_v55 }
 0x378   :  { %1663 = vmatpush1.msra.mxu0 %v8991_v58  ;;  %1734 = vmatpush1.msra.mxu1 %v8992_v61 }
 0x379   :  { %1664 = vmatprep.subr.mxu0 %v8993_v56  ;;  %1735 = vmatprep.subr.mxu1 %v8994_v6 }
 0x37a   :  { %1665 = vmatpush1.msra.mxu0 %v8995_v8  ;;  %1736 = vmatpush1.msra.mxu1 %v8996_v1 }
 0x37b   :  { %1666 = vmatprep.subr.mxu0 %v8997_v11  ;;  %1737 = vmatprep.subr.mxu1 %v8998_v13 }
 0x37c   :  { %1667 = vmatpush1.msra.mxu0 %v8999_v16  ;;  %1738 = vmatpush1.msra.mxu1 %v9000_v18 }
 0x37d   :  { %1668 = vmatprep.subr.mxu0 %v9001_v20  ;;  %1739 = vmatprep.subr.mxu1 %v9002_v22 }
 0x37e   :  { %1669 = vmatpush1.msra.mxu0 %v9003_v24  ;;  %1740 = vmatpush1.msra.mxu1 %v9004_v63 }
 0x37f   :  { %1670 = vmatprep.subr.mxu0 %v9005_v26  ;;  %1741 = vmatprep.subr.mxu1 %v9006_v28 }
 0x380   :  { %1671 = vmatpush1.msra.mxu0 %v9007_v30  ;;  %1704 = vmatprep.mubr.f32.mxu0 %v9008_v32 }
 0x381   :  { %1742 = vmatpush1.msra.mxu1 %v9009_v31  ;;  %1775 = vmatprep.mubr.f32.mxu1 %v9008_v32 }
 0x382   :  { %1829 = vmatprep.subr.mxu0 %v9010_v40  ;;  %1900 = vmatprep.subr.mxu1 %v9011_v59 }
 0x421   :  { %v1517_v38 = vpop.f32.mrf.mxu0  ;;  %v1588_v14 = vpop.f32.mrf.mxu1 }
 0x422   :  { %v1597_v33 = vrot.slane %v1517_v38, 4  ;;  %v1599_v41 = vrot.slane %v1588_v14, 4 }
 0x423   :  { %v1519_v35 = vpop.f32.mrf.mxu0  ;;  %v1590_v46 = vpop.f32.mrf.mxu1 }
 0x424   :  { %v1605_v44 = vadd.f32 %v1597_v33, %v6816_v27  ;;  %v1598_v45 = vrot.slane %v1519_v35, 4  ;;  %v1600_v48 = vrot.slane %v1590_v46, 4  ;;  %v1607_v50 = vadd.f32 %v1599_v41, %v6826_v3  ;;  %v6998_v41 = vld [vmem:[%s8709_s5 + $0x1c8] sm:$0xff] }
 0x425   :  { %v1629_v35 = vrot.slane %v6911_v39, 6  ;;  %v6991_v39 = vld [vmem:[%s8709_s5 + $0x1e0] sm:$0xff] }
 0x426   :  { %v5004_v37 = vmul.f32 -1.442695, %v1605_v44  ;;  %v1606_v54 = vadd.f32 %v1598_v45, %v6818_v36  ;;  %v1608_v51 = vadd.f32 %v1600_v48, %v6828_v43 }
 0x428   :  { %5244 = vpow2.f32 %v5004_v37  ;;  %v5005_v29 = vmul.f32 -1.442695, %v1606_v54  ;;  %v5006_v42 = vmul.f32 -1.442695, %v1608_v51 }
 0x42a   :  { %5246 = vpow2.f32 %v5005_v29 }
 0x42b   :  { %5248 = vpow2.f32 %v5006_v42  ;;  %v7005_v42 = vld [vmem:[%s8709_s5 + $0x1c0] sm:$0xff] }
 0x435   :  { %v5245_v34 = vpop.eup %5244 }
 0x436   :  { %v1612_v58 = vadd.f32 1.0, %v5245_v34 }
 0x437   :  { %v5247_v56 = vpop.eup %5246 }
 0x438   :  { %5250 = vrcp.f32 %v1612_v58  ;;  %v1618_v8 = vadd.f32 1.0, %v5247_v56  ;;  %v5249_v59 = vpop.eup %5248 }
 0x439   :  { %5252 = vtanh.f32 %v1607_v50  ;;  %v1625_v45 = vadd.f32 1.0, %v5249_v59 }
 0x43a   :  { %5254 = vrcp.f32 %v1618_v8 }
 0x43b   :  { %5256 = vrcp.f32 %v1625_v45 }
 0x445   :  { %v5251_v38 = vpop.eup %5250 }
 0x446   :  { %v5253_v33 = vpop.eup %5252 }
 0x447   :  { %v5255_v44 = vpop.eup %5254  ;;  %v1632_v37 = vmul.f32 %v5253_v33, %v5251_v38 }
 0x448   :  { %v1631_v14 = vmul.f32 %v5255_v44, %v1629_v35  ;;  %v5257_v29 = vpop.eup %5256 }
 0x44a   :  { %v6985_v54 = vadd.f32 %v1632_v37, %v1631_v14 }
 0x44c   :  { %5258 = vtanh.f32 %v6985_v54  ;;  %v1818_v38 = vrot.slane %v6985_v54, 6  ;;  %v7196_v54 = vld [vmem:[%s8709_s5 + $0x1f0] sm:$0xff] }
 0x459   :  { %v5259_v46 = vpop.eup %5258 }
 0x45a   :  { %v1635_v48 = vmul.f32 %v5259_v46, %v5257_v29  ;;  %v7203_v46 = vld [vmem:[%s8709_s5 + $0x1d8] sm:$0xff] }
 0x45c   :  { %1636 = vst [vmem:[#allocation2] sm:$0x30] %v1635_v48  ;;  %v1638_v51 = vrot.slane %v1635_v48, 4  ;;  %v7210_v48 = vld [vmem:[%s8709_s5 + $0x1d0] sm:$0xff] }
 0x45e   :  { %1705 = vmatmul.mubr.f32.vlgmr.msra.gmra.mxu0 %v1638_v51  ;;  %1776 = vmatmul.mubr.f32.vlgmr.msra.gmra.mxu1 %v1638_v51  ;;  %v7217_v51 = vld [vmem:[%s8709_s5 + $0x1b8] sm:$0xff] }
 0x45f   :  { %1830 = vmatpush1.msra.mxu0 %v6991_v39  ;;  %1901 = vmatpush1.msra.mxu1 %v6508_v52  ;;  %v7012_v52 = vld [vmem:[%s8709_s5 + $0x1a8] sm:$0xff] }
 0x460   :  { %1831 = vmatprep.subr.mxu0 %v6998_v41  ;;  %1902 = vmatprep.subr.mxu1 %v6521_v57  ;;  %v7019_v57 = vld [vmem:[%s8709_s5 + $0x1a0] sm:$0xff] }
 0x461   :  { %1832 = vmatpush1.msra.mxu0 %v7005_v42  ;;  %1903 = vmatpush1.msra.mxu1 %v6535_v53  ;;  %v7026_v53 = vld [vmem:[%s8709_s5 + $0x188] sm:$0xff] }
 0x462   :  { %1833 = vmatprep.subr.mxu0 %v7012_v52  ;;  %1904 = vmatprep.subr.mxu1 %v6544_v49  ;;  %v7033_v49 = vld [vmem:[%s8709_s5 + $0x180] sm:$0xff] }
 0x463   :  { %1834 = vmatpush1.msra.mxu0 %v7019_v57  ;;  %1905 = vmatpush1.msra.mxu1 %v6551_v60  ;;  %v7040_v60 = vld [vmem:[%s8709_s5 + $0x168] sm:$0xff] }
 0x464   :  { %1835 = vmatprep.subr.mxu0 %v7026_v53  ;;  %1906 = vmatprep.subr.mxu1 %v6559_v62  ;;  %v7047_v62 = vld [vmem:[%s8709_s5 + $0x160] sm:$0xff] }
 0x465   :  { %1836 = vmatpush1.msra.mxu0 %v7033_v49  ;;  %1907 = vmatpush1.msra.mxu1 %v6565_v0  ;;  %v7054_v0 = vld [vmem:[%s8709_s5 + $0x148] sm:$0xff] }
 0x466   :  { %1837 = vmatprep.subr.mxu0 %v7040_v60  ;;  %1908 = vmatprep.subr.mxu1 %v6572_v2  ;;  %v7061_v2 = vld [vmem:[%s8709_s5 + $0x140] sm:$0xff] }
 0x467   :  { %1838 = vmatpush1.msra.mxu0 %v7047_v62  ;;  %1909 = vmatpush1.msra.mxu1 %v6579_v5  ;;  %v7068_v5 = vld [vmem:[%s8709_s5 + $0x128] sm:$0xff] }
 0x468   :  { %1839 = vmatprep.subr.mxu0 %v7054_v0  ;;  %1910 = vmatprep.subr.mxu1 %v6586_v7  ;;  %v7075_v7 = vld [vmem:[%s8709_s5 + $0x120] sm:$0xff] }
 0x469   :  { %1840 = vmatpush1.msra.mxu0 %v7061_v2  ;;  %1911 = vmatpush1.msra.mxu1 %v6593_v9  ;;  %v7082_v9 = vld [vmem:[%s8709_s5 + $0x108] sm:$0xff] }
 0x46a   :  { %1841 = vmatprep.subr.mxu0 %v7068_v5  ;;  %1912 = vmatprep.subr.mxu1 %v6600_v10  ;;  %v7089_v10 = vld [vmem:[%s8709_s5 + $0x100] sm:$0xff] }
 0x46b   :  { %1842 = vmatpush1.msra.mxu0 %v7075_v7  ;;  %1913 = vmatpush1.msra.mxu1 %v6607_v12  ;;  %v7096_v12 = vld [vmem:[%s8709_s5 + $0xe8] sm:$0xff] }
 0x46c   :  { %1843 = vmatprep.subr.mxu0 %v7082_v9  ;;  %1914 = vmatprep.subr.mxu1 %v6614_v15  ;;  %v7103_v15 = vld [vmem:[%s8709_s5 + $0xe0] sm:$0xff] }
 0x46d   :  { %1844 = vmatpush1.msra.mxu0 %v7089_v10  ;;  %1915 = vmatpush1.msra.mxu1 %v6621_v17  ;;  %v7110_v17 = vld [vmem:[%s8709_s5 + $0xc8] sm:$0xff] }
 0x46e   :  { %1845 = vmatprep.subr.mxu0 %v7096_v12  ;;  %1916 = vmatprep.subr.mxu1 %v6628_v19  ;;  %v7117_v19 = vld [vmem:[%s8709_s5 + $0xc0] sm:$0xff] }
 0x46f   :  { %1846 = vmatpush1.msra.mxu0 %v7103_v15  ;;  %1917 = vmatpush1.msra.mxu1 %v6635_v21  ;;  %v7124_v21 = vld [vmem:[%s8709_s5 + $0xa8] sm:$0xff] }
 0x470   :  { %1847 = vmatprep.subr.mxu0 %v7110_v17  ;;  %1918 = vmatprep.subr.mxu1 %v6642_v23  ;;  %v7131_v23 = vld [vmem:[%s8709_s5 + $0xa0] sm:$0xff] }
 0x471   :  { %1848 = vmatpush1.msra.mxu0 %v7117_v19  ;;  %1919 = vmatpush1.msra.mxu1 %v6649_v25  ;;  %v7138_v25 = vld [vmem:[%s8709_s5 + $0x88] sm:$0xff] }
 0x472   :  { %1849 = vmatprep.subr.mxu0 %v7124_v21  ;;  %1920 = vmatprep.subr.mxu1 %v6656_v4  ;;  %9012 = vst [vmem:[#allocation32_spill] sm:$0xff] %v7138_v25  ;;  %v7145_v4 = vld [vmem:[%s8709_s5 + $0x80] sm:$0xff] }
 0x473   :  { %1850 = vmatpush1.msra.mxu0 %v7131_v23  ;;  %1921 = vmatpush1.msra.mxu1 %v8965_v47  ;;  %9013 = vst [vmem:[#allocation21_spill] sm:$0xff] %v7145_v4  ;;  %v7152_v47 = vld [vmem:[%s8709_s5 + $0x68] sm:$0xff] }
 0x474   :  { %1851 = vmatprep.subr.mxu0 %v7138_v25  ;;  %1922 = vmatprep.subr.mxu1 %v8990_v55  ;;  %9014 = vst [vmem:[#allocation33_spill] sm:$0xff] %v7152_v47  ;;  %v7159_v55 = vld [vmem:[%s8709_s5 + $0x60] sm:$0xff] }
 0x475   :  { %1852 = vmatpush1.msra.mxu0 %v7145_v4  ;;  %1923 = vmatpush1.msra.mxu1 %v8992_v61  ;;  %9015 = vst [vmem:[#allocation22_spill] sm:$0xff] %v7159_v55  ;;  %v7181_v61 = vld [vmem:[%s8709_s5 + $0x1f8] sm:$0xff] }
 0x476   :  { %1853 = vmatprep.subr.mxu0 %v7152_v47  ;;  %1924 = vmatprep.subr.mxu1 %v8994_v6  ;;  %9016 = vst [vmem:[#allocation34_spill] sm:$0xff] %v7181_v61 }
 0x477   :  { %1854 = vmatpush1.msra.mxu0 %v7159_v55  ;;  %1925 = vmatpush1.msra.mxu1 %v8996_v1 }
 0x478   :  { %1855 = vmatprep.subr.mxu0 %v8997_v11  ;;  %1926 = vmatprep.subr.mxu1 %v8998_v13 }
 0x479   :  { %1856 = vmatpush1.msra.mxu0 %v8999_v16  ;;  %1927 = vmatpush1.msra.mxu1 %v9000_v18 }
 0x47a   :  { %1857 = vmatprep.subr.mxu0 %v9001_v20  ;;  %1928 = vmatprep.subr.mxu1 %v9002_v22 }
 0x47b   :  { %1858 = vmatpush1.msra.mxu0 %v9003_v24  ;;  %1929 = vmatpush1.msra.mxu1 %v9004_v63 }
 0x47c   :  { %1859 = vmatprep.subr.mxu0 %v9005_v26  ;;  %1930 = vmatprep.subr.mxu1 %v9006_v28 }
 0x47d   :  { %1860 = vmatpush1.msra.mxu0 %v9007_v30  ;;  %1893 = vmatprep.mubr.f32.mxu0 %v9008_v32 }
 0x47e   :  { %1931 = vmatpush1.msra.mxu1 %v9009_v31  ;;  %1964 = vmatprep.mubr.f32.mxu1 %v9008_v32 }
 0x47f   :  { %2003 = vmatprep.subr.mxu0 %v9010_v40  ;;  %2074 = vmatprep.subr.mxu1 %v7181_v61 }
 0x51e   :  { %v1706_v6 = vpop.f32.mrf.mxu0  ;;  %v1777_v16 = vpop.f32.mrf.mxu1 }
 0x51f   :  { %v1786_v1 = vrot.slane %v1706_v6, 2  ;;  %v1788_v30 = vrot.slane %v1777_v16, 2  ;;  %v7224_v6 = vld [vmem:[%s8709_s5 + $0x1b0] sm:$0xff] }
 0x520   :  { %v1708_v11 = vpop.f32.mrf.mxu0  ;;  %v1779_v63 = vpop.f32.mrf.mxu1  ;;  %v7252_v16 = vld [vmem:[%s8709_s5 + $0x170] sm:$0xff] }
 0x521   :  { %v1794_v13 = vadd.f32 %v1786_v1, %v6816_v27  ;;  %v1787_v18 = vrot.slane %v1708_v11, 2  ;;  %v1789_v26 = vrot.slane %v1779_v63, 2  ;;  %v1796_v50 = vadd.f32 %v1788_v30, %v6826_v3  ;;  %v7231_v1 = vld [vmem:[%s8709_s5 + $0x198] sm:$0xff]  ;;  %v7238_v11 = vld [vmem:[%s8709_s5 + $0x190] sm:$0xff] }
 0x522   :  { %v7287_v63 = vld [vmem:[%s8709_s5 + $0x118] sm:$0xff]  ;;  %v7308_v30 = vld [vmem:[%s8709_s5 + $0xf0] sm:$0xff] }
 0x523   :  { %v5007_v20 = vmul.f32 -1.442695, %v1794_v13  ;;  %v1795_v22 = vadd.f32 %v1787_v18, %v6818_v36  ;;  %v1797_v28 = vadd.f32 %v1789_v26, %v6828_v43  ;;  %v7245_v13 = vld [vmem:[%s8709_s5 + $0x178] sm:$0xff]  ;;  %v7294_v26 = vld [vmem:[%s8709_s5 + $0x110] sm:$0xff] }
 0x524   :  { %v7259_v18 = vld [vmem:[%s8709_s5 + $0x158] sm:$0xff] }
 0x525   :  { %5260 = vpow2.f32 %v5007_v20  ;;  %v5008_v24 = vmul.f32 -1.442695, %v1795_v22  ;;  %v5009_v31 = vmul.f32 -1.442695, %v1797_v28  ;;  %v7266_v20 = vld [vmem:[%s8709_s5 + $0x150] sm:$0xff]  ;;  %v7273_v22 = vld [vmem:[%s8709_s5 + $0x138] sm:$0xff] }
 0x526   :  { %v7301_v28 = vld [vmem:[%s8709_s5 + $0xf8] sm:$0xff] }
 0x527   :  { %5262 = vpow2.f32 %v5008_v24  ;;  %v7280_v24 = vld [vmem:[%s8709_s5 + $0x130] sm:$0xff] }
 0x528   :  { %5264 = vpow2.f32 %v5009_v31  ;;  %v7315_v31 = vld [vmem:[%s8709_s5 + $0xd8] sm:$0xff] }
 0x532   :  { %v5261_v34 = vpop.eup %5260 }
 0x533   :  { %v1801_v58 = vadd.f32 1.0, %v5261_v34  ;;  %v7322_v34 = vld [vmem:[%s8709_s5 + $0xd0] sm:$0xff] }
 0x534   :  { %v5263_v56 = vpop.eup %5262 }
 0x535   :  { %5266 = vrcp.f32 %v1801_v58  ;;  %v1807_v27 = vadd.f32 1.0, %v5263_v56  ;;  %v5265_v36 = vpop.eup %5264  ;;  %v7336_v58 = vld [vmem:[%s8709_s5 + $0xb0] sm:$0xff]  ;;  %v7343_v56 = vld [vmem:[%s8709_s5 + $0x98] sm:$0xff] }
 0x536   :  { %5268 = vtanh.f32 %v1796_v50  ;;  %v1814_v35 = vadd.f32 1.0, %v5265_v36  ;;  %v7329_v50 = vld [vmem:[%s8709_s5 + $0xb8] sm:$0xff]  ;;  %9017 = vst [vmem:[#allocation23_spill] sm:$0xff] %v7343_v56 }
 0x537   :  { %5270 = vrcp.f32 %v1807_v27  ;;  %v7350_v27 = vld [vmem:[%s8709_s5 + $0x90] sm:$0xff]  ;;  %v7357_v36 = vld [vmem:[%s8709_s5 + $0x78] sm:$0xff] }
 0x538   :  { %5272 = vrcp.f32 %v1814_v35  ;;  %9018 = vst [vmem:[#allocation35_spill] sm:$0xff] %v7350_v27  ;;  %9019 = vst [vmem:[#allocation24_spill] sm:$0xff] %v7357_v36  ;;  %v7388_v35 = vld [vmem:[%s8709_s5 + $0x50] sm:$0xff] }
 0x539   :  { %9024 = vst [vmem:[#allocation38_spill] sm:$0xff] %v7388_v35 }
 0x542   :  { %v5267_v8 = vpop.eup %5266 }
 0x543   :  { %v5269_v59 = vpop.eup %5268 }
 0x544   :  { %v5271_v33 = vpop.eup %5270  ;;  %v1821_v43 = vmul.f32 %v5269_v59, %v5267_v8  ;;  %v7364_v8 = vld [vmem:[%s8709_s5 + $0x70] sm:$0xff]  ;;  %v7370_v59 = vld [vmem:[%s8709_s5 + $0x48] sm:$0xff] }
 0x545   :  { %v1820_v44 = vmul.f32 %v5271_v33, %v1818_v38  ;;  %v5273_v3 = vpop.eup %5272  ;;  %9020 = vst [vmem:[#allocation36_spill] sm:$0xff] %v7364_v8  ;;  %9021 = vst [vmem:[#allocation25_spill] sm:$0xff] %v7370_v59  ;;  %v7376_v38 = vld [vmem:[%s8709_s5 + $0x58] sm:$0xff]  ;;  %v7382_v33 = vld [vmem:[%s8709_s5 + $0x40] sm:$0xff] }
 0x546   :  { %9022 = vst [vmem:[#allocation37_spill] sm:$0xff] %v7376_v38  ;;  %9023 = vst [vmem:[#allocation26_spill] sm:$0xff] %v7382_v33 }
 0x547   :  { %v7189_v45 = vadd.f32 %v1821_v43, %v1820_v44  ;;  %v7394_v43 = vld [vmem:[%s8709_s5 + $0x28] sm:$0xff]  ;;  %v7400_v44 = vld [vmem:[%s8709_s5 + $0x38] sm:$0xff] }
 0x548   :  { %9025 = vst [vmem:[#allocation27_spill] sm:$0xff] %v7394_v43  ;;  %9026 = vst [vmem:[#allocation39_spill] sm:$0xff] %v7400_v44 }
 0x549   :  { %5274 = vtanh.f32 %v7189_v45 }
 0x556   :  { %v5275_v37 = vpop.eup %5274 }
 0x557   :  { %v1824_v14 = vmul.f32 %v5275_v37, %v5273_v3  ;;  %v7406_v3 = vld [vmem:[%s8709_s5 + $0x20] sm:$0xff]  ;;  %v7412_v37 = vld [vmem:[%s8709_s5 + $0x30] sm:$0xff] }
 0x558   :  { %9027 = vst [vmem:[#allocation29_spill] sm:$0xff] %v7406_v3  ;;  %9028 = vst [vmem:[#allocation40_spill] sm:$0xff] %v7412_v37 }
 0x559   :  { %1825 = vst [vmem:[#allocation2] sm:$0xc0] %v1824_v14  ;;  %v1827_v29 = vrot.slane %v1824_v14, 6  ;;  %v7418_v14 = vld [vmem:[%s8709_s5 + $0x8] sm:$0xff] }
 0x55a   :  { %9029 = vst [vmem:[#allocation30_spill] sm:$0xff] %v7418_v14 }
 0x55b   :  { %1894 = vmatmul.mubr.f32.vlgmr.msra.gmra.mxu0 %v1827_v29  ;;  %1965 = vmatmul.mubr.f32.vlgmr.msra.gmra.mxu1 %v1827_v29  ;;  %v7424_v29 = vld [vmem:[%s8709_s5 + $0x18] sm:$0xff] }
 0x55c   :  { %2004 = vmatpush1.msra.mxu0 %v6991_v39  ;;  %2075 = vmatpush1.msra.mxu1 %v7196_v54  ;;  %9030 = vst [vmem:[#allocation41_spill] sm:$0xff] %v7424_v29 }
 0x55d   :  { %2005 = vmatprep.subr.mxu0 %v6998_v41  ;;  %2076 = vmatprep.subr.mxu1 %v7203_v46 }
 0x55e   :  { %2006 = vmatpush1.msra.mxu0 %v7005_v42  ;;  %2077 = vmatpush1.msra.mxu1 %v7210_v48 }
 0x55f   :  { %2007 = vmatprep.subr.mxu0 %v7012_v52  ;;  %2078 = vmatprep.subr.mxu1 %v7217_v51 }
 0x560   :  { %2008 = vmatpush1.msra.mxu0 %v7019_v57  ;;  %2079 = vmatpush1.msra.mxu1 %v7224_v6 }
 0x561   :  { %2009 = vmatprep.subr.mxu0 %v7026_v53  ;;  %2080 = vmatprep.subr.mxu1 %v7231_v1 }
 0x562   :  { %2010 = vmatpush1.msra.mxu0 %v7033_v49  ;;  %2081 = vmatpush1.msra.mxu1 %v7238_v11 }
 0x563   :  { %2011 = vmatprep.subr.mxu0 %v7040_v60  ;;  %2082 = vmatprep.subr.mxu1 %v7245_v13 }
 0x564   :  { %2012 = vmatpush1.msra.mxu0 %v7047_v62  ;;  %2083 = vmatpush1.msra.mxu1 %v7252_v16 }
 0x565   :  { %2013 = vmatprep.subr.mxu0 %v7054_v0  ;;  %2084 = vmatprep.subr.mxu1 %v7259_v18 }
 0x566   :  { %2014 = vmatpush1.msra.mxu0 %v7061_v2  ;;  %2085 = vmatpush1.msra.mxu1 %v7266_v20 }
 0x567   :  { %2015 = vmatprep.subr.mxu0 %v7068_v5  ;;  %2086 = vmatprep.subr.mxu1 %v7273_v22 }
 0x568   :  { %2016 = vmatpush1.msra.mxu0 %v7075_v7  ;;  %2087 = vmatpush1.msra.mxu1 %v7280_v24 }
 0x569   :  { %2017 = vmatprep.subr.mxu0 %v7082_v9  ;;  %2088 = vmatprep.subr.mxu1 %v7287_v63 }
 0x56a   :  { %2018 = vmatpush1.msra.mxu0 %v7089_v10  ;;  %2089 = vmatpush1.msra.mxu1 %v7294_v26 }
 0x56b   :  { %2019 = vmatprep.subr.mxu0 %v7096_v12  ;;  %2090 = vmatprep.subr.mxu1 %v7301_v28 }
 0x56c   :  { %2020 = vmatpush1.msra.mxu0 %v7103_v15  ;;  %2091 = vmatpush1.msra.mxu1 %v7308_v30 }
 0x56d   :  { %2021 = vmatprep.subr.mxu0 %v7110_v17  ;;  %2092 = vmatprep.subr.mxu1 %v7315_v31 }
 0x56e   :  { %2022 = vmatpush1.msra.mxu0 %v7117_v19  ;;  %2093 = vmatpush1.msra.mxu1 %v7322_v34 }
 0x56f   :  { %2023 = vmatprep.subr.mxu0 %v7124_v21  ;;  %2094 = vmatprep.subr.mxu1 %v7329_v50 }
 0x570   :  { %2024 = vmatpush1.msra.mxu0 %v7131_v23  ;;  %2095 = vmatpush1.msra.mxu1 %v7336_v58 }
 0x571   :  { %2025 = vmatprep.subr.mxu0 %v7138_v25  ;;  %2096 = vmatprep.subr.mxu1 %v7343_v56 }
 0x572   :  { %2026 = vmatpush1.msra.mxu0 %v7145_v4  ;;  %2097 = vmatpush1.msra.mxu1 %v7350_v27 }
 0x573   :  { %2027 = vmatprep.subr.mxu0 %v7152_v47  ;;  %2098 = vmatprep.subr.mxu1 %v7357_v36  ;;  %v9036_v47 = vld [vmem:[#allocation49_spill] sm:$0xff] }
 0x574   :  { %2028 = vmatpush1.msra.mxu0 %v7159_v55  ;;  %2099 = vmatpush1.msra.mxu1 %v7364_v8  ;;  %v9035_v55 = vld [vmem:[#allocation50_spill] sm:$0xff] }
 0x575   :  { %2029 = vmatprep.subr.mxu0 %v7370_v59  ;;  %2100 = vmatprep.subr.mxu1 %v7376_v38 }
 0x576   :  { %2030 = vmatpush1.msra.mxu0 %v7382_v33  ;;  %2101 = vmatpush1.msra.mxu1 %v7388_v35  ;;  %v9034_v35 = vld [vmem:[#allocation48_spill] sm:$0xff] }
 0x577   :  { %2031 = vmatprep.subr.mxu0 %v7394_v43  ;;  %2102 = vmatprep.subr.mxu1 %v7400_v44 }
 0x578   :  { %2032 = vmatpush1.msra.mxu0 %v7406_v3  ;;  %2103 = vmatpush1.msra.mxu1 %v7412_v37  ;;  %v7430_v3 = vld [vmem:[%s8709_s5] sm:$0xff] }
 0x579   :  { %2033 = vmatprep.subr.mxu0 %v7418_v14  ;;  %2104 = vmatprep.subr.mxu1 %v7424_v29  ;;  %9031 = vst [vmem:[#allocation31_spill] sm:$0xff] %v7430_v3  ;;  %v7437_v14 = vld [vmem:[%s8709_s5 + $0x10] sm:$0xff]  ;;  %v9033_v37 = vld [vmem:[#allocation47_spill] sm:$0xff] }
 0x57a   :  { %2034 = vmatpush1.msra.mxu0 %v7430_v3  ;;  %2067 = vmatprep.mubr.f32.mxu0 %v9008_v32  ;;  %9032 = vst [vmem:[#allocation42_spill] sm:$0xff] %v7437_v14 }
 0x57b   :  { %2105 = vmatpush1.msra.mxu1 %v7437_v14  ;;  %2138 = vmatprep.mubr.f32.mxu1 %v9008_v32 }
 0x57c   :  { %2192 = vmatprep.subr.mxu0 %v9010_v40  ;;  %2263 = vmatprep.subr.mxu1 %v7181_v61 }
 0x61b   :  { %v1895_v29 = vpop.f32.mrf.mxu0  ;;  %v1966_v38 = vpop.f32.mrf.mxu1 }
 0x61c   :  { %v1971_v44 = vadd.f32 %v1895_v29, %v9033_v37  ;;  %v1973_v40 = vadd.f32 %v1966_v38, %v9036_v47  ;;  %v9040_v38 = vld [vmem:[#allocation22_spill] sm:$0xff] }
 0x61d   :  { %v1897_v43 = vpop.f32.mrf.mxu0  ;;  %v1968_v8 = vpop.f32.mrf.mxu1 }
 0x61e   :  { %v5010_v3 = vmul.f32 -1.442695, %v1971_v44  ;;  %v1972_v33 = vadd.f32 %v1897_v43, %v9034_v35  ;;  %v1974_v14 = vadd.f32 %v1968_v8, %v9035_v55 }
 0x620   :  { %5276 = vpow2.f32 %v5010_v3  ;;  %v5011_v59 = vmul.f32 -1.442695, %v1972_v33  ;;  %v5012_v36 = vmul.f32 -1.442695, %v1974_v14  ;;  %v1995_v33 = vrot.slane %v7189_v45, 6  ;;  %v9039_v45 = vld [vmem:[#allocation24_spill] sm:$0xff] }
 0x622   :  { %5278 = vpow2.f32 %v5011_v59 }
 0x623   :  { %5280 = vpow2.f32 %v5012_v36 }
 0x62d   :  { %v5277_v32 = vpop.eup %5276 }
 0x62e   :  { %v1978_v27 = vadd.f32 1.0, %v5277_v32 }
 0x62f   :  { %v5279_v61 = vpop.eup %5278 }
 0x630   :  { %5282 = vrcp.f32 %v1978_v27  ;;  %v1984_v29 = vadd.f32 1.0, %v5279_v61  ;;  %v5281_v44 = vpop.eup %5280  ;;  %v9038_v61 = vld [vmem:[#allocation33_spill] sm:$0xff] }
 0x631   :  { %5284 = vtanh.f32 %v1973_v40  ;;  %v1991_v35 = vadd.f32 1.0, %v5281_v44  ;;  %v9037_v40 = vld [vmem:[#allocation35_spill] sm:$0xff]  ;;  %v9044_v44 = vld [vmem:[#allocation26_spill] sm:$0xff] }
 0x632   :  { %5286 = vrcp.f32 %v1984_v29  ;;  %v9043_v29 = vld [vmem:[#allocation37_spill] sm:$0xff] }
 0x633   :  { %5288 = vrcp.f32 %v1991_v35  ;;  %v9041_v35 = vld [vmem:[#allocation36_spill] sm:$0xff] }
 0x63d   :  { %v5283_v43 = vpop.eup %5282 }
 0x63e   :  { %v5285_v3 = vpop.eup %5284 }
 0x63f   :  { %v5287_v59 = vpop.eup %5286  ;;  %v1998_v37 = vmul.f32 %v5285_v3, %v5283_v43  ;;  %v9045_v43 = vld [vmem:[#allocation38_spill] sm:$0xff]  ;;  %v9046_v3 = vld [vmem:[#allocation27_spill] sm:$0xff] }
 0x640   :  { %v1997_v8 = vmul.f32 %v5287_v59, %v1995_v33  ;;  %v5289_v32 = vpop.eup %5288  ;;  %v9047_v33 = vld [vmem:[#allocation39_spill] sm:$0xff]  ;;  %v9048_v59 = vld [vmem:[#allocation29_spill] sm:$0xff] }
 0x642   :  { %v7448_v14 = vadd.f32 %v1998_v37, %v1997_v8  ;;  %v9042_v37 = vld [vmem:[#allocation25_spill] sm:$0xff]  ;;  %v9049_v8 = vld [vmem:[#allocation40_spill] sm:$0xff] }
 0x644   :  { %5290 = vtanh.f32 %v7448_v14 }
 0x651   :  { %v5291_v36 = vpop.eup %5290 }
 0x652   :  { %v2001_v27 = vmul.f32 %v5291_v36, %v5289_v32  ;;  %v9050_v32 = vld [vmem:[#allocation30_spill] sm:$0xff]  ;;  %v9051_v36 = vld [vmem:[#allocation41_spill] sm:$0xff] }
 0x654   :  { %2002 = vst [vmem:[#allocation2 + $0x8] sm:$0x3] %v2001_v27  ;;  %2068 = vmatmul.mubr.f32.vlgmr.msra.gmra.mxu0 %v2001_v27  ;;  %2139 = vmatmul.mubr.f32.vlgmr.msra.gmra.mxu1 %v2001_v27  ;;  %v9052_v27 = vld [vmem:[#allocation31_spill] sm:$0xff] }
 0x655   :  { %2193 = vmatpush1.msra.mxu0 %v6991_v39  ;;  %2264 = vmatpush1.msra.mxu1 %v7196_v54 }
 0x656   :  { %2194 = vmatprep.subr.mxu0 %v6998_v41  ;;  %2265 = vmatprep.subr.mxu1 %v7203_v46 }
 0x657   :  { %2195 = vmatpush1.msra.mxu0 %v7005_v42  ;;  %2266 = vmatpush1.msra.mxu1 %v7210_v48 }
 0x658   :  { %2196 = vmatprep.subr.mxu0 %v7012_v52  ;;  %2267 = vmatprep.subr.mxu1 %v7217_v51 }
 0x659   :  { %2197 = vmatpush1.msra.mxu0 %v7019_v57  ;;  %2268 = vmatpush1.msra.mxu1 %v7224_v6 }
 0x65a   :  { %2198 = vmatprep.subr.mxu0 %v7026_v53  ;;  %2269 = vmatprep.subr.mxu1 %v7231_v1 }
 0x65b   :  { %2199 = vmatpush1.msra.mxu0 %v7033_v49  ;;  %2270 = vmatpush1.msra.mxu1 %v7238_v11 }
 0x65c   :  { %2200 = vmatprep.subr.mxu0 %v7040_v60  ;;  %2271 = vmatprep.subr.mxu1 %v7245_v13 }
 0x65d   :  { %2201 = vmatpush1.msra.mxu0 %v7047_v62  ;;  %2272 = vmatpush1.msra.mxu1 %v7252_v16 }
 0x65e   :  { %2202 = vmatprep.subr.mxu0 %v7054_v0  ;;  %2273 = vmatprep.subr.mxu1 %v7259_v18 }
 0x65f   :  { %2203 = vmatpush1.msra.mxu0 %v7061_v2  ;;  %2274 = vmatpush1.msra.mxu1 %v7266_v20 }
 0x660   :  { %2204 = vmatprep.subr.mxu0 %v7068_v5  ;;  %2275 = vmatprep.subr.mxu1 %v7273_v22 }
 0x661   :  { %2205 = vmatpush1.msra.mxu0 %v7075_v7  ;;  %2276 = vmatpush1.msra.mxu1 %v7280_v24 }
 0x662   :  { %2206 = vmatprep.subr.mxu0 %v7082_v9  ;;  %2277 = vmatprep.subr.mxu1 %v7287_v63 }
 0x663   :  { %2207 = vmatpush1.msra.mxu0 %v7089_v10  ;;  %2278 = vmatpush1.msra.mxu1 %v7294_v26 }
 0x664   :  { %2208 = vmatprep.subr.mxu0 %v7096_v12  ;;  %2279 = vmatprep.subr.mxu1 %v7301_v28 }
 0x665   :  { %2209 = vmatpush1.msra.mxu0 %v7103_v15  ;;  %2280 = vmatpush1.msra.mxu1 %v7308_v30 }
 0x666   :  { %2210 = vmatprep.subr.mxu0 %v7110_v17  ;;  %2281 = vmatprep.subr.mxu1 %v7315_v31 }
 0x667   :  { %2211 = vmatpush1.msra.mxu0 %v7117_v19  ;;  %2282 = vmatpush1.msra.mxu1 %v7322_v34 }
 0x668   :  { %2212 = vmatprep.subr.mxu0 %v7124_v21  ;;  %2283 = vmatprep.subr.mxu1 %v7329_v50 }
 0x669   :  { %2213 = vmatpush1.msra.mxu0 %v7131_v23  ;;  %2284 = vmatpush1.msra.mxu1 %v7336_v58 }
 0x66a   :  { %2214 = vmatprep.subr.mxu0 %v7138_v25  ;;  %2285 = vmatprep.subr.mxu1 %v7343_v56 }
 0x66b   :  { %2215 = vmatpush1.msra.mxu0 %v7145_v4  ;;  %2286 = vmatpush1.msra.mxu1 %v9037_v40 }
 0x66c   :  { %2216 = vmatprep.subr.mxu0 %v9038_v61  ;;  %2287 = vmatprep.subr.mxu1 %v9039_v45  ;;  %v9058_v45 = vld [vmem:[#allocation48_spill] sm:$0xff] }
 0x66d   :  { %2217 = vmatpush1.msra.mxu0 %v9040_v38  ;;  %2288 = vmatpush1.msra.mxu1 %v9041_v35 }
 0x66e   :  { %2218 = vmatprep.subr.mxu0 %v9042_v37  ;;  %2289 = vmatprep.subr.mxu1 %v9043_v29  ;;  %v9053_v37 = vmov 0.0   ;;  %v9054_v29 = vld [vmem:[#allocation42_spill] sm:$0xff] }
 0x66f   :  { %2219 = vmatpush1.msra.mxu0 %v9044_v44  ;;  %2290 = vmatpush1.msra.mxu1 %v9045_v43  ;;  %v9055_v43 = vld [vmem:[#allocation20_spill] sm:$0xff] }
 0x670   :  { %2220 = vmatprep.subr.mxu0 %v9046_v3  ;;  %2291 = vmatprep.subr.mxu1 %v9047_v33  ;;  %v9056_v3 = vld [vmem:[#allocation34_spill] sm:$0xff] }
 0x671   :  { %2221 = vmatpush1.msra.mxu0 %v9048_v59  ;;  %2292 = vmatpush1.msra.mxu1 %v9049_v8  ;;  %v9057_v8 = vld [vmem:[#allocation47_spill] sm:$0xff] }
 0x672   :  { %2222 = vmatprep.subr.mxu0 %v9050_v32  ;;  %2293 = vmatprep.subr.mxu1 %v9051_v36 }
 0x673   :  { %2223 = vmatpush1.msra.mxu0 %v9052_v27  ;;  %2256 = vmatprep.mubr.f32.mxu0 %v9053_v37 }
 0x674   :  { %2294 = vmatpush1.msra.mxu1 %v9054_v29  ;;  %2327 = vmatprep.mubr.f32.mxu1 %v9053_v37 }
 0x675   :  { %2381 = vmatprep.subr.mxu0 %v9055_v43  ;;  %2452 = vmatprep.subr.mxu1 %v9056_v3 }
 0x714   :  { %v2069_v33 = vpop.f32.mrf.mxu0  ;;  %v2140_v32 = vpop.f32.mrf.mxu1 }
 0x715   :  { %v2149_v59 = vrot.slane %v2069_v33, 6  ;;  %v2151_v43 = vrot.slane %v2140_v32, 6 }
 0x716   :  { %v2071_v44 = vpop.f32.mrf.mxu0  ;;  %v2142_v40 = vpop.f32.mrf.mxu1 }
 0x717   :  { %v2157_v35 = vadd.f32 %v2149_v59, %v9057_v8  ;;  %v2150_v38 = vrot.slane %v2071_v44, 6  ;;  %v2152_v29 = vrot.slane %v2142_v40, 6  ;;  %v2159_v33 = vadd.f32 %v2151_v43, %v9036_v47 }
 0x719   :  { %v5013_v36 = vmul.f32 -1.442695, %v2157_v35  ;;  %v2158_v27 = vadd.f32 %v2150_v38, %v9058_v45  ;;  %v2160_v37 = vadd.f32 %v2152_v29, %v9035_v55 }
 0x71b   :  { %5292 = vpow2.f32 %v5013_v36  ;;  %v5014_v61 = vmul.f32 -1.442695, %v2158_v27  ;;  %v5015_v4 = vmul.f32 -1.442695, %v2160_v37 }
 0x71d   :  { %5294 = vpow2.f32 %v5014_v61  ;;  %v2181_v61 = vrot.slane %v7448_v14, 6 }
 0x71e   :  { %5296 = vpow2.f32 %v5015_v4 }
 0x728   :  { %v5293_v3 = vpop.eup %5292 }
 0x729   :  { %v2164_v56 = vadd.f32 1.0, %v5293_v3 }
 0x72a   :  { %v5295_v25 = vpop.eup %5294 }
 0x72b   :  { %5298 = vrcp.f32 %v2164_v56  ;;  %v2170_v44 = vadd.f32 1.0, %v5295_v25  ;;  %v5297_v38 = vpop.eup %5296 }
 0x72c   :  { %5300 = vtanh.f32 %v2159_v33  ;;  %v2177_v36 = vadd.f32 1.0, %v5297_v38 }
 0x72d   :  { %5302 = vrcp.f32 %v2170_v44 }
 0x72e   :  { %5304 = vrcp.f32 %v2177_v36 }
 0x738   :  { %v5299_v35 = vpop.eup %5298 }
 0x739   :  { %v5301_v59 = vpop.eup %5300 }
 0x73a   :  { %v5303_v40 = vpop.eup %5302  ;;  %v2184_v29 = vmul.f32 %v5301_v59, %v5299_v35 }
 0x73b   :  { %v2183_v32 = vmul.f32 %v5303_v40, %v2181_v61  ;;  %v5305_v27 = vpop.eup %5304 }
 0x73d   :  { %v7522_v37 = vadd.f32 %v2184_v29, %v2183_v32 }
 0x73f   :  { %5306 = vtanh.f32 %v7522_v37  ;;  %v2370_v33 = vrot.slane %v7522_v37, 6  ;;  %v7609_v37 = vld [vmem:[#allocation6 + $0x1d8] sm:$0xff] }
 0x74c   :  { %v5307_v4 = vpop.eup %5306 }
 0x74d   :  { %v2187_v56 = vmul.f32 %v5307_v4, %v5305_v27  ;;  %v7603_v27 = vld [vmem:[#allocation6 + $0x1e0] sm:$0xff]  ;;  %v7605_v4 = vld [vmem:[#allocation6 + $0x1f0] sm:$0xff] }
 0x74f   :  { %2188 = vst [vmem:[#allocation2 + $0x8] sm:$0xc] %v2187_v56  ;;  %v2190_v25 = vrot.slane %v2187_v56, 2  ;;  %v7607_v56 = vld [vmem:[#allocation6 + $0x1c8] sm:$0xff] }
 0x751   :  { %2257 = vmatmul.mubr.f32.vlgmr.msra.gmra.mxu0 %v2190_v25  ;;  %2328 = vmatmul.mubr.f32.vlgmr.msra.gmra.mxu1 %v2190_v25  ;;  %v7611_v25 = vld [vmem:[#allocation6 + $0x1c0] sm:$0xff] }
 0x752   :  { %2382 = vmatpush1.msra.mxu0 %v6991_v39  ;;  %2453 = vmatpush1.msra.mxu1 %v7196_v54  ;;  %v9059_v39 = vld [vmem:[#allocation32_spill] sm:$0xff]  ;;  %v7589_v54 = vld [vmem:[#allocation6 + $0x1e8] sm:$0xff] }
 0x753   :  { %2383 = vmatprep.subr.mxu0 %v6998_v41  ;;  %2454 = vmatprep.subr.mxu1 %v7203_v46  ;;  %v9060_v41 = vld [vmem:[#allocation23_spill] sm:$0xff]  ;;  %9080 = vst [vmem:[#allocation28_spill] sm:$0xff] %v7589_v54  ;;  %v7591_v46 = vld [vmem:[#allocation6 + $0x1f8] sm:$0xff] }
 0x754   :  { %2384 = vmatpush1.msra.mxu0 %v7005_v42  ;;  %2455 = vmatpush1.msra.mxu1 %v7210_v48  ;;  %v9061_v42 = vld [vmem:[#allocation21_spill] sm:$0xff]  ;;  %9081 = vst [vmem:[#allocation20_spill] sm:$0xff] %v7591_v46 }
 0x755   :  { %2385 = vmatprep.subr.mxu0 %v7012_v52  ;;  %2456 = vmatprep.subr.mxu1 %v7217_v51  ;;  %v9062_v52 = vld [vmem:[#allocation35_spill] sm:$0xff] }
 0x756   :  { %2386 = vmatpush1.msra.mxu0 %v7019_v57  ;;  %2457 = vmatpush1.msra.mxu1 %v7224_v6  ;;  %v9063_v57 = vld [vmem:[#allocation33_spill] sm:$0xff] }
 0x757   :  { %2387 = vmatprep.subr.mxu0 %v7026_v53  ;;  %2458 = vmatprep.subr.mxu1 %v7231_v1  ;;  %v9064_v53 = vld [vmem:[#allocation24_spill] sm:$0xff] }
 0x758   :  { %2388 = vmatpush1.msra.mxu0 %v7033_v49  ;;  %2459 = vmatpush1.msra.mxu1 %v7238_v11  ;;  %v9065_v49 = vld [vmem:[#allocation22_spill] sm:$0xff] }
 0x759   :  { %2389 = vmatprep.subr.mxu0 %v7040_v60  ;;  %2460 = vmatprep.subr.mxu1 %v7245_v13  ;;  %v9066_v60 = vld [vmem:[#allocation36_spill] sm:$0xff] }
 0x75a   :  { %2390 = vmatpush1.msra.mxu0 %v7047_v62  ;;  %2461 = vmatpush1.msra.mxu1 %v7252_v16  ;;  %v9067_v62 = vld [vmem:[#allocation25_spill] sm:$0xff] }
 0x75b   :  { %2391 = vmatprep.subr.mxu0 %v7054_v0  ;;  %2462 = vmatprep.subr.mxu1 %v7259_v18  ;;  %v9068_v0 = vld [vmem:[#allocation37_spill] sm:$0xff] }
 0x75c   :  { %2392 = vmatpush1.msra.mxu0 %v7061_v2  ;;  %2463 = vmatpush1.msra.mxu1 %v7266_v20  ;;  %v9069_v2 = vld [vmem:[#allocation26_spill] sm:$0xff] }
 0x75d   :  { %2393 = vmatprep.subr.mxu0 %v7068_v5  ;;  %2464 = vmatprep.subr.mxu1 %v7273_v22  ;;  %v9070_v5 = vld [vmem:[#allocation38_spill] sm:$0xff] }
 0x75e   :  { %2394 = vmatpush1.msra.mxu0 %v7075_v7  ;;  %2465 = vmatpush1.msra.mxu1 %v7280_v24  ;;  %v9071_v7 = vld [vmem:[#allocation27_spill] sm:$0xff] }
 0x75f   :  { %2395 = vmatprep.subr.mxu0 %v7082_v9  ;;  %2466 = vmatprep.subr.mxu1 %v7287_v63  ;;  %v9072_v9 = vld [vmem:[#allocation39_spill] sm:$0xff] }
 0x760   :  { %2396 = vmatpush1.msra.mxu0 %v7089_v10  ;;  %2467 = vmatpush1.msra.mxu1 %v7294_v26  ;;  %v9073_v10 = vld [vmem:[#allocation29_spill] sm:$0xff] }
 0x761   :  { %2397 = vmatprep.subr.mxu0 %v7096_v12  ;;  %2468 = vmatprep.subr.mxu1 %v7301_v28  ;;  %v9074_v12 = vld [vmem:[#allocation40_spill] sm:$0xff] }
 0x762   :  { %2398 = vmatpush1.msra.mxu0 %v7103_v15  ;;  %2469 = vmatpush1.msra.mxu1 %v7308_v30  ;;  %v9075_v15 = vld [vmem:[#allocation30_spill] sm:$0xff] }
 0x763   :  { %2399 = vmatprep.subr.mxu0 %v7110_v17  ;;  %2470 = vmatprep.subr.mxu1 %v7315_v31  ;;  %v9076_v17 = vld [vmem:[#allocation41_spill] sm:$0xff] }
 0x764   :  { %2400 = vmatpush1.msra.mxu0 %v7117_v19  ;;  %2471 = vmatpush1.msra.mxu1 %v7322_v34  ;;  %v9077_v19 = vld [vmem:[#allocation31_spill] sm:$0xff] }
 0x765   :  { %2401 = vmatprep.subr.mxu0 %v7124_v21  ;;  %2472 = vmatprep.subr.mxu1 %v7329_v50  ;;  %v9078_v21 = vld [vmem:[#allocation42_spill] sm:$0xff] }
 0x766   :  { %2402 = vmatpush1.msra.mxu0 %v7131_v23  ;;  %2473 = vmatpush1.msra.mxu1 %v7336_v58  ;;  %v9079_v23 = vmov 0.0  }
 0x767   :  { %2403 = vmatprep.subr.mxu0 %v9059_v39  ;;  %2474 = vmatprep.subr.mxu1 %v9060_v41  ;;  %v7613_v39 = vld [vmem:[#allocation6 + $0x1d0] sm:$0xff]  ;;  %v7617_v41 = vld [vmem:[#allocation6 + $0x1a8] sm:$0xff] }
 0x768   :  { %2404 = vmatpush1.msra.mxu0 %v9061_v42  ;;  %2475 = vmatpush1.msra.mxu1 %v9062_v52  ;;  %v7619_v42 = vld [vmem:[#allocation6 + $0x1b8] sm:$0xff]  ;;  %v7623_v52 = vld [vmem:[#allocation6 + $0x1a0] sm:$0xff] }
 0x769   :  { %2405 = vmatprep.subr.mxu0 %v9063_v57  ;;  %2476 = vmatprep.subr.mxu1 %v9064_v53  ;;  %v7625_v57 = vld [vmem:[#allocation6 + $0x1b0] sm:$0xff]  ;;  %v7629_v53 = vld [vmem:[#allocation6 + $0x188] sm:$0xff] }
 0x76a   :  { %2406 = vmatpush1.msra.mxu0 %v9065_v49  ;;  %2477 = vmatpush1.msra.mxu1 %v9066_v60  ;;  %v7631_v49 = vld [vmem:[#allocation6 + $0x198] sm:$0xff]  ;;  %v7635_v60 = vld [vmem:[#allocation6 + $0x180] sm:$0xff] }
 0x76b   :  { %2407 = vmatprep.subr.mxu0 %v9067_v62  ;;  %2478 = vmatprep.subr.mxu1 %v9068_v0  ;;  %v7637_v62 = vld [vmem:[#allocation6 + $0x190] sm:$0xff]  ;;  %v7641_v0 = vld [vmem:[#allocation6 + $0x168] sm:$0xff] }
 0x76c   :  { %2408 = vmatpush1.msra.mxu0 %v9069_v2  ;;  %2479 = vmatpush1.msra.mxu1 %v9070_v5  ;;  %v7643_v2 = vld [vmem:[#allocation6 + $0x178] sm:$0xff]  ;;  %v7647_v5 = vld [vmem:[#allocation6 + $0x160] sm:$0xff] }
 0x76d   :  { %2409 = vmatprep.subr.mxu0 %v9071_v7  ;;  %2480 = vmatprep.subr.mxu1 %v9072_v9  ;;  %v7649_v7 = vld [vmem:[#allocation6 + $0x170] sm:$0xff]  ;;  %v7653_v9 = vld [vmem:[#allocation6 + $0x148] sm:$0xff] }
 0x76e   :  { %2410 = vmatpush1.msra.mxu0 %v9073_v10  ;;  %2481 = vmatpush1.msra.mxu1 %v9074_v12  ;;  %v7655_v10 = vld [vmem:[#allocation6 + $0x158] sm:$0xff]  ;;  %v7659_v12 = vld [vmem:[#allocation6 + $0x140] sm:$0xff] }
 0x76f   :  { %2411 = vmatprep.subr.mxu0 %v9075_v15  ;;  %2482 = vmatprep.subr.mxu1 %v9076_v17  ;;  %v7661_v15 = vld [vmem:[#allocation6 + $0x150] sm:$0xff]  ;;  %v7665_v17 = vld [vmem:[#allocation6 + $0x128] sm:$0xff] }
 0x770   :  { %2412 = vmatpush1.msra.mxu0 %v9077_v19  ;;  %2483 = vmatpush1.msra.mxu1 %v9078_v21  ;;  %v7667_v19 = vld [vmem:[#allocation6 + $0x138] sm:$0xff]  ;;  %v7671_v21 = vld [vmem:[#allocation6 + $0x120] sm:$0xff] }
 0x771   :  { %2445 = vmatprep.mubr.f32.mxu0 %v9079_v23  ;;  %2516 = vmatprep.mubr.f32.mxu1 %v9079_v23 }
 0x772   :  { %2567 = vmatprep.subr.mxu0 %v7589_v54  ;;  %2638 = vmatprep.subr.mxu1 %v7591_v46 }
 0x811   :  { %v2258_v48 = vpop.f32.mrf.mxu0  ;;  %v2329_v11 = vpop.f32.mrf.mxu1 }
 0x812   :  { %v2338_v51 = vrot.slane %v2258_v48, 4  ;;  %v2340_v26 = vrot.slane %v2329_v11, 4  ;;  %v7673_v48 = vld [vmem:[#allocation6 + $0x130] sm:$0xff] }
 0x813   :  { %v2260_v6 = vpop.f32.mrf.mxu0  ;;  %v2331_v22 = vpop.f32.mrf.mxu1  ;;  %v7685_v11 = vld [vmem:[#allocation6 + $0x110] sm:$0xff] }
 0x814   :  { %v2346_v1 = vadd.f32 %v2338_v51, %v9057_v8  ;;  %v2339_v13 = vrot.slane %v2260_v6, 4  ;;  %v2341_v24 = vrot.slane %v2331_v22, 4  ;;  %v2348_v31 = vadd.f32 %v2340_v26, %v9036_v47  ;;  %v7677_v51 = vld [vmem:[#allocation6 + $0x108] sm:$0xff]  ;;  %v7679_v6 = vld [vmem:[#allocation6 + $0x118] sm:$0xff]  ;;  %v7709_v26 = vld [vmem:[#allocation6 + $0xd0] sm:$0xff] }
 0x815   :  { %v7701_v22 = vld [vmem:[#allocation6 + $0xc8] sm:$0xff]  ;;  %v7769_v47 = vld [vmem:[#allocation6 + $0x30] sm:$0xff]  ;;  %v7779_v8 = vld [vmem:[#allocation6] sm:$0xff] }
 0x816   :  { %v5016_v16 = vmul.f32 -1.442695, %v2346_v1  ;;  %v2347_v18 = vadd.f32 %v2339_v13, %v9058_v45  ;;  %v2349_v63 = vadd.f32 %v2341_v24, %v9035_v55  ;;  %v7683_v1 = vld [vmem:[#allocation6 + $0x100] sm:$0xff]  ;;  %v7689_v13 = vld [vmem:[#allocation6 + $0xe8] sm:$0xff]  ;;  %v7703_v24 = vld [vmem:[#allocation6 + $0xd8] sm:$0xff]  ;;  %9099 = vst [vmem:[#allocation30_spill] sm:$0xff] %v7769_v47 }
 0x817   :  { %v7773_v55 = vld [vmem:[#allocation6 + $0x8] sm:$0xff]  ;;  %v7775_v45 = vld [vmem:[#allocation6 + $0x18] sm:$0xff]  ;;  %9102 = vst [vmem:[#allocation42_spill] sm:$0xff] %v7779_v8 }
 0x818   :  { %5308 = vpow2.f32 %v5016_v16  ;;  %v5017_v20 = vmul.f32 -1.442695, %v2347_v18  ;;  %v5018_v28 = vmul.f32 -1.442695, %v2349_v63  ;;  %v7691_v16 = vld [vmem:[#allocation6 + $0xf8] sm:$0xff]  ;;  %v7695_v18 = vld [vmem:[#allocation6 + $0xe0] sm:$0xff] }
 0x819   :  { %v7707_v63 = vld [vmem:[#allocation6 + $0xc0] sm:$0xff]  ;;  %9100 = vst [vmem:[#allocation41_spill] sm:$0xff] %v7773_v55  ;;  %9101 = vst [vmem:[#allocation31_spill] sm:$0xff] %v7775_v45 }
 0x81a   :  { %5310 = vpow2.f32 %v5017_v20  ;;  %v7697_v20 = vld [vmem:[#allocation6 + $0xf0] sm:$0xff] }
 0x81b   :  { %5312 = vpow2.f32 %v5018_v28  ;;  %v7713_v28 = vld [vmem:[#allocation6 + $0xa8] sm:$0xff] }
 0x825   :  { %v5309_v30 = vpop.eup %5308 }
 0x826   :  { %v2353_v34 = vadd.f32 1.0, %v5309_v30  ;;  %v7715_v30 = vld [vmem:[#allocation6 + $0xb8] sm:$0xff] }
 0x827   :  { %v5311_v50 = vpop.eup %5310 }
 0x828   :  { %5314 = vrcp.f32 %v2353_v34  ;;  %v2359_v58 = vadd.f32 1.0, %v5311_v50  ;;  %v5313_v14 = vpop.eup %5312  ;;  %v7721_v34 = vld [vmem:[#allocation6 + $0xb0] sm:$0xff]  ;;  %v7725_v50 = vld [vmem:[#allocation6 + $0x88] sm:$0xff] }
 0x829   :  { %5316 = vtanh.f32 %v2348_v31  ;;  %v2366_v38 = vadd.f32 1.0, %v5313_v14  ;;  %v7719_v31 = vld [vmem:[#allocation6 + $0xa0] sm:$0xff]  ;;  %9084 = vst [vmem:[#allocation23_spill] sm:$0xff] %v7725_v50 }
 0x82a   :  { %5318 = vrcp.f32 %v2359_v58  ;;  %9083 = vst [vmem:[#allocation32_spill] sm:$0xff] %v7719_v31  ;;  %v7727_v58 = vld [vmem:[#allocation6 + $0x98] sm:$0xff]  ;;  %v7731_v14 = vld [vmem:[#allocation6 + $0x80] sm:$0xff] }
 0x82b   :  { %5320 = vrcp.f32 %v2366_v38  ;;  %9085 = vst [vmem:[#allocation21_spill] sm:$0xff] %v7727_v58  ;;  %9086 = vst [vmem:[#allocation35_spill] sm:$0xff] %v7731_v14  ;;  %v7745_v38 = vld [vmem:[#allocation6 + $0x70] sm:$0xff] }
 0x82c   :  { %9091 = vst [vmem:[#allocation25_spill] sm:$0xff] %v7745_v38 }
 0x835   :  { %v5315_v43 = vpop.eup %5314 }
 0x836   :  { %v5317_v3 = vpop.eup %5316 }
 0x837   :  { %v5319_v44 = vpop.eup %5318  ;;  %v2373_v35 = vmul.f32 %v5317_v3, %v5315_v43  ;;  %v7733_v43 = vld [vmem:[#allocation6 + $0x90] sm:$0xff]  ;;  %v7737_v3 = vld [vmem:[#allocation6 + $0x68] sm:$0xff] }
 0x838   :  { %v2372_v59 = vmul.f32 %v5319_v44, %v2370_v33  ;;  %v5321_v40 = vpop.eup %5320  ;;  %9087 = vst [vmem:[#allocation33_spill] sm:$0xff] %v7733_v43  ;;  %9088 = vst [vmem:[#allocation24_spill] sm:$0xff] %v7737_v3  ;;  %v7739_v33 = vld [vmem:[#allocation6 + $0x78] sm:$0xff]  ;;  %v7743_v44 = vld [vmem:[#allocation6 + $0x60] sm:$0xff] }
 0x839   :  { %9089 = vst [vmem:[#allocation22_spill] sm:$0xff] %v7739_v33  ;;  %9090 = vst [vmem:[#allocation36_spill] sm:$0xff] %v7743_v44 }
 0x83a   :  { %v7600_v61 = vadd.f32 %v2373_v35, %v2372_v59  ;;  %v7749_v35 = vld [vmem:[#allocation6 + $0x48] sm:$0xff]  ;;  %v7751_v59 = vld [vmem:[#allocation6 + $0x58] sm:$0xff] }
 0x83b   :  { %9092 = vst [vmem:[#allocation37_spill] sm:$0xff] %v7749_v35  ;;  %9093 = vst [vmem:[#allocation26_spill] sm:$0xff] %v7751_v59 }
 0x83c   :  { %9082 = vst [vmem:[#allocation34_spill] sm:$0xff] %v7600_v61  ;;  %5322 = vtanh.f32 %v7600_v61  ;;  %v7767_v61 = vld [vmem:[#allocation6 + $0x20] sm:$0xff] }
 0x83d   :  { %9098 = vst [vmem:[#allocation40_spill] sm:$0xff] %v7767_v61 }
 0x849   :  { %v5323_v36 = vpop.eup %5322 }
 0x84a   :  { %v2376_v29 = vmul.f32 %v5323_v36, %v5321_v40  ;;  %v7755_v40 = vld [vmem:[#allocation6 + $0x40] sm:$0xff]  ;;  %v7757_v36 = vld [vmem:[#allocation6 + $0x50] sm:$0xff] }
 0x84b   :  { %9094 = vst [vmem:[#allocation38_spill] sm:$0xff] %v7755_v40  ;;  %9095 = vst [vmem:[#allocation27_spill] sm:$0xff] %v7757_v36 }
 0x84c   :  { %2377 = vst [vmem:[#allocation2 + $0x8] sm:$0x30] %v2376_v29  ;;  %v2379_v32 = vrot.slane %v2376_v29, 4  ;;  %v7761_v29 = vld [vmem:[#allocation6 + $0x28] sm:$0xff] }
 0x84d   :  { %9096 = vst [vmem:[#allocation39_spill] sm:$0xff] %v7761_v29 }
 0x84e   :  { %2446 = vmatmul.mubr.f32.vlgmr.msra.gmra.mxu0 %v2379_v32  ;;  %2517 = vmatmul.mubr.f32.vlgmr.msra.gmra.mxu1 %v2379_v32  ;;  %v7763_v32 = vld [vmem:[#allocation6 + $0x38] sm:$0xff] }
 0x84f   :  { %2568 = vmatpush1.msra.mxu0 %v7603_v27  ;;  %2639 = vmatpush1.msra.mxu1 %v7605_v4  ;;  %9097 = vst [vmem:[#allocation29_spill] sm:$0xff] %v7763_v32 }
 0x850   :  { %2569 = vmatprep.subr.mxu0 %v7607_v56  ;;  %2640 = vmatprep.subr.mxu1 %v7609_v37 }
 0x851   :  { %2570 = vmatpush1.msra.mxu0 %v7611_v25  ;;  %2641 = vmatpush1.msra.mxu1 %v7613_v39 }
 0x852   :  { %2571 = vmatprep.subr.mxu0 %v7617_v41  ;;  %2642 = vmatprep.subr.mxu1 %v7619_v42 }
 0x853   :  { %2572 = vmatpush1.msra.mxu0 %v7623_v52  ;;  %2643 = vmatpush1.msra.mxu1 %v7625_v57 }
 0x854   :  { %2573 = vmatprep.subr.mxu0 %v7629_v53  ;;  %2644 = vmatprep.subr.mxu1 %v7631_v49 }
 0x855   :  { %2574 = vmatpush1.msra.mxu0 %v7635_v60  ;;  %2645 = vmatpush1.msra.mxu1 %v7637_v62 }
 0x856   :  { %2575 = vmatprep.subr.mxu0 %v7641_v0  ;;  %2646 = vmatprep.subr.mxu1 %v7643_v2 }
 0x857   :  { %2576 = vmatpush1.msra.mxu0 %v7647_v5  ;;  %2647 = vmatpush1.msra.mxu1 %v7649_v7 }
 0x858   :  { %2577 = vmatprep.subr.mxu0 %v7653_v9  ;;  %2648 = vmatprep.subr.mxu1 %v7655_v10 }
 0x859   :  { %2578 = vmatpush1.msra.mxu0 %v7659_v12  ;;  %2649 = vmatpush1.msra.mxu1 %v7661_v15 }
 0x85a   :  { %2579 = vmatprep.subr.mxu0 %v7665_v17  ;;  %2650 = vmatprep.subr.mxu1 %v7667_v19 }
 0x85b   :  { %2580 = vmatpush1.msra.mxu0 %v7671_v21  ;;  %2651 = vmatpush1.msra.mxu1 %v7673_v48 }
 0x85c   :  { %2581 = vmatprep.subr.mxu0 %v7677_v51  ;;  %2652 = vmatprep.subr.mxu1 %v7679_v6 }
 0x85d   :  { %2582 = vmatpush1.msra.mxu0 %v7683_v1  ;;  %2653 = vmatpush1.msra.mxu1 %v7685_v11 }
 0x85e   :  { %2583 = vmatprep.subr.mxu0 %v7689_v13  ;;  %2654 = vmatprep.subr.mxu1 %v7691_v16 }
 0x85f   :  { %2584 = vmatpush1.msra.mxu0 %v7695_v18  ;;  %2655 = vmatpush1.msra.mxu1 %v7697_v20 }
 0x860   :  { %2585 = vmatprep.subr.mxu0 %v7701_v22  ;;  %2656 = vmatprep.subr.mxu1 %v7703_v24 }
 0x861   :  { %2586 = vmatpush1.msra.mxu0 %v7707_v63  ;;  %2657 = vmatpush1.msra.mxu1 %v7709_v26 }
 0x862   :  { %2587 = vmatprep.subr.mxu0 %v7713_v28  ;;  %2658 = vmatprep.subr.mxu1 %v7715_v30 }
 0x863   :  { %2588 = vmatpush1.msra.mxu0 %v7719_v31  ;;  %2659 = vmatpush1.msra.mxu1 %v7721_v34 }
 0x864   :  { %2589 = vmatprep.subr.mxu0 %v7725_v50  ;;  %2660 = vmatprep.subr.mxu1 %v7727_v58 }
 0x865   :  { %2590 = vmatpush1.msra.mxu0 %v7731_v14  ;;  %2661 = vmatpush1.msra.mxu1 %v7733_v43 }
 0x866   :  { %2591 = vmatprep.subr.mxu0 %v7737_v3  ;;  %2662 = vmatprep.subr.mxu1 %v7739_v33 }
 0x867   :  { %2592 = vmatpush1.msra.mxu0 %v7743_v44  ;;  %2663 = vmatpush1.msra.mxu1 %v7745_v38 }
 0x868   :  { %2593 = vmatprep.subr.mxu0 %v7749_v35  ;;  %2664 = vmatprep.subr.mxu1 %v7751_v59  ;;  %v7783_v59 = vld [vmem:[#allocation6 + $0x10] sm:$0xff] }
 0x869   :  { %2594 = vmatpush1.msra.mxu0 %v7755_v40  ;;  %2665 = vmatpush1.msra.mxu1 %v7757_v36  ;;  %9103 = vst [vmem:[#allocation59_spill] sm:$0xff] %v7783_v59 }
 0x86a   :  { %2595 = vmatprep.subr.mxu0 %v7761_v29  ;;  %2666 = vmatprep.subr.mxu1 %v7763_v32 }
 0x86b   :  { %2596 = vmatpush1.msra.mxu0 %v7767_v61  ;;  %2667 = vmatpush1.msra.mxu1 %v7769_v47 }
 0x86c   :  { %2597 = vmatprep.subr.mxu0 %v7773_v55  ;;  %2668 = vmatprep.subr.mxu1 %v7775_v45 }
 0x86d   :  { %2598 = vmatpush1.msra.mxu0 %v7779_v8  ;;  %2631 = vmatprep.mubr.f32.mxu0 %v9079_v23 }
 0x86e   :  { %2669 = vmatpush1.msra.mxu1 %v7783_v59  ;;  %2702 = vmatprep.mubr.f32.mxu1 %v9079_v23 }
 0x86f   :  { %2632 = vmatmul.mubr.f32.vlgmr.msra.gmra.mxu0 %v9079_v23  ;;  %2703 = vmatmul.mubr.f32.vlgmr.msra.gmra.mxu1 %v9079_v23 }
 0x870   :  { %2755 = vmatprep.subr.mxu0 %v7589_v54  ;;  %2826 = vmatprep.subr.mxu1 %v7591_v46 }
 0x871   :  { %2756 = vmatpush1.msra.mxu0 %v7603_v27  ;;  %2827 = vmatpush1.msra.mxu1 %v7605_v4 }
 0x872   :  { %2757 = vmatprep.subr.mxu0 %v7607_v56  ;;  %2828 = vmatprep.subr.mxu1 %v7609_v37 }
 0x873   :  { %2758 = vmatpush1.msra.mxu0 %v7611_v25  ;;  %2829 = vmatpush1.msra.mxu1 %v7613_v39 }
 0x874   :  { %2759 = vmatprep.subr.mxu0 %v7617_v41  ;;  %2830 = vmatprep.subr.mxu1 %v7619_v42 }
 0x875   :  { %2760 = vmatpush1.msra.mxu0 %v7623_v52  ;;  %2831 = vmatpush1.msra.mxu1 %v7625_v57 }
 0x876   :  { %2761 = vmatprep.subr.mxu0 %v7629_v53  ;;  %2832 = vmatprep.subr.mxu1 %v7631_v49 }
 0x877   :  { %2762 = vmatpush1.msra.mxu0 %v7635_v60  ;;  %2833 = vmatpush1.msra.mxu1 %v7637_v62 }
 0x878   :  { %2763 = vmatprep.subr.mxu0 %v7641_v0  ;;  %2834 = vmatprep.subr.mxu1 %v7643_v2 }
 0x879   :  { %2764 = vmatpush1.msra.mxu0 %v7647_v5  ;;  %2835 = vmatpush1.msra.mxu1 %v7649_v7 }
 0x87a   :  { %2765 = vmatprep.subr.mxu0 %v7653_v9  ;;  %2836 = vmatprep.subr.mxu1 %v7655_v10 }
 0x87b   :  { %2766 = vmatpush1.msra.mxu0 %v7659_v12  ;;  %2837 = vmatpush1.msra.mxu1 %v7661_v15 }
 0x87c   :  { %2767 = vmatprep.subr.mxu0 %v7665_v17  ;;  %2838 = vmatprep.subr.mxu1 %v7667_v19 }
 0x87d   :  { %2768 = vmatpush1.msra.mxu0 %v7671_v21  ;;  %2839 = vmatpush1.msra.mxu1 %v7673_v48 }
 0x87e   :  { %2769 = vmatprep.subr.mxu0 %v7677_v51  ;;  %2840 = vmatprep.subr.mxu1 %v7679_v6 }
 0x87f   :  { %2770 = vmatpush1.msra.mxu0 %v7683_v1  ;;  %2841 = vmatpush1.msra.mxu1 %v7685_v11 }
 0x880   :  { %2771 = vmatprep.subr.mxu0 %v7689_v13  ;;  %2842 = vmatprep.subr.mxu1 %v7691_v16 }
 0x881   :  { %2772 = vmatpush1.msra.mxu0 %v7695_v18  ;;  %2843 = vmatpush1.msra.mxu1 %v7697_v20 }
 0x882   :  { %2773 = vmatprep.subr.mxu0 %v7701_v22  ;;  %2844 = vmatprep.subr.mxu1 %v7703_v24 }
 0x883   :  { %2774 = vmatpush1.msra.mxu0 %v7707_v63  ;;  %2845 = vmatpush1.msra.mxu1 %v7709_v26 }
 0x884   :  { %2775 = vmatprep.subr.mxu0 %v7713_v28  ;;  %2846 = vmatprep.subr.mxu1 %v7715_v30 }
 0x885   :  { %2776 = vmatpush1.msra.mxu0 %v7719_v31  ;;  %2847 = vmatpush1.msra.mxu1 %v7721_v34  ;;  %v9104_v31 = vld [vmem:[#allocation26_spill] sm:$0xff] }
 0x886   :  { %2777 = vmatprep.subr.mxu0 %v7725_v50  ;;  %2848 = vmatprep.subr.mxu1 %v7727_v58 }
 0x887   :  { %2778 = vmatpush1.msra.mxu0 %v7731_v14  ;;  %2849 = vmatpush1.msra.mxu1 %v7733_v43 }
 0x888   :  { %2779 = vmatprep.subr.mxu0 %v7737_v3  ;;  %2850 = vmatprep.subr.mxu1 %v7739_v33  ;;  %v9108_v3 = vld [vmem:[#allocation49_spill] sm:$0xff] }
 0x889   :  { %2780 = vmatpush1.msra.mxu0 %v7743_v44  ;;  %2851 = vmatpush1.msra.mxu1 %v7745_v38 }
 0x88a   :  { %2781 = vmatprep.subr.mxu0 %v7749_v35  ;;  %2852 = vmatprep.subr.mxu1 %v9104_v31  ;;  %v9106_v31 = vld [vmem:[#allocation48_spill] sm:$0xff] }
 0x88b   :  { %2782 = vmatpush1.msra.mxu0 %v7755_v40  ;;  %2853 = vmatpush1.msra.mxu1 %v7757_v36  ;;  %v9105_v36 = vld [vmem:[#allocation47_spill] sm:$0xff] }
 0x88c   :  { %2783 = vmatprep.subr.mxu0 %v7761_v29  ;;  %2854 = vmatprep.subr.mxu1 %v7763_v32 }
 0x88d   :  { %2784 = vmatpush1.msra.mxu0 %v7767_v61  ;;  %2855 = vmatpush1.msra.mxu1 %v7769_v47 }
 0x88e   :  { %2785 = vmatprep.subr.mxu0 %v7773_v55  ;;  %2856 = vmatprep.subr.mxu1 %v7775_v45 }
 0x88f   :  { %2786 = vmatpush1.msra.mxu0 %v7779_v8  ;;  %2819 = vmatprep.mubr.f32.mxu0 %v9079_v23 }
 0x890   :  { %2857 = vmatpush1.msra.mxu1 %v7783_v59  ;;  %2890 = vmatprep.mubr.f32.mxu1 %v9079_v23  ;;  %v9107_v23 = vld [vmem:[#allocation50_spill] sm:$0xff] }
 0x891   :  { %2946 = vmatprep.subr.mxu0 %v7589_v54  ;;  %3017 = vmatprep.subr.mxu1 %v7591_v46 }
 0x90e   :  { %v2447_v32 = vpop.f32.mrf.mxu0  ;;  %v2518_v29 = vpop.f32.mrf.mxu1 }
 0x90f   :  { %v2527_v61 = vrot.slane %v2447_v32, 2  ;;  %v2529_v54 = vrot.slane %v2518_v29, 2 }
 0x910   :  { %v2449_v47 = vpop.f32.mrf.mxu0  ;;  %v2520_v35 = vpop.f32.mrf.mxu1 }
 0x911   :  { %v2535_v55 = vadd.f32 %v2527_v61, %v9105_v36  ;;  %v2528_v40 = vrot.slane %v2449_v47, 2  ;;  %v2530_v59 = vrot.slane %v2520_v35, 2  ;;  %v2537_v32 = vadd.f32 %v2529_v54, %v9108_v3  ;;  %v9114_v3 = vld [vmem:[#allocation34_spill] sm:$0xff] }
 0x913   :  { %v5019_v45 = vmul.f32 -1.442695, %v2535_v55  ;;  %v2536_v8 = vadd.f32 %v2528_v40, %v9106_v31  ;;  %v2538_v44 = vadd.f32 %v2530_v59, %v9107_v23  ;;  %v9113_v59 = vld [vmem:[#allocation56_spill] sm:$0xff] }
 0x915   :  { %5324 = vpow2.f32 %v5019_v45  ;;  %v5020_v38 = vmul.f32 -1.442695, %v2536_v8  ;;  %v5021_v33 = vmul.f32 -1.442695, %v2538_v44  ;;  %v9109_v45 = vld [vmem:[#allocation43_spill] sm:$0xff]  ;;  %v9110_v8 = vld [vmem:[#allocation53_spill] sm:$0xff] }
 0x916   :  { %v7867_v31 = vadd.f32 %v9110_v8, %v9109_v45  ;;  %v9112_v44 = vld [vmem:[#allocation44_spill] sm:$0xff] }
 0x917   :  { %5326 = vpow2.f32 %v5020_v38  ;;  %v7871_v40 = vadd.f32 %v9113_v59, %v9112_v44  ;;  %v9115_v44 = vld [vmem:[#allocation52_spill] sm:$0xff] }
 0x918   :  { %5328 = vpow2.f32 %v5021_v33  ;;  %9111 = vst [vmem:[#allocation47_spill] sm:$0xff] %v7867_v31  ;;  %v2559_v33 = vrot.slane %v9114_v3, 6 }
 0x922   :  { %v5325_v46 = vpop.eup %5324 }
 0x923   :  { %v2542_v43 = vadd.f32 1.0, %v5325_v46 }
 0x924   :  { %v5327_v14 = vpop.eup %5326 }
 0x925   :  { %5330 = vrcp.f32 %v2542_v43  ;;  %v2548_v47 = vadd.f32 1.0, %v5327_v14  ;;  %v5329_v61 = vpop.eup %5328 }
 0x926   :  { %5332 = vtanh.f32 %v2537_v32  ;;  %v2555_v36 = vadd.f32 1.0, %v5329_v61 }
 0x927   :  { %5334 = vrcp.f32 %v2548_v47 }
 0x92f   :  { %v2633_v55 = vpop.f32.mrf.mxu0  ;;  %v2704_v46 = vpop.f32.mrf.mxu1 }
 0x930   :  { %v2713_v38 = vrot.slane %v2633_v55, 2  ;;  %v2715_v3 = vrot.slane %v2704_v46, 2 }
 0x931   :  { %v2635_v23 = vpop.f32.mrf.mxu0  ;;  %v2706_v58 = vpop.f32.mrf.mxu1 }
 0x932   :  { %v5331_v35 = vpop.eup %5330  ;;  %v2721_v54 = vadd.f32 %v2713_v38, %v7867_v31  ;;  %v2714_v43 = vrot.slane %v2635_v23, 2  ;;  %v2716_v38 = vrot.slane %v2706_v58, 2  ;;  %v9116_v23 = vld [vmem:[#allocation58_spill] sm:$0xff]  ;;  %v9118_v31 = vld [vmem:[#allocation57_spill] sm:$0xff] }
 0x933   :  { %v5333_v14 = vpop.eup %5332  ;;  %v7878_v59 = vadd.f32 %v9116_v23, %v9115_v44 }
 0x934   :  { %v5335_v29 = vpop.eup %5334  ;;  %v5022_v32 = vmul.f32 -1.442695, %v2721_v54  ;;  %v2722_v47 = vadd.f32 %v2714_v43, %v7871_v40  ;;  %v2562_v45 = vmul.f32 %v5333_v14, %v5331_v35  ;;  %v9117_v54 = vld [vmem:[#allocation51_spill] sm:$0xff] }
 0x935   :  { %v2561_v55 = vmul.f32 %v5335_v29, %v2559_v33  ;;  %v2724_v61 = vadd.f32 %v2716_v38, %v7878_v59  ;;  %v7883_v43 = vadd.f32 %v9118_v31, %v9117_v54 }
 0x936   :  { %5336 = vpow2.f32 %v5022_v32  ;;  %v5023_v8 = vmul.f32 -1.442695, %v2722_v47 }
 0x937   :  { %v2563_v50 = vadd.f32 %v2562_v45, %v2561_v55  ;;  %5338 = vrcp.f32 %v2555_v36  ;;  %v5024_v35 = vmul.f32 -1.442695, %v2724_v61  ;;  %v2723_v33 = vadd.f32 %v2715_v3, %v7883_v43 }
 0x938   :  { %5340 = vpow2.f32 %v5023_v8 }
 0x939   :  { %5342 = vtanh.f32 %v2563_v50 }
 0x93a   :  { %5344 = vpow2.f32 %v5024_v35 }
 0x943   :  { %v5337_v14 = vpop.eup %5336 }
 0x944   :  { %v5339_v29 = vpop.eup %5338  ;;  %v2728_v36 = vadd.f32 1.0, %v5337_v14 }
 0x945   :  { %v5341_v32 = vpop.eup %5340 }
 0x946   :  { %v5343_v50 = vpop.eup %5342  ;;  %5346 = vrcp.f32 %v2728_v36  ;;  %v2734_v58 = vadd.f32 1.0, %v5341_v32  ;;  %v9120_v36 = vld [vmem:[#allocation23_spill] sm:$0xff]  ;;  %v9121_v32 = vld [vmem:[#allocation21_spill] sm:$0xff] }
 0x947   :  { %v2565_v47 = vmul.f32 %v5343_v50, %v5339_v29  ;;  %5348 = vtanh.f32 %v2723_v33  ;;  %v5345_v46 = vpop.eup %5344  ;;  %v9119_v29 = vld [vmem:[#allocation32_spill] sm:$0xff]  ;;  %v9122_v50 = vld [vmem:[#allocation35_spill] sm:$0xff] }
 0x948   :  { %5350 = vrcp.f32 %v2734_v58  ;;  %v2741_v8 = vadd.f32 1.0, %v5345_v46  ;;  %v9123_v58 = vld [vmem:[#allocation33_spill] sm:$0xff]  ;;  %v9125_v46 = vld [vmem:[#allocation22_spill] sm:$0xff] }
 0x949   :  { %2566 = vst [vmem:[#allocation2 + $0x8] sm:$0xc0] %v2565_v47  ;;  %v9124_v47 = vld [vmem:[#allocation24_spill] sm:$0xff] }
 0x94a   :  { %5352 = vrcp.f32 %v2741_v8  ;;  %v9129_v8 = vld [vmem:[#allocation26_spill] sm:$0xff] }
 0x950   :  { %v2749_v14 = vld [vmem:[#allocation2 + $0xe] sm:$0x3] }
 0x953   :  { %v5347_v45 = vpop.eup %5346 }
 0x954   :  { %v5349_v55 = vpop.eup %5348 }
 0x955   :  { %v5351_v31 = vpop.eup %5350  ;;  %v2745_v44 = vmul.f32 %v5349_v55, %v5347_v45  ;;  %v9126_v45 = vld [vmem:[#allocation36_spill] sm:$0xff]  ;;  %v9127_v55 = vld [vmem:[#allocation25_spill] sm:$0xff] }
 0x956   :  { %v2744_v38 = vmul.f32 0.0, %v5351_v31  ;;  %v9128_v31 = vld [vmem:[#allocation37_spill] sm:$0xff] }
 0x957   :  { %v5353_v61 = vpop.eup %5352 }
 0x958   :  { %v7886_v23 = vadd.f32 %v2745_v44, %v2744_v38  ;;  %v9130_v38 = vld [vmem:[#allocation38_spill] sm:$0xff]  ;;  %v9131_v44 = vld [vmem:[#allocation27_spill] sm:$0xff] }
 0x95a   :  { %5354 = vtanh.f32 %v7886_v23 }
 0x967   :  { %v5355_v3 = vpop.eup %5354 }
 0x968   :  { %v2748_v54 = vmul.f32 %v5355_v3, %v5353_v61  ;;  %v9132_v61 = vld [vmem:[#allocation39_spill] sm:$0xff]  ;;  %v9133_v3 = vld [vmem:[#allocation29_spill] sm:$0xff] }
 0x96a   :  { %v2751_v35 = vrot.slane %v2748_v54, 6  ;;  %v9134_v54 = vld [vmem:[#allocation40_spill] sm:$0xff] }
 0x96c   :  { %v2753_v33 = vadd.f32 %v2751_v35, %v2749_v14  ;;  %2820 = vmatmul.mubr.f32.vlgmr.msra.gmra.mxu0 %v2751_v35  ;;  %2891 = vmatmul.mubr.f32.vlgmr.msra.gmra.mxu1 %v2751_v35  ;;  %v9135_v35 = vld [vmem:[#allocation30_spill] sm:$0xff]  ;;  %v9136_v14 = vld [vmem:[#allocation41_spill] sm:$0xff] }
 0x96d   :  { %2947 = vmatpush1.msra.mxu0 %v7603_v27  ;;  %3018 = vmatpush1.msra.mxu1 %v7605_v4 }
 0x96e   :  { %2754 = vst [vmem:[#allocation2 + $0xe] sm:$0x3] %v2753_v33  ;;  %2948 = vmatprep.subr.mxu0 %v7607_v56  ;;  %3019 = vmatprep.subr.mxu1 %v7609_v37  ;;  %v9137_v33 = vld [vmem:[#allocation31_spill] sm:$0xff] }
 0x96f   :  { %2949 = vmatpush1.msra.mxu0 %v7611_v25  ;;  %3020 = vmatpush1.msra.mxu1 %v7613_v39 }
 0x970   :  { %2950 = vmatprep.subr.mxu0 %v7617_v41  ;;  %3021 = vmatprep.subr.mxu1 %v7619_v42 }
 0x971   :  { %2951 = vmatpush1.msra.mxu0 %v7623_v52  ;;  %3022 = vmatpush1.msra.mxu1 %v7625_v57 }
 0x972   :  { %2952 = vmatprep.subr.mxu0 %v7629_v53  ;;  %3023 = vmatprep.subr.mxu1 %v7631_v49 }
 0x973   :  { %2953 = vmatpush1.msra.mxu0 %v7635_v60  ;;  %3024 = vmatpush1.msra.mxu1 %v7637_v62 }
 0x974   :  { %2954 = vmatprep.subr.mxu0 %v7641_v0  ;;  %3025 = vmatprep.subr.mxu1 %v7643_v2 }
 0x975   :  { %2955 = vmatpush1.msra.mxu0 %v7647_v5  ;;  %3026 = vmatpush1.msra.mxu1 %v7649_v7 }
 0x976   :  { %2956 = vmatprep.subr.mxu0 %v7653_v9  ;;  %3027 = vmatprep.subr.mxu1 %v7655_v10 }
 0x977   :  { %2957 = vmatpush1.msra.mxu0 %v7659_v12  ;;  %3028 = vmatpush1.msra.mxu1 %v7661_v15 }
 0x978   :  { %2958 = vmatprep.subr.mxu0 %v7665_v17  ;;  %3029 = vmatprep.subr.mxu1 %v7667_v19 }
 0x979   :  { %2959 = vmatpush1.msra.mxu0 %v7671_v21  ;;  %3030 = vmatpush1.msra.mxu1 %v7673_v48 }
 0x97a   :  { %2960 = vmatprep.subr.mxu0 %v7677_v51  ;;  %3031 = vmatprep.subr.mxu1 %v7679_v6 }
 0x97b   :  { %2961 = vmatpush1.msra.mxu0 %v7683_v1  ;;  %3032 = vmatpush1.msra.mxu1 %v7685_v11 }
 0x97c   :  { %2962 = vmatprep.subr.mxu0 %v7689_v13  ;;  %3033 = vmatprep.subr.mxu1 %v7691_v16 }
 0x97d   :  { %2963 = vmatpush1.msra.mxu0 %v7695_v18  ;;  %3034 = vmatpush1.msra.mxu1 %v7697_v20 }
 0x97e   :  { %2964 = vmatprep.subr.mxu0 %v7701_v22  ;;  %3035 = vmatprep.subr.mxu1 %v7703_v24 }
 0x97f   :  { %2965 = vmatpush1.msra.mxu0 %v7707_v63  ;;  %3036 = vmatpush1.msra.mxu1 %v7709_v26 }
 0x980   :  { %2966 = vmatprep.subr.mxu0 %v7713_v28  ;;  %3037 = vmatprep.subr.mxu1 %v7715_v30 }
 0x981   :  { %2967 = vmatpush1.msra.mxu0 %v9119_v29  ;;  %3038 = vmatpush1.msra.mxu1 %v7721_v34 }
 0x982   :  { %2968 = vmatprep.subr.mxu0 %v9120_v36  ;;  %3039 = vmatprep.subr.mxu1 %v9121_v32 }
 0x983   :  { %2969 = vmatpush1.msra.mxu0 %v9122_v50  ;;  %3040 = vmatpush1.msra.mxu1 %v9123_v58 }
 0x984   :  { %2970 = vmatprep.subr.mxu0 %v9124_v47  ;;  %3041 = vmatprep.subr.mxu1 %v9125_v46 }
 0x985   :  { %2971 = vmatpush1.msra.mxu0 %v9126_v45  ;;  %3042 = vmatpush1.msra.mxu1 %v9127_v55  ;;  %v9138_v55 = vld [vmem:[#allocation42_spill] sm:$0xff] }
 0x986   :  { %2972 = vmatprep.subr.mxu0 %v9128_v31  ;;  %3043 = vmatprep.subr.mxu1 %v9129_v8  ;;  %v9139_v31 = vmov 0.0   ;;  %v9140_v8 = vld [vmem:[#allocation59_spill] sm:$0xff] }
 0x987   :  { %2973 = vmatpush1.msra.mxu0 %v9130_v38  ;;  %3044 = vmatpush1.msra.mxu1 %v9131_v44  ;;  %v9141_v44 = vld [vmem:[#allocation28_spill] sm:$0xff] }
 0x988   :  { %2974 = vmatprep.subr.mxu0 %v9132_v61  ;;  %3045 = vmatprep.subr.mxu1 %v9133_v3  ;;  %v9142_v61 = vld [vmem:[#allocation20_spill] sm:$0xff] }
 0x989   :  { %2975 = vmatpush1.msra.mxu0 %v9134_v54  ;;  %3046 = vmatpush1.msra.mxu1 %v9135_v35  ;;  %v9143_v35 = vld [vmem:[#allocation47_spill] sm:$0xff] }
 0x98a   :  { %2976 = vmatprep.subr.mxu0 %v9136_v14  ;;  %3047 = vmatprep.subr.mxu1 %v9137_v33 }
 0x98b   :  { %2977 = vmatpush1.msra.mxu0 %v9138_v55  ;;  %3010 = vmatprep.mubr.f32.mxu0 %v9139_v31 }
 0x98c   :  { %3048 = vmatpush1.msra.mxu1 %v9140_v8  ;;  %3081 = vmatprep.mubr.f32.mxu1 %v9139_v31 }
 0x98d   :  { %3137 = vmatprep.subr.mxu0 %v9141_v44  ;;  %3208 = vmatprep.subr.mxu1 %v9142_v61 }
 0xa2c   :  { %v2821_v3 = vpop.f32.mrf.mxu0  ;;  %v2892_v14 = vpop.f32.mrf.mxu1 }
 0xa2d   :  { %v2901_v54 = vrot.slane %v2821_v3, 4  ;;  %v2903_v44 = vrot.slane %v2892_v14, 4 }
 0xa2e   :  { %v2823_v38 = vpop.f32.mrf.mxu0  ;;  %v2894_v58 = vpop.f32.mrf.mxu1 }
 0xa2f   :  { %v2909_v45 = vadd.f32 %v2901_v54, %v9143_v35  ;;  %v2902_v46 = vrot.slane %v2823_v38, 4  ;;  %v2904_v8 = vrot.slane %v2894_v58, 4  ;;  %v2911_v3 = vadd.f32 %v2903_v44, %v7883_v43 }
 0xa31   :  { %v5025_v33 = vmul.f32 -1.442695, %v2909_v45  ;;  %v2910_v55 = vadd.f32 %v2902_v46, %v7871_v40  ;;  %v2912_v31 = vadd.f32 %v2904_v8, %v7878_v59 }
 0xa33   :  { %5356 = vpow2.f32 %v5025_v33  ;;  %v5026_v47 = vmul.f32 -1.442695, %v2910_v55  ;;  %v5027_v50 = vmul.f32 -1.442695, %v2912_v31 }
 0xa35   :  { %5358 = vpow2.f32 %v5026_v47  ;;  %v2933_v47 = vrot.slane %v7886_v23, 2  ;;  %v9144_v23 = vld [vmem:[#allocation23_spill] sm:$0xff] }
 0xa36   :  { %5360 = vpow2.f32 %v5027_v50 }
 0xa40   :  { %v5357_v61 = vpop.eup %5356 }
 0xa41   :  { %v2916_v32 = vadd.f32 1.0, %v5357_v61  ;;  %v2940_v61 = vld [vmem:[#allocation2 + $0xc] sm:$0x3] }
 0xa42   :  { %v5359_v36 = vpop.eup %5358 }
 0xa43   :  { %5362 = vrcp.f32 %v2916_v32  ;;  %v2922_v38 = vadd.f32 1.0, %v5359_v36  ;;  %v5361_v46 = vpop.eup %5360 }
 0xa44   :  { %5364 = vtanh.f32 %v2911_v3  ;;  %v2929_v54 = vadd.f32 1.0, %v5361_v46  ;;  %v9145_v3 = vld [vmem:[#allocation21_spill] sm:$0xff] }
 0xa45   :  { %5366 = vrcp.f32 %v2922_v38  ;;  %v9146_v38 = vld [vmem:[#allocation35_spill] sm:$0xff]  ;;  %v9147_v46 = vld [vmem:[#allocation33_spill] sm:$0xff] }
 0xa46   :  { %5368 = vrcp.f32 %v2929_v54  ;;  %v9152_v54 = vld [vmem:[#allocation37_spill] sm:$0xff] }
 0xa50   :  { %v5363_v45 = vpop.eup %5362 }
 0xa51   :  { %v5365_v55 = vpop.eup %5364 }
 0xa52   :  { %v5367_v58 = vpop.eup %5366  ;;  %v2936_v8 = vmul.f32 %v5365_v55, %v5363_v45  ;;  %v9148_v45 = vld [vmem:[#allocation24_spill] sm:$0xff]  ;;  %v9149_v55 = vld [vmem:[#allocation22_spill] sm:$0xff] }
 0xa53   :  { %v2935_v14 = vmul.f32 %v5367_v58, %v2933_v47  ;;  %v5369_v44 = vpop.eup %5368  ;;  %v9150_v47 = vld [vmem:[#allocation36_spill] sm:$0xff]  ;;  %v9151_v58 = vld [vmem:[#allocation25_spill] sm:$0xff] }
 0xa55   :  { %v7960_v31 = vadd.f32 %v2936_v8, %v2935_v14  ;;  %v9153_v8 = vld [vmem:[#allocation26_spill] sm:$0xff] }
 0xa56   :  { %v9154_v14 = vld [vmem:[#allocation38_spill] sm:$0xff] }
 0xa57   :  { %5370 = vtanh.f32 %v7960_v31 }
 0xa64   :  { %v5371_v50 = vpop.eup %5370 }
 0xa65   :  { %v2939_v32 = vmul.f32 %v5371_v50, %v5369_v44  ;;  %v9155_v44 = vld [vmem:[#allocation27_spill] sm:$0xff] }
 0xa66   :  { %v9156_v50 = vld [vmem:[#allocation39_spill] sm:$0xff] }
 0xa67   :  { %v2942_v36 = vrot.slane %v2939_v32, 4  ;;  %v9157_v32 = vld [vmem:[#allocation29_spill] sm:$0xff] }
 0xa69   :  { %v2944_v33 = vadd.f32 %v2942_v36, %v2940_v61  ;;  %3011 = vmatmul.mubr.f32.vlgmr.msra.gmra.mxu0 %v2942_v36  ;;  %3082 = vmatmul.mubr.f32.vlgmr.msra.gmra.mxu1 %v2942_v36  ;;  %v9158_v36 = vld [vmem:[#allocation40_spill] sm:$0xff]  ;;  %v9159_v61 = vld [vmem:[#allocation30_spill] sm:$0xff] }
 0xa6a   :  { %3138 = vmatpush1.msra.mxu0 %v7603_v27  ;;  %3209 = vmatpush1.msra.mxu1 %v7605_v4 }
 0xa6b   :  { %2945 = vst [vmem:[#allocation2 + $0xc] sm:$0x3] %v2944_v33  ;;  %3139 = vmatprep.subr.mxu0 %v7607_v56  ;;  %3210 = vmatprep.subr.mxu1 %v7609_v37  ;;  %v9160_v33 = vld [vmem:[#allocation41_spill] sm:$0xff] }
 0xa6c   :  { %3140 = vmatpush1.msra.mxu0 %v7611_v25  ;;  %3211 = vmatpush1.msra.mxu1 %v7613_v39 }
 0xa6d   :  { %3141 = vmatprep.subr.mxu0 %v7617_v41  ;;  %3212 = vmatprep.subr.mxu1 %v7619_v42 }
 0xa6e   :  { %3142 = vmatpush1.msra.mxu0 %v7623_v52  ;;  %3213 = vmatpush1.msra.mxu1 %v7625_v57 }
 0xa6f   :  { %3143 = vmatprep.subr.mxu0 %v7629_v53  ;;  %3214 = vmatprep.subr.mxu1 %v7631_v49 }
 0xa70   :  { %3144 = vmatpush1.msra.mxu0 %v7635_v60  ;;  %3215 = vmatpush1.msra.mxu1 %v7637_v62 }
 0xa71   :  { %3145 = vmatprep.subr.mxu0 %v7641_v0  ;;  %3216 = vmatprep.subr.mxu1 %v7643_v2 }
 0xa72   :  { %3146 = vmatpush1.msra.mxu0 %v7647_v5  ;;  %3217 = vmatpush1.msra.mxu1 %v7649_v7 }
 0xa73   :  { %3147 = vmatprep.subr.mxu0 %v7653_v9  ;;  %3218 = vmatprep.subr.mxu1 %v7655_v10 }
 0xa74   :  { %3148 = vmatpush1.msra.mxu0 %v7659_v12  ;;  %3219 = vmatpush1.msra.mxu1 %v7661_v15 }
 0xa75   :  { %3149 = vmatprep.subr.mxu0 %v7665_v17  ;;  %3220 = vmatprep.subr.mxu1 %v7667_v19 }
 0xa76   :  { %3150 = vmatpush1.msra.mxu0 %v7671_v21  ;;  %3221 = vmatpush1.msra.mxu1 %v7673_v48 }
 0xa77   :  { %3151 = vmatprep.subr.mxu0 %v7677_v51  ;;  %3222 = vmatprep.subr.mxu1 %v7679_v6 }
 0xa78   :  { %3152 = vmatpush1.msra.mxu0 %v7683_v1  ;;  %3223 = vmatpush1.msra.mxu1 %v7685_v11 }
 0xa79   :  { %3153 = vmatprep.subr.mxu0 %v7689_v13  ;;  %3224 = vmatprep.subr.mxu1 %v7691_v16 }
 0xa7a   :  { %3154 = vmatpush1.msra.mxu0 %v7695_v18  ;;  %3225 = vmatpush1.msra.mxu1 %v7697_v20 }
 0xa7b   :  { %3155 = vmatprep.subr.mxu0 %v7701_v22  ;;  %3226 = vmatprep.subr.mxu1 %v7703_v24 }
 0xa7c   :  { %3156 = vmatpush1.msra.mxu0 %v7707_v63  ;;  %3227 = vmatpush1.msra.mxu1 %v7709_v26 }
 0xa7d   :  { %3157 = vmatprep.subr.mxu0 %v7713_v28  ;;  %3228 = vmatprep.subr.mxu1 %v7715_v30 }
 0xa7e   :  { %3158 = vmatpush1.msra.mxu0 %v9119_v29  ;;  %3229 = vmatpush1.msra.mxu1 %v7721_v34 }
 0xa7f   :  { %3159 = vmatprep.subr.mxu0 %v9144_v23  ;;  %3230 = vmatprep.subr.mxu1 %v9145_v3 }
 0xa80   :  { %3160 = vmatpush1.msra.mxu0 %v9146_v38  ;;  %3231 = vmatpush1.msra.mxu1 %v9147_v46 }
 0xa81   :  { %3161 = vmatprep.subr.mxu0 %v9148_v45  ;;  %3232 = vmatprep.subr.mxu1 %v9149_v55 }
 0xa82   :  { %3162 = vmatpush1.msra.mxu0 %v9150_v47  ;;  %3233 = vmatpush1.msra.mxu1 %v9151_v58  ;;  %v9161_v47 = vld [vmem:[#allocation31_spill] sm:$0xff]  ;;  %v9162_v58 = vld [vmem:[#allocation42_spill] sm:$0xff] }
 0xa83   :  { %3163 = vmatprep.subr.mxu0 %v9152_v54  ;;  %3234 = vmatprep.subr.mxu1 %v9153_v8  ;;  %v9163_v54 = vmov 0.0   ;;  %v9164_v8 = vld [vmem:[#allocation59_spill] sm:$0xff] }
 0xa84   :  { %3164 = vmatpush1.msra.mxu0 %v9154_v14  ;;  %3235 = vmatpush1.msra.mxu1 %v9155_v44  ;;  %v9165_v44 = vld [vmem:[#allocation28_spill] sm:$0xff] }
 0xa85   :  { %3165 = vmatprep.subr.mxu0 %v9156_v50  ;;  %3236 = vmatprep.subr.mxu1 %v9157_v32  ;;  %v9166_v50 = vld [vmem:[#allocation20_spill] sm:$0xff] }
 0xa86   :  { %3166 = vmatpush1.msra.mxu0 %v9158_v36  ;;  %3237 = vmatpush1.msra.mxu1 %v9159_v61 }
 0xa87   :  { %3167 = vmatprep.subr.mxu0 %v9160_v33  ;;  %3238 = vmatprep.subr.mxu1 %v9161_v47 }
 0xa88   :  { %3168 = vmatpush1.msra.mxu0 %v9162_v58  ;;  %3201 = vmatprep.mubr.f32.mxu0 %v9163_v54 }
 0xa89   :  { %3239 = vmatpush1.msra.mxu1 %v9164_v8  ;;  %3272 = vmatprep.mubr.f32.mxu1 %v9163_v54 }
 0xa8a   :  { %3313 = vmatprep.subr.mxu0 %v9165_v44  ;;  %3384 = vmatprep.subr.mxu1 %v9166_v50 }
 0xb29   :  { %v3012_v32 = vpop.f32.mrf.mxu0  ;;  %v3083_v33 = vpop.f32.mrf.mxu1 }
 0xb2a   :  { %v3092_v36 = vrot.slane %v3012_v32, 6  ;;  %v3094_v44 = vrot.slane %v3083_v33, 6 }
 0xb2b   :  { %v3014_v14 = vpop.f32.mrf.mxu0  ;;  %v3085_v46 = vpop.f32.mrf.mxu1 }
 0xb2c   :  { %v3100_v61 = vadd.f32 %v3092_v36, %v9143_v35  ;;  %v3093_v55 = vrot.slane %v3014_v14, 6  ;;  %v3095_v8 = vrot.slane %v3085_v46, 6  ;;  %v3102_v32 = vadd.f32 %v3094_v44, %v7883_v43  ;;  %v3131_v44 = vld [vmem:[#allocation2 + $0xa] sm:$0x3] }
 0xb2e   :  { %v5028_v47 = vmul.f32 -1.442695, %v3100_v61  ;;  %v3101_v58 = vadd.f32 %v3093_v55, %v7871_v40  ;;  %v3103_v54 = vadd.f32 %v3095_v8, %v7878_v59 }
 0xb30   :  { %5372 = vpow2.f32 %v5028_v47  ;;  %v5029_v45 = vmul.f32 -1.442695, %v3101_v58  ;;  %v5030_v38 = vmul.f32 -1.442695, %v3103_v54 }
 0xb32   :  { %5374 = vpow2.f32 %v5029_v45  ;;  %v3124_v45 = vrot.slane %v7960_v31, 2 }
 0xb33   :  { %5376 = vpow2.f32 %v5030_v38 }
 0xb3d   :  { %v5373_v50 = vpop.eup %5372 }
 0xb3e   :  { %v3107_v3 = vadd.f32 1.0, %v5373_v50 }
 0xb3f   :  { %v5375_v23 = vpop.eup %5374 }
 0xb40   :  { %5378 = vrcp.f32 %v3107_v3  ;;  %v3113_v14 = vadd.f32 1.0, %v5375_v23  ;;  %v5377_v55 = vpop.eup %5376 }
 0xb41   :  { %5380 = vtanh.f32 %v3102_v32  ;;  %v3120_v36 = vadd.f32 1.0, %v5377_v55 }
 0xb42   :  { %5382 = vrcp.f32 %v3113_v14 }
 0xb43   :  { %5384 = vrcp.f32 %v3120_v36  ;;  %v8121_v36 = vld [vmem:[#allocation6 + $0x1c8] sm:$0xff] }
 0xb4d   :  { %v5379_v47 = vpop.eup %5378 }
 0xb4e   :  { %v5381_v58 = vpop.eup %5380 }
 0xb4f   :  { %v5383_v46 = vpop.eup %5382  ;;  %v3127_v8 = vmul.f32 %v5381_v58, %v5379_v47  ;;  %v3310_v47 = vld [vmem:[#allocation2 + $0x8] sm:$0x3] }
 0xb50   :  { %v3126_v61 = vmul.f32 %v5383_v46, %v3124_v45  ;;  %v5385_v33 = vpop.eup %5384  ;;  %v8115_v45 = vld [vmem:[#allocation6 + $0x1e0] sm:$0xff]  ;;  %v8118_v46 = vld [vmem:[#allocation6 + $0x1f0] sm:$0xff] }
 0xb52   :  { %v8034_v54 = vadd.f32 %v3127_v8, %v3126_v61  ;;  %v8124_v8 = vld [vmem:[#allocation6 + $0x1d8] sm:$0xff]  ;;  %v8127_v61 = vld [vmem:[#allocation6 + $0x1c0] sm:$0xff] }
 0xb54   :  { %5386 = vtanh.f32 %v8034_v54 }
 0xb61   :  { %v5387_v38 = vpop.eup %5386 }
 0xb62   :  { %v3130_v3 = vmul.f32 %v5387_v38, %v5385_v33  ;;  %v8133_v33 = vld [vmem:[#allocation6 + $0x1a8] sm:$0xff]  ;;  %v8136_v38 = vld [vmem:[#allocation6 + $0x1b8] sm:$0xff] }
 0xb64   :  { %v3133_v23 = vrot.slane %v3130_v3, 2  ;;  %v8139_v3 = vld [vmem:[#allocation6 + $0x1a0] sm:$0xff] }
 0xb66   :  { %v3135_v50 = vadd.f32 %v3133_v23, %v3131_v44  ;;  %3202 = vmatmul.mubr.f32.vlgmr.msra.gmra.mxu0 %v3133_v23  ;;  %3273 = vmatmul.mubr.f32.vlgmr.msra.gmra.mxu1 %v3133_v23  ;;  %v8142_v23 = vld [vmem:[#allocation6 + $0x1b0] sm:$0xff]  ;;  %v8145_v44 = vld [vmem:[#allocation6 + $0x188] sm:$0xff] }
 0xb67   :  { %3314 = vmatpush1.msra.mxu0 %v7603_v27  ;;  %3385 = vmatpush1.msra.mxu1 %v7605_v4  ;;  %v9167_v27 = vld [vmem:[#allocation23_spill] sm:$0xff]  ;;  %v9168_v4 = vld [vmem:[#allocation21_spill] sm:$0xff] }
 0xb68   :  { %3136 = vst [vmem:[#allocation2 + $0xa] sm:$0x3] %v3135_v50  ;;  %3315 = vmatprep.subr.mxu0 %v7607_v56  ;;  %3386 = vmatprep.subr.mxu1 %v7609_v37  ;;  %v9169_v56 = vld [vmem:[#allocation35_spill] sm:$0xff]  ;;  %v9170_v37 = vld [vmem:[#allocation33_spill] sm:$0xff] }
 0xb69   :  { %3316 = vmatpush1.msra.mxu0 %v7611_v25  ;;  %3387 = vmatpush1.msra.mxu1 %v7613_v39  ;;  %v9171_v25 = vld [vmem:[#allocation24_spill] sm:$0xff]  ;;  %v9172_v39 = vld [vmem:[#allocation22_spill] sm:$0xff]  ;;  %v8148_v50 = vld [vmem:[#allocation6 + $0x198] sm:$0xff] }
 0xb6a   :  { %3317 = vmatprep.subr.mxu0 %v7617_v41  ;;  %3388 = vmatprep.subr.mxu1 %v7619_v42  ;;  %v9173_v41 = vld [vmem:[#allocation36_spill] sm:$0xff]  ;;  %v9174_v42 = vld [vmem:[#allocation25_spill] sm:$0xff] }
 0xb6b   :  { %3318 = vmatpush1.msra.mxu0 %v7623_v52  ;;  %3389 = vmatpush1.msra.mxu1 %v7625_v57  ;;  %v9175_v52 = vld [vmem:[#allocation37_spill] sm:$0xff]  ;;  %v9176_v57 = vld [vmem:[#allocation26_spill] sm:$0xff] }
 0xb6c   :  { %3319 = vmatprep.subr.mxu0 %v7629_v53  ;;  %3390 = vmatprep.subr.mxu1 %v7631_v49  ;;  %v9177_v53 = vld [vmem:[#allocation38_spill] sm:$0xff]  ;;  %v9178_v49 = vld [vmem:[#allocation27_spill] sm:$0xff] }
 0xb6d   :  { %3320 = vmatpush1.msra.mxu0 %v7635_v60  ;;  %3391 = vmatpush1.msra.mxu1 %v7637_v62  ;;  %v9179_v60 = vld [vmem:[#allocation39_spill] sm:$0xff]  ;;  %v9180_v62 = vld [vmem:[#allocation29_spill] sm:$0xff] }
 0xb6e   :  { %3321 = vmatprep.subr.mxu0 %v7641_v0  ;;  %3392 = vmatprep.subr.mxu1 %v7643_v2  ;;  %v9181_v0 = vld [vmem:[#allocation40_spill] sm:$0xff]  ;;  %v9182_v2 = vld [vmem:[#allocation30_spill] sm:$0xff] }
 0xb6f   :  { %3322 = vmatpush1.msra.mxu0 %v7647_v5  ;;  %3393 = vmatpush1.msra.mxu1 %v7649_v7  ;;  %v9183_v5 = vld [vmem:[#allocation41_spill] sm:$0xff]  ;;  %v9184_v7 = vld [vmem:[#allocation31_spill] sm:$0xff] }
 0xb70   :  { %3323 = vmatprep.subr.mxu0 %v7653_v9  ;;  %3394 = vmatprep.subr.mxu1 %v7655_v10  ;;  %v9185_v9 = vld [vmem:[#allocation42_spill] sm:$0xff]  ;;  %v9186_v10 = vmov 0.0  }
 0xb71   :  { %3324 = vmatpush1.msra.mxu0 %v7659_v12  ;;  %3395 = vmatpush1.msra.mxu1 %v7661_v15  ;;  %v9187_v12 = vld [vmem:[#allocation59_spill] sm:$0xff] }
 0xb72   :  { %3325 = vmatprep.subr.mxu0 %v7665_v17  ;;  %3396 = vmatprep.subr.mxu1 %v7667_v19  ;;  %v8101_v15 = vld [vmem:[#allocation6 + $0x1e8] sm:$0xff]  ;;  %v8104_v17 = vld [vmem:[#allocation6 + $0x1f8] sm:$0xff] }
 0xb73   :  { %3326 = vmatpush1.msra.mxu0 %v7671_v21  ;;  %3397 = vmatpush1.msra.mxu1 %v7673_v48  ;;  %9188 = vst [vmem:[#allocation48_spill] sm:$0xff] %v8101_v15  ;;  %9189 = vst [vmem:[#allocation50_spill] sm:$0xff] %v8104_v17 }
 0xb74   :  { %3327 = vmatprep.subr.mxu0 %v7677_v51  ;;  %3398 = vmatprep.subr.mxu1 %v7679_v6 }
 0xb75   :  { %3328 = vmatpush1.msra.mxu0 %v7683_v1  ;;  %3399 = vmatpush1.msra.mxu1 %v7685_v11 }
 0xb76   :  { %3329 = vmatprep.subr.mxu0 %v7689_v13  ;;  %3400 = vmatprep.subr.mxu1 %v7691_v16 }
 0xb77   :  { %3330 = vmatpush1.msra.mxu0 %v7695_v18  ;;  %3401 = vmatpush1.msra.mxu1 %v7697_v20 }
 0xb78   :  { %3331 = vmatprep.subr.mxu0 %v7701_v22  ;;  %3402 = vmatprep.subr.mxu1 %v7703_v24 }
 0xb79   :  { %3332 = vmatpush1.msra.mxu0 %v7707_v63  ;;  %3403 = vmatpush1.msra.mxu1 %v7709_v26 }
 0xb7a   :  { %3333 = vmatprep.subr.mxu0 %v7713_v28  ;;  %3404 = vmatprep.subr.mxu1 %v7715_v30 }
 0xb7b   :  { %3334 = vmatpush1.msra.mxu0 %v9119_v29  ;;  %3405 = vmatpush1.msra.mxu1 %v7721_v34 }
 0xb7c   :  { %3335 = vmatprep.subr.mxu0 %v9167_v27  ;;  %3406 = vmatprep.subr.mxu1 %v9168_v4  ;;  %v8151_v27 = vld [vmem:[#allocation6 + $0x180] sm:$0xff]  ;;  %v8154_v4 = vld [vmem:[#allocation6 + $0x190] sm:$0xff] }
 0xb7d   :  { %3336 = vmatpush1.msra.mxu0 %v9169_v56  ;;  %3407 = vmatpush1.msra.mxu1 %v9170_v37  ;;  %v8157_v56 = vld [vmem:[#allocation6 + $0x168] sm:$0xff]  ;;  %v8160_v37 = vld [vmem:[#allocation6 + $0x178] sm:$0xff] }
 0xb7e   :  { %3337 = vmatprep.subr.mxu0 %v9171_v25  ;;  %3408 = vmatprep.subr.mxu1 %v9172_v39  ;;  %v8163_v25 = vld [vmem:[#allocation6 + $0x160] sm:$0xff]  ;;  %v8166_v39 = vld [vmem:[#allocation6 + $0x170] sm:$0xff] }
 0xb7f   :  { %3338 = vmatpush1.msra.mxu0 %v9173_v41  ;;  %3409 = vmatpush1.msra.mxu1 %v9174_v42  ;;  %v8169_v41 = vld [vmem:[#allocation6 + $0x148] sm:$0xff]  ;;  %v8172_v42 = vld [vmem:[#allocation6 + $0x158] sm:$0xff] }
 0xb80   :  { %3339 = vmatprep.subr.mxu0 %v9175_v52  ;;  %3410 = vmatprep.subr.mxu1 %v9176_v57  ;;  %v8175_v52 = vld [vmem:[#allocation6 + $0x140] sm:$0xff]  ;;  %v8178_v57 = vld [vmem:[#allocation6 + $0x150] sm:$0xff] }
 0xb81   :  { %3340 = vmatpush1.msra.mxu0 %v9177_v53  ;;  %3411 = vmatpush1.msra.mxu1 %v9178_v49  ;;  %v8181_v53 = vld [vmem:[#allocation6 + $0x128] sm:$0xff]  ;;  %v8184_v49 = vld [vmem:[#allocation6 + $0x138] sm:$0xff] }
 0xb82   :  { %3341 = vmatprep.subr.mxu0 %v9179_v60  ;;  %3412 = vmatprep.subr.mxu1 %v9180_v62  ;;  %v8187_v60 = vld [vmem:[#allocation6 + $0x120] sm:$0xff]  ;;  %v8190_v62 = vld [vmem:[#allocation6 + $0x130] sm:$0xff] }
 0xb83   :  { %3342 = vmatpush1.msra.mxu0 %v9181_v0  ;;  %3413 = vmatpush1.msra.mxu1 %v9182_v2  ;;  %v8193_v0 = vld [vmem:[#allocation6 + $0x108] sm:$0xff]  ;;  %v8196_v2 = vld [vmem:[#allocation6 + $0x118] sm:$0xff] }
 0xb84   :  { %3343 = vmatprep.subr.mxu0 %v9183_v5  ;;  %3414 = vmatprep.subr.mxu1 %v9184_v7  ;;  %v8199_v5 = vld [vmem:[#allocation6 + $0x100] sm:$0xff]  ;;  %v8202_v7 = vld [vmem:[#allocation6 + $0x110] sm:$0xff] }
 0xb85   :  { %3344 = vmatpush1.msra.mxu0 %v9185_v9  ;;  %3377 = vmatprep.mubr.f32.mxu0 %v9186_v10  ;;  %v8205_v9 = vld [vmem:[#allocation6 + $0xe8] sm:$0xff] }
 0xb86   :  { %3415 = vmatpush1.msra.mxu1 %v9187_v12  ;;  %3448 = vmatprep.mubr.f32.mxu1 %v9186_v10  ;;  %v8208_v12 = vld [vmem:[#allocation6 + $0xf8] sm:$0xff] }
 0xb87   :  { %3504 = vmatprep.subr.mxu0 %v8101_v15  ;;  %3575 = vmatprep.subr.mxu1 %v8104_v17 }
 0xc26   :  { %v3203_v19 = vpop.f32.mrf.mxu0  ;;  %v3274_v1 = vpop.f32.mrf.mxu1 }
 0xc27   :  { %v3279_v21 = vadd.f32 %v3203_v19, %v9143_v35  ;;  %v3281_v22 = vadd.f32 %v3274_v1, %v7883_v43  ;;  %v8211_v19 = vld [vmem:[#allocation6 + $0xe0] sm:$0xff]  ;;  %v8226_v1 = vld [vmem:[#allocation6 + $0xd0] sm:$0xff] }
 0xc28   :  { %v3205_v48 = vpop.f32.mrf.mxu0  ;;  %v3276_v13 = vpop.f32.mrf.mxu1 }
 0xc29   :  { %v5031_v51 = vmul.f32 -1.442695, %v3279_v21  ;;  %v3280_v6 = vadd.f32 %v3205_v48, %v7871_v40  ;;  %v3282_v16 = vadd.f32 %v3276_v13, %v7878_v59  ;;  %v3303_v40 = vrot.slane %v8034_v54, 2  ;;  %v8130_v54 = vld [vmem:[#allocation6 + $0x1d0] sm:$0xff]  ;;  %v8217_v48 = vld [vmem:[#allocation6 + $0xc8] sm:$0xff]  ;;  %v8232_v13 = vld [vmem:[#allocation6 + $0xb8] sm:$0xff] }
 0xc2a   :  { %v8214_v21 = vld [vmem:[#allocation6 + $0xf0] sm:$0xff] }
 0xc2b   :  { %5388 = vpow2.f32 %v5031_v51  ;;  %v5032_v11 = vmul.f32 -1.442695, %v3280_v6  ;;  %v5033_v18 = vmul.f32 -1.442695, %v3282_v16  ;;  %v8220_v51 = vld [vmem:[#allocation6 + $0xd8] sm:$0xff]  ;;  %v8223_v6 = vld [vmem:[#allocation6 + $0xc0] sm:$0xff] }
 0xc2c   :  { %v8235_v16 = vld [vmem:[#allocation6 + $0xa0] sm:$0xff] }
 0xc2d   :  { %5390 = vpow2.f32 %v5032_v11  ;;  %v8229_v11 = vld [vmem:[#allocation6 + $0xa8] sm:$0xff] }
 0xc2e   :  { %5392 = vpow2.f32 %v5033_v18  ;;  %v8238_v18 = vld [vmem:[#allocation6 + $0xb0] sm:$0xff] }
 0xc38   :  { %v5389_v20 = vpop.eup %5388 }
 0xc39   :  { %v3286_v24 = vadd.f32 1.0, %v5389_v20  ;;  %v8241_v20 = vld [vmem:[#allocation6 + $0x88] sm:$0xff] }
 0xc3a   :  { %v5391_v63 = vpop.eup %5390  ;;  %9190 = vst [vmem:[#allocation49_spill] sm:$0xff] %v8241_v20 }
 0xc3b   :  { %5394 = vrcp.f32 %v3286_v24  ;;  %v3292_v26 = vadd.f32 1.0, %v5391_v63  ;;  %v5393_v28 = vpop.eup %5392  ;;  %v8247_v24 = vld [vmem:[#allocation6 + $0x80] sm:$0xff]  ;;  %v8250_v63 = vld [vmem:[#allocation6 + $0x90] sm:$0xff] }
 0xc3c   :  { %5396 = vtanh.f32 %v3281_v22  ;;  %v3299_v35 = vadd.f32 1.0, %v5393_v28  ;;  %v8244_v22 = vld [vmem:[#allocation6 + $0x98] sm:$0xff]  ;;  %9192 = vst [vmem:[#allocation53_spill] sm:$0xff] %v8247_v24  ;;  %9193 = vst [vmem:[#allocation44_spill] sm:$0xff] %v8250_v63 }
 0xc3d   :  { %5398 = vrcp.f32 %v3292_v26  ;;  %9191 = vst [vmem:[#allocation43_spill] sm:$0xff] %v8244_v22  ;;  %v8253_v26 = vld [vmem:[#allocation6 + $0x68] sm:$0xff]  ;;  %v8256_v28 = vld [vmem:[#allocation6 + $0x78] sm:$0xff] }
 0xc3e   :  { %5400 = vrcp.f32 %v3299_v35  ;;  %9194 = vst [vmem:[#allocation56_spill] sm:$0xff] %v8253_v26  ;;  %9195 = vst [vmem:[#allocation34_spill] sm:$0xff] %v8256_v28  ;;  %v8271_v35 = vld [vmem:[#allocation6 + $0x40] sm:$0xff] }
 0xc3f   :  { %9200 = vst [vmem:[#allocation32_spill] sm:$0xff] %v8271_v35 }
 0xc48   :  { %v5395_v30 = vpop.eup %5394 }
 0xc49   :  { %v5397_v34 = vpop.eup %5396 }
 0xc4a   :  { %v5399_v29 = vpop.eup %5398  ;;  %v3306_v31 = vmul.f32 %v5397_v34, %v5395_v30  ;;  %v8259_v30 = vld [vmem:[#allocation6 + $0x60] sm:$0xff]  ;;  %v8262_v34 = vld [vmem:[#allocation6 + $0x70] sm:$0xff] }
 0xc4b   :  { %v3305_v59 = vmul.f32 %v5399_v29, %v3303_v40  ;;  %v5401_v43 = vpop.eup %5400  ;;  %9196 = vst [vmem:[#allocation52_spill] sm:$0xff] %v8259_v30  ;;  %9197 = vst [vmem:[#allocation58_spill] sm:$0xff] %v8262_v34  ;;  %v8265_v40 = vld [vmem:[#allocation6 + $0x48] sm:$0xff]  ;;  %v8268_v29 = vld [vmem:[#allocation6 + $0x58] sm:$0xff] }
 0xc4c   :  { %9198 = vst [vmem:[#allocation51_spill] sm:$0xff] %v8265_v40  ;;  %9199 = vst [vmem:[#allocation57_spill] sm:$0xff] %v8268_v29 }
 0xc4d   :  { %v8112_v32 = vadd.f32 %v3306_v31, %v3305_v59  ;;  %v8274_v31 = vld [vmem:[#allocation6 + $0x50] sm:$0xff]  ;;  %v8277_v59 = vld [vmem:[#allocation6 + $0x28] sm:$0xff] }
 0xc4e   :  { %9201 = vst [vmem:[#allocation47_spill] sm:$0xff] %v8274_v31  ;;  %9202 = vst [vmem:[#allocation28_spill] sm:$0xff] %v8277_v59 }
 0xc4f   :  { %5402 = vtanh.f32 %v8112_v32 }
 0xc5c   :  { %v5403_v14 = vpop.eup %5402 }
 0xc5d   :  { %v3309_v55 = vmul.f32 %v5403_v14, %v5401_v43  ;;  %v8280_v43 = vld [vmem:[#allocation6 + $0x38] sm:$0xff]  ;;  %v8283_v14 = vld [vmem:[#allocation6 + $0x20] sm:$0xff] }
 0xc5e   :  { %9203 = vst [vmem:[#allocation20_spill] sm:$0xff] %v8280_v43  ;;  %9204 = vst [vmem:[#allocation23_spill] sm:$0xff] %v8283_v14 }
 0xc5f   :  { %v3311_v58 = vadd.f32 %v3310_v47, %v3309_v55  ;;  %3378 = vmatmul.mubr.f32.vlgmr.msra.gmra.mxu0 %v3309_v55  ;;  %3449 = vmatmul.mubr.f32.vlgmr.msra.gmra.mxu1 %v3309_v55  ;;  %v8286_v55 = vld [vmem:[#allocation6 + $0x30] sm:$0xff]  ;;  %v8289_v47 = vld [vmem:[#allocation6 + $0x8] sm:$0xff] }
 0xc60   :  { %3505 = vmatpush1.msra.mxu0 %v8115_v45  ;;  %3576 = vmatpush1.msra.mxu1 %v8118_v46  ;;  %9205 = vst [vmem:[#allocation21_spill] sm:$0xff] %v8286_v55  ;;  %9206 = vst [vmem:[#allocation35_spill] sm:$0xff] %v8289_v47 }
 0xc61   :  { %3312 = vst [vmem:[#allocation2 + $0x8] sm:$0x3] %v3311_v58  ;;  %3506 = vmatprep.subr.mxu0 %v8121_v36  ;;  %3577 = vmatprep.subr.mxu1 %v8124_v8  ;;  %v8292_v58 = vld [vmem:[#allocation6 + $0x18] sm:$0xff] }
 0xc62   :  { %3507 = vmatpush1.msra.mxu0 %v8127_v61  ;;  %3578 = vmatpush1.msra.mxu1 %v8130_v54  ;;  %9207 = vst [vmem:[#allocation33_spill] sm:$0xff] %v8292_v58 }
 0xc63   :  { %3508 = vmatprep.subr.mxu0 %v8133_v33  ;;  %3579 = vmatprep.subr.mxu1 %v8136_v38 }
 0xc64   :  { %3509 = vmatpush1.msra.mxu0 %v8139_v3  ;;  %3580 = vmatpush1.msra.mxu1 %v8142_v23 }
 0xc65   :  { %3510 = vmatprep.subr.mxu0 %v8145_v44  ;;  %3581 = vmatprep.subr.mxu1 %v8148_v50 }
 0xc66   :  { %3511 = vmatpush1.msra.mxu0 %v8151_v27  ;;  %3582 = vmatpush1.msra.mxu1 %v8154_v4 }
 0xc67   :  { %3512 = vmatprep.subr.mxu0 %v8157_v56  ;;  %3583 = vmatprep.subr.mxu1 %v8160_v37 }
 0xc68   :  { %3513 = vmatpush1.msra.mxu0 %v8163_v25  ;;  %3584 = vmatpush1.msra.mxu1 %v8166_v39 }
 0xc69   :  { %3514 = vmatprep.subr.mxu0 %v8169_v41  ;;  %3585 = vmatprep.subr.mxu1 %v8172_v42 }
 0xc6a   :  { %3515 = vmatpush1.msra.mxu0 %v8175_v52  ;;  %3586 = vmatpush1.msra.mxu1 %v8178_v57 }
 0xc6b   :  { %3516 = vmatprep.subr.mxu0 %v8181_v53  ;;  %3587 = vmatprep.subr.mxu1 %v8184_v49 }
 0xc6c   :  { %3517 = vmatpush1.msra.mxu0 %v8187_v60  ;;  %3588 = vmatpush1.msra.mxu1 %v8190_v62 }
 0xc6d   :  { %3518 = vmatprep.subr.mxu0 %v8193_v0  ;;  %3589 = vmatprep.subr.mxu1 %v8196_v2 }
 0xc6e   :  { %3519 = vmatpush1.msra.mxu0 %v8199_v5  ;;  %3590 = vmatpush1.msra.mxu1 %v8202_v7 }
 0xc6f   :  { %3520 = vmatprep.subr.mxu0 %v8205_v9  ;;  %3591 = vmatprep.subr.mxu1 %v8208_v12 }
 0xc70   :  { %3521 = vmatpush1.msra.mxu0 %v8211_v19  ;;  %3592 = vmatpush1.msra.mxu1 %v8214_v21 }
 0xc71   :  { %3522 = vmatprep.subr.mxu0 %v8217_v48  ;;  %3593 = vmatprep.subr.mxu1 %v8220_v51 }
 0xc72   :  { %3523 = vmatpush1.msra.mxu0 %v8223_v6  ;;  %3594 = vmatpush1.msra.mxu1 %v8226_v1 }
 0xc73   :  { %3524 = vmatprep.subr.mxu0 %v8229_v11  ;;  %3595 = vmatprep.subr.mxu1 %v8232_v13 }
 0xc74   :  { %3525 = vmatpush1.msra.mxu0 %v8235_v16  ;;  %3596 = vmatpush1.msra.mxu1 %v8238_v18 }
 0xc75   :  { %3526 = vmatprep.subr.mxu0 %v8241_v20  ;;  %3597 = vmatprep.subr.mxu1 %v8244_v22 }
 0xc76   :  { %3527 = vmatpush1.msra.mxu0 %v8247_v24  ;;  %3598 = vmatpush1.msra.mxu1 %v8250_v63  ;;  %v9213_v24 = vld [vmem:[#allocation54_spill] sm:$0xff] }
 0xc77   :  { %3528 = vmatprep.subr.mxu0 %v8253_v26  ;;  %3599 = vmatprep.subr.mxu1 %v8256_v28 }
 0xc78   :  { %3529 = vmatpush1.msra.mxu0 %v8259_v30  ;;  %3600 = vmatpush1.msra.mxu1 %v8262_v34 }
 0xc79   :  { %3530 = vmatprep.subr.mxu0 %v8265_v40  ;;  %3601 = vmatprep.subr.mxu1 %v8268_v29  ;;  %v9211_v40 = vld [vmem:[#allocation46_spill] sm:$0xff] }
 0xc7a   :  { %3531 = vmatpush1.msra.mxu0 %v8271_v35  ;;  %3602 = vmatpush1.msra.mxu1 %v8274_v31 }
 0xc7b   :  { %3532 = vmatprep.subr.mxu0 %v8277_v59  ;;  %3603 = vmatprep.subr.mxu1 %v8280_v43  ;;  %v8295_v59 = vld [vmem:[#allocation6] sm:$0xff]  ;;  %v8299_v43 = vld [vmem:[#allocation6 + $0x10] sm:$0xff] }
 0xc7c   :  { %3533 = vmatpush1.msra.mxu0 %v8283_v14  ;;  %3604 = vmatpush1.msra.mxu1 %v8286_v55  ;;  %9208 = vst [vmem:[#allocation24_spill] sm:$0xff] %v8295_v59  ;;  %9209 = vst [vmem:[#allocation22_spill] sm:$0xff] %v8299_v43 }
 0xc7d   :  { %3534 = vmatprep.subr.mxu0 %v8289_v47  ;;  %3605 = vmatprep.subr.mxu1 %v8292_v58  ;;  %v9210_v58 = vld [vmem:[#allocation45_spill] sm:$0xff] }
 0xc7e   :  { %3535 = vmatpush1.msra.mxu0 %v8295_v59  ;;  %3568 = vmatprep.mubr.f32.mxu0 %v9186_v10 }
 0xc7f   :  { %3606 = vmatpush1.msra.mxu1 %v8299_v43  ;;  %3639 = vmatprep.mubr.f32.mxu1 %v9186_v10  ;;  %v9212_v10 = vld [vmem:[#allocation55_spill] sm:$0xff] }
 0xc80   :  { %3695 = vmatprep.subr.mxu0 %v8101_v15  ;;  %3766 = vmatprep.subr.mxu1 %v8104_v17 }
 0xd1f   :  { %v3379_v47 = vpop.f32.mrf.mxu0  ;;  %v3450_v35 = vpop.f32.mrf.mxu1 }
 0xd20   :  { %v3459_v55 = vrot.slane %v3379_v47, 2  ;;  %v3461_v15 = vrot.slane %v3450_v35, 2 }
 0xd21   :  { %v3381_v14 = vpop.f32.mrf.mxu0  ;;  %v3452_v28 = vpop.f32.mrf.mxu1 }
 0xd22   :  { %v3467_v31 = vadd.f32 %v3459_v55, %v9210_v58  ;;  %v3460_v29 = vrot.slane %v3381_v14, 2  ;;  %v3462_v43 = vrot.slane %v3452_v28, 2  ;;  %v3469_v47 = vadd.f32 %v3461_v15, %v9213_v24 }
 0xd24   :  { %v5034_v59 = vmul.f32 -1.442695, %v3467_v31  ;;  %v3468_v34 = vadd.f32 %v3460_v29, %v9211_v40  ;;  %v3470_v26 = vadd.f32 %v3462_v43, %v9212_v10 }
 0xd26   :  { %5404 = vpow2.f32 %v5034_v59  ;;  %v5035_v30 = vmul.f32 -1.442695, %v3468_v34  ;;  %v5036_v63 = vmul.f32 -1.442695, %v3470_v26 }
 0xd28   :  { %5406 = vpow2.f32 %v5035_v30  ;;  %v3491_v30 = vrot.slane %v8112_v32, 2  ;;  %v9214_v32 = vld [vmem:[#allocation49_spill] sm:$0xff] }
 0xd29   :  { %5408 = vpow2.f32 %v5036_v63  ;;  %v3498_v63 = vld [vmem:[#allocation2 + $0x6] sm:$0x3] }
 0xd33   :  { %v5405_v17 = vpop.eup %5404 }
 0xd34   :  { %v3474_v22 = vadd.f32 1.0, %v5405_v17 }
 0xd35   :  { %v5407_v20 = vpop.eup %5406 }
 0xd36   :  { %5410 = vrcp.f32 %v3474_v22  ;;  %v3480_v14 = vadd.f32 1.0, %v5407_v20  ;;  %v5409_v29 = vpop.eup %5408 }
 0xd37   :  { %5412 = vtanh.f32 %v3469_v47  ;;  %v3487_v59 = vadd.f32 1.0, %v5409_v29  ;;  %v9215_v47 = vld [vmem:[#allocation43_spill] sm:$0xff]  ;;  %v9217_v29 = vld [vmem:[#allocation44_spill] sm:$0xff] }
 0xd38   :  { %5414 = vrcp.f32 %v3480_v14  ;;  %v9216_v14 = vld [vmem:[#allocation53_spill] sm:$0xff] }
 0xd39   :  { %5416 = vrcp.f32 %v3487_v59  ;;  %v9222_v59 = vld [vmem:[#allocation51_spill] sm:$0xff] }
 0xd43   :  { %v5411_v31 = vpop.eup %5410 }
 0xd44   :  { %v5413_v34 = vpop.eup %5412 }
 0xd45   :  { %v5415_v28 = vpop.eup %5414  ;;  %v3494_v43 = vmul.f32 %v5413_v34, %v5411_v31  ;;  %v9218_v31 = vld [vmem:[#allocation56_spill] sm:$0xff]  ;;  %v9219_v34 = vld [vmem:[#allocation34_spill] sm:$0xff] }
 0xd46   :  { %v3493_v35 = vmul.f32 %v5415_v28, %v3491_v30  ;;  %v5417_v15 = vpop.eup %5416  ;;  %v9220_v30 = vld [vmem:[#allocation52_spill] sm:$0xff]  ;;  %v9221_v28 = vld [vmem:[#allocation58_spill] sm:$0xff] }
 0xd48   :  { %v8310_v26 = vadd.f32 %v3494_v43, %v3493_v35  ;;  %v9223_v43 = vld [vmem:[#allocation57_spill] sm:$0xff]  ;;  %v9224_v35 = vld [vmem:[#allocation32_spill] sm:$0xff] }
 0xd4a   :  { %5418 = vtanh.f32 %v8310_v26 }
 0xd57   :  { %v5419_v17 = vpop.eup %5418 }
 0xd58   :  { %v3497_v22 = vmul.f32 %v5419_v17, %v5417_v15  ;;  %v9225_v15 = vld [vmem:[#allocation47_spill] sm:$0xff]  ;;  %v9226_v17 = vld [vmem:[#allocation28_spill] sm:$0xff] }
 0xd5a   :  { %v3500_v20 = vrot.slane %v3497_v22, 6  ;;  %v9227_v22 = vld [vmem:[#allocation20_spill] sm:$0xff] }
 0xd5c   :  { %v3502_v55 = vadd.f32 %v3500_v20, %v3498_v63  ;;  %3569 = vmatmul.mubr.f32.vlgmr.msra.gmra.mxu0 %v3500_v20  ;;  %3640 = vmatmul.mubr.f32.vlgmr.msra.gmra.mxu1 %v3500_v20  ;;  %v9228_v20 = vld [vmem:[#allocation23_spill] sm:$0xff]  ;;  %v9229_v63 = vld [vmem:[#allocation21_spill] sm:$0xff] }
 0xd5d   :  { %3696 = vmatpush1.msra.mxu0 %v8115_v45  ;;  %3767 = vmatpush1.msra.mxu1 %v8118_v46 }
 0xd5e   :  { %3503 = vst [vmem:[#allocation2 + $0x6] sm:$0x3] %v3502_v55  ;;  %3697 = vmatprep.subr.mxu0 %v8121_v36  ;;  %3768 = vmatprep.subr.mxu1 %v8124_v8  ;;  %v9230_v55 = vld [vmem:[#allocation35_spill] sm:$0xff] }
 0xd5f   :  { %3698 = vmatpush1.msra.mxu0 %v8127_v61  ;;  %3769 = vmatpush1.msra.mxu1 %v8130_v54 }
 0xd60   :  { %3699 = vmatprep.subr.mxu0 %v8133_v33  ;;  %3770 = vmatprep.subr.mxu1 %v8136_v38 }
 0xd61   :  { %3700 = vmatpush1.msra.mxu0 %v8139_v3  ;;  %3771 = vmatpush1.msra.mxu1 %v8142_v23 }
 0xd62   :  { %3701 = vmatprep.subr.mxu0 %v8145_v44  ;;  %3772 = vmatprep.subr.mxu1 %v8148_v50 }
 0xd63   :  { %3702 = vmatpush1.msra.mxu0 %v8151_v27  ;;  %3773 = vmatpush1.msra.mxu1 %v8154_v4 }
 0xd64   :  { %3703 = vmatprep.subr.mxu0 %v8157_v56  ;;  %3774 = vmatprep.subr.mxu1 %v8160_v37 }
 0xd65   :  { %3704 = vmatpush1.msra.mxu0 %v8163_v25  ;;  %3775 = vmatpush1.msra.mxu1 %v8166_v39 }
 0xd66   :  { %3705 = vmatprep.subr.mxu0 %v8169_v41  ;;  %3776 = vmatprep.subr.mxu1 %v8172_v42 }
 0xd67   :  { %3706 = vmatpush1.msra.mxu0 %v8175_v52  ;;  %3777 = vmatpush1.msra.mxu1 %v8178_v57 }
 0xd68   :  { %3707 = vmatprep.subr.mxu0 %v8181_v53  ;;  %3778 = vmatprep.subr.mxu1 %v8184_v49 }
 0xd69   :  { %3708 = vmatpush1.msra.mxu0 %v8187_v60  ;;  %3779 = vmatpush1.msra.mxu1 %v8190_v62 }
 0xd6a   :  { %3709 = vmatprep.subr.mxu0 %v8193_v0  ;;  %3780 = vmatprep.subr.mxu1 %v8196_v2 }
 0xd6b   :  { %3710 = vmatpush1.msra.mxu0 %v8199_v5  ;;  %3781 = vmatpush1.msra.mxu1 %v8202_v7 }
 0xd6c   :  { %3711 = vmatprep.subr.mxu0 %v8205_v9  ;;  %3782 = vmatprep.subr.mxu1 %v8208_v12 }
 0xd6d   :  { %3712 = vmatpush1.msra.mxu0 %v8211_v19  ;;  %3783 = vmatpush1.msra.mxu1 %v8214_v21 }
 0xd6e   :  { %3713 = vmatprep.subr.mxu0 %v8217_v48  ;;  %3784 = vmatprep.subr.mxu1 %v8220_v51 }
 0xd6f   :  { %3714 = vmatpush1.msra.mxu0 %v8223_v6  ;;  %3785 = vmatpush1.msra.mxu1 %v8226_v1 }
 0xd70   :  { %3715 = vmatprep.subr.mxu0 %v8229_v11  ;;  %3786 = vmatprep.subr.mxu1 %v8232_v13 }
 0xd71   :  { %3716 = vmatpush1.msra.mxu0 %v8235_v16  ;;  %3787 = vmatpush1.msra.mxu1 %v8238_v18 }
 0xd72   :  { %3717 = vmatprep.subr.mxu0 %v9214_v32  ;;  %3788 = vmatprep.subr.mxu1 %v9215_v47 }
 0xd73   :  { %3718 = vmatpush1.msra.mxu0 %v9216_v14  ;;  %3789 = vmatpush1.msra.mxu1 %v9217_v29 }
 0xd74   :  { %3719 = vmatprep.subr.mxu0 %v9218_v31  ;;  %3790 = vmatprep.subr.mxu1 %v9219_v34 }
 0xd75   :  { %3720 = vmatpush1.msra.mxu0 %v9220_v30  ;;  %3791 = vmatpush1.msra.mxu1 %v9221_v28  ;;  %v9231_v30 = vld [vmem:[#allocation33_spill] sm:$0xff]  ;;  %v9232_v28 = vld [vmem:[#allocation24_spill] sm:$0xff] }
 0xd76   :  { %3721 = vmatprep.subr.mxu0 %v9222_v59  ;;  %3792 = vmatprep.subr.mxu1 %v9223_v43  ;;  %v9233_v59 = vmov 0.0   ;;  %v9234_v43 = vld [vmem:[#allocation22_spill] sm:$0xff] }
 0xd77   :  { %3722 = vmatpush1.msra.mxu0 %v9224_v35  ;;  %3793 = vmatpush1.msra.mxu1 %v9225_v15  ;;  %v9235_v15 = vld [vmem:[#allocation48_spill] sm:$0xff] }
 0xd78   :  { %3723 = vmatprep.subr.mxu0 %v9226_v17  ;;  %3794 = vmatprep.subr.mxu1 %v9227_v22  ;;  %v9236_v17 = vld [vmem:[#allocation50_spill] sm:$0xff] }
 0xd79   :  { %3724 = vmatpush1.msra.mxu0 %v9228_v20  ;;  %3795 = vmatpush1.msra.mxu1 %v9229_v63 }
 0xd7a   :  { %3725 = vmatprep.subr.mxu0 %v9230_v55  ;;  %3796 = vmatprep.subr.mxu1 %v9231_v30 }
 0xd7b   :  { %3726 = vmatpush1.msra.mxu0 %v9232_v28  ;;  %3759 = vmatprep.mubr.f32.mxu0 %v9233_v59 }
 0xd7c   :  { %3797 = vmatpush1.msra.mxu1 %v9234_v43  ;;  %3830 = vmatprep.mubr.f32.mxu1 %v9233_v59 }
 0xd7d   :  { %3886 = vmatprep.subr.mxu0 %v9235_v15  ;;  %3957 = vmatprep.subr.mxu1 %v9236_v17 }
 0xe1c   :  { %v3570_v22 = vpop.f32.mrf.mxu0  ;;  %v3641_v55 = vpop.f32.mrf.mxu1 }
 0xe1d   :  { %v3650_v20 = vrot.slane %v3570_v22, 4  ;;  %v3652_v15 = vrot.slane %v3641_v55, 4 }
 0xe1e   :  { %v3572_v35 = vpop.f32.mrf.mxu0  ;;  %v3643_v29 = vpop.f32.mrf.mxu1 }
 0xe1f   :  { %v3658_v63 = vadd.f32 %v3650_v20, %v9210_v58  ;;  %v3651_v34 = vrot.slane %v3572_v35, 4  ;;  %v3653_v43 = vrot.slane %v3643_v29, 4  ;;  %v3660_v22 = vadd.f32 %v3652_v15, %v9213_v24  ;;  %v3689_v15 = vld [vmem:[#allocation2 + $0x4] sm:$0x3] }
 0xe21   :  { %v5037_v30 = vmul.f32 -1.442695, %v3658_v63  ;;  %v3659_v28 = vadd.f32 %v3651_v34, %v9211_v40  ;;  %v3661_v59 = vadd.f32 %v3653_v43, %v9212_v10 }
 0xe23   :  { %5420 = vpow2.f32 %v5037_v30  ;;  %v5038_v31 = vmul.f32 -1.442695, %v3659_v28  ;;  %v5039_v14 = vmul.f32 -1.442695, %v3661_v59 }
 0xe25   :  { %5422 = vpow2.f32 %v5038_v31  ;;  %v3682_v31 = vrot.slane %v8310_v26, 2 }
 0xe26   :  { %5424 = vpow2.f32 %v5039_v14 }
 0xe30   :  { %v5421_v17 = vpop.eup %5420 }
 0xe31   :  { %v3665_v47 = vadd.f32 1.0, %v5421_v17 }
 0xe32   :  { %v5423_v32 = vpop.eup %5422 }
 0xe33   :  { %5426 = vrcp.f32 %v3665_v47  ;;  %v3671_v35 = vadd.f32 1.0, %v5423_v32  ;;  %v5425_v34 = vpop.eup %5424 }
 0xe34   :  { %5428 = vtanh.f32 %v3660_v22  ;;  %v3678_v20 = vadd.f32 1.0, %v5425_v34 }
 0xe35   :  { %5430 = vrcp.f32 %v3671_v35 }
 0xe36   :  { %5432 = vrcp.f32 %v3678_v20 }
 0xe40   :  { %v5427_v30 = vpop.eup %5426 }
 0xe41   :  { %v5429_v28 = vpop.eup %5428 }
 0xe42   :  { %v5431_v29 = vpop.eup %5430  ;;  %v3685_v43 = vmul.f32 %v5429_v28, %v5427_v30 }
 0xe43   :  { %v3684_v63 = vmul.f32 %v5431_v29, %v3682_v31  ;;  %v5433_v55 = vpop.eup %5432 }
 0xe45   :  { %v8384_v59 = vadd.f32 %v3685_v43, %v3684_v63 }
 0xe47   :  { %5434 = vtanh.f32 %v8384_v59  ;;  %v3873_v22 = vrot.slane %v8384_v59, 2  ;;  %v4079_v59 = vld [vmem:[%s8711_s7 + $0x78] sm:$0xff] }
 0xe54   :  { %v5435_v14 = vpop.eup %5434 }
 0xe55   :  { %v3688_v47 = vmul.f32 %v5435_v14, %v5433_v55  ;;  %v3880_v55 = vld [vmem:[#allocation2 + $0x2] sm:$0x3] }
 0xe57   :  { %v3691_v32 = vrot.slane %v3688_v47, 4  ;;  %v4078_v47 = vld [vmem:[%s8711_s7 + $0x70] sm:$0xff] }
 0xe59   :  { %v3693_v17 = vadd.f32 %v3691_v32, %v3689_v15  ;;  %3760 = vmatmul.mubr.f32.vlgmr.msra.gmra.mxu0 %v3691_v32  ;;  %3831 = vmatmul.mubr.f32.vlgmr.msra.gmra.mxu1 %v3691_v32  ;;  %v4077_v32 = vld [vmem:[%s8711_s7 + $0x68] sm:$0xff]  ;;  %v4076_v15 = vld [vmem:[%s8711_s7 + $0x60] sm:$0xff] }
 0xe5a   :  { %3887 = vmatpush1.msra.mxu0 %v8115_v45  ;;  %3958 = vmatpush1.msra.mxu1 %v8118_v46  ;;  %v9237_v45 = vld [vmem:[#allocation49_spill] sm:$0xff]  ;;  %v9238_v46 = vld [vmem:[#allocation43_spill] sm:$0xff] }
 0xe5b   :  { %3694 = vst [vmem:[#allocation2 + $0x4] sm:$0x3] %v3693_v17  ;;  %3888 = vmatprep.subr.mxu0 %v8121_v36  ;;  %3959 = vmatprep.subr.mxu1 %v8124_v8  ;;  %v9239_v36 = vld [vmem:[#allocation53_spill] sm:$0xff]  ;;  %v9240_v8 = vld [vmem:[#allocation44_spill] sm:$0xff]  ;;  %v4075_v17 = vld [vmem:[%s8711_s7 + $0x58] sm:$0xff] }
 0xe5c   :  { %3889 = vmatpush1.msra.mxu0 %v8127_v61  ;;  %3960 = vmatpush1.msra.mxu1 %v8130_v54  ;;  %v9241_v61 = vld [vmem:[#allocation56_spill] sm:$0xff]  ;;  %v9242_v54 = vld [vmem:[#allocation34_spill] sm:$0xff] }
 0xe5d   :  { %3890 = vmatprep.subr.mxu0 %v8133_v33  ;;  %3961 = vmatprep.subr.mxu1 %v8136_v38  ;;  %v9243_v33 = vld [vmem:[#allocation52_spill] sm:$0xff]  ;;  %v9244_v38 = vld [vmem:[#allocation58_spill] sm:$0xff] }
 0xe5e   :  { %3891 = vmatpush1.msra.mxu0 %v8139_v3  ;;  %3962 = vmatpush1.msra.mxu1 %v8142_v23  ;;  %v9245_v3 = vld [vmem:[#allocation51_spill] sm:$0xff]  ;;  %v9246_v23 = vld [vmem:[#allocation57_spill] sm:$0xff] }
 0xe5f   :  { %3892 = vmatprep.subr.mxu0 %v8145_v44  ;;  %3963 = vmatprep.subr.mxu1 %v8148_v50  ;;  %v9247_v44 = vld [vmem:[#allocation32_spill] sm:$0xff]  ;;  %v9248_v50 = vld [vmem:[#allocation47_spill] sm:$0xff] }
 0xe60   :  { %3893 = vmatpush1.msra.mxu0 %v8151_v27  ;;  %3964 = vmatpush1.msra.mxu1 %v8154_v4  ;;  %v9249_v27 = vld [vmem:[#allocation28_spill] sm:$0xff] }
 0xe61   :  { %3894 = vmatprep.subr.mxu0 %v8157_v56  ;;  %3965 = vmatprep.subr.mxu1 %v8160_v37  ;;  %v9250_v4 = vld [vmem:[#allocation20_spill] sm:$0xff]  ;;  %v9251_v56 = vld [vmem:[#allocation23_spill] sm:$0xff]  ;;  %v9252_v37 = vld [vmem:[#allocation21_spill] sm:$0xff] }
 0xe62   :  { %3895 = vmatpush1.msra.mxu0 %v8163_v25  ;;  %3966 = vmatpush1.msra.mxu1 %v8166_v39  ;;  %v9253_v25 = vld [vmem:[#allocation35_spill] sm:$0xff]  ;;  %v9254_v39 = vld [vmem:[#allocation33_spill] sm:$0xff] }
 0xe63   :  { %3896 = vmatprep.subr.mxu0 %v8169_v41  ;;  %3967 = vmatprep.subr.mxu1 %v8172_v42  ;;  %v9255_v41 = vld [vmem:[#allocation24_spill] sm:$0xff]  ;;  %v9256_v42 = vmov 0.0  }
 0xe64   :  { %3897 = vmatpush1.msra.mxu0 %v8175_v52  ;;  %3968 = vmatpush1.msra.mxu1 %v8178_v57  ;;  %v9257_v52 = vld [vmem:[#allocation22_spill] sm:$0xff] }
 0xe65   :  { %3898 = vmatprep.subr.mxu0 %v8181_v53  ;;  %3969 = vmatprep.subr.mxu1 %v8184_v49 }
 0xe66   :  { %3899 = vmatpush1.msra.mxu0 %v8187_v60  ;;  %3970 = vmatpush1.msra.mxu1 %v8190_v62 }
 0xe67   :  { %3900 = vmatprep.subr.mxu0 %v8193_v0  ;;  %3971 = vmatprep.subr.mxu1 %v8196_v2 }
 0xe68   :  { %3901 = vmatpush1.msra.mxu0 %v8199_v5  ;;  %3972 = vmatpush1.msra.mxu1 %v8202_v7 }
 0xe69   :  { %3902 = vmatprep.subr.mxu0 %v8205_v9  ;;  %3973 = vmatprep.subr.mxu1 %v8208_v12 }
 0xe6a   :  { %3903 = vmatpush1.msra.mxu0 %v8211_v19  ;;  %3974 = vmatpush1.msra.mxu1 %v8214_v21 }
 0xe6b   :  { %3904 = vmatprep.subr.mxu0 %v8217_v48  ;;  %3975 = vmatprep.subr.mxu1 %v8220_v51 }
 0xe6c   :  { %3905 = vmatpush1.msra.mxu0 %v8223_v6  ;;  %3976 = vmatpush1.msra.mxu1 %v8226_v1 }
 0xe6d   :  { %3906 = vmatprep.subr.mxu0 %v8229_v11  ;;  %3977 = vmatprep.subr.mxu1 %v8232_v13 }
 0xe6e   :  { %3907 = vmatpush1.msra.mxu0 %v8235_v16  ;;  %3978 = vmatpush1.msra.mxu1 %v8238_v18 }
 0xe6f   :  { %3908 = vmatprep.subr.mxu0 %v9237_v45  ;;  %3979 = vmatprep.subr.mxu1 %v9238_v46  ;;  %v4074_v45 = vld [vmem:[%s8711_s7 + $0x50] sm:$0xff]  ;;  %v4073_v46 = vld [vmem:[%s8711_s7 + $0x48] sm:$0xff] }
 0xe70   :  { %3909 = vmatpush1.msra.mxu0 %v9239_v36  ;;  %3980 = vmatpush1.msra.mxu1 %v9240_v8  ;;  %v4072_v36 = vld [vmem:[%s8711_s7 + $0x40] sm:$0xff]  ;;  %v4071_v8 = vld [vmem:[%s8711_s7 + $0x38] sm:$0xff] }
 0xe71   :  { %3910 = vmatprep.subr.mxu0 %v9241_v61  ;;  %3981 = vmatprep.subr.mxu1 %v9242_v54  ;;  %v4070_v61 = vld [vmem:[%s8711_s7 + $0x30] sm:$0xff]  ;;  %v4069_v54 = vld [vmem:[%s8711_s7 + $0x28] sm:$0xff] }
 0xe72   :  { %3911 = vmatpush1.msra.mxu0 %v9243_v33  ;;  %3982 = vmatpush1.msra.mxu1 %v9244_v38  ;;  %v4068_v33 = vld [vmem:[%s8711_s7 + $0x20] sm:$0xff]  ;;  %v4067_v38 = vld [vmem:[%s8711_s7 + $0x18] sm:$0xff] }
 0xe73   :  { %3912 = vmatprep.subr.mxu0 %v9245_v3  ;;  %3983 = vmatprep.subr.mxu1 %v9246_v23  ;;  %v4066_v3 = vld [vmem:[%s8711_s7 + $0x10] sm:$0xff]  ;;  %v4065_v23 = vld [vmem:[%s8711_s7 + $0x8] sm:$0xff] }
 0xe74   :  { %3913 = vmatpush1.msra.mxu0 %v9247_v44  ;;  %3984 = vmatpush1.msra.mxu1 %v9248_v50  ;;  %v4064_v44 = vld [vmem:[%s8711_s7] sm:$0xff]  ;;  %v8508_v50 = vld [vmem:[#allocation9] ss:$0 sm:$0xff] }
 0xe75   :  { %3914 = vmatprep.subr.mxu0 %v9249_v27  ;;  %3985 = vmatprep.subr.mxu1 %v9250_v4  ;;  %v4461_v27 = vmul.f32 0.0, %v8508_v50 }
 0xe76   :  { %3915 = vmatpush1.msra.mxu0 %v9251_v56  ;;  %3986 = vmatpush1.msra.mxu1 %v9252_v37 }
 0xe77   :  { %3916 = vmatprep.subr.mxu0 %v9253_v25  ;;  %3987 = vmatprep.subr.mxu1 %v9254_v39 }
 0xe78   :  { %3917 = vmatpush1.msra.mxu0 %v9255_v41  ;;  %3950 = vmatprep.mubr.f32.mxu0 %v9256_v42 }
 0xe79   :  { %3988 = vmatpush1.msra.mxu1 %v9257_v52  ;;  %4021 = vmatprep.mubr.f32.mxu1 %v9256_v42 }
 0xe7a   :  { %5168 = vmatprep.subr.mxu1 %v9256_v42  ;;  %5133 = vmatprep.subr.mxu0 %v4079_v59 }
 0xe7b   :  { %4463 = vrot.lane.b32.xlu0 %v4461_v27, %s5882_s22 }
 0xf19   :  { %v3761_v57 = vpop.f32.mrf.mxu0  ;;  %v3832_v62 = vpop.f32.mrf.mxu1 }
 0xf1a   :  { %v3841_v53 = vrot.slane %v3761_v57, 6  ;;  %v3843_v21 = vrot.slane %v3832_v62, 6 }
 0xf1b   :  { %v3763_v49 = vpop.f32.mrf.mxu0  ;;  %v3834_v9 = vpop.f32.mrf.mxu1 }
 0xf1c   :  { %v3849_v60 = vadd.f32 %v3841_v53, %v9210_v58  ;;  %v3842_v0 = vrot.slane %v3763_v49, 6  ;;  %v3844_v12 = vrot.slane %v3834_v9, 6  ;;  %v3851_v6 = vadd.f32 %v3843_v21, %v9213_v24 }
 0xf1e   :  { %v5040_v2 = vmul.f32 -1.442695, %v3849_v60  ;;  %v3850_v5 = vadd.f32 %v3842_v0, %v9211_v40  ;;  %v3852_v19 = vadd.f32 %v3844_v12, %v9212_v10 }
 0xf20   :  { %5436 = vpow2.f32 %v5040_v2  ;;  %v5041_v7 = vmul.f32 -1.442695, %v3850_v5  ;;  %v5042_v48 = vmul.f32 -1.442695, %v3852_v19 }
 0xf22   :  { %5438 = vpow2.f32 %v5041_v7 }
 0xf23   :  { %5440 = vpow2.f32 %v5042_v48 }
 0xf2d   :  { %v5437_v51 = vpop.eup %5436 }
 0xf2e   :  { %v3856_v1 = vadd.f32 1.0, %v5437_v51 }
 0xf2f   :  { %v5439_v11 = vpop.eup %5438 }
 0xf30   :  { %5442 = vrcp.f32 %v3856_v1  ;;  %v3862_v13 = vadd.f32 1.0, %v5439_v11  ;;  %v5441_v16 = vpop.eup %5440  ;;  %v4059_v1 = vld [vmem:[#allocation2] sm:$0x3] }
 0xf31   :  { %5444 = vtanh.f32 %v3851_v6  ;;  %v3869_v34 = vadd.f32 1.0, %v5441_v16  ;;  %v4063_v16 = vld [vmem:[#allocation2 + $0x8] sm:$0xff] }
 0xf32   :  { %5446 = vrcp.f32 %v3862_v13 }
 0xf33   :  { %5448 = vrcp.f32 %v3869_v34 }
 0xf3d   :  { %v5443_v18 = vpop.eup %5442 }
 0xf3e   :  { %v5445_v26 = vpop.eup %5444 }
 0xf3f   :  { %v5447_v35 = vpop.eup %5446  ;;  %v3876_v30 = vmul.f32 %v5445_v26, %v5443_v18  ;;  %v5046_v18 = vld [vmem:[%s8712_s8] ss:$0 sm:$0xff]  ;;  %s5884_s8 = smov 1  }
 0xf40   :  { %v3875_v28 = vmul.f32 %v5447_v35, %v3873_v22  ;;  %v5449_v29 = vpop.eup %5448  ;;  %v4464_v22 = vpop.permute.xlu0 %4463 }
 0xf42   :  { %v8457_v31 = vadd.f32 %v3876_v30, %v3875_v28 }
 0xf44   :  { %5450 = vtanh.f32 %v8457_v31  ;;  %v4052_v9 = vrot.slane %v8457_v31, 2 }
 0xf51   :  { %v5451_v20 = vpop.eup %5450 }
 0xf52   :  { %v3879_v43 = vmul.f32 %v5451_v20, %v5449_v29 }
 0xf54   :  { %v3882_v63 = vrot.slane %v3879_v43, 2 }
 0xf56   :  { %v3884_v14 = vadd.f32 %v3882_v63, %v3880_v55  ;;  %3951 = vmatmul.mubr.f32.vlgmr.msra.gmra.mxu0 %v3882_v63  ;;  %4022 = vmatmul.mubr.f32.vlgmr.msra.gmra.mxu1 %v3882_v63 }
 0xf57   :  { %5134 = vmatpush3.msra.mxu0 %v4079_v59  ;;  %5170 = vmatprep.mubr.msk.f32.mxu1 %vm5890_vm0, %v9256_v42 }
 0xf58   :  { %3885 = vst [vmem:[#allocation2 + $0x2] sm:$0x3] %v3884_v14  ;;  %5135 = vmatprep.subr.mxu0 %v4078_v47 }
 0xf59   :  { %5136 = vmatpush3.msra.mxu0 %v4078_v47  ;;  %v5885_v47 = vmov 7  }
 0xf5a   :  { %5137 = vmatprep.subr.mxu0 %v4077_v32  ;;  %5198 = vset.pattern.permute.xlu0 %v5885_v47 }
 0xf5b   :  { %5138 = vmatpush3.msra.mxu0 %v4077_v32 }
 0xf5c   :  { %5139 = vmatprep.subr.mxu0 %v4076_v15 }
 0xf5d   :  { %5140 = vmatpush3.msra.mxu0 %v4076_v15 }
 0xf5e   :  { %5141 = vmatprep.subr.mxu0 %v4075_v17 }
 0xf5f   :  { %5142 = vmatpush3.msra.mxu0 %v4075_v17 }
 0xf60   :  { %5143 = vmatprep.subr.mxu0 %v4074_v45 }
 0xf61   :  { %5144 = vmatpush3.msra.mxu0 %v4074_v45 }
 0xf62   :  { %5145 = vmatprep.subr.mxu0 %v4073_v46 }
 0xf63   :  { %5146 = vmatpush3.msra.mxu0 %v4073_v46 }
 0xf64   :  { %5147 = vmatprep.subr.mxu0 %v4072_v36 }
 0xf65   :  { %5148 = vmatpush3.msra.mxu0 %v4072_v36 }
 0xf66   :  { %5149 = vmatprep.subr.mxu0 %v4071_v8 }
 0xf67   :  { %5150 = vmatpush3.msra.mxu0 %v4071_v8 }
 0xf68   :  { %5151 = vmatprep.subr.mxu0 %v4070_v61 }
 0xf69   :  { %5152 = vmatpush3.msra.mxu0 %v4070_v61  ;;  %v8532_v61 = vld [vmem:[#allocation8] ss:$0 sm:$0xff] }
 0xf6a   :  { %5153 = vmatprep.subr.mxu0 %v4069_v54 }
 0xf6b   :  { %5154 = vmatpush3.msra.mxu0 %v4069_v54 }
 0xf6c   :  { %5155 = vmatprep.subr.mxu0 %v4068_v33 }
 0xf6d   :  { %5156 = vmatpush3.msra.mxu0 %v4068_v33  ;;  %v4170_v33 = vmul.f32 0.0, %v8532_v61 }
 0xf6e   :  { %5157 = vmatprep.subr.mxu0 %v4067_v38 }
 0xf6f   :  { %5158 = vmatpush3.msra.mxu0 %v4067_v38 }
 0xf70   :  { %5159 = vmatprep.subr.mxu0 %v4066_v3 }
 0xf71   :  { %5160 = vmatpush3.msra.mxu0 %v4066_v3 }
 0xf72   :  { %5161 = vmatprep.subr.mxu0 %v4065_v23 }
 0xf73   :  { %5162 = vmatpush3.msra.mxu0 %v4065_v23 }
 0xf74   :  { %5163 = vmatprep.subr.mxu0 %v4064_v44 }
 0xf75   :  { %5164 = vmatpush3.msra.mxu0 %v4064_v44 }
0x1016   :  { %v3952_v4 = vpop.f32.mrf.mxu0  ;;  %v4023_v41 = vpop.f32.mrf.mxu1 }
0x1017   :  { %v4028_v56 = vadd.f32 %v3952_v4, %v9210_v58  ;;  %v4030_v62 = vadd.f32 %v4023_v41, %v9213_v24 }
0x1018   :  { %v3954_v37 = vpop.f32.mrf.mxu0  ;;  %v4025_v57 = vpop.f32.mrf.mxu1 }
0x1019   :  { %v5043_v25 = vmul.f32 -1.442695, %v4028_v56  ;;  %v4029_v39 = vadd.f32 %v3954_v37, %v9211_v40  ;;  %v4031_v53 = vadd.f32 %v4025_v57, %v9212_v10 }
0x101b   :  { %5452 = vpow2.f32 %v5043_v25  ;;  %v5044_v52 = vmul.f32 -1.442695, %v4029_v39  ;;  %v5045_v49 = vmul.f32 -1.442695, %v4031_v53 }
0x101d   :  { %5454 = vpow2.f32 %v5044_v52 }
0x101e   :  { %5456 = vpow2.f32 %v5045_v49 }
0x1028   :  { %v5453_v60 = vpop.eup %5452 }
0x1029   :  { %v4035_v0 = vadd.f32 1.0, %v5453_v60 }
0x102a   :  { %v5455_v2 = vpop.eup %5454 }
0x102b   :  { %5458 = vrcp.f32 %v4035_v0  ;;  %v4041_v58 = vadd.f32 1.0, %v5455_v2  ;;  %v5457_v5 = vpop.eup %5456 }
0x102c   :  { %5460 = vtanh.f32 %v4030_v62  ;;  %v4048_v19 = vadd.f32 1.0, %v5457_v5 }
0x102d   :  { %5462 = vrcp.f32 %v4041_v58 }
0x102e   :  { %5464 = vrcp.f32 %v4048_v19 }
0x1038   :  { %v5459_v40 = vpop.eup %5458 }
0x1039   :  { %v5461_v7 = vpop.eup %5460 }
0x103a   :  { %v5463_v12 = vpop.eup %5462  ;;  %v4055_v21 = vmul.f32 %v5461_v7, %v5459_v40 }
0x103b   :  { %v4054_v10 = vmul.f32 %v5463_v12, %v4052_v9  ;;  %v5465_v24 = vpop.eup %5464 }
0x103d   :  { %v4056_v48 = vadd.f32 %v4055_v21, %v4054_v10  ;;  %v5887_v10 = vmov 3  }
0x103e   :  { %5199 = vset.pattern.permute.xlu1 %v5887_v10 }
0x103f   :  { %5466 = vtanh.f32 %v4056_v48 }
0x104c   :  { %v5467_v51 = vpop.eup %5466 }
0x104d   :  { %v4058_v6 = vmul.f32 %v5467_v51, %v5465_v24 }
0x104f   :  { %v4060_v11 = vadd.f32 %v4059_v1, %v4058_v6 }
0x1051   :  { %4061 = vst [vmem:[#allocation2] sm:$0x3] %v4060_v11 }
0x1058   :  { %v4062_v13 = vld [vmem:[#allocation2] sm:$0xff] }
0x1059   :  { %5165 = vmatprep.mubr.f32.mxu0 %v4062_v13 }
0x105a   :  { %5166 = vmatmul.mubr.f32.vlgmr.msra.gmra.mxu0 %v4063_v16 }
0x111a   :  { %v5167_v26 = vpop.f32.mrf.mxu0 }
0x111b   :  { %v8520_v35 = vadd.f32 %v5167_v26, %v5046_v18 }
0x111c   :  { %v4153_v8 = vpop.f32.mrf.mxu0 }
0x111d   :  { %v4466_v34 = vadd.f32 %v4464_v22, %v8520_v35  ;;  %v8534_v54 = vadd.f32 %v5046_v18, %v4153_v8 }
0x111f   :  { %5468 = vtanh.f32 %v4466_v34  ;;  %v5057_v28 = vmul.f32 -1.442695, %v4466_v34  ;;  %v4171_v23 = vadd.f32 %v4170_v33, %v8534_v54 }
0x1121   :  { %5470 = vpow2.f32 %v5057_v28  ;;  %v5048_v56 = vmul.f32 -1.442695, %v4171_v23 }
0x112c   :  { %v5469_v30 = vpop.eup %5468 }
0x112d   :  { %4476 = vrot.lane.b32.xlu0 %v5469_v30, %s5883_s23 }
0x112e   :  { %v5471_v31 = vpop.eup %5470 }
0x112f   :  { %v4470_v29 = vadd.f32 1.0, %v5471_v31 }
0x1131   :  { %5472 = vrcp.f32 %v4470_v29 }
0x113e   :  { %v5473_v20 = vpop.eup %5472 }
0x113f   :  { %v4474_v55 = vmul.f32 0.0, %v5473_v20 }
0x119f   :  { %v4477_v43 = vpop.permute.xlu0 %4476 }
0x11a0   :  { %v4479_v63 = vmul.f32 %v5473_v20, %v4477_v43 }
0x11a2   :  { %4481 = vrot.lane.b32.xlu1 %v4479_v63, %s5884_s8 }
0x1214   :  { %v4482_v14 = vpop.permute.xlu1 %4481 }
0x1215   :  { %v4484_v59 = vadd.f32 %v4482_v14, %v4474_v55 }
0x1217   :  { %5474 = vtanh.f32 %v4484_v59  ;;  %v4515_v0 = vrot.slane %v4484_v59, 2 }
0x1224   :  { %v5475_v32 = vpop.eup %5474 }
0x1225   :  { %4487 = vrot.lane.b32.xlu1 %v5475_v32, %s5886_s24 }
0x1297   :  { %v4488_v15 = vpop.permute.xlu1 %4487 }
0x1298   :  { %v8527_v17 = vmul.f32 %v5473_v20, %v4488_v15 }
0x129a   :  { %4497 = vperm.xlu0 %5198, %v8527_v17  }
0x1315   :  { %v4498_v45 = vpop.permute.xlu0 %4497 }
0x1316   :  { %v4500_v46 = vmul.f32 %v8508_v50, %v4498_v45 }
0x1318   :  { %v4502_v36 = vrot.slane %v4500_v46, 2 }
0x131a   :  { %4503 = vrot.lane.b32.xlu1 %v4502_v36, %s5882_s22 }
0x138c   :  { %v4504_v38 = vpop.permute.xlu1 %4503 }
0x138d   :  { %v4506_v3 = vadd.f32 %v4504_v38, %v8520_v35 }
0x138f   :  { %5476 = vtanh.f32 %v4506_v3  ;;  %v5058_v4 = vmul.f32 -1.442695, %v4506_v3 }
0x1390   :  { %5478 = vtanh.f32 %v4171_v23 }
0x1391   :  { %5480 = vpow2.f32 %v5058_v4 }
0x1392   :  { %5482 = vpow2.f32 %v5048_v56 }
0x139c   :  { %v5477_v44 = vpop.eup %5476 }
0x139d   :  { %4519 = vrot.lane.b32.xlu1 %v5477_v44, %s5883_s23  ;;  %v5479_v27 = vpop.eup %5478 }
0x139e   :  { %v5481_v37 = vpop.eup %5480 }
0x139f   :  { %v4510_v25 = vadd.f32 1.0, %v5481_v37  ;;  %v5483_v39 = vpop.eup %5482 }
0x13a0   :  { %v4175_v41 = vadd.f32 1.0, %v5483_v39 }
0x13a1   :  { %4181 = vrot.lane.b32.xlu1 %v5479_v27, %s5883_s23  ;;  %5484 = vrcp.f32 %v4510_v25 }
0x13a2   :  { %5486 = vrcp.f32 %v4175_v41 }
0x13ae   :  { %v5485_v52 = vpop.eup %5484 }
0x13af   :  { %v5487_v49 = vpop.eup %5486  ;;  %v4517_v2 = vmul.f32 %v5485_v52, %v4515_v0 }
0x13b0   :  { %v4179_v9 = vmul.f32 0.0, %v5487_v49 }
0x140f   :  { %v4520_v57 = vpop.permute.xlu1 %4519 }
0x1410   :  { %v4522_v53 = vmul.f32 %v5485_v52, %v4520_v57 }
0x1412   :  { %4524 = vrot.lane.b32.xlu0 %v4522_v53, %s5884_s8 }
0x1413   :  { %v4182_v60 = vpop.permute.xlu1 %4181 }
0x1414   :  { %v4184_v62 = vmul.f32 %v5487_v49, %v4182_v60 }
0x1416   :  { %4186 = vrot.lane.b32.xlu1 %v4184_v62, %s5884_s8 }
0x1484   :  { %v4525_v58 = vpop.permute.xlu0 %4524 }
0x1485   :  { %v4527_v5 = vadd.f32 %v4525_v58, %v4517_v2 }
0x1487   :  { %5488 = vtanh.f32 %v4527_v5  ;;  %v4558_v36 = vrot.slane %v4527_v5, 2 }
0x1488   :  { %v4187_v7 = vpop.permute.xlu1 %4186 }
0x1489   :  { %v4189_v12 = vadd.f32 %v4187_v7, %v4179_v9 }
0x148b   :  { %5490 = vtanh.f32 %v4189_v12  ;;  %v4214_v3 = vrot.slane %v4189_v12, 6 }
0x1494   :  { %v5489_v40 = vpop.eup %5488 }
0x1495   :  { %4530 = vrot.lane.b32.xlu0 %v5489_v40, %s5886_s24 }
0x1498   :  { %v5491_v48 = vpop.eup %5490 }
0x1507   :  { %v4531_v19 = vpop.permute.xlu0 %4530 }
0x1508   :  { %v8544_v21 = vmul.f32 %v5485_v52, %v4531_v19 }
0x150a   :  { %4540 = vperm.xlu0 %5198, %v8544_v21  }
0x150e   :  { %4192 = vrot.lane.b32.xlu0 %v5491_v48, %s5886_s24 }
0x150f   :  { %5201 = vset.pattern.permute.xlu0 %v5887_v10 }
0x1585   :  { %v4541_v24 = vpop.permute.xlu0 %4540 }
0x1586   :  { %v4543_v51 = vmul.f32 %v8508_v50, %v4541_v24 }
0x1588   :  { %v4545_v6 = vrot.slane %v4543_v51, 2 }
0x1589   :  { %v4193_v1 = vpop.permute.xlu0 %4192 }
0x158a   :  { %4546 = vrot.lane.b32.xlu1 %v4545_v6, %s5882_s22  ;;  %v8552_v11 = vmul.f32 %v5487_v49, %v4193_v1 }
0x158e   :  { %4198 = vperm.xlu1 %5199, %v8552_v11  }
0x1592   :  { %5200 = vset.pattern.permute.xlu1 %v5885_v47 }
0x15fc   :  { %v4547_v13 = vpop.permute.xlu1 %4546 }
0x15fd   :  { %v4549_v16 = vadd.f32 %v4547_v13, %v8520_v35 }
0x15ff   :  { %5492 = vtanh.f32 %v4549_v16  ;;  %v5059_v31 = vmul.f32 -1.442695, %v4549_v16 }
0x1609   :  { %v4199_v18 = vpop.permute.xlu1 %4198 }
0x160a   :  { %v4201_v26 = vmul.f32 %v8532_v61, %v4199_v18 }
0x160c   :  { %v5493_v22 = vpop.eup %5492  ;;  %v4203_v34 = vrot.slane %v4201_v26, 6 }
0x160d   :  { %4562 = vrot.lane.b32.xlu0 %v5493_v22, %s5883_s23 }
0x160e   :  { %v4205_v30 = vadd.f32 %v4203_v34, %v8534_v54 }
0x1610   :  { %5494 = vtanh.f32 %v4205_v30  ;;  %v5049_v20 = vmul.f32 -1.442695, %v4205_v30 }
0x1611   :  { %5496 = vpow2.f32 %v5059_v31 }
0x1612   :  { %5498 = vpow2.f32 %v5049_v20 }
0x161d   :  { %v5495_v28 = vpop.eup %5494 }
0x161e   :  { %4218 = vrot.lane.b32.xlu0 %v5495_v28, %s5883_s23  ;;  %v5497_v29 = vpop.eup %5496 }
0x161f   :  { %v4553_v43 = vadd.f32 1.0, %v5497_v29  ;;  %v5499_v63 = vpop.eup %5498 }
0x1620   :  { %v4209_v14 = vadd.f32 1.0, %v5499_v63 }
0x1621   :  { %5500 = vrcp.f32 %v4553_v43 }
0x1622   :  { %5502 = vrcp.f32 %v4209_v14 }
0x162e   :  { %v5501_v55 = vpop.eup %5500 }
0x162f   :  { %v5503_v15 = vpop.eup %5502  ;;  %v4560_v8 = vmul.f32 %v5501_v55, %v4558_v36 }
0x1630   :  { %v4216_v44 = vmul.f32 %v5503_v15, %v4214_v3 }
0x167f   :  { %v4563_v59 = vpop.permute.xlu0 %4562 }
0x1680   :  { %v4565_v32 = vmul.f32 %v5501_v55, %v4563_v59 }
0x1682   :  { %4567 = vrot.lane.b32.xlu1 %v4565_v32, %s5884_s8 }
0x1690   :  { %v4219_v45 = vpop.permute.xlu0 %4218 }
0x1691   :  { %v4221_v46 = vmul.f32 %v5503_v15, %v4219_v45 }
0x1693   :  { %4223 = vrot.lane.b32.xlu0 %v4221_v46, %s5884_s8 }
0x16f4   :  { %v4568_v33 = vpop.permute.xlu1 %4567 }
0x16f5   :  { %v4570_v38 = vadd.f32 %v4568_v33, %v4560_v8 }
0x16f7   :  { %5504 = vtanh.f32 %v4570_v38  ;;  %v4601_v26 = vrot.slane %v4570_v38, 2 }
0x1704   :  { %v5505_v23 = vpop.eup %5504 }
0x1705   :  { %4573 = vrot.lane.b32.xlu1 %v5505_v23, %s5886_s24  ;;  %v4224_v27 = vpop.permute.xlu0 %4223 }
0x1706   :  { %v4226_v4 = vadd.f32 %v4224_v27, %v4216_v44 }
0x1708   :  { %5506 = vtanh.f32 %v4226_v4  ;;  %v4251_v30 = vrot.slane %v4226_v4, 6 }
0x1715   :  { %v5507_v56 = vpop.eup %5506 }
0x1716   :  { %4229 = vrot.lane.b32.xlu0 %v5507_v56, %s5886_s24 }
0x1777   :  { %v4574_v37 = vpop.permute.xlu1 %4573 }
0x1778   :  { %v8565_v25 = vmul.f32 %v5501_v55, %v4574_v37 }
0x177a   :  { %4583 = vperm.xlu1 %5200, %v8565_v25  }
0x177e   :  { %5203 = vset.pattern.permute.xlu1 %v5887_v10 }
0x1788   :  { %v4230_v39 = vpop.permute.xlu0 %4229 }
0x1789   :  { %v8569_v41 = vmul.f32 %v5503_v15, %v4230_v39 }
0x178b   :  { %4235 = vperm.xlu0 %5201, %v8569_v41  }
0x178f   :  { %5202 = vset.pattern.permute.xlu0 %v5885_v47 }
0x17f5   :  { %v4584_v52 = vpop.permute.xlu1 %4583 }
0x17f6   :  { %v4586_v57 = vmul.f32 %v8508_v50, %v4584_v52 }
0x17f8   :  { %v4588_v53 = vrot.slane %v4586_v57, 2 }
0x17fa   :  { %4589 = vrot.lane.b32.xlu1 %v4588_v53, %s5882_s22 }
0x1806   :  { %v4236_v49 = vpop.permute.xlu0 %4235 }
0x1807   :  { %v4238_v60 = vmul.f32 %v8532_v61, %v4236_v49 }
0x1809   :  { %v4240_v62 = vrot.slane %v4238_v60, 6 }
0x180b   :  { %v4242_v58 = vadd.f32 %v4240_v62, %v8534_v54 }
0x180d   :  { %v5050_v9 = vmul.f32 -1.442695, %v4242_v58 }
0x186c   :  { %v4590_v0 = vpop.permute.xlu1 %4589 }
0x186d   :  { %v4592_v2 = vadd.f32 %v4590_v0, %v8520_v35 }
0x186f   :  { %5508 = vtanh.f32 %v4592_v2  ;;  %v5060_v7 = vmul.f32 -1.442695, %v4592_v2 }
0x1870   :  { %5510 = vtanh.f32 %v4242_v58 }
0x1871   :  { %5512 = vpow2.f32 %v5060_v7 }
0x1872   :  { %5514 = vpow2.f32 %v5050_v9 }
0x187c   :  { %v5509_v5 = vpop.eup %5508 }
0x187d   :  { %4605 = vrot.lane.b32.xlu1 %v5509_v5, %s5883_s23  ;;  %v5511_v40 = vpop.eup %5510 }
0x187e   :  { %v5513_v12 = vpop.eup %5512 }
0x187f   :  { %v4596_v19 = vadd.f32 1.0, %v5513_v12  ;;  %v5515_v48 = vpop.eup %5514 }
0x1880   :  { %v4246_v24 = vadd.f32 1.0, %v5515_v48 }
0x1881   :  { %4255 = vrot.lane.b32.xlu1 %v5511_v40, %s5883_s23  ;;  %5516 = vrcp.f32 %v4596_v19 }
0x1882   :  { %5518 = vrcp.f32 %v4246_v24 }
0x188e   :  { %v5517_v51 = vpop.eup %5516 }
0x188f   :  { %v5519_v13 = vpop.eup %5518  ;;  %v4603_v22 = vmul.f32 %v5517_v51, %v4601_v26 }
0x1890   :  { %v4253_v31 = vmul.f32 %v5519_v13, %v4251_v30 }
0x18ef   :  { %v4606_v6 = vpop.permute.xlu1 %4605 }
0x18f0   :  { %v4608_v1 = vmul.f32 %v5517_v51, %v4606_v6 }
0x18f2   :  { %4610 = vrot.lane.b32.xlu0 %v4608_v1, %s5884_s8 }
0x18f3   :  { %v4256_v16 = vpop.permute.xlu1 %4255 }
0x18f4   :  { %v4258_v18 = vmul.f32 %v5519_v13, %v4256_v16 }
0x18f6   :  { %4260 = vrot.lane.b32.xlu1 %v4258_v18, %s5884_s8 }
0x1964   :  { %v4611_v34 = vpop.permute.xlu0 %4610 }
0x1965   :  { %v4613_v28 = vadd.f32 %v4611_v34, %v4603_v22 }
0x1967   :  { %5520 = vtanh.f32 %v4613_v28  ;;  %v4644_v12 = vrot.slane %v4613_v28, 2 }
0x1968   :  { %v4261_v29 = vpop.permute.xlu1 %4260 }
0x1969   :  { %v4263_v20 = vadd.f32 %v4261_v29, %v4253_v31 }
0x196b   :  { %5522 = vtanh.f32 %v4263_v20  ;;  %v4288_v58 = vrot.slane %v4263_v20, 6 }
0x1974   :  { %v5521_v43 = vpop.eup %5520 }
0x1975   :  { %4616 = vrot.lane.b32.xlu0 %v5521_v43, %s5886_s24 }
0x1978   :  { %v5523_v63 = vpop.eup %5522 }
0x1979   :  { %4266 = vrot.lane.b32.xlu1 %v5523_v63, %s5886_s24 }
0x19e7   :  { %v4617_v55 = vpop.permute.xlu0 %4616 }
0x19e8   :  { %v8584_v14 = vmul.f32 %v5517_v51, %v4617_v55 }
0x19ea   :  { %4626 = vperm.xlu0 %5202, %v8584_v14  }
0x19eb   :  { %v4267_v59 = vpop.permute.xlu1 %4266 }
0x19ec   :  { %v8587_v32 = vmul.f32 %v5519_v13, %v4267_v59 }
0x19ee   :  { %4272 = vperm.xlu1 %5203, %v8587_v32   ;;  %5204 = vset.pattern.permute.xlu0 %v5887_v10 }
0x19f2   :  { %5205 = vset.pattern.permute.xlu1 %v5885_v47 }
0x1a65   :  { %v4627_v15 = vpop.permute.xlu0 %4626 }
0x1a66   :  { %v4629_v45 = vmul.f32 %v8508_v50, %v4627_v15 }
0x1a68   :  { %v4631_v46 = vrot.slane %v4629_v45, 2 }
0x1a69   :  { %v4273_v36 = vpop.permute.xlu1 %4272 }
0x1a6a   :  { %v4275_v8 = vmul.f32 %v8532_v61, %v4273_v36  ;;  %4632 = vrot.lane.b32.xlu1 %v4631_v46, %s5882_s22 }
0x1a6c   :  { %v4277_v33 = vrot.slane %v4275_v8, 6 }
0x1a6e   :  { %v4279_v38 = vadd.f32 %v4277_v33, %v8534_v54 }
0x1a70   :  { %5524 = vtanh.f32 %v4279_v38  ;;  %v5051_v23 = vmul.f32 -1.442695, %v4279_v38 }
0x1a72   :  { %5526 = vpow2.f32 %v5051_v23 }
0x1a7d   :  { %v5525_v3 = vpop.eup %5524 }
0x1a7e   :  { %4292 = vrot.lane.b32.xlu0 %v5525_v3, %s5883_s23 }
0x1a7f   :  { %v5527_v44 = vpop.eup %5526 }
0x1a80   :  { %v4283_v56 = vadd.f32 1.0, %v5527_v44 }
0x1adc   :  { %v4633_v27 = vpop.permute.xlu1 %4632 }
0x1add   :  { %v4635_v4 = vadd.f32 %v4633_v27, %v8534_v54 }
0x1adf   :  { %5528 = vtanh.f32 %v4635_v4  ;;  %v5061_v53 = vmul.f32 -1.442695, %v4635_v4 }
0x1ae0   :  { %5530 = vrcp.f32 %v4283_v56 }
0x1ae1   :  { %5532 = vpow2.f32 %v5061_v53 }
0x1aec   :  { %v5529_v37 = vpop.eup %5528 }
0x1aed   :  { %4648 = vrot.lane.b32.xlu1 %v5529_v37, %s5883_s23  ;;  %v5531_v39 = vpop.eup %5530 }
0x1aee   :  { %v5533_v49 = vpop.eup %5532  ;;  %v4290_v5 = vmul.f32 %v5531_v39, %v4288_v58 }
0x1aef   :  { %v4639_v60 = vadd.f32 1.0, %v5533_v49 }
0x1af0   :  { %v4293_v52 = vpop.permute.xlu0 %4292 }
0x1af1   :  { %v4295_v57 = vmul.f32 %v5531_v39, %v4293_v52  ;;  %5534 = vrcp.f32 %v4639_v60 }
0x1af3   :  { %4297 = vrot.lane.b32.xlu0 %v4295_v57, %s5884_s8 }
0x1afe   :  { %v5535_v62 = vpop.eup %5534 }
0x1aff   :  { %v4646_v19 = vmul.f32 %v5535_v62, %v4644_v12 }
0x1b5f   :  { %v4649_v0 = vpop.permute.xlu1 %4648 }
0x1b60   :  { %v4651_v2 = vmul.f32 %v5535_v62, %v4649_v0 }
0x1b62   :  { %4653 = vrot.lane.b32.xlu1 %v4651_v2, %s5884_s8 }
0x1b65   :  { %v4298_v40 = vpop.permute.xlu0 %4297 }
0x1b66   :  { %v4300_v7 = vadd.f32 %v4298_v40, %v4290_v5 }
0x1b68   :  { %5536 = vtanh.f32 %v4300_v7  ;;  %v4325_v8 = vrot.slane %v4300_v7, 6 }
0x1b75   :  { %v5537_v9 = vpop.eup %5536 }
0x1b76   :  { %4303 = vrot.lane.b32.xlu0 %v5537_v9, %s5886_s24 }
0x1bd4   :  { %v4654_v48 = vpop.permute.xlu1 %4653 }
0x1bd5   :  { %v4656_v24 = vadd.f32 %v4654_v48, %v4646_v19 }
0x1bd7   :  { %5538 = vtanh.f32 %v4656_v24  ;;  %v4687_v53 = vrot.slane %v4656_v24, 2 }
0x1be4   :  { %v5539_v51 = vpop.eup %5538 }
0x1be5   :  { %4659 = vrot.lane.b32.xlu1 %v5539_v51, %s5886_s24 }
0x1be8   :  { %v4304_v6 = vpop.permute.xlu0 %4303 }
0x1be9   :  { %v8603_v1 = vmul.f32 %v5531_v39, %v4304_v6 }
0x1beb   :  { %4309 = vperm.xlu0 %5204, %v8603_v1  }
0x1bef   :  { %5207 = vset.pattern.permute.xlu0 %v5885_v47 }
0x1c57   :  { %v4660_v13 = vpop.permute.xlu1 %4659 }
0x1c58   :  { %v8607_v16 = vmul.f32 %v5535_v62, %v4660_v13 }
0x1c5a   :  { %4669 = vperm.xlu1 %5205, %v8607_v16  }
0x1c5e   :  { %5206 = vset.pattern.permute.xlu1 %v5887_v10 }
0x1c66   :  { %v4310_v18 = vpop.permute.xlu0 %4309 }
0x1c67   :  { %v4312_v26 = vmul.f32 %v8532_v61, %v4310_v18 }
0x1c69   :  { %v4314_v22 = vrot.slane %v4312_v26, 6 }
0x1c6b   :  { %v4316_v34 = vadd.f32 %v4314_v22, %v8520_v35 }
0x1c6d   :  { %5540 = vtanh.f32 %v4316_v34  ;;  %v5052_v28 = vmul.f32 -1.442695, %v4316_v34 }
0x1c6f   :  { %5542 = vpow2.f32 %v5052_v28 }
0x1c7a   :  { %v5541_v30 = vpop.eup %5540 }
0x1c7b   :  { %4329 = vrot.lane.b32.xlu1 %v5541_v30, %s5883_s23 }
0x1c7c   :  { %v5543_v43 = vpop.eup %5542 }
0x1c7d   :  { %v4320_v63 = vadd.f32 1.0, %v5543_v43 }
0x1c7f   :  { %5544 = vrcp.f32 %v4320_v63 }
0x1c8c   :  { %v5545_v55 = vpop.eup %5544 }
0x1c8d   :  { %v4327_v33 = vmul.f32 %v5545_v55, %v4325_v8 }
0x1cd5   :  { %v4670_v31 = vpop.permute.xlu1 %4669 }
0x1cd6   :  { %v4672_v29 = vmul.f32 %v8508_v50, %v4670_v31 }
0x1cd8   :  { %v4674_v20 = vrot.slane %v4672_v29, 2 }
0x1cda   :  { %4675 = vrot.lane.b32.xlu0 %v4674_v20, %s5882_s22 }
0x1ced   :  { %v4330_v59 = vpop.permute.xlu1 %4329 }
0x1cee   :  { %v4332_v15 = vmul.f32 %v5545_v55, %v4330_v59 }
0x1cf0   :  { %4334 = vrot.lane.b32.xlu1 %v4332_v15, %s5884_s8 }
0x1d4c   :  { %v4676_v45 = vpop.permute.xlu0 %4675 }
0x1d4d   :  { %v4678_v46 = vadd.f32 %v4676_v45, %v8534_v54 }
0x1d4f   :  { %5546 = vtanh.f32 %v4678_v46  ;;  %v5062_v44 = vmul.f32 -1.442695, %v4678_v46 }
0x1d5c   :  { %v5547_v36 = vpop.eup %5546 }
0x1d5d   :  { %4691 = vrot.lane.b32.xlu0 %v5547_v36, %s5883_s23 }
0x1d62   :  { %v4335_v38 = vpop.permute.xlu1 %4334 }
0x1d63   :  { %v4337_v3 = vadd.f32 %v4335_v38, %v4327_v33 }
0x1d65   :  { %5548 = vtanh.f32 %v4337_v3  ;;  %v4362_v34 = vrot.slane %v4337_v3, 6 }
0x1d66   :  { %5550 = vpow2.f32 %v5062_v44 }
0x1d72   :  { %v5549_v23 = vpop.eup %5548 }
0x1d73   :  { %4340 = vrot.lane.b32.xlu1 %v5549_v23, %s5886_s24  ;;  %v5551_v27 = vpop.eup %5550 }
0x1d74   :  { %v4682_v4 = vadd.f32 1.0, %v5551_v27 }
0x1d76   :  { %5552 = vrcp.f32 %v4682_v4 }
0x1d83   :  { %v5553_v56 = vpop.eup %5552 }
0x1d84   :  { %v4689_v49 = vmul.f32 %v5553_v56, %v4687_v53 }
0x1dcf   :  { %v4692_v37 = vpop.permute.xlu0 %4691 }
0x1dd0   :  { %v4694_v39 = vmul.f32 %v5553_v56, %v4692_v37 }
0x1dd2   :  { %4696 = vrot.lane.b32.xlu0 %v4694_v39, %s5884_s8 }
0x1de5   :  { %v4341_v52 = vpop.permute.xlu1 %4340 }
0x1de6   :  { %v8621_v57 = vmul.f32 %v5545_v55, %v4341_v52 }
0x1de8   :  { %4346 = vperm.xlu1 %5206, %v8621_v57  }
0x1e44   :  { %v4697_v60 = vpop.permute.xlu0 %4696 }
0x1e45   :  { %v4699_v62 = vadd.f32 %v4697_v60, %v4689_v49 }
0x1e47   :  { %5554 = vtanh.f32 %v4699_v62  ;;  %v4730_v4 = vrot.slane %v4699_v62, 2 }
0x1e54   :  { %v5555_v0 = vpop.eup %5554 }
0x1e55   :  { %4702 = vrot.lane.b32.xlu0 %v5555_v0, %s5886_s24 }
0x1e63   :  { %v4347_v2 = vpop.permute.xlu1 %4346 }
0x1e64   :  { %v4349_v58 = vmul.f32 %v8532_v61, %v4347_v2 }
0x1e66   :  { %v4351_v5 = vrot.slane %v4349_v58, 6 }
0x1e68   :  { %v4353_v40 = vadd.f32 %v4351_v5, %v8520_v35 }
0x1e6a   :  { %5556 = vtanh.f32 %v4353_v40  ;;  %v5053_v9 = vmul.f32 -1.442695, %v4353_v40 }
0x1e6c   :  { %5558 = vpow2.f32 %v5053_v9 }
0x1e77   :  { %v5557_v7 = vpop.eup %5556 }
0x1e78   :  { %4366 = vrot.lane.b32.xlu1 %v5557_v7, %s5883_s23 }
0x1e79   :  { %v5559_v48 = vpop.eup %5558 }
0x1e7a   :  { %v4357_v24 = vadd.f32 1.0, %v5559_v48 }
0x1e7c   :  { %5560 = vrcp.f32 %v4357_v24 }
0x1e89   :  { %v5561_v51 = vpop.eup %5560 }
0x1e8a   :  { %v4364_v30 = vmul.f32 %v5561_v51, %v4362_v34 }
0x1ec7   :  { %v4703_v12 = vpop.permute.xlu0 %4702 }
0x1ec8   :  { %v8628_v19 = vmul.f32 %v5553_v56, %v4703_v12 }
0x1eca   :  { %4712 = vperm.xlu0 %5207, %v8628_v19  }
0x1ece   :  { %5208 = vset.pattern.permute.xlu0 %v5887_v10 }
0x1eea   :  { %v4367_v6 = vpop.permute.xlu1 %4366 }
0x1eeb   :  { %v4369_v13 = vmul.f32 %v5561_v51, %v4367_v6 }
0x1eed   :  { %4371 = vrot.lane.b32.xlu1 %v4369_v13, %s5884_s8 }
0x1f45   :  { %v4713_v18 = vpop.permute.xlu0 %4712 }
0x1f46   :  { %v4715_v26 = vmul.f32 %v8508_v50, %v4713_v18 }
0x1f48   :  { %v4717_v22 = vrot.slane %v4715_v26, 2 }
0x1f4a   :  { %4718 = vrot.lane.b32.xlu1 %v4717_v22, %s5882_s22 }
0x1f5f   :  { %v4372_v28 = vpop.permute.xlu1 %4371 }
0x1f60   :  { %v4374_v31 = vadd.f32 %v4372_v28, %v4364_v30 }
0x1f62   :  { %5562 = vtanh.f32 %v4374_v31  ;;  %v4399_v40 = vrot.slane %v4374_v31, 6 }
0x1f6f   :  { %v5563_v29 = vpop.eup %5562 }
0x1f70   :  { %4377 = vrot.lane.b32.xlu0 %v5563_v29, %s5886_s24 }
0x1fbc   :  { %v4719_v20 = vpop.permute.xlu1 %4718 }
0x1fbd   :  { %v4721_v43 = vadd.f32 %v4719_v20, %v8534_v54 }
0x1fbf   :  { %5564 = vtanh.f32 %v4721_v43  ;;  %v5063_v15 = vmul.f32 -1.442695, %v4721_v43 }
0x1fc1   :  { %5566 = vpow2.f32 %v5063_v15 }
0x1fcc   :  { %v5565_v63 = vpop.eup %5564 }
0x1fcd   :  { %4734 = vrot.lane.b32.xlu1 %v5565_v63, %s5883_s23 }
0x1fce   :  { %v5567_v45 = vpop.eup %5566 }
0x1fcf   :  { %v4725_v46 = vadd.f32 1.0, %v5567_v45 }
0x1fd1   :  { %5568 = vrcp.f32 %v4725_v46 }
0x1fde   :  { %v5569_v36 = vpop.eup %5568 }
0x1fdf   :  { %v4732_v56 = vmul.f32 %v5569_v36, %v4730_v4 }
0x1fe2   :  { %v4378_v55 = vpop.permute.xlu0 %4377 }
0x1fe3   :  { %v8638_v59 = vmul.f32 %v5561_v51, %v4378_v55 }
0x1fe5   :  { %4383 = vperm.xlu0 %5208, %v8638_v59  }
0x1fe9   :  { %5209 = vset.pattern.permute.xlu0 %v5885_v47 }
0x203f   :  { %v4735_v8 = vpop.permute.xlu1 %4734 }
0x2040   :  { %v4737_v33 = vmul.f32 %v5569_v36, %v4735_v8 }
0x2042   :  { %4739 = vrot.lane.b32.xlu1 %v4737_v33, %s5884_s8 }
0x2060   :  { %v4384_v38 = vpop.permute.xlu0 %4383 }
0x2061   :  { %v4386_v3 = vmul.f32 %v8532_v61, %v4384_v38 }
0x2063   :  { %v4388_v23 = vrot.slane %v4386_v3, 6 }
0x2065   :  { %v4390_v44 = vadd.f32 %v4388_v23, %v8520_v35 }
0x2067   :  { %5570 = vtanh.f32 %v4390_v44  ;;  %v5054_v52 = vmul.f32 -1.442695, %v4390_v44 }
0x2074   :  { %v5571_v27 = vpop.eup %5570 }
0x2075   :  { %4403 = vrot.lane.b32.xlu1 %v5571_v27, %s5883_s23 }
0x20b4   :  { %v4740_v37 = vpop.permute.xlu1 %4739 }
0x20b5   :  { %v8646_v39 = vadd.f32 %v4740_v37, %v4732_v56 }
0x20b7   :  { %5572 = vtanh.f32 %v8646_v39 }
0x20b8   :  { %5574 = vpow2.f32 %v5054_v52 }
0x20c4   :  { %v5573_v53 = vpop.eup %5572 }
0x20c5   :  { %4745 = vrot.lane.b32.xlu0 %v5573_v53, %s5886_s24  ;;  %v5575_v49 = vpop.eup %5574 }
0x20c6   :  { %v4394_v60 = vadd.f32 1.0, %v5575_v49 }
0x20c8   :  { %5576 = vrcp.f32 %v4394_v60  ;;  %v4849_v60 = vld [vmem:[#allocation11] sm:$0xff] }
0x20c9   :  { %5169 = vmatpush3.msra.mxu1 %v4849_v60 }
0x20d5   :  { %v5577_v0 = vpop.eup %5576 }
0x20d6   :  { %v4401_v7 = vmul.f32 %v5577_v0, %v4399_v40 }
0x20e7   :  { %v4404_v2 = vpop.permute.xlu1 %4403 }
0x20e8   :  { %v4406_v58 = vmul.f32 %v5577_v0, %v4404_v2 }
0x20ea   :  { %4408 = vrot.lane.b32.xlu1 %v4406_v58, %s5884_s8 }
0x2137   :  { %v4746_v62 = vpop.permute.xlu0 %4745 }
0x2138   :  { %v4748_v5 = vmul.f32 %v5569_v36, %v4746_v62  ;;  %v4773_v36 = vrot.slane %v8646_v39, 2 }
0x213a   :  { %4755 = vperm.xlu0 %5209, %v4748_v5  }
0x213e   :  { %5210 = vset.pattern.permute.xlu0 %v5887_v10 }
0x215c   :  { %v4409_v9 = vpop.permute.xlu1 %4408 }
0x215d   :  { %v4411_v12 = vadd.f32 %v4409_v9, %v4401_v7 }
0x215f   :  { %5578 = vtanh.f32 %v4411_v12  ;;  %v4436_v23 = vrot.slane %v4411_v12, 6 }
0x216c   :  { %v5579_v48 = vpop.eup %5578 }
0x216d   :  { %4414 = vrot.lane.b32.xlu1 %v5579_v48, %s5886_s24 }
0x21b5   :  { %v4756_v24 = vpop.permute.xlu0 %4755 }
0x21b6   :  { %v4758_v51 = vmul.f32 %v8508_v50, %v4756_v24 }
0x21b8   :  { %v4760_v6 = vrot.slane %v4758_v51, 2 }
0x21ba   :  { %4761 = vrot.lane.b32.xlu1 %v4760_v6, %s5882_s22 }
0x21df   :  { %v4415_v13 = vpop.permute.xlu1 %4414 }
0x21e0   :  { %v8655_v18 = vmul.f32 %v5577_v0, %v4415_v13 }
0x21e2   :  { %4420 = vperm.xlu0 %5210, %v8655_v18  }
0x21e6   :  { %5211 = vset.pattern.permute.xlu0 %v5885_v47 }
0x222c   :  { %v4762_v10 = vpop.permute.xlu1 %4761 }
0x222d   :  { %v4764_v26 = vadd.f32 %v4762_v10, %v8534_v54 }
0x222f   :  { %5580 = vtanh.f32 %v4764_v26  ;;  %v5064_v29 = vmul.f32 -1.442695, %v4764_v26 }
0x223c   :  { %v5581_v22 = vpop.eup %5580 }
0x223d   :  { %4777 = vrot.lane.b32.xlu1 %v5581_v22, %s5883_s23 }
0x225d   :  { %v4421_v34 = vpop.permute.xlu0 %4420 }
0x225e   :  { %v4423_v50 = vmul.f32 %v8532_v61, %v4421_v34 }
0x2260   :  { %v4425_v30 = vrot.slane %v4423_v50, 6 }
0x2262   :  { %v4427_v28 = vadd.f32 %v4425_v30, %v8520_v35 }
0x2264   :  { %5582 = vtanh.f32 %v4427_v28  ;;  %v5055_v55 = vmul.f32 -1.442695, %v4427_v28 }
0x2265   :  { %5584 = vpow2.f32 %v5064_v29 }
0x2271   :  { %v5583_v31 = vpop.eup %5582 }
0x2272   :  { %4440 = vrot.lane.b32.xlu0 %v5583_v31, %s5883_s23  ;;  %v5585_v47 = vpop.eup %5584 }
0x2273   :  { %v4768_v20 = vadd.f32 1.0, %v5585_v47 }
0x2275   :  { %5586 = vrcp.f32 %v4768_v20 }
0x2276   :  { %5588 = vpow2.f32 %v5055_v55 }
0x2282   :  { %v5587_v54 = vpop.eup %5586 }
0x2283   :  { %v5589_v61 = vpop.eup %5588  ;;  %v4775_v8 = vmul.f32 %v5587_v54, %v4773_v36 }
0x2284   :  { %v4431_v15 = vadd.f32 1.0, %v5589_v61 }
0x2286   :  { %5590 = vrcp.f32 %v4431_v15 }
0x2293   :  { %v5591_v35 = vpop.eup %5590 }
0x2294   :  { %v4438_v44 = vmul.f32 %v5591_v35, %v4436_v23 }
0x22af   :  { %v4778_v43 = vpop.permute.xlu1 %4777 }
0x22b0   :  { %v4780_v63 = vmul.f32 %v5587_v54, %v4778_v43 }
0x22b2   :  { %4782 = vrot.lane.b32.xlu1 %v4780_v63, %s5884_s8 }
0x22e4   :  { %v4441_v45 = vpop.permute.xlu0 %4440 }
0x22e5   :  { %v4443_v46 = vmul.f32 %v5591_v35, %v4441_v45 }
0x22e7   :  { %4445 = vrot.lane.b32.xlu1 %v4443_v46, %s5884_s8 }
0x22eb   :  { %4750 = vrot.lane.b32.xlu1 %v4748_v5, %s5888_s25 }
0x22ef   :  { %4578 = vrot.lane.b32.xlu1 %v8565_v25, %s5888_s25 }
0x2324   :  { %v4783_v33 = vpop.permute.xlu1 %4782 }
0x2325   :  { %v4785_v38 = vadd.f32 %v4783_v33, %v4775_v8 }
0x2327   :  { %5592 = vtanh.f32 %v4785_v38 }
0x2334   :  { %v5593_v3 = vpop.eup %5592 }
0x2335   :  { %4788 = vrot.lane.b32.xlu0 %v5593_v3, %s5886_s24 }
0x2339   :  { %4707 = vrot.lane.b32.xlu0 %v8628_v19, %s5888_s25 }
0x2359   :  { %v4446_v27 = vpop.permute.xlu1 %4445 }
0x235a   :  { %v4448_v4 = vadd.f32 %v4446_v27, %v4438_v44 }
0x235c   :  { %5594 = vtanh.f32 %v4448_v4 }
0x235d   :  { %v4751_v52 = vpop.permute.xlu1 %4750 }
0x235e   :  { %v4753_v49 = vadd.f32 %v4751_v52, %v8569_v41 }
0x2361   :  { %v4579_v0 = vpop.permute.xlu1 %4578 }
0x2369   :  { %v5595_v56 = vpop.eup %5594 }
0x236a   :  { %4451 = vrot.lane.b32.xlu0 %v5595_v56, %s5886_s24 }
0x236e   :  { %4535 = vrot.lane.b32.xlu0 %v8544_v21, %s5888_s25 }
0x2372   :  { %4492 = vrot.lane.b32.xlu0 %v8527_v17, %s5888_s25  ;;  %v4802_v17 = vrot.slane %v4753_v49, 2 }
0x23a7   :  { %v4789_v25 = vpop.permute.xlu0 %4788 }
0x23a8   :  { %v4791_v37 = vmul.f32 %v5587_v54, %v4789_v25 }
0x23aa   :  { %4793 = vrot.lane.b32.xlu1 %v4791_v37, %s5888_s25 }
0x23ab   :  { %v4708_v39 = vpop.permute.xlu0 %4707 }
0x23ac   :  { %v4710_v19 = vadd.f32 %v4708_v39, %v8587_v32 }
0x23ae   :  { %v4807_v53 = vrot.slane %v4710_v19, 4  ;;  %4621 = vrot.lane.b32.xlu1 %v8584_v14, %s5888_s25  ;;  %v4581_v14 = vadd.f32 %v4579_v0, %v8638_v59 }
0x23b0   :  { %4808 = vrot.lane.b32.xlu0 %v4807_v53, %s5889_s11  ;;  %v4819_v5 = vrot.slane %v4581_v14, 2 }
0x23b2   :  { %4664 = vrot.lane.b32.xlu1 %v8607_v16, %s5888_s25 }
0x23b6   :  { %4803 = vrot.lane.b32.xlu1 %v4802_v17, %s5883_s23 }
0x23dc   :  { %v4452_v21 = vpop.permute.xlu0 %4451 }
0x23dd   :  { %v4454_v62 = vmul.f32 %v5591_v35, %v4452_v21 }
0x23e0   :  { %v4536_v2 = vpop.permute.xlu0 %4535 }
0x23e1   :  { %v4538_v40 = vadd.f32 %v4536_v2, %v8655_v18 }
0x23e3   :  { %v4824_v42 = vrot.slane %v4538_v40, 4 }
0x23e4   :  { %v4493_v58 = vpop.permute.xlu0 %4492 }
0x23e5   :  { %v4495_v7 = vadd.f32 %v4493_v58, %v4454_v62 }
0x23e7   :  { %v4829_v12 = vrot.slane %v4495_v7, 6 }
0x241c   :  { %v4794_v32 = vpop.permute.xlu1 %4793 }
0x241d   :  { %v4796_v41 = vadd.f32 %v4794_v32, %v8552_v11 }
0x241f   :  { %4798 = vrot.lane.b32.xlu0 %v4796_v41, %s5891_s26 }
0x2420   :  { %v4622_v16 = vpop.permute.xlu1 %4621 }
0x2421   :  { %v4624_v9 = vadd.f32 %v4622_v16, %v8621_v57 }
0x2422   :  { %v4809_v59 = vpop.permute.xlu0 %4808 }
0x2423   :  { %4815 = vrot.lane.b32.xlu1 %v4624_v9, %s5884_s8  ;;  %4820 = vrot.lane.b32.xlu0 %v4819_v5, %s5886_s24 }
0x2424   :  { %v4665_v11 = vpop.permute.xlu1 %4664 }
0x2425   :  { %v4667_v48 = vadd.f32 %v4665_v11, %v8603_v1 }
0x2427   :  { %4825 = vrot.lane.b32.xlu1 %v4824_v42, %s5892_s27  ;;  %4830 = vrot.lane.b32.xlu0 %v4829_v12, %s5882_s22  ;;  %v4812_v57 = vrot.slane %v4667_v48, 6 }
0x2428   :  { %v4804_v24 = vpop.permute.xlu1 %4803 }
0x2491   :  { %v4799_v51 = vpop.permute.xlu0 %4798 }
0x2492   :  { %v4834_v6 = vsel %vm4833_vm2, %v4799_v51, %v4804_v24 }
0x2493   :  { %v4836_v13 = vsel %vm4835_vm12, %v4834_v6, %v4809_v59 }
0x2494   :  { %v4838_v18 = vsel %vm4837_vm13, %v4836_v13, %v4812_v57 }
0x2495   :  { %v4816_v10 = vpop.permute.xlu1 %4815  ;;  %v4821_v26 = vpop.permute.xlu0 %4820 }
0x2496   :  { %v4840_v22 = vsel %vm4839_vm14, %v4838_v18, %v4816_v10 }
0x2497   :  { %v4842_v34 = vsel %vm4841_vm15, %v4840_v22, %v4821_v26 }
0x2499   :  { %v4826_v50 = vpop.permute.xlu1 %4825  ;;  %v4831_v30 = vpop.permute.xlu0 %4830 }
0x249a   :  { %v4844_v1 = vsel %vm4843_vm1, %v4842_v34, %v4826_v50 }
0x249b   :  { %v4846_v28 = vsel %vm4845_vm3, %v4844_v1, %v4831_v30 }
0x249c   :  { %5171 = vmatmul.mubr.msk.f32.vlgmr.msra.gmra.mxu1 %vm4857_vm4, %v4846_v28  ;;  %4848 = vst.msk [vmem:[#allocation12] sm:$0x3] %vm4847_vm5, %v4846_v28 }
0x249d   :  { %5835 = shalt.err (!%p5832_p1)
}
0x249e   :  { %4942 = dma.vmem_to_hbm [thread:$0]  %s4940_s28, 32, %s8717_s13, [#allocation5]   ;;  %v5065_v31 = vld [vmem:[%s8716_s12] ss:$0 sm:$0xff]  ;;  %vm4931_vm6 = vcmask 517120  }
0x249f   :  { %s5894_s16 = smov [#allocation13]  }
0x24a0   :  { %s4949_s17 = sshll.u32 %s5894_s16, 4  ;;  %s4950_s17 = int_to_ptr.vmem [resolvable:$true] %s4949_s17 }
0x24a1   :  { %s5844_s18 = scalar_lea.vmem %s4950_s17, 32  ;;  %p5849_p3 = scmp.lt.s32.totalorder %s4950_s17, %s4950_s17 }
0x24a2   :  { %p5845_p2 = scmp.ne.s32.totalorder %s4950_s17, %s5844_s18  ;;  %p5850_p4 = scmp.lt.s32.totalorder %s5844_s18, %s5844_s18 }
0x24a4   :  { %p5851_p5 = por %p5850_p4, %p5849_p3 }
0x24a6   :  { %p5852_p6 = pnand %p5851_p5, %p5845_p2 }
0x255c   :  { %v4927_v29 = vpop.f32.mrf.mxu1 }
0x255d   :  { %v4928_v47 = vadd.f32 %v5065_v31, %v4927_v29 }
0x255e   :  { %v5172_v20 = vpop.f32.mrf.mxu1 }
0x255f   :  { %4932 = vst.msk [vmem:[#allocation13] sm:$0x3] %vm4931_vm6, %v4928_v47 }
0x2560   :  { %5855 = shalt.err (!%p5852_p6)
}
0x2561   :  { %4952 = dma.vmem_to_hbm [thread:$0]  %s4950_s17, 32, %s8718_s14, [#allocation14]  }
0x2562   :  { %5870 = dma.done.wait [#allocation5], 32  }
0x2563   :  { %5871 = vsyncadd [#allocation5], 4294967264 }
0x2564   :  { %5872 = dma.done.wait [#allocation14], 32  }
0x2565   :  { %5873 = vsyncadd [#allocation14], 4294967264 }
0x2566   :  { %4959 = vsyncpa [#allocation4], 1 }
0x2567   :  { %4960 = vsyncpa [#allocation7], 1 }
0x2568   :  { %4961 = vsyncpa [#allocation10], 1 }
0x2569   :  { %4962 = vsyncpa [#allocation5], 1 }
0x256a   :  { %4963 = vsyncpa [#allocation14], 1 }

</bundles_post_ra>
